<compile_context>
chip_gen: v5e
topology: v5e:2x2
jax: 0.10.0
libtpu: 0.0.40
codegen_flags: <defaults>
</compile_context>

<pallas_src>
import math

import jax
import jax.numpy as jnp
from jax.experimental import pallas as pl
from jax.experimental.pallas import tpu as pltpu

HP = 128   # padded per-gate hidden width (real LSTM hidden size is 50)
FP = 128   # padded CNN feature width   (real hidden1 width is 18)


def _round_up(n, m):
    return ((n + m - 1) // m) * m


# ------------------------------ fused kernel ----------------------------------
def _fused_kernel(x_ref, w1d_ref, b1d_ref, w2d_ref, b2d_ref, wh_ref, bh_ref,
                  wih1_ref, whh1_ref, b1g_ref, wih2_ref, whh2_ref, b2g_ref,
                  wlin_ref, blin_ref, out_ref):
    f32, bf16 = jnp.float32, jnp.bfloat16
    TB, CP = out_ref.shape                 # batch-tile rows, padded class width
    S = x_ref.shape[1] // TB               # sequence length (time-major rows)

    # CNN input rows are time-major (s, b) within this batch tile.
    x = x_ref[0].astype(bf16)                                        # (S*TB, 36)

    # -------- CNN: conv1/conv2 folded into dense zero-padded MXU matmuls -----
    a1 = jnp.dot(x, w1d_ref[...], preferred_element_type=f32) + b1d_ref[...]
    a1 = jnp.maximum(a1, 0.0)                                        # (S*TB, 512)
    a2 = jnp.dot(a1.astype(bf16), w2d_ref[...],
                 preferred_element_type=f32) + b2d_ref[...]
    a2 = jnp.maximum(a2, 0.0)                                        # (S*TB, 256)
    feat = jnp.dot(a2.astype(bf16), wh_ref[...],
                   preferred_element_type=f32) + bh_ref[...]
    feat = jnp.maximum(feat, 0.0)                                    # (S*TB, FP) lane-dense

    # -------- LSTM layer-1 input projection hoisted out of the recurrence ----
    gx1 = jnp.dot(feat.astype(bf16), wih1_ref[...],
                  preferred_element_type=f32) + b1g_ref[...]         # (S*TB, 4*HP)

    whh1 = whh1_ref[...]                                             # (HP, 4*HP) bf16
    wih2 = wih2_ref[...]                                             # (HP, 4*HP) bf16
    whh2 = whh2_ref[...]                                             # (HP, 4*HP) bf16
    b2g = b2g_ref[...]                                               # (1, 4*HP)  f32

    def gate_math(gates, c):                    # lane-tile-aligned static slices
        i = jax.nn.sigmoid(gates[:, 0 * HP:1 * HP])
        f = jax.nn.sigmoid(gates[:, 1 * HP:2 * HP])
        g = jnp.tanh(gates[:, 2 * HP:3 * HP])
        o = jax.nn.sigmoid(gates[:, 3 * HP:4 * HP])
        c_new = f * c + i * g
        return o * jnp.tanh(c_new), c_new

    zeros = jnp.zeros((TB, HP), f32)
    h1, c1, h2, c2 = zeros, zeros, zeros, zeros
    # Fully unrolled (S static & small): only the h@whh recurrence matmuls sit
    # on the serial chain; gx1[t*TB:(t+1)*TB] is a contiguous static view.
    # (If a very large TILE_B ever shows vreg spills here, switch to a
    #  lax.fori_loop over t with pl.ds(t*TB, TB) slicing.)
    for t in range(S):
        gates1 = gx1[t * TB:(t + 1) * TB, :] + jnp.dot(
            h1.astype(bf16), whh1, preferred_element_type=f32)
        # layer-2 recurrence term uses h2(t-1): issue it before layer-1's gate
        # math so it overlaps with the serial dependency on h1(t).
        g2h = jnp.dot(h2.astype(bf16), whh2, preferred_element_type=f32)
        h1, c1 = gate_math(gates1, c1)
        gates2 = jnp.dot(h1.astype(bf16), wih2,
                         preferred_element_type=f32) + g2h + b2g
        h2, c2 = gate_math(gates2, c2)
    # TODO(synk): Dropout2d in BioCNN and the nn.LSTM inter-layer dropout
    # (p=0.8) are train-only; omitted here (inference semantics).

    # --------------------------- head + log_softmax ---------------------------
    # Pad logit columns carry a -1e30 bias (zero weights), so they contribute
    # exp(~-1e30)=0 to the normalizer; the real NC columns are exact.
    logits = jnp.dot(h2.astype(bf16), wlin_ref[...],
                     preferred_element_type=f32) + blin_ref[...]     # (TB, CP)
    m = jnp.max(logits, axis=1, keepdims=True)
    z = logits - m
    out_ref[...] = z - jnp.log(jnp.sum(jnp.exp(z), axis=1, keepdims=True))


# ------------------------------ wrapper / specs --------------------------------
def biocnn_lstm_forward(x, kparams, num_class, tile_b=256):
    # x: (batch, timesteps, C, sequence_size, H, W), like the torch module.
    # tile_b: batch-tile rows per grid step. 256 fills the v6e/v7x MXU; use 128
    # on v5e (or raise vmem_limit_bytes) so per-tile activations fit scoped VMEM.
    B, T, C, S, H, W = x.shape
    assert T == 1 and C == 1 and H == 6 and W == 6, "module requires C=1, H=W=6, T=1"
    CP = kparams[-1].shape[-1]                  # padded class width (>=128)
    Fin = C * H * W                             # 36

    tile_b = min(tile_b, _round_up(B, 8))       # >=8 sublanes, never over-pad wildly
    Bp = _round_up(B, tile_b)
    n_tiles = Bp // tile_b

    # Layout plumbing (one XLA copy, outside the kernel):
    # (B,T,C,S,H,W) -> (B,S,36) -> pad batch -> per-tile TIME-MAJOR rows:
    # (n_tiles, S*tile_b, 36) with row r = s*tile_b + b_local inside each tile.
    x2 = x.reshape(B, S, Fin)
    x2 = jnp.pad(x2, ((0, Bp - B), (0, 0), (0, 0)))
    x3 = x2.reshape(n_tiles, tile_b, S, Fin).transpose(0, 2, 1, 3)
    x3 = x3.reshape(n_tiles, S * tile_b, Fin)

    in_specs = [pl.BlockSpec((1, S * tile_b, Fin), lambda i: (i, 0, 0))]
    for a in kparams:                            # weights: constant index_map
        nd = a.ndim                              # -> stay VMEM-resident
        in_specs.append(pl.BlockSpec(a.shape, lambda i, nd=nd: (0,) * nd))

    out = pl.pallas_call(
        _fused_kernel,
        out_shape=jax.ShapeDtypeStruct((Bp, CP), jnp.float32),
        grid=(n_tiles,),
        in_specs=in_specs,
        out_specs=pl.BlockSpec((tile_b, CP), lambda i: (i, 0)),
        compiler_params=pltpu.CompilerParams(
            dimension_semantics=("parallel",),
            vmem_limit_bytes=32 * 1024 * 1024),
    )(x3, *kparams)
    return out[:B, :num_class]


# --------------------------- parameter preparation -----------------------------
def prepare_params(params, dtype=jnp.bfloat16):
    """One-time transform of torch-layout params into kernel-ready matrices."""
    f32 = jnp.float32
    cnn, lstm, lin = params['cnn'], params['lstm'], params['linear']

    # conv1 as a dense (36, 16*32) matmul weight (valid 3x3: 6x6 -> 4x4).
    w1 = cnn['conv1_w'][:, 0]                                   # (32, 3, 3)
    W1d = jnp.zeros((36, 16 * 32), f32)
    for oh in range(4):
        for ow in range(4):
            opos = oh * 4 + ow
            for kh in range(3):
                for kw in range(3):
                    irow = (oh + kh) * 6 + (ow + kw)
                    W1d = W1d.at[irow, opos * 32:(opos + 1) * 32].set(w1[:, kh, kw])
    b1d = jnp.tile(cnn['conv1_b'], 16)[None, :]                 # (1, 512)

    # conv2 as a dense (16*32, 4*64) matmul weight (valid 3x3: 4x4 -> 2x2).
    w2 = cnn['conv2_w']                                         # (64, 32, 3, 3)
    W2d = jnp.zeros((16 * 32, 4 * 64), f32)
    for oh in range(2):
        for ow in range(2):
            opos = oh * 2 + ow
            for kh in range(3):
                for kw in range(3):
                    ipos = (oh + kh) * 4 + (ow + kw)
                    W2d = W2d.at[ipos * 32:(ipos + 1) * 32,
                                 opos * 64:(opos + 1) * 64].set(w2[:, :, kh, kw].T)
    b2d = jnp.tile(cnn['conv2_b'], 4)[None, :]                  # (1, 256)

    # hidden1: torch flattens NCHW (c,h,w); our conv2 slab is (pos, c).
    # Output columns padded 18 -> FP so the feature slab is lane-dense.
    h_real = cnn['hidden1_w'].shape[0]                          # 18
    Wh_core = jnp.transpose(cnn['hidden1_w'].reshape(h_real, 64, 2, 2),
                            (2, 3, 1, 0)).reshape(256, h_real)
    Wh = jnp.zeros((256, FP), f32).at[:, :h_real].set(Wh_core)
    bh = jnp.zeros((1, FP), f32).at[0, :h_real].set(cnn['hidden1_b'])

    # LSTM weights: gate blocks (i, f, g, o) padded 50 -> HP, lane-tile aligned.
    Hh = 50

    def pad_gate_cols(w_t):                     # (in, 4*H) -> (in, 4*HP)
        out = jnp.zeros((w_t.shape[0], 4 * HP), f32)
        for g in range(4):
            out = out.at[:, g * HP:g * HP + Hh].set(w_t[:, g * Hh:(g + 1) * Hh])
        return out

    def pad_rows(w, rows):                      # (r, k) -> (rows, k)
        return jnp.zeros((rows, w.shape[1]), f32).at[:w.shape[0], :].set(w)

    def pad_gate_bias(b):                       # (4*H,) -> (1, 4*HP)
        out = jnp.zeros((4 * HP,), f32)
        for g in range(4):
            out = out.at[g * HP:g * HP + Hh].set(b[g * Hh:(g + 1) * Hh])
        return out[None, :]

    wih1 = pad_rows(pad_gate_cols(lstm['wih0'].T), FP)          # (FP, 4*HP)
    whh1 = pad_rows(pad_gate_cols(lstm['whh0'].T), HP)          # (HP, 4*HP)
    b1g = pad_gate_bias(lstm['bih0'] + lstm['bhh0'])
    wih2 = pad_rows(pad_gate_cols(lstm['wih1'].T), HP)          # (HP, 4*HP)
    whh2 = pad_rows(pad_gate_cols(lstm['whh1'].T), HP)          # (HP, 4*HP)
    b2g = pad_gate_bias(lstm['bih1'] + lstm['bhh1'])

    # Linear head: lane-dense padded logits. Pad columns: zero weight + -1e30
    # bias so they vanish from the softmax normalizer.
    NC = lin['w'].shape[0]
    CP = max(128, _round_up(NC, 128))
    wlin = jnp.zeros((HP, CP), f32).at[:Hh, :NC].set(lin['w'].T)
    blin = jnp.full((1, CP), -1e30, f32).at[0, :NC].set(lin['b'])

    cast = lambda a: a.astype(dtype)   # bf16 at the MXU; biases stay f32
    return (cast(W1d), b1d, cast(W2d), b2d, cast(Wh), bh,
            cast(wih1), cast(whh1), b1g, cast(wih2), cast(whh2), b2g,
            cast(wlin), blin)


# ------------------------------- init / main -----------------------------------
def init_params(key, num_class=10):
    def u(k, shape, fan_in):
        b = 1.0 / math.sqrt(fan_in)
        return jax.random.uniform(k, shape, jnp.float32, -b, b)

    ks = jax.random.split(key, 16)
    cnn = {
        'conv1_w': u(ks[0], (32, 1, 3, 3), 9),
        'conv1_b': u(ks[1], (32,), 9),
        'conv2_w': u(ks[2], (64, 32, 3, 3), 288),
        'conv2_b': u(ks[3], (64,), 288),
        'hidden1_w': u(ks[4], (18, 256), 256),
        'hidden1_b': u(ks[5], (18,), 256),
    }
    lstm = {
        'wih0': u(ks[6], (200, 18), 50), 'whh0': u(ks[7], (200, 50), 50),
        'bih0': u(ks[8], (200,), 50), 'bhh0': u(ks[9], (200,), 50),
        'wih1': u(ks[10], (200, 50), 50), 'whh1': u(ks[11], (200, 50), 50),
        'bih1': u(ks[12], (200,), 50), 'bhh1': u(ks[13], (200,), 50),
    }
    linear = {
        'w': u(ks[14], (num_class, 50), 50),
        'b': u(ks[15], (num_class,), 50),
    }
    return {'cnn': cnn, 'lstm': lstm, 'linear': linear}


if __name__ == "__main__":
    key = jax.random.PRNGKey(0)
    pkey, xkey = jax.random.split(key)
    num_class = 10
    params = init_params(pkey, num_class=num_class)
    kparams = prepare_params(params)            # one-time, kernel-ready layout

    # batch=2, timesteps=1, C=1, sequence=8, H=W=6 (forced by c2*4=256 flatten)
    B, T, C, S, H, W = 2, 1, 1, 8, 6, 6
    x = jax.random.normal(xkey, (B, T, C, S, H, W), jnp.float32)

    fwd = jax.jit(biocnn_lstm_forward, static_argnames=("num_class", "tile_b"))
    out = fwd(x, kparams, num_class=num_class)
    out = jax.block_until_ready(out)
    assert out.shape == (B, num_class)
    assert bool(jnp.all(jnp.isfinite(out)))
    # log_softmax sanity: per-row probabilities sum to ~1
    assert bool(jnp.all(jnp.abs(jnp.sum(jnp.exp(out), axis=1) - 1.0) < 1e-3))
    print("KERNEL_OK")
</pallas_src>

<mosaic_0001>
module attributes {stable_mosaic.version = 11 : i64} {
  func.func @_fused_kernel(%arg0: i32, %arg1: memref<1x64x36xf32, #tpu.memory_space<vmem>>, %arg2: memref<36x512xbf16, #tpu.memory_space<vmem>>, %arg3: memref<1x512xf32, #tpu.memory_space<vmem>>, %arg4: memref<512x256xbf16, #tpu.memory_space<vmem>>, %arg5: memref<1x256xf32, #tpu.memory_space<vmem>>, %arg6: memref<256x128xbf16, #tpu.memory_space<vmem>>, %arg7: memref<1x128xf32, #tpu.memory_space<vmem>>, %arg8: memref<128x512xbf16, #tpu.memory_space<vmem>>, %arg9: memref<128x512xbf16, #tpu.memory_space<vmem>>, %arg10: memref<1x512xf32, #tpu.memory_space<vmem>>, %arg11: memref<128x512xbf16, #tpu.memory_space<vmem>>, %arg12: memref<128x512xbf16, #tpu.memory_space<vmem>>, %arg13: memref<1x512xf32, #tpu.memory_space<vmem>>, %arg14: memref<128x128xbf16, #tpu.memory_space<vmem>>, %arg15: memref<1x128xf32, #tpu.memory_space<vmem>>, %arg16: memref<8x128xf32, #tpu.memory_space<vmem>>) attributes {dimension_semantics = [#tpu.dimension_semantics<parallel>], iteration_bounds = array<i64: 1>, scalar_prefetch = 0 : i64, scratch_operands = 0 : i64, tpu.core_type = #tpu.core_type<tc>, window_params = [{transform_indices = @transform_0, window_bounds = array<i64: 1, 64, 36>}, {pipeline_mode = #tpu.pipeline_mode<synchronous>, transform_indices = @transform_1, window_bounds = array<i64: 36, 512>}, {pipeline_mode = #tpu.pipeline_mode<synchronous>, transform_indices = @transform_2, window_bounds = array<i64: 1, 512>}, {pipeline_mode = #tpu.pipeline_mode<synchronous>, transform_indices = @transform_3, window_bounds = array<i64: 512, 256>}, {pipeline_mode = #tpu.pipeline_mode<synchronous>, transform_indices = @transform_4, window_bounds = array<i64: 1, 256>}, {pipeline_mode = #tpu.pipeline_mode<synchronous>, transform_indices = @transform_5, window_bounds = array<i64: 256, 128>}, {pipeline_mode = #tpu.pipeline_mode<synchronous>, transform_indices = @transform_6, window_bounds = array<i64: 1, 128>}, {pipeline_mode = #tpu.pipeline_mode<synchronous>, transform_indices = @transform_7, window_bounds = array<i64: 128, 512>}, {pipeline_mode = #tpu.pipeline_mode<synchronous>, transform_indices = @transform_8, window_bounds = array<i64: 128, 512>}, {pipeline_mode = #tpu.pipeline_mode<synchronous>, transform_indices = @transform_9, window_bounds = array<i64: 1, 512>}, {pipeline_mode = #tpu.pipeline_mode<synchronous>, transform_indices = @transform_10, window_bounds = array<i64: 128, 512>}, {pipeline_mode = #tpu.pipeline_mode<synchronous>, transform_indices = @transform_11, window_bounds = array<i64: 128, 512>}, {pipeline_mode = #tpu.pipeline_mode<synchronous>, transform_indices = @transform_12, window_bounds = array<i64: 1, 512>}, {pipeline_mode = #tpu.pipeline_mode<synchronous>, transform_indices = @transform_13, window_bounds = array<i64: 128, 128>}, {pipeline_mode = #tpu.pipeline_mode<synchronous>, transform_indices = @transform_14, window_bounds = array<i64: 1, 128>}, {transform_indices = @transform_15, window_bounds = array<i64: 8, 128>}]} {
    %c0 = arith.constant 0 : index
    %c0_0 = arith.constant 0 : index
    %c0_1 = arith.constant 0 : index
    %0 = vector.load %arg1[%c0, %c0_0, %c0_1] : memref<1x64x36xf32, #tpu.memory_space<vmem>>, vector<1x64x36xf32>
    %1 = vector.shape_cast %0 : vector<1x64x36xf32> to vector<64x36xf32>
    %2 = arith.truncf %1 : vector<64x36xf32> to vector<64x36xbf16>
    %c0_2 = arith.constant 0 : index
    %c0_3 = arith.constant 0 : index
    %3 = vector.load %arg2[%c0_2, %c0_3] : memref<36x512xbf16, #tpu.memory_space<vmem>>, vector<36x512xbf16>
    %cst = arith.constant dense<0.000000e+00> : vector<64x512xf32>
    %4 = tpu.matmul %2, %3, %cst {dimension_numbers = #tpu.dot_dimension_numbers<[1], [0], [0], [1], [0, 0, 1, 1], [], []>} : vector<64x36xbf16>, vector<36x512xbf16>, vector<64x512xf32> -> vector<64x512xf32>
    %c0_4 = arith.constant 0 : index
    %c0_5 = arith.constant 0 : index
    %5 = vector.load %arg3[%c0_4, %c0_5] : memref<1x512xf32, #tpu.memory_space<vmem>>, vector<1x512xf32>
    %6 = vector.broadcast %5 : vector<1x512xf32> to vector<64x512xf32>
    %7 = arith.addf %4, %6 : vector<64x512xf32>
    %cst_6 = arith.constant 0.000000e+00 : f32
    %8 = vector.broadcast %cst_6 : f32 to vector<64x512xf32>
    %9 = arith.maximumf %7, %8 : vector<64x512xf32>
    %10 = arith.truncf %9 : vector<64x512xf32> to vector<64x512xbf16>
    %c0_7 = arith.constant 0 : index
    %c0_8 = arith.constant 0 : index
    %11 = vector.load %arg4[%c0_7, %c0_8] : memref<512x256xbf16, #tpu.memory_space<vmem>>, vector<512x256xbf16>
    %cst_9 = arith.constant dense<0.000000e+00> : vector<64x256xf32>
    %12 = tpu.matmul %10, %11, %cst_9 {dimension_numbers = #tpu.dot_dimension_numbers<[1], [0], [0], [1], [0, 0, 1, 1], [], []>} : vector<64x512xbf16>, vector<512x256xbf16>, vector<64x256xf32> -> vector<64x256xf32>
    %c0_10 = arith.constant 0 : index
    %c0_11 = arith.constant 0 : index
    %13 = vector.load %arg5[%c0_10, %c0_11] : memref<1x256xf32, #tpu.memory_space<vmem>>, vector<1x256xf32>
    %14 = vector.broadcast %13 : vector<1x256xf32> to vector<64x256xf32>
    %15 = arith.addf %12, %14 : vector<64x256xf32>
    %cst_12 = arith.constant 0.000000e+00 : f32
    %16 = vector.broadcast %cst_12 : f32 to vector<64x256xf32>
    %17 = arith.maximumf %15, %16 : vector<64x256xf32>
    %18 = arith.truncf %17 : vector<64x256xf32> to vector<64x256xbf16>
    %c0_13 = arith.constant 0 : index
    %c0_14 = arith.constant 0 : index
    %19 = vector.load %arg6[%c0_13, %c0_14] : memref<256x128xbf16, #tpu.memory_space<vmem>>, vector<256x128xbf16>
    %cst_15 = arith.constant dense<0.000000e+00> : vector<64x128xf32>
    %20 = tpu.matmul %18, %19, %cst_15 {dimension_numbers = #tpu.dot_dimension_numbers<[1], [0], [0], [1], [0, 0, 1, 1], [], []>} : vector<64x256xbf16>, vector<256x128xbf16>, vector<64x128xf32> -> vector<64x128xf32>
    %c0_16 = arith.constant 0 : index
    %c0_17 = arith.constant 0 : index
    %21 = vector.load %arg7[%c0_16, %c0_17] : memref<1x128xf32, #tpu.memory_space<vmem>>, vector<1x128xf32>
    %22 = vector.broadcast %21 : vector<1x128xf32> to vector<64x128xf32>
    %23 = arith.addf %20, %22 : vector<64x128xf32>
    %cst_18 = arith.constant 0.000000e+00 : f32
    %24 = vector.broadcast %cst_18 : f32 to vector<64x128xf32>
    %25 = arith.maximumf %23, %24 : vector<64x128xf32>
    %26 = arith.truncf %25 : vector<64x128xf32> to vector<64x128xbf16>
    %c0_19 = arith.constant 0 : index
    %c0_20 = arith.constant 0 : index
    %27 = vector.load %arg8[%c0_19, %c0_20] : memref<128x512xbf16, #tpu.memory_space<vmem>>, vector<128x512xbf16>
    %cst_21 = arith.constant dense<0.000000e+00> : vector<64x512xf32>
    %28 = tpu.matmul %26, %27, %cst_21 {dimension_numbers = #tpu.dot_dimension_numbers<[1], [0], [0], [1], [0, 0, 1, 1], [], []>} : vector<64x128xbf16>, vector<128x512xbf16>, vector<64x512xf32> -> vector<64x512xf32>
    %c0_22 = arith.constant 0 : index
    %c0_23 = arith.constant 0 : index
    %29 = vector.load %arg10[%c0_22, %c0_23] : memref<1x512xf32, #tpu.memory_space<vmem>>, vector<1x512xf32>
    %30 = vector.broadcast %29 : vector<1x512xf32> to vector<64x512xf32>
    %31 = arith.addf %28, %30 : vector<64x512xf32>
    %c0_24 = arith.constant 0 : index
    %c0_25 = arith.constant 0 : index
    %32 = vector.load %arg9[%c0_24, %c0_25] : memref<128x512xbf16, #tpu.memory_space<vmem>>, vector<128x512xbf16>
    %c0_26 = arith.constant 0 : index
    %c0_27 = arith.constant 0 : index
    %33 = vector.load %arg11[%c0_26, %c0_27] : memref<128x512xbf16, #tpu.memory_space<vmem>>, vector<128x512xbf16>
    %c0_28 = arith.constant 0 : index
    %c0_29 = arith.constant 0 : index
    %34 = vector.load %arg12[%c0_28, %c0_29] : memref<128x512xbf16, #tpu.memory_space<vmem>>, vector<128x512xbf16>
    %c0_30 = arith.constant 0 : index
    %c0_31 = arith.constant 0 : index
    %35 = vector.load %arg13[%c0_30, %c0_31] : memref<1x512xf32, #tpu.memory_space<vmem>>, vector<1x512xf32>
    %cst_32 = arith.constant 0.000000e+00 : f32
    %36 = vector.broadcast %cst_32 : f32 to vector<8x128xf32>
    %37 = vector.extract_strided_slice %31 {offsets = [0, 0], sizes = [8, 512], strides = [1, 1]} : vector<64x512xf32> to vector<8x512xf32>
    %38 = arith.truncf %36 : vector<8x128xf32> to vector<8x128xbf16>
    %cst_33 = arith.constant dense<0.000000e+00> : vector<8x512xf32>
    %39 = tpu.matmul %38, %32, %cst_33 {dimension_numbers = #tpu.dot_dimension_numbers<[1], [0], [0], [1], [0, 0, 1, 1], [], []>} : vector<8x128xbf16>, vector<128x512xbf16>, vector<8x512xf32> -> vector<8x512xf32>
    %40 = arith.addf %37, %39 : vector<8x512xf32>
    %41 = arith.truncf %36 : vector<8x128xf32> to vector<8x128xbf16>
    %cst_34 = arith.constant dense<0.000000e+00> : vector<8x512xf32>
    %42 = tpu.matmul %41, %34, %cst_34 {dimension_numbers = #tpu.dot_dimension_numbers<[1], [0], [0], [1], [0, 0, 1, 1], [], []>} : vector<8x128xbf16>, vector<128x512xbf16>, vector<8x512xf32> -> vector<8x512xf32>
    %43 = vector.extract_strided_slice %40 {offsets = [0, 0], sizes = [8, 128], strides = [1, 1]} : vector<8x512xf32> to vector<8x128xf32>
    %44 = arith.negf %43 : vector<8x128xf32>
    %45 = math.exp %44 : vector<8x128xf32>
    %cst_35 = arith.constant 1.000000e+00 : f32
    %46 = vector.broadcast %cst_35 : f32 to vector<8x128xf32>
    %47 = arith.addf %46, %45 : vector<8x128xf32>
    %48 = arith.divf %46, %47 : vector<8x128xf32>
    %49 = vector.extract_strided_slice %40 {offsets = [0, 128], sizes = [8, 128], strides = [1, 1]} : vector<8x512xf32> to vector<8x128xf32>
    %50 = arith.negf %49 : vector<8x128xf32>
    %51 = math.exp %50 : vector<8x128xf32>
    %cst_36 = arith.constant 1.000000e+00 : f32
    %52 = vector.broadcast %cst_36 : f32 to vector<8x128xf32>
    %53 = arith.addf %52, %51 : vector<8x128xf32>
    %54 = arith.divf %52, %53 : vector<8x128xf32>
    %55 = vector.extract_strided_slice %40 {offsets = [0, 256], sizes = [8, 128], strides = [1, 1]} : vector<8x512xf32> to vector<8x128xf32>
    %56 = math.tanh %55 : vector<8x128xf32>
    %57 = vector.extract_strided_slice %40 {offsets = [0, 384], sizes = [8, 128], strides = [1, 1]} : vector<8x512xf32> to vector<8x128xf32>
    %58 = arith.negf %57 : vector<8x128xf32>
    %59 = math.exp %58 : vector<8x128xf32>
    %cst_37 = arith.constant 1.000000e+00 : f32
    %60 = vector.broadcast %cst_37 : f32 to vector<8x128xf32>
    %61 = arith.addf %60, %59 : vector<8x128xf32>
    %62 = arith.divf %60, %61 : vector<8x128xf32>
    %63 = arith.mulf %54, %36 : vector<8x128xf32>
    %64 = arith.mulf %48, %56 : vector<8x128xf32>
    %65 = arith.addf %63, %64 : vector<8x128xf32>
    %66 = math.tanh %65 : vector<8x128xf32>
    %67 = arith.mulf %62, %66 : vector<8x128xf32>
    %68 = arith.truncf %67 : vector<8x128xf32> to vector<8x128xbf16>
    %cst_38 = arith.constant dense<0.000000e+00> : vector<8x512xf32>
    %69 = tpu.matmul %68, %33, %cst_38 {dimension_numbers = #tpu.dot_dimension_numbers<[1], [0], [0], [1], [0, 0, 1, 1], [], []>} : vector<8x128xbf16>, vector<128x512xbf16>, vector<8x512xf32> -> vector<8x512xf32>
    %70 = arith.addf %69, %42 : vector<8x512xf32>
    %71 = vector.broadcast %35 : vector<1x512xf32> to vector<8x512xf32>
    %72 = arith.addf %70, %71 : vector<8x512xf32>
    %73 = vector.extract_strided_slice %72 {offsets = [0, 0], sizes = [8, 128], strides = [1, 1]} : vector<8x512xf32> to vector<8x128xf32>
    %74 = arith.negf %73 : vector<8x128xf32>
    %75 = math.exp %74 : vector<8x128xf32>
    %cst_39 = arith.constant 1.000000e+00 : f32
    %76 = vector.broadcast %cst_39 : f32 to vector<8x128xf32>
    %77 = arith.addf %76, %75 : vector<8x128xf32>
    %78 = arith.divf %76, %77 : vector<8x128xf32>
    %79 = vector.extract_strided_slice %72 {offsets = [0, 128], sizes = [8, 128], strides = [1, 1]} : vector<8x512xf32> to vector<8x128xf32>
    %80 = arith.negf %79 : vector<8x128xf32>
    %81 = math.exp %80 : vector<8x128xf32>
    %cst_40 = arith.constant 1.000000e+00 : f32
    %82 = vector.broadcast %cst_40 : f32 to vector<8x128xf32>
    %83 = arith.addf %82, %81 : vector<8x128xf32>
    %84 = arith.divf %82, %83 : vector<8x128xf32>
    %85 = vector.extract_strided_slice %72 {offsets = [0, 256], sizes = [8, 128], strides = [1, 1]} : vector<8x512xf32> to vector<8x128xf32>
    %86 = math.tanh %85 : vector<8x128xf32>
    %87 = vector.extract_strided_slice %72 {offsets = [0, 384], sizes = [8, 128], strides = [1, 1]} : vector<8x512xf32> to vector<8x128xf32>
    %88 = arith.negf %87 : vector<8x128xf32>
    %89 = math.exp %88 : vector<8x128xf32>
    %cst_41 = arith.constant 1.000000e+00 : f32
    %90 = vector.broadcast %cst_41 : f32 to vector<8x128xf32>
    %91 = arith.addf %90, %89 : vector<8x128xf32>
    %92 = arith.divf %90, %91 : vector<8x128xf32>
    %93 = arith.mulf %84, %36 : vector<8x128xf32>
    %94 = arith.mulf %78, %86 : vector<8x128xf32>
    %95 = arith.addf %93, %94 : vector<8x128xf32>
    %96 = math.tanh %95 : vector<8x128xf32>
    %97 = arith.mulf %92, %96 : vector<8x128xf32>
    %98 = vector.extract_strided_slice %31 {offsets = [8, 0], sizes = [8, 512], strides = [1, 1]} : vector<64x512xf32> to vector<8x512xf32>
    %99 = arith.truncf %67 : vector<8x128xf32> to vector<8x128xbf16>
    %cst_42 = arith.constant dense<0.000000e+00> : vector<8x512xf32>
    %100 = tpu.matmul %99, %32, %cst_42 {dimension_numbers = #tpu.dot_dimension_numbers<[1], [0], [0], [1], [0, 0, 1, 1], [], []>} : vector<8x128xbf16>, vector<128x512xbf16>, vector<8x512xf32> -> vector<8x512xf32>
    %101 = arith.addf %98, %100 : vector<8x512xf32>
    %102 = arith.truncf %97 : vector<8x128xf32> to vector<8x128xbf16>
    %cst_43 = arith.constant dense<0.000000e+00> : vector<8x512xf32>
    %103 = tpu.matmul %102, %34, %cst_43 {dimension_numbers = #tpu.dot_dimension_numbers<[1], [0], [0], [1], [0, 0, 1, 1], [], []>} : vector<8x128xbf16>, vector<128x512xbf16>, vector<8x512xf32> -> vector<8x512xf32>
    %104 = vector.extract_strided_slice %101 {offsets = [0, 0], sizes = [8, 128], strides = [1, 1]} : vector<8x512xf32> to vector<8x128xf32>
    %105 = arith.negf %104 : vector<8x128xf32>
    %106 = math.exp %105 : vector<8x128xf32>
    %cst_44 = arith.constant 1.000000e+00 : f32
    %107 = vector.broadcast %cst_44 : f32 to vector<8x128xf32>
    %108 = arith.addf %107, %106 : vector<8x128xf32>
    %109 = arith.divf %107, %108 : vector<8x128xf32>
    %110 = vector.extract_strided_slice %101 {offsets = [0, 128], sizes = [8, 128], strides = [1, 1]} : vector<8x512xf32> to vector<8x128xf32>
    %111 = arith.negf %110 : vector<8x128xf32>
    %112 = math.exp %111 : vector<8x128xf32>
    %cst_45 = arith.constant 1.000000e+00 : f32
    %113 = vector.broadcast %cst_45 : f32 to vector<8x128xf32>
    %114 = arith.addf %113, %112 : vector<8x128xf32>
    %115 = arith.divf %113, %114 : vector<8x128xf32>
    %116 = vector.extract_strided_slice %101 {offsets = [0, 256], sizes = [8, 128], strides = [1, 1]} : vector<8x512xf32> to vector<8x128xf32>
    %117 = math.tanh %116 : vector<8x128xf32>
    %118 = vector.extract_strided_slice %101 {offsets = [0, 384], sizes = [8, 128], strides = [1, 1]} : vector<8x512xf32> to vector<8x128xf32>
    %119 = arith.negf %118 : vector<8x128xf32>
    %120 = math.exp %119 : vector<8x128xf32>
    %cst_46 = arith.constant 1.000000e+00 : f32
    %121 = vector.broadcast %cst_46 : f32 to vector<8x128xf32>
    %122 = arith.addf %121, %120 : vector<8x128xf32>
    %123 = arith.divf %121, %122 : vector<8x128xf32>
    %124 = arith.mulf %115, %65 : vector<8x128xf32>
    %125 = arith.mulf %109, %117 : vector<8x128xf32>
    %126 = arith.addf %124, %125 : vector<8x128xf32>
    %127 = math.tanh %126 : vector<8x128xf32>
    %128 = arith.mulf %123, %127 : vector<8x128xf32>
    %129 = arith.truncf %128 : vector<8x128xf32> to vector<8x128xbf16>
    %cst_47 = arith.constant dense<0.000000e+00> : vector<8x512xf32>
    %130 = tpu.matmul %129, %33, %cst_47 {dimension_numbers = #tpu.dot_dimension_numbers<[1], [0], [0], [1], [0, 0, 1, 1], [], []>} : vector<8x128xbf16>, vector<128x512xbf16>, vector<8x512xf32> -> vector<8x512xf32>
    %131 = arith.addf %130, %103 : vector<8x512xf32>
    %132 = vector.broadcast %35 : vector<1x512xf32> to vector<8x512xf32>
    %133 = arith.addf %131, %132 : vector<8x512xf32>
    %134 = vector.extract_strided_slice %133 {offsets = [0, 0], sizes = [8, 128], strides = [1, 1]} : vector<8x512xf32> to vector<8x128xf32>
    %135 = arith.negf %134 : vector<8x128xf32>
    %136 = math.exp %135 : vector<8x128xf32>
    %cst_48 = arith.constant 1.000000e+00 : f32
    %137 = vector.broadcast %cst_48 : f32 to vector<8x128xf32>
    %138 = arith.addf %137, %136 : vector<8x128xf32>
    %139 = arith.divf %137, %138 : vector<8x128xf32>
    %140 = vector.extract_strided_slice %133 {offsets = [0, 128], sizes = [8, 128], strides = [1, 1]} : vector<8x512xf32> to vector<8x128xf32>
    %141 = arith.negf %140 : vector<8x128xf32>
    %142 = math.exp %141 : vector<8x128xf32>
    %cst_49 = arith.constant 1.000000e+00 : f32
    %143 = vector.broadcast %cst_49 : f32 to vector<8x128xf32>
    %144 = arith.addf %143, %142 : vector<8x128xf32>
    %145 = arith.divf %143, %144 : vector<8x128xf32>
    %146 = vector.extract_strided_slice %133 {offsets = [0, 256], sizes = [8, 128], strides = [1, 1]} : vector<8x512xf32> to vector<8x128xf32>
    %147 = math.tanh %146 : vector<8x128xf32>
    %148 = vector.extract_strided_slice %133 {offsets = [0, 384], sizes = [8, 128], strides = [1, 1]} : vector<8x512xf32> to vector<8x128xf32>
    %149 = arith.negf %148 : vector<8x128xf32>
    %150 = math.exp %149 : vector<8x128xf32>
    %cst_50 = arith.constant 1.000000e+00 : f32
    %151 = vector.broadcast %cst_50 : f32 to vector<8x128xf32>
    %152 = arith.addf %151, %150 : vector<8x128xf32>
    %153 = arith.divf %151, %152 : vector<8x128xf32>
    %154 = arith.mulf %145, %95 : vector<8x128xf32>
    %155 = arith.mulf %139, %147 : vector<8x128xf32>
    %156 = arith.addf %154, %155 : vector<8x128xf32>
    %157 = math.tanh %156 : vector<8x128xf32>
    %158 = arith.mulf %153, %157 : vector<8x128xf32>
    %159 = vector.extract_strided_slice %31 {offsets = [16, 0], sizes = [8, 512], strides = [1, 1]} : vector<64x512xf32> to vector<8x512xf32>
    %160 = arith.truncf %128 : vector<8x128xf32> to vector<8x128xbf16>
    %cst_51 = arith.constant dense<0.000000e+00> : vector<8x512xf32>
    %161 = tpu.matmul %160, %32, %cst_51 {dimension_numbers = #tpu.dot_dimension_numbers<[1], [0], [0], [1], [0, 0, 1, 1], [], []>} : vector<8x128xbf16>, vector<128x512xbf16>, vector<8x512xf32> -> vector<8x512xf32>
    %162 = arith.addf %159, %161 : vector<8x512xf32>
    %163 = arith.truncf %158 : vector<8x128xf32> to vector<8x128xbf16>
    %cst_52 = arith.constant dense<0.000000e+00> : vector<8x512xf32>
    %164 = tpu.matmul %163, %34, %cst_52 {dimension_numbers = #tpu.dot_dimension_numbers<[1], [0], [0], [1], [0, 0, 1, 1], [], []>} : vector<8x128xbf16>, vector<128x512xbf16>, vector<8x512xf32> -> vector<8x512xf32>
    %165 = vector.extract_strided_slice %162 {offsets = [0, 0], sizes = [8, 128], strides = [1, 1]} : vector<8x512xf32> to vector<8x128xf32>
    %166 = arith.negf %165 : vector<8x128xf32>
    %167 = math.exp %166 : vector<8x128xf32>
    %cst_53 = arith.constant 1.000000e+00 : f32
    %168 = vector.broadcast %cst_53 : f32 to vector<8x128xf32>
    %169 = arith.addf %168, %167 : vector<8x128xf32>
    %170 = arith.divf %168, %169 : vector<8x128xf32>
    %171 = vector.extract_strided_slice %162 {offsets = [0, 128], sizes = [8, 128], strides = [1, 1]} : vector<8x512xf32> to vector<8x128xf32>
    %172 = arith.negf %171 : vector<8x128xf32>
    %173 = math.exp %172 : vector<8x128xf32>
    %cst_54 = arith.constant 1.000000e+00 : f32
    %174 = vector.broadcast %cst_54 : f32 to vector<8x128xf32>
    %175 = arith.addf %174, %173 : vector<8x128xf32>
    %176 = arith.divf %174, %175 : vector<8x128xf32>
    %177 = vector.extract_strided_slice %162 {offsets = [0, 256], sizes = [8, 128], strides = [1, 1]} : vector<8x512xf32> to vector<8x128xf32>
    %178 = math.tanh %177 : vector<8x128xf32>
    %179 = vector.extract_strided_slice %162 {offsets = [0, 384], sizes = [8, 128], strides = [1, 1]} : vector<8x512xf32> to vector<8x128xf32>
    %180 = arith.negf %179 : vector<8x128xf32>
    %181 = math.exp %180 : vector<8x128xf32>
    %cst_55 = arith.constant 1.000000e+00 : f32
    %182 = vector.broadcast %cst_55 : f32 to vector<8x128xf32>
    %183 = arith.addf %182, %181 : vector<8x128xf32>
    %184 = arith.divf %182, %183 : vector<8x128xf32>
    %185 = arith.mulf %176, %126 : vector<8x128xf32>
    %186 = arith.mulf %170, %178 : vector<8x128xf32>
    %187 = arith.addf %185, %186 : vector<8x128xf32>
    %188 = math.tanh %187 : vector<8x128xf32>
    %189 = arith.mulf %184, %188 : vector<8x128xf32>
    %190 = arith.truncf %189 : vector<8x128xf32> to vector<8x128xbf16>
    %cst_56 = arith.constant dense<0.000000e+00> : vector<8x512xf32>
    %191 = tpu.matmul %190, %33, %cst_56 {dimension_numbers = #tpu.dot_dimension_numbers<[1], [0], [0], [1], [0, 0, 1, 1], [], []>} : vector<8x128xbf16>, vector<128x512xbf16>, vector<8x512xf32> -> vector<8x512xf32>
    %192 = arith.addf %191, %164 : vector<8x512xf32>
    %193 = vector.broadcast %35 : vector<1x512xf32> to vector<8x512xf32>
    %194 = arith.addf %192, %193 : vector<8x512xf32>
    %195 = vector.extract_strided_slice %194 {offsets = [0, 0], sizes = [8, 128], strides = [1, 1]} : vector<8x512xf32> to vector<8x128xf32>
    %196 = arith.negf %195 : vector<8x128xf32>
    %197 = math.exp %196 : vector<8x128xf32>
    %cst_57 = arith.constant 1.000000e+00 : f32
    %198 = vector.broadcast %cst_57 : f32 to vector<8x128xf32>
    %199 = arith.addf %198, %197 : vector<8x128xf32>
    %200 = arith.divf %198, %199 : vector<8x128xf32>
    %201 = vector.extract_strided_slice %194 {offsets = [0, 128], sizes = [8, 128], strides = [1, 1]} : vector<8x512xf32> to vector<8x128xf32>
    %202 = arith.negf %201 : vector<8x128xf32>
    %203 = math.exp %202 : vector<8x128xf32>
    %cst_58 = arith.constant 1.000000e+00 : f32
    %204 = vector.broadcast %cst_58 : f32 to vector<8x128xf32>
    %205 = arith.addf %204, %203 : vector<8x128xf32>
    %206 = arith.divf %204, %205 : vector<8x128xf32>
    %207 = vector.extract_strided_slice %194 {offsets = [0, 256], sizes = [8, 128], strides = [1, 1]} : vector<8x512xf32> to vector<8x128xf32>
    %208 = math.tanh %207 : vector<8x128xf32>
    %209 = vector.extract_strided_slice %194 {offsets = [0, 384], sizes = [8, 128], strides = [1, 1]} : vector<8x512xf32> to vector<8x128xf32>
    %210 = arith.negf %209 : vector<8x128xf32>
    %211 = math.exp %210 : vector<8x128xf32>
    %cst_59 = arith.constant 1.000000e+00 : f32
    %212 = vector.broadcast %cst_59 : f32 to vector<8x128xf32>
    %213 = arith.addf %212, %211 : vector<8x128xf32>
    %214 = arith.divf %212, %213 : vector<8x128xf32>
    %215 = arith.mulf %206, %156 : vector<8x128xf32>
    %216 = arith.mulf %200, %208 : vector<8x128xf32>
    %217 = arith.addf %215, %216 : vector<8x128xf32>
    %218 = math.tanh %217 : vector<8x128xf32>
    %219 = arith.mulf %214, %218 : vector<8x128xf32>
    %220 = vector.extract_strided_slice %31 {offsets = [24, 0], sizes = [8, 512], strides = [1, 1]} : vector<64x512xf32> to vector<8x512xf32>
    %221 = arith.truncf %189 : vector<8x128xf32> to vector<8x128xbf16>
    %cst_60 = arith.constant dense<0.000000e+00> : vector<8x512xf32>
    %222 = tpu.matmul %221, %32, %cst_60 {dimension_numbers = #tpu.dot_dimension_numbers<[1], [0], [0], [1], [0, 0, 1, 1], [], []>} : vector<8x128xbf16>, vector<128x512xbf16>, vector<8x512xf32> -> vector<8x512xf32>
    %223 = arith.addf %220, %222 : vector<8x512xf32>
    %224 = arith.truncf %219 : vector<8x128xf32> to vector<8x128xbf16>
    %cst_61 = arith.constant dense<0.000000e+00> : vector<8x512xf32>
    %225 = tpu.matmul %224, %34, %cst_61 {dimension_numbers = #tpu.dot_dimension_numbers<[1], [0], [0], [1], [0, 0, 1, 1], [], []>} : vector<8x128xbf16>, vector<128x512xbf16>, vector<8x512xf32> -> vector<8x512xf32>
    %226 = vector.extract_strided_slice %223 {offsets = [0, 0], sizes = [8, 128], strides = [1, 1]} : vector<8x512xf32> to vector<8x128xf32>
    %227 = arith.negf %226 : vector<8x128xf32>
    %228 = math.exp %227 : vector<8x128xf32>
    %cst_62 = arith.constant 1.000000e+00 : f32
    %229 = vector.broadcast %cst_62 : f32 to vector<8x128xf32>
    %230 = arith.addf %229, %228 : vector<8x128xf32>
    %231 = arith.divf %229, %230 : vector<8x128xf32>
    %232 = vector.extract_strided_slice %223 {offsets = [0, 128], sizes = [8, 128], strides = [1, 1]} : vector<8x512xf32> to vector<8x128xf32>
    %233 = arith.negf %232 : vector<8x128xf32>
    %234 = math.exp %233 : vector<8x128xf32>
    %cst_63 = arith.constant 1.000000e+00 : f32
    %235 = vector.broadcast %cst_63 : f32 to vector<8x128xf32>
    %236 = arith.addf %235, %234 : vector<8x128xf32>
    %237 = arith.divf %235, %236 : vector<8x128xf32>
    %238 = vector.extract_strided_slice %223 {offsets = [0, 256], sizes = [8, 128], strides = [1, 1]} : vector<8x512xf32> to vector<8x128xf32>
    %239 = math.tanh %238 : vector<8x128xf32>
    %240 = vector.extract_strided_slice %223 {offsets = [0, 384], sizes = [8, 128], strides = [1, 1]} : vector<8x512xf32> to vector<8x128xf32>
    %241 = arith.negf %240 : vector<8x128xf32>
    %242 = math.exp %241 : vector<8x128xf32>
    %cst_64 = arith.constant 1.000000e+00 : f32
    %243 = vector.broadcast %cst_64 : f32 to vector<8x128xf32>
    %244 = arith.addf %243, %242 : vector<8x128xf32>
    %245 = arith.divf %243, %244 : vector<8x128xf32>
    %246 = arith.mulf %237, %187 : vector<8x128xf32>
    %247 = arith.mulf %231, %239 : vector<8x128xf32>
    %248 = arith.addf %246, %247 : vector<8x128xf32>
    %249 = math.tanh %248 : vector<8x128xf32>
    %250 = arith.mulf %245, %249 : vector<8x128xf32>
    %251 = arith.truncf %250 : vector<8x128xf32> to vector<8x128xbf16>
    %cst_65 = arith.constant dense<0.000000e+00> : vector<8x512xf32>
    %252 = tpu.matmul %251, %33, %cst_65 {dimension_numbers = #tpu.dot_dimension_numbers<[1], [0], [0], [1], [0, 0, 1, 1], [], []>} : vector<8x128xbf16>, vector<128x512xbf16>, vector<8x512xf32> -> vector<8x512xf32>
    %253 = arith.addf %252, %225 : vector<8x512xf32>
    %254 = vector.broadcast %35 : vector<1x512xf32> to vector<8x512xf32>
    %255 = arith.addf %253, %254 : vector<8x512xf32>
    %256 = vector.extract_strided_slice %255 {offsets = [0, 0], sizes = [8, 128], strides = [1, 1]} : vector<8x512xf32> to vector<8x128xf32>
    %257 = arith.negf %256 : vector<8x128xf32>
    %258 = math.exp %257 : vector<8x128xf32>
    %cst_66 = arith.constant 1.000000e+00 : f32
    %259 = vector.broadcast %cst_66 : f32 to vector<8x128xf32>
    %260 = arith.addf %259, %258 : vector<8x128xf32>
    %261 = arith.divf %259, %260 : vector<8x128xf32>
    %262 = vector.extract_strided_slice %255 {offsets = [0, 128], sizes = [8, 128], strides = [1, 1]} : vector<8x512xf32> to vector<8x128xf32>
    %263 = arith.negf %262 : vector<8x128xf32>
    %264 = math.exp %263 : vector<8x128xf32>
    %cst_67 = arith.constant 1.000000e+00 : f32
    %265 = vector.broadcast %cst_67 : f32 to vector<8x128xf32>
    %266 = arith.addf %265, %264 : vector<8x128xf32>
    %267 = arith.divf %265, %266 : vector<8x128xf32>
    %268 = vector.extract_strided_slice %255 {offsets = [0, 256], sizes = [8, 128], strides = [1, 1]} : vector<8x512xf32> to vector<8x128xf32>
    %269 = math.tanh %268 : vector<8x128xf32>
    %270 = vector.extract_strided_slice %255 {offsets = [0, 384], sizes = [8, 128], strides = [1, 1]} : vector<8x512xf32> to vector<8x128xf32>
    %271 = arith.negf %270 : vector<8x128xf32>
    %272 = math.exp %271 : vector<8x128xf32>
    %cst_68 = arith.constant 1.000000e+00 : f32
    %273 = vector.broadcast %cst_68 : f32 to vector<8x128xf32>
    %274 = arith.addf %273, %272 : vector<8x128xf32>
    %275 = arith.divf %273, %274 : vector<8x128xf32>
    %276 = arith.mulf %267, %217 : vector<8x128xf32>
    %277 = arith.mulf %261, %269 : vector<8x128xf32>
    %278 = arith.addf %276, %277 : vector<8x128xf32>
    %279 = math.tanh %278 : vector<8x128xf32>
    %280 = arith.mulf %275, %279 : vector<8x128xf32>
    %281 = vector.extract_strided_slice %31 {offsets = [32, 0], sizes = [8, 512], strides = [1, 1]} : vector<64x512xf32> to vector<8x512xf32>
    %282 = arith.truncf %250 : vector<8x128xf32> to vector<8x128xbf16>
    %cst_69 = arith.constant dense<0.000000e+00> : vector<8x512xf32>
    %283 = tpu.matmul %282, %32, %cst_69 {dimension_numbers = #tpu.dot_dimension_numbers<[1], [0], [0], [1], [0, 0, 1, 1], [], []>} : vector<8x128xbf16>, vector<128x512xbf16>, vector<8x512xf32> -> vector<8x512xf32>
    %284 = arith.addf %281, %283 : vector<8x512xf32>
    %285 = arith.truncf %280 : vector<8x128xf32> to vector<8x128xbf16>
    %cst_70 = arith.constant dense<0.000000e+00> : vector<8x512xf32>
    %286 = tpu.matmul %285, %34, %cst_70 {dimension_numbers = #tpu.dot_dimension_numbers<[1], [0], [0], [1], [0, 0, 1, 1], [], []>} : vector<8x128xbf16>, vector<128x512xbf16>, vector<8x512xf32> -> vector<8x512xf32>
    %287 = vector.extract_strided_slice %284 {offsets = [0, 0], sizes = [8, 128], strides = [1, 1]} : vector<8x512xf32> to vector<8x128xf32>
    %288 = arith.negf %287 : vector<8x128xf32>
    %289 = math.exp %288 : vector<8x128xf32>
    %cst_71 = arith.constant 1.000000e+00 : f32
    %290 = vector.broadcast %cst_71 : f32 to vector<8x128xf32>
    %291 = arith.addf %290, %289 : vector<8x128xf32>
    %292 = arith.divf %290, %291 : vector<8x128xf32>
    %293 = vector.extract_strided_slice %284 {offsets = [0, 128], sizes = [8, 128], strides = [1, 1]} : vector<8x512xf32> to vector<8x128xf32>
    %294 = arith.negf %293 : vector<8x128xf32>
    %295 = math.exp %294 : vector<8x128xf32>
    %cst_72 = arith.constant 1.000000e+00 : f32
    %296 = vector.broadcast %cst_72 : f32 to vector<8x128xf32>
    %297 = arith.addf %296, %295 : vector<8x128xf32>
    %298 = arith.divf %296, %297 : vector<8x128xf32>
    %299 = vector.extract_strided_slice %284 {offsets = [0, 256], sizes = [8, 128], strides = [1, 1]} : vector<8x512xf32> to vector<8x128xf32>
    %300 = math.tanh %299 : vector<8x128xf32>
    %301 = vector.extract_strided_slice %284 {offsets = [0, 384], sizes = [8, 128], strides = [1, 1]} : vector<8x512xf32> to vector<8x128xf32>
    %302 = arith.negf %301 : vector<8x128xf32>
    %303 = math.exp %302 : vector<8x128xf32>
    %cst_73 = arith.constant 1.000000e+00 : f32
    %304 = vector.broadcast %cst_73 : f32 to vector<8x128xf32>
    %305 = arith.addf %304, %303 : vector<8x128xf32>
    %306 = arith.divf %304, %305 : vector<8x128xf32>
    %307 = arith.mulf %298, %248 : vector<8x128xf32>
    %308 = arith.mulf %292, %300 : vector<8x128xf32>
    %309 = arith.addf %307, %308 : vector<8x128xf32>
    %310 = math.tanh %309 : vector<8x128xf32>
    %311 = arith.mulf %306, %310 : vector<8x128xf32>
    %312 = arith.truncf %311 : vector<8x128xf32> to vector<8x128xbf16>
    %cst_74 = arith.constant dense<0.000000e+00> : vector<8x512xf32>
    %313 = tpu.matmul %312, %33, %cst_74 {dimension_numbers = #tpu.dot_dimension_numbers<[1], [0], [0], [1], [0, 0, 1, 1], [], []>} : vector<8x128xbf16>, vector<128x512xbf16>, vector<8x512xf32> -> vector<8x512xf32>
    %314 = arith.addf %313, %286 : vector<8x512xf32>
    %315 = vector.broadcast %35 : vector<1x512xf32> to vector<8x512xf32>
    %316 = arith.addf %314, %315 : vector<8x512xf32>
    %317 = vector.extract_strided_slice %316 {offsets = [0, 0], sizes = [8, 128], strides = [1, 1]} : vector<8x512xf32> to vector<8x128xf32>
    %318 = arith.negf %317 : vector<8x128xf32>
    %319 = math.exp %318 : vector<8x128xf32>
    %cst_75 = arith.constant 1.000000e+00 : f32
    %320 = vector.broadcast %cst_75 : f32 to vector<8x128xf32>
    %321 = arith.addf %320, %319 : vector<8x128xf32>
    %322 = arith.divf %320, %321 : vector<8x128xf32>
    %323 = vector.extract_strided_slice %316 {offsets = [0, 128], sizes = [8, 128], strides = [1, 1]} : vector<8x512xf32> to vector<8x128xf32>
    %324 = arith.negf %323 : vector<8x128xf32>
    %325 = math.exp %324 : vector<8x128xf32>
    %cst_76 = arith.constant 1.000000e+00 : f32
    %326 = vector.broadcast %cst_76 : f32 to vector<8x128xf32>
    %327 = arith.addf %326, %325 : vector<8x128xf32>
    %328 = arith.divf %326, %327 : vector<8x128xf32>
    %329 = vector.extract_strided_slice %316 {offsets = [0, 256], sizes = [8, 128], strides = [1, 1]} : vector<8x512xf32> to vector<8x128xf32>
    %330 = math.tanh %329 : vector<8x128xf32>
    %331 = vector.extract_strided_slice %316 {offsets = [0, 384], sizes = [8, 128], strides = [1, 1]} : vector<8x512xf32> to vector<8x128xf32>
    %332 = arith.negf %331 : vector<8x128xf32>
    %333 = math.exp %332 : vector<8x128xf32>
    %cst_77 = arith.constant 1.000000e+00 : f32
    %334 = vector.broadcast %cst_77 : f32 to vector<8x128xf32>
    %335 = arith.addf %334, %333 : vector<8x128xf32>
    %336 = arith.divf %334, %335 : vector<8x128xf32>
    %337 = arith.mulf %328, %278 : vector<8x128xf32>
    %338 = arith.mulf %322, %330 : vector<8x128xf32>
    %339 = arith.addf %337, %338 : vector<8x128xf32>
    %340 = math.tanh %339 : vector<8x128xf32>
    %341 = arith.mulf %336, %340 : vector<8x128xf32>
    %342 = vector.extract_strided_slice %31 {offsets = [40, 0], sizes = [8, 512], strides = [1, 1]} : vector<64x512xf32> to vector<8x512xf32>
    %343 = arith.truncf %311 : vector<8x128xf32> to vector<8x128xbf16>
    %cst_78 = arith.constant dense<0.000000e+00> : vector<8x512xf32>
    %344 = tpu.matmul %343, %32, %cst_78 {dimension_numbers = #tpu.dot_dimension_numbers<[1], [0], [0], [1], [0, 0, 1, 1], [], []>} : vector<8x128xbf16>, vector<128x512xbf16>, vector<8x512xf32> -> vector<8x512xf32>
    %345 = arith.addf %342, %344 : vector<8x512xf32>
    %346 = arith.truncf %341 : vector<8x128xf32> to vector<8x128xbf16>
    %cst_79 = arith.constant dense<0.000000e+00> : vector<8x512xf32>
    %347 = tpu.matmul %346, %34, %cst_79 {dimension_numbers = #tpu.dot_dimension_numbers<[1], [0], [0], [1], [0, 0, 1, 1], [], []>} : vector<8x128xbf16>, vector<128x512xbf16>, vector<8x512xf32> -> vector<8x512xf32>
    %348 = vector.extract_strided_slice %345 {offsets = [0, 0], sizes = [8, 128], strides = [1, 1]} : vector<8x512xf32> to vector<8x128xf32>
    %349 = arith.negf %348 : vector<8x128xf32>
    %350 = math.exp %349 : vector<8x128xf32>
    %cst_80 = arith.constant 1.000000e+00 : f32
    %351 = vector.broadcast %cst_80 : f32 to vector<8x128xf32>
    %352 = arith.addf %351, %350 : vector<8x128xf32>
    %353 = arith.divf %351, %352 : vector<8x128xf32>
    %354 = vector.extract_strided_slice %345 {offsets = [0, 128], sizes = [8, 128], strides = [1, 1]} : vector<8x512xf32> to vector<8x128xf32>
    %355 = arith.negf %354 : vector<8x128xf32>
    %356 = math.exp %355 : vector<8x128xf32>
    %cst_81 = arith.constant 1.000000e+00 : f32
    %357 = vector.broadcast %cst_81 : f32 to vector<8x128xf32>
    %358 = arith.addf %357, %356 : vector<8x128xf32>
    %359 = arith.divf %357, %358 : vector<8x128xf32>
    %360 = vector.extract_strided_slice %345 {offsets = [0, 256], sizes = [8, 128], strides = [1, 1]} : vector<8x512xf32> to vector<8x128xf32>
    %361 = math.tanh %360 : vector<8x128xf32>
    %362 = vector.extract_strided_slice %345 {offsets = [0, 384], sizes = [8, 128], strides = [1, 1]} : vector<8x512xf32> to vector<8x128xf32>
    %363 = arith.negf %362 : vector<8x128xf32>
    %364 = math.exp %363 : vector<8x128xf32>
    %cst_82 = arith.constant 1.000000e+00 : f32
    %365 = vector.broadcast %cst_82 : f32 to vector<8x128xf32>
    %366 = arith.addf %365, %364 : vector<8x128xf32>
    %367 = arith.divf %365, %366 : vector<8x128xf32>
    %368 = arith.mulf %359, %309 : vector<8x128xf32>
    %369 = arith.mulf %353, %361 : vector<8x128xf32>
    %370 = arith.addf %368, %369 : vector<8x128xf32>
    %371 = math.tanh %370 : vector<8x128xf32>
    %372 = arith.mulf %367, %371 : vector<8x128xf32>
    %373 = arith.truncf %372 : vector<8x128xf32> to vector<8x128xbf16>
    %cst_83 = arith.constant dense<0.000000e+00> : vector<8x512xf32>
    %374 = tpu.matmul %373, %33, %cst_83 {dimension_numbers = #tpu.dot_dimension_numbers<[1], [0], [0], [1], [0, 0, 1, 1], [], []>} : vector<8x128xbf16>, vector<128x512xbf16>, vector<8x512xf32> -> vector<8x512xf32>
    %375 = arith.addf %374, %347 : vector<8x512xf32>
    %376 = vector.broadcast %35 : vector<1x512xf32> to vector<8x512xf32>
    %377 = arith.addf %375, %376 : vector<8x512xf32>
    %378 = vector.extract_strided_slice %377 {offsets = [0, 0], sizes = [8, 128], strides = [1, 1]} : vector<8x512xf32> to vector<8x128xf32>
    %379 = arith.negf %378 : vector<8x128xf32>
    %380 = math.exp %379 : vector<8x128xf32>
    %cst_84 = arith.constant 1.000000e+00 : f32
    %381 = vector.broadcast %cst_84 : f32 to vector<8x128xf32>
    %382 = arith.addf %381, %380 : vector<8x128xf32>
    %383 = arith.divf %381, %382 : vector<8x128xf32>
    %384 = vector.extract_strided_slice %377 {offsets = [0, 128], sizes = [8, 128], strides = [1, 1]} : vector<8x512xf32> to vector<8x128xf32>
    %385 = arith.negf %384 : vector<8x128xf32>
    %386 = math.exp %385 : vector<8x128xf32>
    %cst_85 = arith.constant 1.000000e+00 : f32
    %387 = vector.broadcast %cst_85 : f32 to vector<8x128xf32>
    %388 = arith.addf %387, %386 : vector<8x128xf32>
    %389 = arith.divf %387, %388 : vector<8x128xf32>
    %390 = vector.extract_strided_slice %377 {offsets = [0, 256], sizes = [8, 128], strides = [1, 1]} : vector<8x512xf32> to vector<8x128xf32>
    %391 = math.tanh %390 : vector<8x128xf32>
    %392 = vector.extract_strided_slice %377 {offsets = [0, 384], sizes = [8, 128], strides = [1, 1]} : vector<8x512xf32> to vector<8x128xf32>
    %393 = arith.negf %392 : vector<8x128xf32>
    %394 = math.exp %393 : vector<8x128xf32>
    %cst_86 = arith.constant 1.000000e+00 : f32
    %395 = vector.broadcast %cst_86 : f32 to vector<8x128xf32>
    %396 = arith.addf %395, %394 : vector<8x128xf32>
    %397 = arith.divf %395, %396 : vector<8x128xf32>
    %398 = arith.mulf %389, %339 : vector<8x128xf32>
    %399 = arith.mulf %383, %391 : vector<8x128xf32>
    %400 = arith.addf %398, %399 : vector<8x128xf32>
    %401 = math.tanh %400 : vector<8x128xf32>
    %402 = arith.mulf %397, %401 : vector<8x128xf32>
    %403 = vector.extract_strided_slice %31 {offsets = [48, 0], sizes = [8, 512], strides = [1, 1]} : vector<64x512xf32> to vector<8x512xf32>
    %404 = arith.truncf %372 : vector<8x128xf32> to vector<8x128xbf16>
    %cst_87 = arith.constant dense<0.000000e+00> : vector<8x512xf32>
    %405 = tpu.matmul %404, %32, %cst_87 {dimension_numbers = #tpu.dot_dimension_numbers<[1], [0], [0], [1], [0, 0, 1, 1], [], []>} : vector<8x128xbf16>, vector<128x512xbf16>, vector<8x512xf32> -> vector<8x512xf32>
    %406 = arith.addf %403, %405 : vector<8x512xf32>
    %407 = arith.truncf %402 : vector<8x128xf32> to vector<8x128xbf16>
    %cst_88 = arith.constant dense<0.000000e+00> : vector<8x512xf32>
    %408 = tpu.matmul %407, %34, %cst_88 {dimension_numbers = #tpu.dot_dimension_numbers<[1], [0], [0], [1], [0, 0, 1, 1], [], []>} : vector<8x128xbf16>, vector<128x512xbf16>, vector<8x512xf32> -> vector<8x512xf32>
    %409 = vector.extract_strided_slice %406 {offsets = [0, 0], sizes = [8, 128], strides = [1, 1]} : vector<8x512xf32> to vector<8x128xf32>
    %410 = arith.negf %409 : vector<8x128xf32>
    %411 = math.exp %410 : vector<8x128xf32>
    %cst_89 = arith.constant 1.000000e+00 : f32
    %412 = vector.broadcast %cst_89 : f32 to vector<8x128xf32>
    %413 = arith.addf %412, %411 : vector<8x128xf32>
    %414 = arith.divf %412, %413 : vector<8x128xf32>
    %415 = vector.extract_strided_slice %406 {offsets = [0, 128], sizes = [8, 128], strides = [1, 1]} : vector<8x512xf32> to vector<8x128xf32>
    %416 = arith.negf %415 : vector<8x128xf32>
    %417 = math.exp %416 : vector<8x128xf32>
    %cst_90 = arith.constant 1.000000e+00 : f32
    %418 = vector.broadcast %cst_90 : f32 to vector<8x128xf32>
    %419 = arith.addf %418, %417 : vector<8x128xf32>
    %420 = arith.divf %418, %419 : vector<8x128xf32>
    %421 = vector.extract_strided_slice %406 {offsets = [0, 256], sizes = [8, 128], strides = [1, 1]} : vector<8x512xf32> to vector<8x128xf32>
    %422 = math.tanh %421 : vector<8x128xf32>
    %423 = vector.extract_strided_slice %406 {offsets = [0, 384], sizes = [8, 128], strides = [1, 1]} : vector<8x512xf32> to vector<8x128xf32>
    %424 = arith.negf %423 : vector<8x128xf32>
    %425 = math.exp %424 : vector<8x128xf32>
    %cst_91 = arith.constant 1.000000e+00 : f32
    %426 = vector.broadcast %cst_91 : f32 to vector<8x128xf32>
    %427 = arith.addf %426, %425 : vector<8x128xf32>
    %428 = arith.divf %426, %427 : vector<8x128xf32>
    %429 = arith.mulf %420, %370 : vector<8x128xf32>
    %430 = arith.mulf %414, %422 : vector<8x128xf32>
    %431 = arith.addf %429, %430 : vector<8x128xf32>
    %432 = math.tanh %431 : vector<8x128xf32>
    %433 = arith.mulf %428, %432 : vector<8x128xf32>
    %434 = arith.truncf %433 : vector<8x128xf32> to vector<8x128xbf16>
    %cst_92 = arith.constant dense<0.000000e+00> : vector<8x512xf32>
    %435 = tpu.matmul %434, %33, %cst_92 {dimension_numbers = #tpu.dot_dimension_numbers<[1], [0], [0], [1], [0, 0, 1, 1], [], []>} : vector<8x128xbf16>, vector<128x512xbf16>, vector<8x512xf32> -> vector<8x512xf32>
    %436 = arith.addf %435, %408 : vector<8x512xf32>
    %437 = vector.broadcast %35 : vector<1x512xf32> to vector<8x512xf32>
    %438 = arith.addf %436, %437 : vector<8x512xf32>
    %439 = vector.extract_strided_slice %438 {offsets = [0, 0], sizes = [8, 128], strides = [1, 1]} : vector<8x512xf32> to vector<8x128xf32>
    %440 = arith.negf %439 : vector<8x128xf32>
    %441 = math.exp %440 : vector<8x128xf32>
    %cst_93 = arith.constant 1.000000e+00 : f32
    %442 = vector.broadcast %cst_93 : f32 to vector<8x128xf32>
    %443 = arith.addf %442, %441 : vector<8x128xf32>
    %444 = arith.divf %442, %443 : vector<8x128xf32>
    %445 = vector.extract_strided_slice %438 {offsets = [0, 128], sizes = [8, 128], strides = [1, 1]} : vector<8x512xf32> to vector<8x128xf32>
    %446 = arith.negf %445 : vector<8x128xf32>
    %447 = math.exp %446 : vector<8x128xf32>
    %cst_94 = arith.constant 1.000000e+00 : f32
    %448 = vector.broadcast %cst_94 : f32 to vector<8x128xf32>
    %449 = arith.addf %448, %447 : vector<8x128xf32>
    %450 = arith.divf %448, %449 : vector<8x128xf32>
    %451 = vector.extract_strided_slice %438 {offsets = [0, 256], sizes = [8, 128], strides = [1, 1]} : vector<8x512xf32> to vector<8x128xf32>
    %452 = math.tanh %451 : vector<8x128xf32>
    %453 = vector.extract_strided_slice %438 {offsets = [0, 384], sizes = [8, 128], strides = [1, 1]} : vector<8x512xf32> to vector<8x128xf32>
    %454 = arith.negf %453 : vector<8x128xf32>
    %455 = math.exp %454 : vector<8x128xf32>
    %cst_95 = arith.constant 1.000000e+00 : f32
    %456 = vector.broadcast %cst_95 : f32 to vector<8x128xf32>
    %457 = arith.addf %456, %455 : vector<8x128xf32>
    %458 = arith.divf %456, %457 : vector<8x128xf32>
    %459 = arith.mulf %450, %400 : vector<8x128xf32>
    %460 = arith.mulf %444, %452 : vector<8x128xf32>
    %461 = arith.addf %459, %460 : vector<8x128xf32>
    %462 = math.tanh %461 : vector<8x128xf32>
    %463 = arith.mulf %458, %462 : vector<8x128xf32>
    %464 = vector.extract_strided_slice %31 {offsets = [56, 0], sizes = [8, 512], strides = [1, 1]} : vector<64x512xf32> to vector<8x512xf32>
    %465 = arith.truncf %433 : vector<8x128xf32> to vector<8x128xbf16>
    %cst_96 = arith.constant dense<0.000000e+00> : vector<8x512xf32>
    %466 = tpu.matmul %465, %32, %cst_96 {dimension_numbers = #tpu.dot_dimension_numbers<[1], [0], [0], [1], [0, 0, 1, 1], [], []>} : vector<8x128xbf16>, vector<128x512xbf16>, vector<8x512xf32> -> vector<8x512xf32>
    %467 = arith.addf %464, %466 : vector<8x512xf32>
    %468 = arith.truncf %463 : vector<8x128xf32> to vector<8x128xbf16>
    %cst_97 = arith.constant dense<0.000000e+00> : vector<8x512xf32>
    %469 = tpu.matmul %468, %34, %cst_97 {dimension_numbers = #tpu.dot_dimension_numbers<[1], [0], [0], [1], [0, 0, 1, 1], [], []>} : vector<8x128xbf16>, vector<128x512xbf16>, vector<8x512xf32> -> vector<8x512xf32>
    %470 = vector.extract_strided_slice %467 {offsets = [0, 0], sizes = [8, 128], strides = [1, 1]} : vector<8x512xf32> to vector<8x128xf32>
    %471 = arith.negf %470 : vector<8x128xf32>
    %472 = math.exp %471 : vector<8x128xf32>
    %cst_98 = arith.constant 1.000000e+00 : f32
    %473 = vector.broadcast %cst_98 : f32 to vector<8x128xf32>
    %474 = arith.addf %473, %472 : vector<8x128xf32>
    %475 = arith.divf %473, %474 : vector<8x128xf32>
    %476 = vector.extract_strided_slice %467 {offsets = [0, 128], sizes = [8, 128], strides = [1, 1]} : vector<8x512xf32> to vector<8x128xf32>
    %477 = arith.negf %476 : vector<8x128xf32>
    %478 = math.exp %477 : vector<8x128xf32>
    %cst_99 = arith.constant 1.000000e+00 : f32
    %479 = vector.broadcast %cst_99 : f32 to vector<8x128xf32>
    %480 = arith.addf %479, %478 : vector<8x128xf32>
    %481 = arith.divf %479, %480 : vector<8x128xf32>
    %482 = vector.extract_strided_slice %467 {offsets = [0, 256], sizes = [8, 128], strides = [1, 1]} : vector<8x512xf32> to vector<8x128xf32>
    %483 = math.tanh %482 : vector<8x128xf32>
    %484 = vector.extract_strided_slice %467 {offsets = [0, 384], sizes = [8, 128], strides = [1, 1]} : vector<8x512xf32> to vector<8x128xf32>
    %485 = arith.negf %484 : vector<8x128xf32>
    %486 = math.exp %485 : vector<8x128xf32>
    %cst_100 = arith.constant 1.000000e+00 : f32
    %487 = vector.broadcast %cst_100 : f32 to vector<8x128xf32>
    %488 = arith.addf %487, %486 : vector<8x128xf32>
    %489 = arith.divf %487, %488 : vector<8x128xf32>
    %490 = arith.mulf %481, %431 : vector<8x128xf32>
    %491 = arith.mulf %475, %483 : vector<8x128xf32>
    %492 = arith.addf %490, %491 : vector<8x128xf32>
    %493 = math.tanh %492 : vector<8x128xf32>
    %494 = arith.mulf %489, %493 : vector<8x128xf32>
    %495 = arith.truncf %494 : vector<8x128xf32> to vector<8x128xbf16>
    %cst_101 = arith.constant dense<0.000000e+00> : vector<8x512xf32>
    %496 = tpu.matmul %495, %33, %cst_101 {dimension_numbers = #tpu.dot_dimension_numbers<[1], [0], [0], [1], [0, 0, 1, 1], [], []>} : vector<8x128xbf16>, vector<128x512xbf16>, vector<8x512xf32> -> vector<8x512xf32>
    %497 = arith.addf %496, %469 : vector<8x512xf32>
    %498 = vector.broadcast %35 : vector<1x512xf32> to vector<8x512xf32>
    %499 = arith.addf %497, %498 : vector<8x512xf32>
    %500 = vector.extract_strided_slice %499 {offsets = [0, 0], sizes = [8, 128], strides = [1, 1]} : vector<8x512xf32> to vector<8x128xf32>
    %501 = arith.negf %500 : vector<8x128xf32>
    %502 = math.exp %501 : vector<8x128xf32>
    %cst_102 = arith.constant 1.000000e+00 : f32
    %503 = vector.broadcast %cst_102 : f32 to vector<8x128xf32>
    %504 = arith.addf %503, %502 : vector<8x128xf32>
    %505 = arith.divf %503, %504 : vector<8x128xf32>
    %506 = vector.extract_strided_slice %499 {offsets = [0, 128], sizes = [8, 128], strides = [1, 1]} : vector<8x512xf32> to vector<8x128xf32>
    %507 = arith.negf %506 : vector<8x128xf32>
    %508 = math.exp %507 : vector<8x128xf32>
    %cst_103 = arith.constant 1.000000e+00 : f32
    %509 = vector.broadcast %cst_103 : f32 to vector<8x128xf32>
    %510 = arith.addf %509, %508 : vector<8x128xf32>
    %511 = arith.divf %509, %510 : vector<8x128xf32>
    %512 = vector.extract_strided_slice %499 {offsets = [0, 256], sizes = [8, 128], strides = [1, 1]} : vector<8x512xf32> to vector<8x128xf32>
    %513 = math.tanh %512 : vector<8x128xf32>
    %514 = vector.extract_strided_slice %499 {offsets = [0, 384], sizes = [8, 128], strides = [1, 1]} : vector<8x512xf32> to vector<8x128xf32>
    %515 = arith.negf %514 : vector<8x128xf32>
    %516 = math.exp %515 : vector<8x128xf32>
    %cst_104 = arith.constant 1.000000e+00 : f32
    %517 = vector.broadcast %cst_104 : f32 to vector<8x128xf32>
    %518 = arith.addf %517, %516 : vector<8x128xf32>
    %519 = arith.divf %517, %518 : vector<8x128xf32>
    %520 = arith.mulf %511, %461 : vector<8x128xf32>
    %521 = arith.mulf %505, %513 : vector<8x128xf32>
    %522 = arith.addf %520, %521 : vector<8x128xf32>
    %523 = math.tanh %522 : vector<8x128xf32>
    %524 = arith.mulf %519, %523 : vector<8x128xf32>
    %525 = arith.truncf %524 : vector<8x128xf32> to vector<8x128xbf16>
    %c0_105 = arith.constant 0 : index
    %c0_106 = arith.constant 0 : index
    %526 = vector.load %arg14[%c0_105, %c0_106] : memref<128x128xbf16, #tpu.memory_space<vmem>>, vector<128x128xbf16>
    %cst_107 = arith.constant dense<0.000000e+00> : vector<8x128xf32>
    %527 = tpu.matmul %525, %526, %cst_107 {dimension_numbers = #tpu.dot_dimension_numbers<[1], [0], [0], [1], [0, 0, 1, 1], [], []>} : vector<8x128xbf16>, vector<128x128xbf16>, vector<8x128xf32> -> vector<8x128xf32>
    %c0_108 = arith.constant 0 : index
    %c0_109 = arith.constant 0 : index
    %528 = vector.load %arg15[%c0_108, %c0_109] : memref<1x128xf32, #tpu.memory_space<vmem>>, vector<1x128xf32>
    %529 = vector.broadcast %528 : vector<1x128xf32> to vector<8x128xf32>
    %530 = arith.addf %527, %529 : vector<8x128xf32>
    %cst_110 = arith.constant dense<0xFF800000> : vector<8xf32>
    %531 = vector.multi_reduction <maximumf>, %530, %cst_110 [1] : vector<8x128xf32> to vector<8xf32>
    %532 = vector.shape_cast %531 : vector<8xf32> to vector<8x1xf32>
    %533 = vector.broadcast %532 : vector<8x1xf32> to vector<8x128xf32>
    %534 = arith.subf %530, %533 : vector<8x128xf32>
    %535 = math.exp %534 : vector<8x128xf32>
    %cst_111 = arith.constant dense<0.000000e+00> : vector<8xf32>
    %536 = vector.multi_reduction <add>, %535, %cst_111 [1] : vector<8x128xf32> to vector<8xf32>
    %537 = vector.shape_cast %536 : vector<8xf32> to vector<8x1xf32>
    %538 = math.log %537 : vector<8x1xf32>
    %539 = vector.broadcast %538 : vector<8x1xf32> to vector<8x128xf32>
    %540 = arith.subf %534, %539 : vector<8x128xf32>
    %c0_112 = arith.constant 0 : index
    %c0_113 = arith.constant 0 : index
    %541 = vector.load %arg16[%c0_112, %c0_113] : memref<8x128xf32, #tpu.memory_space<vmem>>, vector<8x128xf32>
    tpu.vector_store %arg16[%c0_112, %c0_113], %540 {strides = array<i32>} : memref<8x128xf32, #tpu.memory_space<vmem>>, vector<8x128xf32>,
    return
  }
  func.func @transform_0(%arg0: i32) -> (i32, i32, i32) {
    %c0_i32 = arith.constant 0 : i32
    %c0_i32_0 = arith.constant 0 : i32
    %c0_i32_1 = arith.constant 0 : i32
    return %arg0, %c0_i32, %c0_i32_0 : i32, i32, i32
  }
  func.func @transform_1(%arg0: i32) -> (i32, i32) {
    %c0_i32 = arith.constant 0 : i32
    %c0_i32_0 = arith.constant 0 : i32
    %c0_i32_1 = arith.constant 0 : i32
    return %c0_i32, %c0_i32_0 : i32, i32
  }
  func.func @transform_2(%arg0: i32) -> (i32, i32) {
    %c0_i32 = arith.constant 0 : i32
    %c0_i32_0 = arith.constant 0 : i32
    %c0_i32_1 = arith.constant 0 : i32
    return %c0_i32, %c0_i32_0 : i32, i32
  }
  func.func @transform_3(%arg0: i32) -> (i32, i32) {
    %c0_i32 = arith.constant 0 : i32
    %c0_i32_0 = arith.constant 0 : i32
    %c0_i32_1 = arith.constant 0 : i32
    return %c0_i32, %c0_i32_0 : i32, i32
  }
  func.func @transform_4(%arg0: i32) -> (i32, i32) {
    %c0_i32 = arith.constant 0 : i32
    %c0_i32_0 = arith.constant 0 : i32
    %c0_i32_1 = arith.constant 0 : i32
    return %c0_i32, %c0_i32_0 : i32, i32
  }
  func.func @transform_5(%arg0: i32) -> (i32, i32) {
    %c0_i32 = arith.constant 0 : i32
    %c0_i32_0 = arith.constant 0 : i32
    %c0_i32_1 = arith.constant 0 : i32
    return %c0_i32, %c0_i32_0 : i32, i32
  }
  func.func @transform_6(%arg0: i32) -> (i32, i32) {
    %c0_i32 = arith.constant 0 : i32
    %c0_i32_0 = arith.constant 0 : i32
    %c0_i32_1 = arith.constant 0 : i32
    return %c0_i32, %c0_i32_0 : i32, i32
  }
  func.func @transform_7(%arg0: i32) -> (i32, i32) {
    %c0_i32 = arith.constant 0 : i32
    %c0_i32_0 = arith.constant 0 : i32
    %c0_i32_1 = arith.constant 0 : i32
    return %c0_i32, %c0_i32_0 : i32, i32
  }
  func.func @transform_8(%arg0: i32) -> (i32, i32) {
    %c0_i32 = arith.constant 0 : i32
    %c0_i32_0 = arith.constant 0 : i32
    %c0_i32_1 = arith.constant 0 : i32
    return %c0_i32, %c0_i32_0 : i32, i32
  }
  func.func @transform_9(%arg0: i32) -> (i32, i32) {
    %c0_i32 = arith.constant 0 : i32
    %c0_i32_0 = arith.constant 0 : i32
    %c0_i32_1 = arith.constant 0 : i32
    return %c0_i32, %c0_i32_0 : i32, i32
  }
  func.func @transform_10(%arg0: i32) -> (i32, i32) {
    %c0_i32 = arith.constant 0 : i32
    %c0_i32_0 = arith.constant 0 : i32
    %c0_i32_1 = arith.constant 0 : i32
    return %c0_i32, %c0_i32_0 : i32, i32
  }
  func.func @transform_11(%arg0: i32) -> (i32, i32) {
    %c0_i32 = arith.constant 0 : i32
    %c0_i32_0 = arith.constant 0 : i32
    %c0_i32_1 = arith.constant 0 : i32
    return %c0_i32, %c0_i32_0 : i32, i32
  }
  func.func @transform_12(%arg0: i32) -> (i32, i32) {
    %c0_i32 = arith.constant 0 : i32
    %c0_i32_0 = arith.constant 0 : i32
    %c0_i32_1 = arith.constant 0 : i32
    return %c0_i32, %c0_i32_0 : i32, i32
  }
  func.func @transform_13(%arg0: i32) -> (i32, i32) {
    %c0_i32 = arith.constant 0 : i32
    %c0_i32_0 = arith.constant 0 : i32
    %c0_i32_1 = arith.constant 0 : i32
    return %c0_i32, %c0_i32_0 : i32, i32
  }
  func.func @transform_14(%arg0: i32) -> (i32, i32) {
    %c0_i32 = arith.constant 0 : i32
    %c0_i32_0 = arith.constant 0 : i32
    %c0_i32_1 = arith.constant 0 : i32
    return %c0_i32, %c0_i32_0 : i32, i32
  }
  func.func @transform_15(%arg0: i32) -> (i32, i32) {
    %c0_i32 = arith.constant 0 : i32
    %c0_i32_0 = arith.constant 0 : i32
    return %arg0, %c0_i32 : i32, i32
  }
}

</mosaic_0001>

<bundles_post_ra>
// kernel: biocnn_lstm_forward.1
= control target key start
LH: loop header
LB: loop body
LE: loop exit
PB: predicated region body
PF: predicated region fallthrough
CT: control target
= control target key end

     0   :  { %20 = vsyncpa [#allocation3], 0  ;;  %s8483_s0 = inlined_call_operand.vmem [shape: f32[1,64,36], index: 0, kind: input, shape index: {}]   ;;  %s8484_s1 = inlined_call_operand.hbm [shape: bf16[36,512], index: 1, kind: input, shape index: {}]   ;;  %s8485_s2 = inlined_call_operand.vmem [shape: f32[1,512], index: 2, kind: input, shape index: {}]   ;;  %s8486_s3 = inlined_call_operand.vmem [shape: bf16[512,256], index: 3, kind: input, shape index: {}]   ;;  %s8487_s4 = inlined_call_operand.vmem [shape: f32[1,256], index: 4, kind: input, shape index: {}]   ;;  %s8488_s5 = inlined_call_operand.vmem [shape: bf16[256,128], index: 5, kind: input, shape index: {}]   ;;  %s8489_s6 = inlined_call_operand.vmem [shape: f32[1,128], index: 6, kind: input, shape index: {}]   ;;  %s8490_s7 = inlined_call_operand.hbm [shape: bf16[128,512], index: 7, kind: input, shape index: {}]   ;;  %s8491_s8 = inlined_call_operand.hbm [shape: bf16[128,512], index: 8, kind: input, shape index: {}]   ;;  %s8492_s9 = inlined_call_operand.vmem [shape: f32[1,512], index: 9, kind: input, shape index: {}]   ;;  %s8493_s10 = inlined_call_operand.hbm [shape: bf16[128,512], index: 10, kind: input, shape index: {}]   ;;  %s8494_s11 = inlined_call_operand.hbm [shape: bf16[128,512], index: 11, kind: input, shape index: {}]   ;;  %s8495_s12 = inlined_call_operand.vmem [shape: f32[1,512], index: 12, kind: input, shape index: {}]   ;;  %s8496_s13 = inlined_call_operand.hbm [shape: bf16[128,128], index: 13, kind: input, shape index: {}]   ;;  %s8497_s14 = inlined_call_operand.vmem [shape: f32[1,128], index: 14, kind: input, shape index: {}]   ;;  %s8498_s15 = inlined_call_operand.vmem [shape: f32[8,128], index: 15, kind: output, shape index: {}]  }
   0x1   :  { %21 = vsyncpa [#allocation5], 0 }
   0x2   :  { %22 = vsyncpa [#allocation8], 0 }
   0x3   :  { %23 = vsyncpa [#allocation11], 0  ;;  %s53_s20 = sshll.u32 %s8490_s7, 4  ;;  %s6217_s21 = smov [#allocation4]   ;;  %s54_s20 = int_to_ptr.hbm [resolvable:$true] %s53_s20 }
   0x4   :  { %s55_s22 = sshll.u32 %s6217_s21, 4  ;;  %s81_s25 = sshll.u32 %s8493_s10, 4  ;;  %s56_s22 = int_to_ptr.vmem [resolvable:$true] %s55_s22  ;;  %s82_s25 = int_to_ptr.hbm [resolvable:$true] %s81_s25 }
   0x5   :  { %s6218_s26 = smov 256   ;;  %s6219_s27 = smov 16  }
   0x6   :  { %61 = dma.hbm_to_vmem [thread:$0]  %s54_s20, 4096, %s56_s22, [#allocation5], %s6218_s26, %s6218_s26, %s6219_s27  }
   0x7   :  { %s6220_s28 = smov [#allocation7]   ;;  %s30_s7 = sshll.u32 %s8484_s1, 4  ;;  %s31_s7 = int_to_ptr.hbm [resolvable:$true] %s30_s7 }
   0x8   :  { %s83_s29 = sshll.u32 %s6220_s28, 4  ;;  %s66_s18 = sshll.u32 %s8491_s8, 4  ;;  %s84_s29 = int_to_ptr.vmem [resolvable:$true] %s83_s29  ;;  %s67_s18 = int_to_ptr.hbm [resolvable:$true] %s66_s18 }
   0x9   :  { %89 = dma.hbm_to_vmem [thread:$0]  %s82_s25, 4096, %s84_s29, [#allocation8], %s6218_s26, %s6218_s26, %s6219_s27  }
   0xa   :  { %s6221_s19 = smov [#allocation2]   ;;  %s6222_s20 = smov [#allocation6]  }
   0xb   :  { %s32_s21 = sshll.u32 %s6221_s19, 4  ;;  %s68_s1 = sshll.u32 %s6222_s20, 4  ;;  %s33_s21 = int_to_ptr.vmem [resolvable:$true] %s32_s21  ;;  %s69_s1 = int_to_ptr.vmem [resolvable:$true] %s68_s1 }
   0xc   :  { %38 = dma.hbm_to_vmem [thread:$0]  %s31_s7, 1280, %s33_s21, [#allocation3], %s6218_s26, %s6218_s26, %s6219_s27  }
   0xd   :  { %s94_s24 = sshll.u32 %s8494_s11, 4  ;;  %s109_s28 = sshll.u32 %s8496_s13, 4  ;;  %s95_s24 = int_to_ptr.hbm [resolvable:$true] %s94_s24  ;;  %s110_s28 = int_to_ptr.hbm [resolvable:$true] %s109_s28 }
   0xe   :  { %74 = dma.hbm_to_vmem [thread:$0]  %s67_s18, 4096, %s69_s1, [#allocation5], %s6218_s26, %s6218_s26, %s6219_s27  }
   0xf   :  { %s6223_s29 = smov [#allocation9]   ;;  %s6224_s16 = smov [#allocation10]  }
  0x10   :  { %s96_s30 = sshll.u32 %s6223_s29, 4  ;;  %s111_s11 = sshll.u32 %s6224_s16, 4  ;;  %s97_s30 = int_to_ptr.vmem [resolvable:$true] %s96_s30  ;;  %s112_s11 = int_to_ptr.vmem [resolvable:$true] %s111_s11 }
  0x11   :  { %102 = dma.hbm_to_vmem [thread:$0]  %s95_s24, 4096, %s97_s30, [#allocation8], %s6218_s26, %s6218_s26, %s6219_s27  }
  0x12   :  { %s6225_s7 = smov 64   ;;  %s6226_s10 = smov 4  }
  0x13   :  { %117 = dma.hbm_to_vmem [thread:$0]  %s110_s28, 1024, %s112_s11, [#allocation11], %s6225_s7, %s6225_s7, %s6226_s10  }
  0x14   :  { %6209 = dma.done.wait [#allocation3], 1280  }
  0x15   :  { %6210 = vsyncadd [#allocation3], 4294966016 }
  0x16   :  { %6211 = dma.done.wait [#allocation5], 8192  }
  0x17   :  { %6212 = vsyncadd [#allocation5], 4294959104 }
  0x18   :  { %6213 = dma.done.wait [#allocation8], 8192  }
  0x19   :  { %6214 = vsyncadd [#allocation8], 4294959104 }
  0x1a   :  { %6215 = dma.done.wait [#allocation11], 1024  }
  0x1b   :  { %6216 = vsyncadd [#allocation11], 4294966272  ;;  %v165_v0 = vld [vmem:[#allocation2 + $0x40] sm:$0x33]  ;;  %v166_v1 = vld [vmem:[#allocation2 + $0x48] sm:$0x33] }
  0x1c   :  { %v203_v2 = vunpack.c.l.b16 %v165_v0  ;;  %v205_v3 = vunpack.c.l.b16 %v166_v1  ;;  %v206_v4 = vunpack.c.h.b16 %v166_v1  ;;  %vm240_vm0 = vcmask 1041408   ;;  %v4623_v8 = vld [vmem:[#allocation2 + $0x20] sm:$0xf]  ;;  %v5571_v9 = vld [vmem:[#allocation2 + $0x2c] sm:$0xf0]  ;;  %v146_v30 = vld [vmem:[%s8483_s0 + $0x8] sm:$0xff] }
  0x1d   :  { %v4631_v10 = vld [vmem:[#allocation2 + $0x28] sm:$0xf]  ;;  %v5572_v11 = vld [vmem:[#allocation2 + $0x34] sm:$0xf0]  ;;  %v5570_v12 = vld [vmem:[#allocation2 + $0x2c] sm:$0xf]  ;;  %v204_v17 = vunpack.c.h.b16 %v165_v0  ;;  %v4624_v18 = vor.u32 %v5571_v9, %v4623_v8 }
  0x1e   :  { %v215_v5 = vpack.c.b16 %v203_v2, %v203_v2  ;;  %v217_v6 = vpack.c.b16 %v205_v3, %v205_v3  ;;  %v218_v7 = vpack.c.b16 %v206_v4, %v206_v4  ;;  %v4633_v13 = vld [vmem:[#allocation2 + $0x38] sm:$0xf0]  ;;  %v4607_v19 = vld [vmem:[#allocation2] sm:$0xf]  ;;  %v4632_v20 = vor.u32 %v5572_v11, %v4631_v10  ;;  %v5567_v22 = vld [vmem:[#allocation2 + $0xc] sm:$0xf0] }
  0x1f   :  { %v4636_v21 = vor.u32 %v5570_v12, %v4633_v13  ;;  %v4615_v23 = vld [vmem:[#allocation2 + $0x8] sm:$0xf]  ;;  %v5568_v24 = vld [vmem:[#allocation2 + $0x14] sm:$0xf0]  ;;  %v5566_v25 = vld [vmem:[#allocation2 + $0xc] sm:$0xf]  ;;  %v216_v28 = vpack.c.b16 %v204_v17, %v204_v17  ;;  %v4608_v29 = vor.u32 %v5567_v22, %v4607_v19 }
  0x20   :  { %v242_v14 = vsel %vm240_vm0, %v215_v5, 0  ;;  %v248_v15 = vsel %vm240_vm0, %v217_v6, 0  ;;  %v251_v16 = vsel %vm240_vm0, %v218_v7, 0  ;;  %v4617_v26 = vld [vmem:[#allocation2 + $0x18] sm:$0xf0]  ;;  %v145_v27 = vld [vmem:[%s8483_s0] sm:$0xff]  ;;  %v4616_v33 = vor.u32 %v5568_v24, %v4615_v23 }
  0x21   :  { %258 = vmatpush.bf16.msra.mxu0 %v242_v14  ;;  %5789 = vmatpush.bf16.msra.mxu1 %v242_v14  ;;  %v151_v31 = vld [vmem:[%s8483_s0 + $0x30] sm:$0xff]  ;;  %v152_v32 = vld [vmem:[%s8483_s0 + $0x38] sm:$0xff]  ;;  %v4620_v34 = vor.u32 %v5566_v25, %v4617_v26  ;;  %v153_v35 = vpack.c.bf16 %v146_v30, %v145_v27  ;;  %v245_v37 = vsel %vm240_vm0, %v216_v28, 0  ;;  %v5569_v38 = vld [vmem:[#allocation2 + $0x24] sm:$0xf]  ;;  %vm227_vm1 = vcmask 293888  }
  0x22   :  { %316 = vmatpush.bf16.msra.mxu2 %v248_v15  ;;  %345 = vmatpush.bf16.msra.mxu3 %v251_v16  ;;  %v6356_v36 = vpack.c.bf16 %v152_v32, %v151_v31  ;;  %v4625_v39 = vld [vmem:[#allocation2 + $0x30] sm:$0xf0]  ;;  %v5565_v41 = vld [vmem:[#allocation2 + $0x4] sm:$0xf]  ;;  %v148_v45 = vld [vmem:[%s8483_s0 + $0x18] sm:$0xff] }
  0x23   :  { %v4628_v40 = vor.u32 %v5569_v38, %v4625_v39  ;;  %v4609_v42 = vld [vmem:[#allocation2 + $0x10] sm:$0xf0]  ;;  %v149_v47 = vld [vmem:[%s8483_s0 + $0x20] sm:$0xff]  ;;  %v150_v48 = vld [vmem:[%s8483_s0 + $0x28] sm:$0xff] }
  0x24   :  { %v4612_v43 = vor.u32 %v5565_v41, %v4609_v42  ;;  %v147_v44 = vld [vmem:[%s8483_s0 + $0x10] sm:$0xff]  ;;  %v6380_v49 = vpack.c.bf16 %v150_v48, %v149_v47  ;;  %v5620_v51 = vld [vmem:[%s8486_s3 + $0x174] sm:$0xf0]  ;;  %v4831_v59 = vld [vmem:[%s8486_s3 + $0x160] sm:$0xf] }
  0x25   :  { %259 = vmatpush.bf16.msra.mxu0 %v4624_v18  ;;  %5790 = vmatpush.bf16.msra.mxu1 %v4624_v18  ;;  %v154_v46 = vpack.c.bf16 %v148_v45, %v147_v44  ;;  %v4839_v50 = vld [vmem:[%s8486_s3 + $0x170] sm:$0xf]  ;;  %v5636_v54 = vld [vmem:[%s8486_s3 + $0x1f4] sm:$0xf0]  ;;  %v5618_v60 = vld [vmem:[%s8486_s3 + $0x164] sm:$0xf0] }
  0x26   :  { %317 = vmatpush.bf16.msra.mxu2 %v4632_v20  ;;  %346 = vmatpush.bf16.msra.mxu3 %v4636_v21  ;;  %v4903_v52 = vld [vmem:[%s8486_s3 + $0x1f0] sm:$0xf]  ;;  %v4840_v53 = vor.u32 %v5620_v51, %v4839_v50  ;;  %v5604_v56 = vld [vmem:[%s8486_s3 + $0xf4] sm:$0xf0]  ;;  %v4895_v61 = vld [vmem:[%s8486_s3 + $0x1e0] sm:$0xf]  ;;  %v4832_v62 = vor.u32 %v5618_v60, %v4831_v59 }
  0x27   :  { %v4775_v55 = vld [vmem:[%s8486_s3 + $0xf0] sm:$0xf]  ;;  %v4904_v57 = vor.u32 %v5636_v54, %v4903_v52  ;;  %v5634_v63 = vld [vmem:[%s8486_s3 + $0x1e4] sm:$0xf0]  ;;  %v4767_v0 = vld [vmem:[%s8486_s3 + $0xe0] sm:$0xf] }
  0x28   :  { %v4776_v58 = vor.u32 %v5604_v56, %v4775_v55  ;;  %v5602_v1 = vld [vmem:[%s8486_s3 + $0xe4] sm:$0xf0]  ;;  %v4896_v2 = vor.u32 %v5634_v63, %v4895_v61  ;;  %v4823_v4 = vld [vmem:[%s8486_s3 + $0x150] sm:$0xf]  ;;  %v5616_v5 = vld [vmem:[%s8486_s3 + $0x154] sm:$0xf0] }
  0x29   :  { %260 = vmatpush.bf16.msra.mxu0 %v4608_v29  ;;  %5791 = vmatpush.bf16.msra.mxu1 %v4608_v29  ;;  %v4768_v3 = vor.u32 %v5602_v1, %v4767_v0  ;;  %v4711_v6 = vld [vmem:[%s8486_s3 + $0x70] sm:$0xf]  ;;  %v5588_v7 = vld [vmem:[%s8486_s3 + $0x74] sm:$0xf0]  ;;  %v4703_v13 = vld [vmem:[%s8486_s3 + $0x60] sm:$0xf]  ;;  %v4824_v14 = vor.u32 %v5616_v5, %v4823_v4 }
  0x2a   :  { %318 = vmatpush.bf16.msra.mxu2 %v4616_v33  ;;  %347 = vmatpush.bf16.msra.mxu3 %v4620_v34  ;;  %v4887_v8 = vld [vmem:[%s8486_s3 + $0x1d0] sm:$0xf]  ;;  %v5632_v9 = vld [vmem:[%s8486_s3 + $0x1d4] sm:$0xf0]  ;;  %v4712_v10 = vor.u32 %v5588_v7, %v4711_v6  ;;  %v5586_v15 = vld [vmem:[%s8486_s3 + $0x64] sm:$0xf0] }
  0x2b   :  { %v4759_v11 = vld [vmem:[%s8486_s3 + $0xd0] sm:$0xf]  ;;  %v5600_v12 = vld [vmem:[%s8486_s3 + $0xd4] sm:$0xf0]  ;;  %v4888_v16 = vor.u32 %v5632_v9, %v4887_v8  ;;  %v4815_v18 = vld [vmem:[%s8486_s3 + $0x140] sm:$0xf]  ;;  %v4704_v20 = vor.u32 %v5586_v15, %v4703_v13 }
  0x2c   :  { %4637 = vmatmul.msk.bf16.vlgmr.msra.gmra.mxu0 %vm227_vm1, %v153_v35  ;;  %4640 = vmatmul.msk.bf16.vlgmr.msra.gmra.mxu1 %vm227_vm1, %v6356_v36  ;;  %v4760_v17 = vor.u32 %v5600_v12, %v4759_v11  ;;  %v5614_v19 = vld [vmem:[%s8486_s3 + $0x144] sm:$0xf0]  ;;  %v4879_v21 = vld [vmem:[%s8486_s3 + $0x1c0] sm:$0xf]  ;;  %v4695_v26 = vld [vmem:[%s8486_s3 + $0x50] sm:$0xf] }
  0x2d   :  { %287 = vmatpush.bf16.msrb.mxu1 %v245_v37  ;;  %4645 = vmatmul.msk.bf16.vlgmr.msra.gmra.mxu2 %vm227_vm1, %v153_v35  ;;  %v5630_v22 = vld [vmem:[%s8486_s3 + $0x1c4] sm:$0xf0]  ;;  %v4751_v23 = vld [vmem:[%s8486_s3 + $0xc0] sm:$0xf]  ;;  %v4816_v24 = vor.u32 %v5614_v19, %v4815_v18  ;;  %v5584_v27 = vld [vmem:[%s8486_s3 + $0x54] sm:$0xf0] }
  0x2e   :  { %4649 = vmatmul.msk.bf16.vlgmr.msra.gmra.mxu3 %vm227_vm1, %v153_v35  ;;  %865 = vmatpush.bf16.msrb.mxu2 %v4840_v53  ;;  %v5598_v25 = vld [vmem:[%s8486_s3 + $0xc4] sm:$0xf0]  ;;  %v4880_v28 = vor.u32 %v5630_v22, %v4879_v21  ;;  %v4807_v29 = vld [vmem:[%s8486_s3 + $0x130] sm:$0xf]  ;;  %v5612_v30 = vld [vmem:[%s8486_s3 + $0x134] sm:$0xf0]  ;;  %v4696_v34 = vor.u32 %v5584_v27, %v4695_v26 }
  0x2f   :  { %894 = vmatpush.bf16.msrb.mxu3 %v4904_v57  ;;  %807 = vmatpush.bf16.msrb.mxu0 %v4712_v10  ;;  %v4871_v31 = vld [vmem:[%s8486_s3 + $0x1b0] sm:$0xf]  ;;  %v5628_v32 = vld [vmem:[%s8486_s3 + $0x1b4] sm:$0xf0]  ;;  %v4752_v33 = vor.u32 %v5598_v25, %v4751_v23  ;;  %v4808_v37 = vor.u32 %v5612_v30, %v4807_v29  ;;  %v5582_v38 = vld [vmem:[%s8486_s3 + $0x44] sm:$0xf0] }
  0x30   :  { %v4743_v39 = vld [vmem:[%s8486_s3 + $0xb0] sm:$0xf]  ;;  %v4872_v41 = vor.u32 %v5628_v32, %v4871_v31  ;;  %v5580_v45 = vld [vmem:[%s8486_s3 + $0x34] sm:$0xf0]  ;;  %v4671_v47 = vld [vmem:[%s8486_s3 + $0x20] sm:$0xf] }
  0x31   :  { %288 = vmatpush.bf16.msrb.mxu1 %v4628_v40  ;;  %v5596_v40 = vld [vmem:[%s8486_s3 + $0xb4] sm:$0xf0]  ;;  %v4679_v44 = vld [vmem:[%s8486_s3 + $0x30] sm:$0xf]  ;;  %v5578_v48 = vld [vmem:[%s8486_s3 + $0x24] sm:$0xf0] }
  0x32   :  { %866 = vmatpush.bf16.msrb.mxu2 %v4832_v62  ;;  %v4672_v50 = vor.u32 %v5578_v48, %v4671_v47  ;;  %v4863_v51 = vld [vmem:[%s8486_s3 + $0x1a0] sm:$0xf]  ;;  %v5626_v53 = vld [vmem:[%s8486_s3 + $0x1a4] sm:$0xf0]  ;;  %v4663_v55 = vld [vmem:[%s8486_s3 + $0x10] sm:$0xf] }
  0x33   :  { %895 = vmatpush.bf16.msrb.mxu3 %v4896_v2  ;;  %808 = vmatpush.bf16.msrb.mxu0 %v4704_v20  ;;  %v4864_v54 = vor.u32 %v5626_v53, %v4863_v51  ;;  %v5576_v56 = vld [vmem:[%s8486_s3 + $0x14] sm:$0xf0]  ;;  %v5594_v59 = vld [vmem:[%s8486_s3 + $0xa4] sm:$0xf0]  ;;  %v4791_v61 = vld [vmem:[%s8486_s3 + $0x110] sm:$0xf] }
  0x34   :  { %v4664_v57 = vor.u32 %v5576_v56, %v4663_v55  ;;  %v5608_v62 = vld [vmem:[%s8486_s3 + $0x114] sm:$0xf0]  ;;  %v4655_v63 = vld [vmem:[%s8486_s3] sm:$0xf]  ;;  %v5574_v1 = vld [vmem:[%s8486_s3 + $0x4] sm:$0xf0] }
  0x35   :  { %289 = vmatpush.bf16.msrb.mxu1 %v4612_v43  ;;  %v4744_v43 = vor.u32 %v5596_v40, %v4743_v39  ;;  %v4792_v0 = vor.u32 %v5608_v62, %v4791_v61  ;;  %v4855_v2 = vld [vmem:[%s8486_s3 + $0x190] sm:$0xf]  ;;  %v4656_v4 = vor.u32 %v5574_v1, %v4655_v63  ;;  %v4783_v6 = vld [vmem:[%s8486_s3 + $0x100] sm:$0xf]  ;;  %v5606_v7 = vld [vmem:[%s8486_s3 + $0x104] sm:$0xf0] }
  0x36   :  { %867 = vmatpush.bf16.msrb.mxu2 %v4824_v14  ;;  %v4784_v8 = vor.u32 %v5606_v7, %v4783_v6  ;;  %v4847_v9 = vld [vmem:[%s8486_s3 + $0x180] sm:$0xf]  ;;  %v5622_v10 = vld [vmem:[%s8486_s3 + $0x184] sm:$0xf0]  ;;  %v4727_v11 = vld [vmem:[%s8486_s3 + $0x90] sm:$0xf] }
  0x37   :  { %896 = vmatpush.bf16.msrb.mxu3 %v4888_v16  ;;  %809 = vmatpush.bf16.msrb.mxu0 %v4696_v34  ;;  %v5592_v12 = vld [vmem:[%s8486_s3 + $0x94] sm:$0xf0]  ;;  %v4848_v13 = vor.u32 %v5622_v10, %v4847_v9  ;;  %v4719_v15 = vld [vmem:[%s8486_s3 + $0x80] sm:$0xf]  ;;  %v5590_v16 = vld [vmem:[%s8486_s3 + $0x84] sm:$0xf0] }
  0x38   :  { %v4728_v14 = vor.u32 %v5592_v12, %v4727_v11  ;;  %v5619_v18 = vld [vmem:[%s8486_s3 + $0x174] sm:$0xf]  ;;  %v4841_v19 = vld [vmem:[%s8486_s3 + $0x178] sm:$0xf0]  ;;  %v167_v27 = vld [vmem:[%s8485_s2] sm:$0xf] }
  0x39   :  { %836 = vmatpush.bf16.msra.mxu1 %v4776_v58  ;;  %v4735_v58 = vld [vmem:[%s8486_s3 + $0xa0] sm:$0xf]  ;;  %v5587_v20 = vld [vmem:[%s8486_s3 + $0x74] sm:$0xf]  ;;  %v4844_v21 = vor.u32 %v5619_v18, %v4841_v19  ;;  %v4713_v22 = vld [vmem:[%s8486_s3 + $0x78] sm:$0xf0] }
  0x3a   :  { %868 = vmatpush.bf16.msrb.mxu2 %v4816_v24  ;;  %v4736_v60 = vor.u32 %v5594_v59, %v4735_v58  ;;  %v5635_v23 = vld [vmem:[%s8486_s3 + $0x1f4] sm:$0xf]  ;;  %v4905_v24 = vld [vmem:[%s8486_s3 + $0x1f8] sm:$0xf0]  ;;  %v4716_v25 = vor.u32 %v5587_v20, %v4713_v22  ;;  %v6618_v32 = vperm.slane %v167_v27, 0  ;;  %v6677_v12 = vperm.slane %v167_v27, 1 }
  0x3b   :  { %897 = vmatpush.bf16.msrb.mxu3 %v4880_v28  ;;  %v4908_v26 = vor.u32 %v5635_v23, %v4905_v24  ;;  %v5603_v30 = vld [vmem:[%s8486_s3 + $0xf4] sm:$0xf]  ;;  %v4777_v31 = vld [vmem:[%s8486_s3 + $0xf8] sm:$0xf0]  ;;  %v5617_v34 = vld [vmem:[%s8486_s3 + $0x164] sm:$0xf] }
  0x3c   :  { %4638 = vmatmul.msk.bf16.gmra.mxu0 %vm227_vm1, %v154_v46  ;;  %4641 = vmatmul.msk.bf16.vlgmr.msrb.gmra.mxu1 %vm227_vm1, %v153_v35  ;;  %v4687_v35 = vld [vmem:[%s8486_s3 + $0x40] sm:$0xf]  ;;  %v5585_v39 = vld [vmem:[%s8486_s3 + $0x64] sm:$0xf]  ;;  %v4705_v40 = vld [vmem:[%s8486_s3 + $0x68] sm:$0xf0] }
  0x3d   :  { %4646 = vmatmul.msk.bf16.gmra.mxu2 %vm227_vm1, %v154_v46  ;;  %837 = vmatpush.bf16.msra.mxu1 %v4768_v3  ;;  %v4688_v42 = vor.u32 %v5582_v38, %v4687_v35  ;;  %v5624_v3 = vld [vmem:[%s8486_s3 + $0x194] sm:$0xf0]  ;;  %v4833_v35 = vld [vmem:[%s8486_s3 + $0x168] sm:$0xf0]  ;;  %v5615_v56 = vld [vmem:[%s8486_s3 + $0x154] sm:$0xf] }
  0x3e   :  { %4650 = vmatmul.msk.bf16.gmra.mxu3 %vm227_vm1, %v154_v46  ;;  %869 = vmatpush.bf16.msrb.mxu2 %v4808_v37  ;;  %v4856_v5 = vor.u32 %v5624_v3, %v4855_v2  ;;  %v4836_v37 = vor.u32 %v5617_v34, %v4833_v35  ;;  %v4769_v53 = vld [vmem:[%s8486_s3 + $0xe8] sm:$0xf0]  ;;  %v4697_v61 = vld [vmem:[%s8486_s3 + $0x58] sm:$0xf0]  ;;  %v5631_v62 = vld [vmem:[%s8486_s3 + $0x1d4] sm:$0xf] }
  0x3f   :  { %898 = vmatpush.bf16.msrb.mxu3 %v4872_v41  ;;  %810 = vmatpush.bf16.msrb.mxu0 %v4688_v42  ;;  %v5633_v41 = vld [vmem:[%s8486_s3 + $0x1e4] sm:$0xf]  ;;  %v4889_v2 = vld [vmem:[%s8486_s3 + $0x1d8] sm:$0xf0]  ;;  %v4817_v19 = vld [vmem:[%s8486_s3 + $0x148] sm:$0xf0] }
  0x40   :  { %v4892_v3 = vor.u32 %v5631_v62, %v4889_v2  ;;  %v5613_v18 = vld [vmem:[%s8486_s3 + $0x144] sm:$0xf] }
  0x41   :  { %838 = vmatpush.bf16.msra.mxu1 %v4760_v17  ;;  %v4720_v17 = vor.u32 %v5590_v16, %v4719_v15  ;;  %v5599_v15 = vld [vmem:[%s8486_s3 + $0xd4] sm:$0xf]  ;;  %v4761_v16 = vld [vmem:[%s8486_s3 + $0xd8] sm:$0xf0]  ;;  %v4820_v22 = vor.u32 %v5613_v18, %v4817_v19  ;;  %v5577_v18 = vld [vmem:[%s8486_s3 + $0x24] sm:$0xf] }
  0x42   :  { %v4673_v19 = vld [vmem:[%s8486_s3 + $0x28] sm:$0xf0] }
  0x43   :  { %899 = vmatpush.bf16.msrb.mxu3 %v4864_v54 }
  0x45   :  { %839 = vmatpush.bf16.msra.mxu1 %v4752_v33  ;;  %v4780_v33 = vor.u32 %v5603_v30, %v4777_v31 }
  0x47   :  { %900 = vmatpush.bf16.msrb.mxu3 %v4856_v5 }
  0x49   :  { %840 = vmatpush.bf16.msra.mxu1 %v4744_v43 }
  0x4b   :  { %901 = vmatpush.bf16.msrb.mxu3 %v4848_v13 }
  0x4c   :  { %4639 = vmatmul.msk.bf16.gmra.mxu0 %vm227_vm1, %v6380_v49  ;;  %4642 = vmatmul.msk.bf16.gmra.mxu1 %vm227_vm1, %v154_v46  ;;  %v4680_v46 = vor.u32 %v5580_v45, %v4679_v44  ;;  %v4708_v44 = vor.u32 %v5585_v39, %v4705_v40  ;;  %v4897_v45 = vld [vmem:[%s8486_s3 + $0x1e8] sm:$0xf0] }
  0x4d   :  { %4647 = vmatmul.msk.bf16.gmra.mxu2 %vm227_vm1, %v6380_v49  ;;  %841 = vmatpush.bf16.msra.mxu1 %v4736_v60  ;;  %v5583_v60 = vld [vmem:[%s8486_s3 + $0x54] sm:$0xf] }
  0x4e   :  { %4651 = vmatmul.msk.bf16.gmra.mxu3 %vm227_vm1, %v6380_v49  ;;  %811 = vmatpush.bf16.msrb.mxu0 %v4680_v46  ;;  %v6639_v46 = vperm.slane %v167_v27, 3  ;;  %v4700_v1 = vor.u32 %v5583_v60, %v4697_v61  ;;  %v4873_v60 = vld [vmem:[%s8486_s3 + $0x1b8] sm:$0xf0] }
  0x4f   :  { %1010 = vmatpush.bf16.msra.mxu3 %v4908_v26  ;;  %v4689_v26 = vld [vmem:[%s8486_s3 + $0x48] sm:$0xf0] }
  0x51   :  { %842 = vmatpush.bf16.msra.mxu1 %v4728_v14 }
  0x52   :  { %812 = vmatpush.bf16.msrb.mxu0 %v4672_v50  ;;  %v6643_v50 = vperm.slane %v167_v27, 2  ;;  %v5629_v27 = vld [vmem:[%s8486_s3 + $0x1c4] sm:$0xf] }
  0x55   :  { %843 = vmatpush.bf16.msra.mxu1 %v4720_v17  ;;  %v4764_v17 = vor.u32 %v5599_v15, %v4761_v16 }
  0x56   :  { %813 = vmatpush.bf16.msrb.mxu0 %v4664_v57  ;;  %v4825_v57 = vld [vmem:[%s8486_s3 + $0x158] sm:$0xf0] }
  0x57   :  { %v4828_v59 = vor.u32 %v5615_v56, %v4825_v57 }
  0x59   :  { %952 = vmatpush.bf16.msrb.mxu1 %v4780_v33  ;;  %v4881_v33 = vld [vmem:[%s8486_s3 + $0x1c8] sm:$0xf0] }
  0x5a   :  { %814 = vmatpush.bf16.msrb.mxu0 %v4656_v4 }
  0x5c   :  { %4643 = vmatmul.msk.bf16.gmra.mxu1 %vm227_vm1, %v6380_v49  ;;  %v5610_v49 = vld [vmem:[%s8486_s3 + $0x124] sm:$0xf0] }
  0x5d   :  { %4648 = vmatmul.msk.bf16.gmra.mxu2 %vm227_vm1, %v6356_v36 }
  0x5e   :  { %4652 = vmatmul.msk.bf16.gmra.mxu3 %vm227_vm1, %v6356_v36  ;;  %923 = vmatpush.bf16.msra.mxu0 %v4716_v25  ;;  %v5581_v25 = vld [vmem:[%s8486_s3 + $0x44] sm:$0xf] }
  0x5f   :  { %v4692_v31 = vor.u32 %v5581_v25, %v4689_v26  ;;  %v5625_v25 = vld [vmem:[%s8486_s3 + $0x1a4] sm:$0xf]  ;;  %v4865_v26 = vld [vmem:[%s8486_s3 + $0x1a8] sm:$0xf0] }
  0x62   :  { %924 = vmatpush.bf16.msra.mxu0 %v4708_v44 }
  0x66   :  { %925 = vmatpush.bf16.msra.mxu0 %v4700_v1 }
  0x6a   :  { %926 = vmatpush.bf16.msra.mxu0 %v4692_v31  ;;  %v4868_v31 = vor.u32 %v5625_v25, %v4865_v26 }
  0x6c   :  { %4644 = vmatmul.msk.bf16.gmra.mxu1 %vm227_vm1, %v6356_v36  ;;  %v4799_v36 = vld [vmem:[%s8486_s3 + $0x120] sm:$0xf] }
  0x6d   :  { %v4800_v52 = vor.u32 %v5610_v49, %v4799_v36  ;;  %v4900_v36 = vor.u32 %v5633_v41, %v4897_v45 }
  0x6f   :  { %870 = vmatpush.bf16.msrb.mxu2 %v4800_v52  ;;  %1011 = vmatpush.bf16.msra.mxu3 %v4900_v36  ;;  %v5601_v52 = vld [vmem:[%s8486_s3 + $0xe4] sm:$0xf]  ;;  %v5611_v36 = vld [vmem:[%s8486_s3 + $0x134] sm:$0xf] }
  0x70   :  { %v4772_v55 = vor.u32 %v5601_v52, %v4769_v53  ;;  %v5579_v53 = vld [vmem:[%s8486_s3 + $0x34] sm:$0xf] }
  0x72   :  { %953 = vmatpush.bf16.msrb.mxu1 %v4772_v55  ;;  %v5627_v55 = vld [vmem:[%s8486_s3 + $0x1b4] sm:$0xf] }
  0x73   :  { %871 = vmatpush.bf16.msrb.mxu2 %v4792_v0  ;;  %1012 = vmatpush.bf16.msra.mxu3 %v4892_v3  ;;  %v4876_v61 = vor.u32 %v5627_v55, %v4873_v60 }
  0x76   :  { %954 = vmatpush.bf16.msrb.mxu1 %v4764_v17 }
  0x77   :  { %872 = vmatpush.bf16.msrb.mxu2 %v4784_v8 }
  0x7b   :  { %981 = vmatpush.bf16.msra.mxu2 %v4844_v21 }
  0x7f   :  { %982 = vmatpush.bf16.msra.mxu2 %v4836_v37  ;;  %v4884_v37 = vor.u32 %v5629_v27, %v4881_v33  ;;  %v5593_v27 = vld [vmem:[%s8486_s3 + $0xa4] sm:$0xf]  ;;  %v4737_v33 = vld [vmem:[%s8486_s3 + $0xa8] sm:$0xf0] }
  0x81   :  { %1013 = vmatpush.bf16.msra.mxu3 %v4884_v37 }
  0x83   :  { %983 = vmatpush.bf16.msra.mxu2 %v4828_v59 }
  0x85   :  { %1014 = vmatpush.bf16.msra.mxu3 %v4876_v61 }
  0x87   :  { %984 = vmatpush.bf16.msra.mxu2 %v4820_v22 }
  0x89   :  { %1015 = vmatpush.bf16.msra.mxu3 %v4868_v31 }
  0xa9   :  { %v262_v28 = vpop.f32.mrf.mxu0  ;;  %v6610_v29 = vpop.f32.mrf.mxu1 }
  0xaa   :  { %v263_v38 = vadd.f32 %v262_v28, %v6618_v32 }
  0xac   :  { %v369_v49 = vmax.f32 %v263_v38, 0.0 }
  0xb0   :  { %v320_v42 = vpop.f32.mrf.mxu2 }
  0xb1   :  { %v349_v43 = vpop.f32.mrf.mxu3  ;;  %v264_v47 = vpop.f32.mrf.mxu0  ;;  %v321_v63 = vadd.f32 %v320_v42, %v6643_v50  ;;  %v5597_v42 = vld [vmem:[%s8486_s3 + $0xc4] sm:$0xf] }
  0xb2   :  { %v6641_v48 = vpop.f32.mrf.mxu1  ;;  %v265_v51 = vadd.f32 %v264_v47, %v6618_v32  ;;  %v350_v58 = vadd.f32 %v349_v43, %v6639_v46  ;;  %v4753_v43 = vld [vmem:[%s8486_s3 + $0xc8] sm:$0xf0] }
  0xb3   :  { %v371_v11 = vmax.f32 %v321_v63, 0.0  ;;  %v4756_v47 = vor.u32 %v5597_v42, %v4753_v43  ;;  %v280_v26 = vadd.f32 %v6641_v48, %v6618_v32 }
  0xb4   :  { %v373_v54 = vmax.f32 %v265_v51, 0.0  ;;  %v372_v6 = vmax.f32 %v350_v58, 0.0 }
  0xb5   :  { %955 = vmatpush.bf16.msrb.mxu1 %v4756_v47  ;;  %v5573_v47 = vld [vmem:[%s8486_s3 + $0x4] sm:$0xf]  ;;  %v397_v48 = vmax.f32 %v280_v26, 0.0 }
  0xb6   :  { %v6669_v0 = vpack.c.bf16 %v373_v54, %v369_v49  ;;  %v4809_v49 = vld [vmem:[%s8486_s3 + $0x138] sm:$0xf0] }
  0xb7   :  { %v4812_v52 = vor.u32 %v5611_v36, %v4809_v49  ;;  %v4681_v54 = vld [vmem:[%s8486_s3 + $0x38] sm:$0xf0]  ;;  %v4657_v36 = vld [vmem:[%s8486_s3 + $0x8] sm:$0xf0] }
  0xb8   :  { %v322_v4 = vpop.f32.mrf.mxu2  ;;  %815 = vmatmul.bf16.vlgmr.msrb.gmra.mxu0 %v6669_v0  ;;  %v4684_v59 = vor.u32 %v5579_v53, %v4681_v54  ;;  %v4793_v53 = vld [vmem:[%s8486_s3 + $0x118] sm:$0xf0]  ;;  %v4660_v55 = vor.u32 %v5573_v47, %v4657_v36 }
  0xb9   :  { %v351_v5 = vpop.f32.mrf.mxu3  ;;  %v323_v7 = vadd.f32 %v322_v4, %v6643_v50  ;;  %v267_v9 = vpop.f32.mrf.mxu0  ;;  %985 = vmatpush.bf16.msra.mxu2 %v4812_v52  ;;  %v5607_v52 = vld [vmem:[%s8486_s3 + $0x114] sm:$0xf] }
  0xba   :  { %v352_v8 = vadd.f32 %v351_v5, %v6639_v46  ;;  %v291_v10 = vpop.f32.mrf.mxu1  ;;  %v268_v23 = vadd.f32 %v267_v9, %v6618_v32  ;;  %927 = vmatpush.bf16.msra.mxu0 %v4684_v59  ;;  %v5595_v9 = vld [vmem:[%s8486_s3 + $0xb4] sm:$0xf]  ;;  %v4796_v54 = vor.u32 %v5607_v52, %v4793_v53  ;;  %v4857_v59 = vld [vmem:[%s8486_s3 + $0x198] sm:$0xf0] }
  0xbb   :  { %v375_v13 = vmax.f32 %v323_v7, 0.0  ;;  %v292_v24 = vadd.f32 %v291_v10, %v6677_v12  ;;  %v4745_v10 = vld [vmem:[%s8486_s3 + $0xb8] sm:$0xf0] }
  0xbc   :  { %v376_v14 = vmax.f32 %v352_v8, 0.0  ;;  %v377_v38 = vmax.f32 %v268_v23, 0.0  ;;  %v4676_v23 = vor.u32 %v5577_v18, %v4673_v19 }
  0xbd   :  { %v6691_v20 = vpack.c.bf16 %v375_v13, %v371_v11  ;;  %v370_v41 = vmax.f32 %v292_v24, 0.0  ;;  %v4748_v11 = vor.u32 %v5595_v9, %v4745_v10  ;;  %v5609_v13 = vld [vmem:[%s8486_s3 + $0x124] sm:$0xf] }
  0xbe   :  { %v6693_v21 = vpack.c.bf16 %v376_v14, %v372_v6  ;;  %v4801_v14 = vld [vmem:[%s8486_s3 + $0x128] sm:$0xf0]  ;;  %928 = vmatpush.bf16.msra.mxu0 %v4676_v23 }
  0xbf   :  { %873 = vmatmul.bf16.vlgmr.msrb.gmra.mxu2 %v6691_v20  ;;  %v4804_v17 = vor.u32 %v5609_v13, %v4801_v14  ;;  %956 = vmatpush.bf16.msrb.mxu1 %v4748_v11  ;;  %v4785_v11 = vld [vmem:[%s8486_s3 + $0x108] sm:$0xf0]  ;;  %v5621_v13 = vld [vmem:[%s8486_s3 + $0x184] sm:$0xf] }
  0xc0   :  { %902 = vmatmul.bf16.vlgmr.msrb.gmra.mxu3 %v6693_v21  ;;  %v325_v28 = vpop.f32.mrf.mxu2  ;;  %v4849_v14 = vld [vmem:[%s8486_s3 + $0x188] sm:$0xf0] }
  0xc1   :  { %v354_v30 = vpop.f32.mrf.mxu3  ;;  %v269_v34 = vpop.f32.mrf.mxu0  ;;  %v326_v56 = vadd.f32 %v325_v28, %v6643_v50  ;;  %986 = vmatpush.bf16.msra.mxu2 %v4804_v17  ;;  %v4852_v18 = vor.u32 %v5621_v13, %v4849_v14 }
  0xc2   :  { %v293_v35 = vpop.f32.mrf.mxu1  ;;  %v270_v39 = vadd.f32 %v269_v34, %v6618_v32  ;;  %v355_v51 = vadd.f32 %v354_v30, %v6639_v46  ;;  %v5575_v34 = vld [vmem:[%s8486_s3 + $0x14] sm:$0xf] }
  0xc3   :  { %v294_v40 = vadd.f32 %v293_v35, %v6677_v12  ;;  %v379_v6 = vmax.f32 %v326_v56, 0.0  ;;  %v4665_v35 = vld [vmem:[%s8486_s3 + $0x18] sm:$0xf0]  ;;  %v5623_v56 = vld [vmem:[%s8486_s3 + $0x194] sm:$0xf] }
  0xc4   :  { %v381_v44 = vmax.f32 %v270_v39, 0.0  ;;  %v380_v1 = vmax.f32 %v355_v51, 0.0  ;;  %v4740_v39 = vor.u32 %v5593_v27, %v4737_v33  ;;  %v5589_v27 = vld [vmem:[%s8486_s3 + $0x84] sm:$0xf] }
  0xc5   :  { %v374_v45 = vmax.f32 %v294_v40, 0.0  ;;  %v4668_v40 = vor.u32 %v5575_v34, %v4665_v35  ;;  %987 = vmatpush.bf16.msra.mxu2 %v4796_v54 }
  0xc6   :  { %v6738_v58 = vpack.c.bf16 %v381_v44, %v377_v38  ;;  %957 = vmatpush.bf16.msrb.mxu1 %v4740_v39 }
  0xc7   :  { %v6736_v57 = vpack.c.bf16 %v374_v45, %v370_v41  ;;  %929 = vmatpush.bf16.msra.mxu0 %v4668_v40 }
  0xc8   :  { %v327_v62 = vpop.f32.mrf.mxu2  ;;  %820 = vmatmul.bf16.gmra.mxu0 %v6738_v58 }
  0xc9   :  { %v356_v63 = vpop.f32.mrf.mxu3  ;;  %844 = vmatmul.bf16.vlgmr.msra.gmra.mxu1 %v6736_v57  ;;  %v328_v2 = vadd.f32 %v327_v62, %v6643_v50  ;;  %v272_v4 = vpop.f32.mrf.mxu0  ;;  %v4860_v62 = vor.u32 %v5623_v56, %v4857_v59 }
  0xca   :  { %v357_v3 = vadd.f32 %v356_v63, %v6639_v46  ;;  %v296_v5 = vpop.f32.mrf.mxu1  ;;  %v273_v22 = vadd.f32 %v272_v4, %v6618_v32  ;;  %v5591_v4 = vld [vmem:[%s8486_s3 + $0x94] sm:$0xf] }
  0xcb   :  { %v383_v7 = vmax.f32 %v328_v2, 0.0  ;;  %v297_v24 = vadd.f32 %v296_v5, %v6677_v12  ;;  %v4729_v5 = vld [vmem:[%s8486_s3 + $0x98] sm:$0xf0]  ;;  %930 = vmatpush.bf16.msra.mxu0 %v4660_v55  ;;  %1016 = vmatpush.bf16.msra.mxu3 %v4860_v62 }
  0xcc   :  { %v384_v8 = vmax.f32 %v357_v3, 0.0  ;;  %v385_v41 = vmax.f32 %v273_v22, 0.0  ;;  %v4732_v10 = vor.u32 %v5591_v4, %v4729_v5 }
  0xcd   :  { %v6759_v15 = vpack.c.bf16 %v383_v7, %v379_v6  ;;  %v378_v44 = vmax.f32 %v297_v24, 0.0  ;;  %v5605_v6 = vld [vmem:[%s8486_s3 + $0x104] sm:$0xf] }
  0xce   :  { %v6761_v16 = vpack.c.bf16 %v384_v8, %v380_v1  ;;  %v4788_v17 = vor.u32 %v5605_v6, %v4785_v11  ;;  %958 = vmatpush.bf16.msrb.mxu1 %v4732_v10 }
  0xcf   :  { %878 = vmatmul.bf16.gmra.mxu2 %v6759_v15  ;;  %1017 = vmatpush.bf16.msra.mxu3 %v4852_v18 }
  0xd0   :  { %907 = vmatmul.bf16.gmra.mxu3 %v6761_v16  ;;  %v330_v28 = vpop.f32.mrf.mxu2  ;;  %988 = vmatpush.bf16.msra.mxu2 %v4788_v17 }
  0xd1   :  { %v359_v30 = vpop.f32.mrf.mxu3  ;;  %v274_v37 = vpop.f32.mrf.mxu0  ;;  %v331_v63 = vadd.f32 %v330_v28, %v6643_v50  ;;  %v4721_v28 = vld [vmem:[%s8486_s3 + $0x88] sm:$0xf0] }
  0xd2   :  { %v298_v38 = vpop.f32.mrf.mxu1  ;;  %v275_v42 = vadd.f32 %v274_v37, %v6618_v32  ;;  %v360_v45 = vadd.f32 %v359_v30, %v6639_v46  ;;  %v278_v30 = vadd.f32 %v6610_v29, %v6618_v32  ;;  %v4724_v35 = vor.u32 %v5589_v27, %v4721_v28 }
  0xd3   :  { %v299_v43 = vadd.f32 %v298_v38, %v6677_v12  ;;  %v387_v19 = vmax.f32 %v331_v63, 0.0 }
  0xd4   :  { %v389_v49 = vmax.f32 %v275_v42, 0.0  ;;  %v388_v1 = vmax.f32 %v360_v45, 0.0  ;;  %959 = vmatpush.bf16.msrb.mxu1 %v4724_v35  ;;  %v393_v39 = vmax.f32 %v278_v30, 0.0 }
  0xd5   :  { %v382_v51 = vmax.f32 %v299_v43, 0.0 }
  0xd6   :  { %v6812_v60 = vpack.c.bf16 %v389_v49, %v385_v41  ;;  %v413_v43 = vpack.c.bf16 %v397_v48, %v393_v39 }
  0xd7   :  { %v6814_v61 = vpack.c.bf16 %v382_v51, %v378_v44 }
  0xd8   :  { %v332_v2 = vpop.f32.mrf.mxu2  ;;  %825 = vmatmul.bf16.gmra.mxu0 %v6812_v60 }
  0xd9   :  { %v361_v3 = vpop.f32.mrf.mxu3  ;;  %849 = vmatmul.bf16.gmra.mxu1 %v6814_v61  ;;  %v333_v7 = vadd.f32 %v332_v2, %v6643_v50 }
  0xda   :  { %v362_v8 = vadd.f32 %v361_v3, %v6639_v46  ;;  %v301_v9 = vpop.f32.mrf.mxu1 }
  0xdb   :  { %v391_v22 = vmax.f32 %v333_v7, 0.0  ;;  %v302_v31 = vadd.f32 %v301_v9, %v6677_v12  ;;  %v5651_v7 = vld [vmem:[%s8488_s5 + $0x70] sm:$0xff] }
  0xdc   :  { %v392_v23 = vmax.f32 %v362_v8, 0.0 }
  0xdd   :  { %v411_v24 = vpack.c.bf16 %v391_v22, %v387_v19  ;;  %v386_v40 = vmax.f32 %v302_v31, 0.0  ;;  %v5650_v19 = vld [vmem:[%s8488_s5 + $0x68] sm:$0xff]  ;;  %v5649_v31 = vld [vmem:[%s8488_s5 + $0x60] sm:$0xff] }
  0xde   :  { %v412_v25 = vpack.c.bf16 %v392_v23, %v388_v1 }
  0xdf   :  { %883 = vmatmul.bf16.gmra.mxu2 %v411_v24 }
  0xe0   :  { %912 = vmatmul.bf16.gmra.mxu3 %v412_v25  ;;  %v335_v33 = vpop.f32.mrf.mxu2 }
  0xe1   :  { %v364_v34 = vpop.f32.mrf.mxu3  ;;  %v336_v45 = vadd.f32 %v335_v33, %v6643_v50 }
  0xe2   :  { %v303_v37 = vpop.f32.mrf.mxu1  ;;  %v365_v42 = vadd.f32 %v364_v34, %v6639_v46 }
  0xe3   :  { %v304_v38 = vadd.f32 %v303_v37, %v6677_v12  ;;  %v395_v52 = vmax.f32 %v336_v45, 0.0 }
  0xe4   :  { %v396_v47 = vmax.f32 %v365_v42, 0.0 }
  0xe5   :  { %v390_v41 = vmax.f32 %v304_v38, 0.0 }
  0xe7   :  { %v410_v44 = vpack.c.bf16 %v390_v41, %v386_v40 }
  0xe8   :  { %v337_v29 = vpop.f32.mrf.mxu2  ;;  %830 = vmatmul.bf16.gmra.mxu0 %v413_v43 }
  0xe9   :  { %v366_v32 = vpop.f32.mrf.mxu3  ;;  %854 = vmatmul.bf16.gmra.mxu1 %v410_v44  ;;  %v338_v36 = vadd.f32 %v337_v29, %v6643_v50  ;;  %v5643_v50 = vld [vmem:[%s8488_s5 + $0x30] sm:$0xff] }
  0xea   :  { %v367_v49 = vadd.f32 %v366_v32, %v6639_v46  ;;  %v306_v51 = vpop.f32.mrf.mxu1  ;;  %v5644_v46 = vld [vmem:[%s8488_s5 + $0x38] sm:$0xff] }
  0xeb   :  { %v399_v53 = vmax.f32 %v338_v36, 0.0  ;;  %v307_v59 = vadd.f32 %v306_v51, %v6677_v12  ;;  %1195 = vmatpush.bf16.msrb.mxu0 %v5644_v46 }
  0xec   :  { %v400_v54 = vmax.f32 %v367_v49, 0.0 }
  0xed   :  { %v415_v55 = vpack.c.bf16 %v399_v53, %v395_v52  ;;  %v394_v1 = vmax.f32 %v307_v59, 0.0  ;;  %v5647_v53 = vld [vmem:[%s8488_s5 + $0x50] sm:$0xff] }
  0xee   :  { %v416_v56 = vpack.c.bf16 %v400_v54, %v396_v47 }
  0xef   :  { %888 = vmatmul.bf16.gmra.mxu2 %v415_v55  ;;  %1196 = vmatpush.bf16.msrb.mxu0 %v5643_v50 }
  0xf0   :  { %917 = vmatmul.bf16.gmra.mxu3 %v416_v56 }
  0xf2   :  { %v308_v62 = vpop.f32.mrf.mxu1 }
  0xf3   :  { %v309_v63 = vadd.f32 %v308_v62, %v6677_v12  ;;  %v5641_v12 = vld [vmem:[%s8488_s5 + $0x20] sm:$0xff] }
  0xf5   :  { %v398_v2 = vmax.f32 %v309_v63, 0.0 }
  0xf7   :  { %v414_v3 = vpack.c.bf16 %v398_v2, %v394_v1 }
  0xf8   :  { %931 = vmatmul.bf16.vlgmr.msra.gmra.mxu0 %v6669_v0  ;;  %v5642_v0 = vld [vmem:[%s8488_s5 + $0x28] sm:$0xff] }
  0xf9   :  { %859 = vmatmul.bf16.gmra.mxu1 %v414_v3  ;;  %1197 = vmatpush.bf16.msrb.mxu0 %v5642_v0  ;;  %v5646_v0 = vld [vmem:[%s8488_s5 + $0x48] sm:$0xff] }
  0xfd   :  { %1198 = vmatpush.bf16.msrb.mxu0 %v5641_v12 }
  0xff   :  { %989 = vmatmul.bf16.vlgmr.msra.gmra.mxu2 %v6691_v20  ;;  %v5640_v20 = vld [vmem:[%s8488_s5 + $0x18] sm:$0xff] }
 0x100   :  { %1018 = vmatmul.bf16.vlgmr.msra.gmra.mxu3 %v6693_v21  ;;  %v5639_v21 = vld [vmem:[%s8488_s5 + $0x10] sm:$0xff] }
 0x101   :  { %1199 = vmatpush.bf16.msrb.mxu0 %v5640_v20 }
 0x105   :  { %1200 = vmatpush.bf16.msrb.mxu0 %v5639_v21 }
 0x108   :  { %936 = vmatmul.bf16.gmra.mxu0 %v6738_v58  ;;  %v5637_v58 = vld [vmem:[%s8488_s5] sm:$0xff] }
 0x109   :  { %960 = vmatmul.bf16.vlgmr.msrb.gmra.mxu1 %v6736_v57  ;;  %v5638_v57 = vld [vmem:[%s8488_s5 + $0x8] sm:$0xff] }
 0x10a   :  { %1201 = vmatpush.bf16.msrb.mxu0 %v5638_v57 }
 0x10e   :  { %1202 = vmatpush.bf16.msrb.mxu0 %v5637_v58 }
 0x10f   :  { %994 = vmatmul.bf16.gmra.mxu2 %v6759_v15 }
 0x110   :  { %1023 = vmatmul.bf16.gmra.mxu3 %v6761_v16  ;;  %v5652_v16 = vld [vmem:[%s8488_s5 + $0x78] sm:$0xff] }
 0x111   :  { %1224 = vmatpush.bf16.msra.mxu1 %v5652_v16 }
 0x115   :  { %1225 = vmatpush.bf16.msra.mxu1 %v5651_v7  ;;  %v5645_v7 = vld [vmem:[%s8488_s5 + $0x40] sm:$0xff] }
 0x118   :  { %941 = vmatmul.bf16.gmra.mxu0 %v6812_v60 }
 0x119   :  { %965 = vmatmul.bf16.gmra.mxu1 %v6814_v61  ;;  %v6896_v61 = vld [vmem:[%s8487_s4] sm:$0x3] }
 0x11a   :  { %v6899_v4 = vperm.slane %v6896_v61, 0  ;;  %1226 = vmatpush.bf16.msra.mxu1 %v5650_v19 }
 0x11e   :  { %1227 = vmatpush.bf16.msra.mxu1 %v5649_v31 }
 0x11f   :  { %999 = vmatmul.bf16.gmra.mxu2 %v411_v24 }
 0x120   :  { %1028 = vmatmul.bf16.gmra.mxu3 %v412_v25 }
 0x128   :  { %946 = vmatmul.bf16.gmra.mxu0 %v413_v43 }
 0x129   :  { %970 = vmatmul.bf16.gmra.mxu1 %v410_v44  ;;  %v5648_v44 = vld [vmem:[%s8488_s5 + $0x58] sm:$0xff] }
 0x12a   :  { %1228 = vmatpush.bf16.msra.mxu1 %v5648_v44 }
 0x12e   :  { %1229 = vmatpush.bf16.msra.mxu1 %v5647_v53 }
 0x12f   :  { %1004 = vmatmul.bf16.gmra.mxu2 %v415_v55 }
 0x130   :  { %1033 = vmatmul.bf16.gmra.mxu3 %v416_v56 }
 0x132   :  { %1230 = vmatpush.bf16.msra.mxu1 %v5646_v0 }
 0x135   :  { %v816_v15 = vpop.f32.mrf.mxu0 }
 0x136   :  { %v817_v10 = vadd.f32 %v816_v15, %v6899_v4  ;;  %1231 = vmatpush.bf16.msra.mxu1 %v5645_v7 }
 0x139   :  { %975 = vmatmul.bf16.gmra.mxu1 %v414_v3 }
 0x13d   :  { %v818_v60 = vpop.f32.mrf.mxu0 }
 0x13e   :  { %v819_v17 = vadd.f32 %v818_v60, %v6899_v4 }
 0x142   :  { %v874_v5 = vpop.f32.mrf.mxu2 }
 0x143   :  { %v903_v6 = vpop.f32.mrf.mxu3 }
 0x145   :  { %v821_v8 = vpop.f32.mrf.mxu0 }
 0x146   :  { %v845_v9 = vpop.f32.mrf.mxu1  ;;  %v822_v48 = vadd.f32 %v821_v8, %v6899_v4 }
 0x147   :  { %v846_v11 = vadd.f32 %v845_v9, %v817_v10 }
 0x149   :  { %v875_v18 = vadd.f32 %v874_v5, %v846_v11 }
 0x14a   :  { %v876_v13 = vpop.f32.mrf.mxu2 }
 0x14b   :  { %v905_v14 = vpop.f32.mrf.mxu3  ;;  %v904_v25 = vadd.f32 %v903_v6, %v875_v18 }
 0x14d   :  { %v823_v22 = vpop.f32.mrf.mxu0  ;;  %v1039_v33 = vmax.f32 %v904_v25, 0.0 }
 0x14e   :  { %v847_v23 = vpop.f32.mrf.mxu1  ;;  %v824_v42 = vadd.f32 %v823_v22, %v6899_v4 }
 0x14f   :  { %v848_v24 = vadd.f32 %v847_v23, %v819_v17 }
 0x151   :  { %v877_v26 = vadd.f32 %v876_v13, %v848_v24 }
 0x152   :  { %v879_v28 = vpop.f32.mrf.mxu2 }
 0x153   :  { %v906_v27 = vadd.f32 %v905_v14, %v877_v26  ;;  %v908_v30 = vpop.f32.mrf.mxu3 }
 0x155   :  { %v1041_v34 = vmax.f32 %v906_v27, 0.0  ;;  %v826_v35 = vpop.f32.mrf.mxu0  ;;  %v6931_v27 = vperm.slane %v6896_v61, 1 }
 0x156   :  { %v850_v37 = vpop.f32.mrf.mxu1  ;;  %v827_v62 = vadd.f32 %v826_v35, %v6899_v4 }
 0x157   :  { %v1055_v38 = vpack.c.bf16 %v1041_v34, %v1039_v33  ;;  %v851_v39 = vadd.f32 %v850_v37, %v822_v48 }
 0x159   :  { %1203 = vmatmul.bf16.vlgmr.msrb.gmra.mxu0 %v1055_v38  ;;  %v880_v43 = vadd.f32 %v879_v28, %v851_v39 }
 0x15a   :  { %v881_v40 = vpop.f32.mrf.mxu2 }
 0x15b   :  { %v910_v41 = vpop.f32.mrf.mxu3  ;;  %v909_v47 = vadd.f32 %v908_v30, %v880_v43 }
 0x15d   :  { %v828_v45 = vpop.f32.mrf.mxu0  ;;  %v1043_v54 = vmax.f32 %v909_v47, 0.0 }
 0x15e   :  { %v852_v29 = vpop.f32.mrf.mxu1  ;;  %v829_v46 = vadd.f32 %v828_v45, %v6899_v4 }
 0x15f   :  { %v853_v32 = vadd.f32 %v852_v29, %v824_v42 }
 0x161   :  { %v882_v36 = vadd.f32 %v881_v40, %v853_v32 }
 0x162   :  { %v884_v51 = vpop.f32.mrf.mxu2 }
 0x163   :  { %v911_v49 = vadd.f32 %v910_v41, %v882_v36  ;;  %v913_v52 = vpop.f32.mrf.mxu3 }
 0x165   :  { %v1045_v55 = vmax.f32 %v911_v49, 0.0  ;;  %v831_v56 = vpop.f32.mrf.mxu0 }
 0x166   :  { %v855_v59 = vpop.f32.mrf.mxu1  ;;  %v832_v10 = vadd.f32 %v831_v56, %v6899_v4 }
 0x167   :  { %v1057_v63 = vpack.c.bf16 %v1045_v55, %v1043_v54  ;;  %v856_v1 = vadd.f32 %v855_v59, %v827_v62 }
 0x169   :  { %1208 = vmatmul.bf16.gmra.mxu0 %v1057_v63  ;;  %v885_v50 = vadd.f32 %v884_v51, %v856_v1 }
 0x16a   :  { %v886_v2 = vpop.f32.mrf.mxu2 }
 0x16b   :  { %v915_v3 = vpop.f32.mrf.mxu3  ;;  %v914_v57 = vadd.f32 %v913_v52, %v885_v50 }
 0x16d   :  { %v833_v12 = vpop.f32.mrf.mxu0  ;;  %v1047_v5 = vmax.f32 %v914_v57, 0.0 }
 0x16e   :  { %v857_v20 = vpop.f32.mrf.mxu1  ;;  %v834_v18 = vadd.f32 %v833_v12, %v6899_v4 }
 0x16f   :  { %v858_v21 = vadd.f32 %v857_v20, %v829_v46 }
 0x171   :  { %v887_v58 = vadd.f32 %v886_v2, %v858_v21 }
 0x172   :  { %v889_v16 = vpop.f32.mrf.mxu2 }
 0x173   :  { %v916_v15 = vadd.f32 %v915_v3, %v887_v58  ;;  %v918_v60 = vpop.f32.mrf.mxu3 }
 0x175   :  { %v1049_v6 = vmax.f32 %v916_v15, 0.0  ;;  %v932_v9 = vpop.f32.mrf.mxu0 }
 0x176   :  { %v860_v8 = vpop.f32.mrf.mxu1  ;;  %v933_v37 = vadd.f32 %v932_v9, %v6931_v27 }
 0x177   :  { %v1059_v11 = vpack.c.bf16 %v1049_v6, %v1047_v5  ;;  %v861_v13 = vadd.f32 %v860_v8, %v832_v10 }
 0x179   :  { %1213 = vmatmul.bf16.gmra.mxu0 %v1059_v11  ;;  %v890_v19 = vadd.f32 %v889_v16, %v861_v13 }
 0x17a   :  { %v891_v14 = vpop.f32.mrf.mxu2 }
 0x17b   :  { %v920_v17 = vpop.f32.mrf.mxu3  ;;  %v919_v25 = vadd.f32 %v918_v60, %v890_v19 }
 0x17d   :  { %v934_v23 = vpop.f32.mrf.mxu0  ;;  %v1051_v33 = vmax.f32 %v919_v25, 0.0 }
 0x17e   :  { %v862_v22 = vpop.f32.mrf.mxu1  ;;  %v935_v41 = vadd.f32 %v934_v23, %v6931_v27 }
 0x17f   :  { %v863_v24 = vadd.f32 %v862_v22, %v834_v18 }
 0x181   :  { %v892_v26 = vadd.f32 %v891_v14, %v863_v24 }
 0x182   :  { %v990_v30 = vpop.f32.mrf.mxu2 }
 0x183   :  { %v921_v28 = vadd.f32 %v920_v17, %v892_v26  ;;  %v1019_v31 = vpop.f32.mrf.mxu3 }
 0x185   :  { %v1053_v34 = vmax.f32 %v921_v28, 0.0  ;;  %v937_v38 = vpop.f32.mrf.mxu0 }
 0x186   :  { %v961_v35 = vpop.f32.mrf.mxu1  ;;  %v938_v53 = vadd.f32 %v937_v38, %v6931_v27  ;;  %v5089_v38 = vld [vmem:[#allocation4 + $0xf0] sm:$0xf0] }
 0x187   :  { %v1061_v48 = vpack.c.bf16 %v1053_v34, %v1051_v33  ;;  %v962_v4 = vadd.f32 %v961_v35, %v933_v37 }
 0x189   :  { %1218 = vmatmul.bf16.gmra.mxu0 %v1061_v48  ;;  %v991_v42 = vadd.f32 %v990_v30, %v962_v4  ;;  %v5681_v48 = vld [vmem:[#allocation4 + $0xe4] sm:$0xf] }
 0x18a   :  { %v992_v39 = vpop.f32.mrf.mxu2 }
 0x18b   :  { %v1021_v40 = vpop.f32.mrf.mxu3  ;;  %v1020_v44 = vadd.f32 %v1019_v31, %v991_v42 }
 0x18d   :  { %v939_v29 = vpop.f32.mrf.mxu0  ;;  %v1040_v49 = vmax.f32 %v1020_v44, 0.0 }
 0x18e   :  { %v963_v43 = vpop.f32.mrf.mxu1  ;;  %v940_v63 = vadd.f32 %v939_v29, %v6931_v27  ;;  %v5087_v29 = vld [vmem:[#allocation4 + $0xe0] sm:$0xf] }
 0x18f   :  { %v964_v61 = vadd.f32 %v963_v43, %v935_v41 }
 0x191   :  { %v993_v45 = vadd.f32 %v992_v39, %v964_v61  ;;  %v5092_v39 = vor.u32 %v5681_v48, %v5089_v38  ;;  %v5670_v48 = vld [vmem:[#allocation4 + $0x8c] sm:$0xf]  ;;  %v5049_v38 = vld [vmem:[#allocation4 + $0x98] sm:$0xf0] }
 0x192   :  { %v995_v47 = vpop.f32.mrf.mxu2 }
 0x193   :  { %v1022_v32 = vadd.f32 %v1021_v40, %v993_v45  ;;  %v1024_v36 = vpop.f32.mrf.mxu3  ;;  %1496 = vmatpush.bf16.msrb.mxu3 %v5092_v39  ;;  %v5052_v39 = vor.u32 %v5670_v48, %v5049_v38  ;;  %v5169_v48 = vld [vmem:[#allocation6 + $0x90] sm:$0xf0] }
 0x195   :  { %v1042_v51 = vmax.f32 %v1022_v32, 0.0  ;;  %v942_v62 = vpop.f32.mrf.mxu0  ;;  %v5683_v32 = vld [vmem:[#allocation4 + $0xec] sm:$0xf0] }
 0x196   :  { %v966_v52 = vpop.f32.mrf.mxu1  ;;  %v943_v16 = vadd.f32 %v942_v62, %v6931_v27  ;;  %v5675_v62 = vld [vmem:[#allocation4 + $0xac] sm:$0xf0] }
 0x197   :  { %v1056_v54 = vpack.c.bf16 %v1042_v51, %v1040_v49  ;;  %v967_v55 = vadd.f32 %v966_v52, %v938_v53  ;;  %v5071_v51 = vld [vmem:[#allocation4 + $0xc0] sm:$0xf]  ;;  %v5679_v52 = vld [vmem:[#allocation4 + $0xcc] sm:$0xf0]  ;;  %v5673_v53 = vld [vmem:[#allocation4 + $0xa4] sm:$0xf] }
 0x199   :  { %1232 = vmatmul.bf16.vlgmr.msra.gmra.mxu1 %v1056_v54  ;;  %v996_v1 = vadd.f32 %v995_v47, %v967_v55  ;;  %v5677_v47 = vld [vmem:[#allocation4 + $0xc4] sm:$0xf]  ;;  %v5072_v54 = vor.u32 %v5679_v52, %v5071_v51  ;;  %v5057_v55 = vld [vmem:[#allocation4 + $0xb0] sm:$0xf0]  ;;  %v5659_v51 = vld [vmem:[#allocation4 + $0x2c] sm:$0xf0] }
 0x19a   :  { %v997_v56 = vpop.f32.mrf.mxu2 }
 0x19b   :  { %v1026_v59 = vpop.f32.mrf.mxu3  ;;  %v1025_v46 = vadd.f32 %v1024_v36, %v996_v1  ;;  %v5088_v36 = vor.u32 %v5683_v32, %v5087_v29  ;;  %v5033_v29 = vld [vmem:[#allocation4 + $0x78] sm:$0xf0] }
 0x19d   :  { %v1044_v21 = vmax.f32 %v1025_v46, 0.0  ;;  %v944_v58 = vpop.f32.mrf.mxu0  ;;  %1467 = vmatpush.bf16.msrb.mxu2 %v5088_v36  ;;  %v5039_v46 = vld [vmem:[#allocation4 + $0x80] sm:$0xf]  ;;  %v5664_v36 = vld [vmem:[#allocation4 + $0x54] sm:$0xf0] }
 0x19e   :  { %v968_v2 = vpop.f32.mrf.mxu1  ;;  %v945_v7 = vadd.f32 %v944_v58, %v6931_v27  ;;  %v5684_v58 = vld [vmem:[#allocation4 + $0xf4] sm:$0xf0] }
 0x19f   :  { %v969_v3 = vadd.f32 %v968_v2, %v940_v63  ;;  %v5669_v63 = vld [vmem:[#allocation4 + $0x84] sm:$0xf]  ;;  %v5041_v2 = vld [vmem:[#allocation4 + $0x90] sm:$0xf0] }
 0x1a1   :  { %v998_v50 = vadd.f32 %v997_v56, %v969_v3  ;;  %v5060_v56 = vor.u32 %v5673_v53, %v5057_v55  ;;  %1468 = vmatpush.bf16.msrb.mxu2 %v5072_v54  ;;  %v5044_v3 = vor.u32 %v5669_v63, %v5041_v2  ;;  %v5017_v53 = vld [vmem:[#allocation4 + $0x58] sm:$0xf0]  ;;  %v4999_v63 = vld [vmem:[#allocation4 + $0x28] sm:$0xf]  ;;  %v5658_v2 = vld [vmem:[#allocation4 + $0x2c] sm:$0xf] }
 0x1a2   :  { %v1000_v12 = vpop.f32.mrf.mxu2 }
 0x1a3   :  { %v1027_v0 = vadd.f32 %v1026_v59, %v998_v50  ;;  %v1029_v20 = vpop.f32.mrf.mxu3  ;;  %v5055_v59 = vld [vmem:[#allocation4 + $0xa0] sm:$0xf]  ;;  %v5671_v50 = vld [vmem:[#allocation4 + $0x8c] sm:$0xf0] }
 0x1a4   :  { %v5056_v1 = vor.u32 %v5675_v62, %v5055_v59  ;;  %v4977_v59 = vld [vmem:[#allocation4 + $0x10] sm:$0xf0] }
 0x1a5   :  { %v1046_v57 = vmax.f32 %v1027_v0, 0.0  ;;  %v947_v13 = vpop.f32.mrf.mxu0  ;;  %v5665_v0 = vld [vmem:[#allocation4 + $0x64] sm:$0xf] }
 0x1a6   :  { %v971_v15 = vpop.f32.mrf.mxu1  ;;  %v948_v25 = vadd.f32 %v947_v13, %v6931_v27  ;;  %1469 = vmatpush.bf16.msrb.mxu2 %v5056_v1  ;;  %v5081_v13 = vld [vmem:[#allocation4 + $0xd8] sm:$0xf0]  ;;  %v5660_v1 = vld [vmem:[#allocation4 + $0x34] sm:$0xf0] }
 0x1a7   :  { %v1058_v60 = vpack.c.bf16 %v1046_v57, %v1044_v21  ;;  %v972_v5 = vadd.f32 %v971_v15, %v943_v16  ;;  %v5095_v57 = vld [vmem:[#allocation4 + $0xe8] sm:$0xf]  ;;  %v5682_v15 = vld [vmem:[#allocation4 + $0xec] sm:$0xf] }
 0x1a8   :  { %v5096_v16 = vor.u32 %v5684_v58, %v5095_v57  ;;  %v5656_v57 = vld [vmem:[#allocation4 + $0x14] sm:$0xf0]  ;;  %v5654_v58 = vld [vmem:[#allocation4 + $0xc] sm:$0xf] }
 0x1a9   :  { %1237 = vmatmul.bf16.gmra.mxu1 %v1058_v60  ;;  %v1001_v8 = vadd.f32 %v1000_v12, %v972_v5  ;;  %v5040_v12 = vor.u32 %v5671_v50, %v5039_v46  ;;  %v5097_v60 = vld [vmem:[#allocation4 + $0xf8] sm:$0xf0] }
 0x1aa   :  { %v1002_v6 = vpop.f32.mrf.mxu2  ;;  %v5100_v5 = vor.u32 %v5682_v15, %v5097_v60  ;;  %1525 = vmatpush.bf16.msra.mxu0 %v5096_v16  ;;  %v5001_v46 = vld [vmem:[#allocation4 + $0x38] sm:$0xf0] }
 0x1ab   :  { %v1031_v9 = vpop.f32.mrf.mxu3  ;;  %v1030_v14 = vadd.f32 %v1029_v20, %v1001_v8  ;;  %v5025_v20 = vld [vmem:[#allocation4 + $0x70] sm:$0xf0]  ;;  %1470 = vmatpush.bf16.msrb.mxu2 %v5040_v12  ;;  %v5079_v8 = vld [vmem:[#allocation4 + $0xc8] sm:$0xf]  ;;  %v5004_v50 = vor.u32 %v5658_v2, %v5001_v46  ;;  %v5655_v12 = vld [vmem:[#allocation4 + $0xc] sm:$0xf0] }
 0x1ac   :  { %v5028_v21 = vor.u32 %v5665_v0, %v5025_v20  ;;  %1554 = vmatpush.bf16.msrb.mxu1 %v5100_v5  ;;  %v4975_v0 = vld [vmem:[#allocation4] sm:$0xf]  ;;  %v4983_v20 = vld [vmem:[#allocation4 + $0x8] sm:$0xf]  ;;  %v4985_v15 = vld [vmem:[#allocation4 + $0x18] sm:$0xf0] }
 0x1ad   :  { %v1048_v19 = vmax.f32 %v1030_v14, 0.0  ;;  %v949_v31 = vpop.f32.mrf.mxu0  ;;  %v4984_v16 = vor.u32 %v5656_v57, %v4983_v20  ;;  %v4988_v60 = vor.u32 %v5654_v58, %v4985_v15  ;;  %v5119_v20 = vld [vmem:[#allocation6 + $0x20] sm:$0xf]  ;;  %v5689_v57 = vld [vmem:[#allocation6 + $0x24] sm:$0xf] }
 0x1ae   :  { %v973_v10 = vpop.f32.mrf.mxu1  ;;  %v950_v33 = vadd.f32 %v949_v31, %v6931_v27  ;;  %v5073_v27 = vld [vmem:[#allocation4 + $0xd0] sm:$0xf0]  ;;  %v5007_v31 = vld [vmem:[#allocation4 + $0x40] sm:$0xf] }
 0x1af   :  { %v974_v11 = vadd.f32 %v973_v10, %v945_v7  ;;  %v5076_v49 = vor.u32 %v5677_v47, %v5073_v27  ;;  %v5667_v7 = vld [vmem:[#allocation4 + $0x6c] sm:$0xf0]  ;;  %v5680_v10 = vld [vmem:[#allocation4 + $0xd4] sm:$0xf0]  ;;  %v5015_v47 = vld [vmem:[#allocation4 + $0x48] sm:$0xf] }
 0x1b0   :  { %v5080_v14 = vor.u32 %v5680_v10, %v5079_v8  ;;  %v5662_v27 = vld [vmem:[#allocation4 + $0x4c] sm:$0xf]  ;;  %v5016_v52 = vor.u32 %v5664_v36, %v5015_v47  ;;  %v5715_v10 = vld [vmem:[#allocation6 + $0xec] sm:$0xf0]  ;;  %v5121_v15 = vld [vmem:[#allocation6 + $0x30] sm:$0xf0] }
 0x1b1   :  { %v1003_v17 = vadd.f32 %v1002_v6, %v974_v11  ;;  %1497 = vmatpush.bf16.msrb.mxu3 %v5076_v49  ;;  %v5023_v6 = vld [vmem:[#allocation4 + $0x60] sm:$0xf]  ;;  %v5678_v11 = vld [vmem:[#allocation4 + $0xcc] sm:$0xf]  ;;  %v5020_v55 = vor.u32 %v5662_v27, %v5017_v53  ;;  %v5697_v27 = vld [vmem:[#allocation6 + $0x64] sm:$0xf] }
 0x1b2   :  { %v1005_v23 = vpop.f32.mrf.mxu2  ;;  %1526 = vmatpush.bf16.msra.mxu0 %v5080_v14  ;;  %v4991_v49 = vld [vmem:[#allocation4 + $0x20] sm:$0xf]  ;;  %v5201_v14 = vld [vmem:[#allocation6 + $0xd0] sm:$0xf0]  ;;  %v5699_v53 = vld [vmem:[#allocation6 + $0x6c] sm:$0xf0] }
 0x1b3   :  { %v1032_v18 = vadd.f32 %v1031_v9, %v1003_v17  ;;  %v1034_v28 = vpop.f32.mrf.mxu3  ;;  %v5024_v9 = vor.u32 %v5667_v7, %v5023_v6  ;;  %v5084_v17 = vor.u32 %v5678_v11, %v5081_v13  ;;  %v4992_v54 = vor.u32 %v5659_v51, %v4991_v49  ;;  %v5713_v6 = vld [vmem:[#allocation6 + $0xe4] sm:$0xf]  ;;  %v5217_v7 = vld [vmem:[#allocation6 + $0xf0] sm:$0xf0] }
 0x1b4   :  { %v6941_v8 = vor.u32 %v5713_v6, %v5217_v7  ;;  %v5709_v11 = vld [vmem:[#allocation6 + $0xc4] sm:$0xf]  ;;  %v5153_v49 = vld [vmem:[#allocation6 + $0x70] sm:$0xf0]  ;;  %v5103_v7 = vld [vmem:[#allocation6] sm:$0xf] }
 0x1b5   :  { %v1050_v22 = vmax.f32 %v1032_v18, 0.0  ;;  %1498 = vmatpush.bf16.msrb.mxu3 %v5060_v56  ;;  %v5661_v18 = vld [vmem:[#allocation4 + $0x44] sm:$0xf]  ;;  %1471 = vmatpush.bf16.msrb.mxu2 %v5024_v9  ;;  %v5215_v9 = vld [vmem:[#allocation6 + $0xe0] sm:$0xf]  ;;  %v6972_v51 = vor.u32 %v5697_v27, %v5153_v49 }
 0x1b6   :  { %v976_v24 = vpop.f32.mrf.mxu1  ;;  %1555 = vmatpush.bf16.msrb.mxu1 %v5084_v17  ;;  %v5653_v56 = vld [vmem:[#allocation4 + $0x4] sm:$0xf]  ;;  %v6944_v13 = vor.u32 %v5715_v10, %v5215_v9  ;;  %v6946_v17 = vor.u32 %v5709_v11, %v5201_v14  ;;  %v5687_v9 = vld [vmem:[#allocation6 + $0xc] sm:$0xf0]  ;;  %v5105_v14 = vld [vmem:[#allocation6 + $0x10] sm:$0xf0] }
 0x1b7   :  { %v1060_v26 = vpack.c.bf16 %v1050_v22, %v1048_v19  ;;  %v977_v30 = vadd.f32 %v976_v24, %v948_v25  ;;  %v5009_v19 = vld [vmem:[#allocation4 + $0x50] sm:$0xf0]  ;;  %v5676_v24 = vld [vmem:[#allocation4 + $0xb4] sm:$0xf0]  ;;  %v5674_v25 = vld [vmem:[#allocation4 + $0xac] sm:$0xf]  ;;  %v4980_v62 = vor.u32 %v5653_v56, %v4977_v59  ;;  %v6992_v11 = vor.u32 %v5687_v9, %v5103_v7 }
 0x1b8   :  { %v5012_v22 = vor.u32 %v5661_v18, %v5009_v19  ;;  %v5199_v19 = vld [vmem:[#allocation6 + $0xc0] sm:$0xf]  ;;  %v5695_v56 = vld [vmem:[#allocation6 + $0x4c] sm:$0xf0]  ;;  %v5693_v59 = vld [vmem:[#allocation6 + $0x44] sm:$0xf] }
 0x1b9   :  { %1242 = vmatmul.bf16.gmra.mxu1 %v1060_v26  ;;  %v1006_v34 = vadd.f32 %v1005_v23, %v977_v30  ;;  %1499 = vmatpush.bf16.msrb.mxu3 %v5044_v3  ;;  %v5063_v23 = vld [vmem:[#allocation4 + $0xa8] sm:$0xf]  ;;  %v5000_v3 = vor.u32 %v5660_v1, %v4999_v63  ;;  %v5685_v10 = vld [vmem:[#allocation6 + $0x4] sm:$0xf]  ;;  %v5694_v9 = vld [vmem:[#allocation6 + $0x4c] sm:$0xf] }
 0x1ba   :  { %v1007_v4 = vpop.f32.mrf.mxu2  ;;  %v5064_v26 = vor.u32 %v5676_v24, %v5063_v23 }
 0x1bb   :  { %v1035_v40 = vadd.f32 %v1034_v28, %v1006_v34  ;;  %v1036_v42 = vpop.f32.mrf.mxu3  ;;  %v5065_v28 = vld [vmem:[#allocation4 + $0xb8] sm:$0xf0]  ;;  %v5047_v34 = vld [vmem:[#allocation4 + $0x88] sm:$0xf] }
 0x1bc   :  { %v5068_v30 = vor.u32 %v5674_v25, %v5065_v28  ;;  %1527 = vmatpush.bf16.msra.mxu0 %v5064_v26  ;;  %v5705_v25 = vld [vmem:[#allocation6 + $0xa4] sm:$0xf]  ;;  %v5185_v26 = vld [vmem:[#allocation6 + $0xb0] sm:$0xf0]  ;;  %v6956_v28 = vld [vmem:[%s8489_s6] ss:$0 sm:$0xff] }
 0x1bd   :  { %v1052_v61 = vmax.f32 %v1035_v40, 0.0  ;;  %1500 = vmatpush.bf16.msrb.mxu3 %v5028_v21  ;;  %v5657_v40 = vld [vmem:[#allocation4 + $0x24] sm:$0xf]  ;;  %v4976_v21 = vor.u32 %v5655_v12, %v4975_v0 }
 0x1be   :  { %v978_v35 = vpop.f32.mrf.mxu1  ;;  %1556 = vmatpush.bf16.msrb.mxu1 %v5068_v30  ;;  %v6958_v30 = vor.u32 %v5705_v25, %v5185_v26  ;;  %v5714_v25 = vld [vmem:[#allocation6 + $0xec] sm:$0xf]  ;;  %v5225_v26 = vld [vmem:[#allocation6 + $0xf8] sm:$0xf0] }
 0x1bf   :  { %v979_v37 = vadd.f32 %v978_v35, %v950_v33  ;;  %v5663_v33 = vld [vmem:[#allocation4 + $0x4c] sm:$0xf0] }
 0x1c0   :  { %v5008_v35 = vor.u32 %v5663_v33, %v5007_v31  ;;  %v5183_v33 = vld [vmem:[#allocation6 + $0xa0] sm:$0xf] }
 0x1c1   :  { %v1008_v41 = vadd.f32 %v1007_v4, %v979_v37  ;;  %1501 = vmatpush.bf16.msrb.mxu3 %v5012_v22  ;;  %v5672_v37 = vld [vmem:[#allocation4 + $0x94] sm:$0xf0]  ;;  %v5711_v22 = vld [vmem:[#allocation6 + $0xcc] sm:$0xf0] }
 0x1c2   :  { %v5048_v4 = vor.u32 %v5672_v37, %v5047_v34  ;;  %1472 = vmatpush.bf16.msrb.mxu2 %v5008_v35  ;;  %1557 = vmatpush.bf16.msrb.mxu1 %v5052_v39  ;;  %v6950_v23 = vor.u32 %v5711_v22, %v5199_v19  ;;  %v5707_v34 = vld [vmem:[#allocation6 + $0xac] sm:$0xf0]  ;;  %v5701_v37 = vld [vmem:[#allocation6 + $0x84] sm:$0xf]  ;;  %v5716_v19 = vld [vmem:[#allocation6 + $0xf4] sm:$0xf0]  ;;  %v6994_v22 = vor.u32 %v5685_v10, %v5105_v14 }
 0x1c3   :  { %v1037_v43 = vadd.f32 %v1036_v42, %v1008_v41  ;;  %v4993_v41 = vld [vmem:[#allocation4 + $0x30] sm:$0xf0]  ;;  %v6961_v35 = vor.u32 %v5707_v34, %v5183_v33  ;;  %v6998_v34 = vor.u32 %v5714_v25, %v5225_v26  ;;  %v5145_v10 = vld [vmem:[#allocation6 + $0x58] sm:$0xf0]  ;;  %v5692_v25 = vld [vmem:[#allocation6 + $0x34] sm:$0xf0] }
 0x1c4   :  { %v4996_v42 = vor.u32 %v5657_v40, %v4993_v41  ;;  %1528 = vmatpush.bf16.msra.mxu0 %v5048_v4  ;;  %v6964_v4 = vor.u32 %v5701_v37, %v5169_v48  ;;  %v5207_v37 = vld [vmem:[#allocation6 + $0xc8] sm:$0xf]  ;;  %v5712_v48 = vld [vmem:[#allocation6 + $0xd4] sm:$0xf0]  ;;  %v5690_v26 = vld [vmem:[#allocation6 + $0x2c] sm:$0xf] }
 0x1c5   :  { %v1054_v44 = vmax.f32 %v1037_v43, 0.0  ;;  %v5031_v43 = vld [vmem:[#allocation4 + $0x68] sm:$0xf] }
 0x1c6   :  { %1502 = vmatpush.bf16.msrb.mxu3 %v4996_v42  ;;  %1473 = vmatpush.bf16.msrb.mxu2 %v4992_v54  ;;  %8648 = vst [vmem:[#allocation16_spill] sm:$0xff] %v6964_v4 }
 0x1c7   :  { %v1062_v45 = vpack.c.bf16 %v1054_v44, %v1052_v61  ;;  %v5668_v61 = vld [vmem:[#allocation4 + $0x74] sm:$0xf0]  ;;  %v5666_v44 = vld [vmem:[#allocation4 + $0x6c] sm:$0xf] }
 0x1c8   :  { %v5036_v32 = vor.u32 %v5666_v44, %v5033_v29  ;;  %v5167_v29 = vld [vmem:[#allocation6 + $0x80] sm:$0xf] }
 0x1c9   :  { %1247 = vmatmul.bf16.gmra.mxu1 %v1062_v45  ;;  %v5032_v45 = vor.u32 %v5668_v61, %v5031_v43 }
 0x1ca   :  { %1558 = vmatpush.bf16.msrb.mxu1 %v5036_v32  ;;  %1503 = vmatpush.bf16.msrb.mxu3 %v4980_v62  ;;  %v5703_v32 = vld [vmem:[#allocation6 + $0x8c] sm:$0xf0]  ;;  %v5137_v62 = vld [vmem:[#allocation6 + $0x50] sm:$0xf0] }
 0x1cb   :  { %1529 = vmatpush.bf16.msra.mxu0 %v5032_v45  ;;  %1474 = vmatpush.bf16.msrb.mxu2 %v4976_v21  ;;  %v6969_v47 = vor.u32 %v5703_v32, %v5167_v29  ;;  %v6981_v2 = vor.u32 %v5693_v59, %v5137_v62  ;;  %v5691_v21 = vld [vmem:[#allocation6 + $0x2c] sm:$0xf0] }
 0x1cc   :  { %v6986_v58 = vor.u32 %v5691_v21, %v5119_v20  ;;  %v5700_v20 = vld [vmem:[#allocation6 + $0x74] sm:$0xf0]  ;;  %v5698_v21 = vld [vmem:[#allocation6 + $0x6c] sm:$0xf] }
 0x1ce   :  { %1559 = vmatpush.bf16.msrb.mxu1 %v5020_v55  ;;  %1853 = vmatpush.bf16.msra.mxu3 %v6941_v8  ;;  %v5135_v55 = vld [vmem:[#allocation6 + $0x40] sm:$0xf] }
 0x1cf   :  { %1530 = vmatpush.bf16.msra.mxu0 %v5016_v52  ;;  %1840 = vmatpush.bf16.msra.mxu2 %v6944_v13  ;;  %v5151_v52 = vld [vmem:[#allocation6 + $0x60] sm:$0xf]  ;;  %v6979_v1 = vor.u32 %v5695_v56, %v5135_v55  ;;  %v5177_v55 = vld [vmem:[#allocation6 + $0x98] sm:$0xf0] }
 0x1d0   :  { %v6974_v54 = vor.u32 %v5699_v53, %v5151_v52  ;;  %v5704_v52 = vld [vmem:[#allocation6 + $0x94] sm:$0xf0]  ;;  %v5702_v53 = vld [vmem:[#allocation6 + $0x8c] sm:$0xf] }
 0x1d2   :  { %1560 = vmatpush.bf16.msrb.mxu1 %v5004_v50  ;;  %1854 = vmatpush.bf16.msra.mxu3 %v6946_v17  ;;  %8649 = vst [vmem:[#allocation17_spill] sm:$0xff] %v6974_v54 }
 0x1d3   :  { %1531 = vmatpush.bf16.msra.mxu0 %v5000_v3  ;;  %1841 = vmatpush.bf16.msra.mxu2 %v6950_v23 }
 0x1d6   :  { %v1204_v5 = vpop.f32.mrf.mxu0  ;;  %1561 = vmatpush.bf16.msrb.mxu1 %v4988_v60  ;;  %1855 = vmatpush.bf16.msra.mxu3 %v6958_v30 }
 0x1d7   :  { %1532 = vmatpush.bf16.msra.mxu0 %v4984_v16  ;;  %v1205_v38 = vadd.f32 %v6956_v28, %v1204_v5  ;;  %1842 = vmatpush.bf16.msra.mxu2 %v6961_v35  ;;  %v6988_v5 = vor.u32 %v5689_v57, %v5121_v15  ;;  %v5161_v15 = vld [vmem:[#allocation6 + $0x78] sm:$0xf0] }
 0x1d8   :  { %v7026_v7 = vor.u32 %v5698_v21, %v5161_v15  ;;  %v5779_v21 = vld [vmem:[#allocation9 + $0xec] sm:$0xf0]  ;;  %v5777_v15 = vld [vmem:[#allocation9 + $0xe4] sm:$0xf] }
 0x1da   :  { %1856 = vmatpush.bf16.msra.mxu3 %v6964_v4 }
 0x1db   :  { %1843 = vmatpush.bf16.msra.mxu2 %v6969_v47 }
 0x1de   :  { %v1206_v18 = vpop.f32.mrf.mxu0  ;;  %1857 = vmatpush.bf16.msra.mxu3 %v6972_v51 }
 0x1df   :  { %v1207_v39 = vadd.f32 %v6956_v28, %v1206_v18  ;;  %1844 = vmatpush.bf16.msra.mxu2 %v6974_v54  ;;  %v5223_v18 = vld [vmem:[#allocation6 + $0xe8] sm:$0xf] }
 0x1e2   :  { %1858 = vmatpush.bf16.msra.mxu3 %v6981_v2 }
 0x1e3   :  { %1845 = vmatpush.bf16.msra.mxu2 %v6979_v1 }
 0x1e6   :  { %v1209_v31 = vpop.f32.mrf.mxu0  ;;  %1859 = vmatpush.bf16.msra.mxu3 %v6988_v5 }
 0x1e7   :  { %v1210_v63 = vadd.f32 %v6956_v28, %v1209_v31  ;;  %1846 = vmatpush.bf16.msra.mxu2 %v6986_v58 }
 0x1ea   :  { %1860 = vmatpush.bf16.msra.mxu3 %v6994_v22 }
 0x1eb   :  { %1847 = vmatpush.bf16.msra.mxu2 %v6992_v11 }
 0x1ee   :  { %v1211_v44 = vpop.f32.mrf.mxu0 }
 0x1ef   :  { %v1212_v46 = vadd.f32 %v6956_v28, %v1211_v44  ;;  %v5193_v44 = vld [vmem:[#allocation6 + $0xb8] sm:$0xf0] }
 0x1f6   :  { %v1214_v3 = vpop.f32.mrf.mxu0 }
 0x1fe   :  { %v1216_v31 = vpop.f32.mrf.mxu0 }
 0x1ff   :  { %v1217_v27 = vadd.f32 %v6956_v28, %v1216_v31  ;;  %v5129_v31 = vld [vmem:[#allocation6 + $0x38] sm:$0xf0] }
 0x206   :  { %v1219_v62 = vpop.f32.mrf.mxu0 }
 0x216   :  { %v1233_v24 = vpop.f32.mrf.mxu1 }
 0x217   :  { %v1234_v40 = vadd.f32 %v1233_v24, %v1205_v38  ;;  %v6996_v24 = vor.u32 %v5716_v19, %v5223_v18  ;;  %v5710_v38 = vld [vmem:[#allocation6 + $0xcc] sm:$0xf]  ;;  %v7032_v18 = vor.u32 %v5694_v9, %v5145_v10  ;;  %v5127_v19 = vld [vmem:[#allocation6 + $0x28] sm:$0xf]  ;;  %v1297_v9 = vld [vmem:[%s8492_s9] sm:$0xf] }
 0x219   :  { %v1253_v43 = vmax.f32 %v1234_v40, 0.0  ;;  %v7004_v40 = vor.u32 %v5712_v48, %v5207_v37  ;;  %v1220_v37 = vadd.f32 %v6956_v28, %v1219_v62  ;;  %v7037_v48 = vor.u32 %v5692_v25, %v5127_v19  ;;  %v5351_v25 = vld [vmem:[#allocation9 + $0xe8] sm:$0xf] }
 0x21e   :  { %v1235_v41 = vpop.f32.mrf.mxu1 }
 0x21f   :  { %v1236_v42 = vadd.f32 %v1235_v41, %v1207_v39  ;;  %v5209_v39 = vld [vmem:[#allocation6 + $0xd8] sm:$0xf0] }
 0x220   :  { %v7006_v41 = vor.u32 %v5710_v38, %v5209_v39  ;;  %v7039_v38 = vor.u32 %v5690_v26, %v5129_v31  ;;  %v5111_v39 = vld [vmem:[#allocation6 + $0x8] sm:$0xf]  ;;  %v5780_v26 = vld [vmem:[#allocation9 + $0xf4] sm:$0xf0]  ;;  %v5778_v31 = vld [vmem:[#allocation9 + $0xec] sm:$0xf] }
 0x221   :  { %v1254_v61 = vmax.f32 %v1236_v42, 0.0  ;;  %v5191_v42 = vld [vmem:[#allocation6 + $0xa8] sm:$0xf] }
 0x223   :  { %v1261_v45 = vpack.c.bf16 %v1254_v61, %v1253_v43  ;;  %v5708_v43 = vld [vmem:[#allocation6 + $0xb4] sm:$0xf0]  ;;  %v5706_v61 = vld [vmem:[#allocation6 + $0xac] sm:$0xf] }
 0x224   :  { %v7011_v29 = vor.u32 %v5708_v43, %v5191_v42  ;;  %v7013_v32 = vor.u32 %v5706_v61, %v5193_v44  ;;  %v5688_v61 = vld [vmem:[#allocation6 + $0x14] sm:$0xf0]  ;;  %v5686_v44 = vld [vmem:[#allocation6 + $0xc] sm:$0xf] }
 0x225   :  { %1475 = vmatmul.bf16.vlgmr.msrb.gmra.mxu2 %v1261_v45  ;;  %1504 = vmatmul.bf16.vlgmr.msrb.gmra.mxu3 %v1261_v45 }
 0x226   :  { %1533 = vmatmul.bf16.vlgmr.msra.gmra.mxu0 %v1261_v45  ;;  %1562 = vmatmul.bf16.vlgmr.msrb.gmra.mxu1 %v1261_v45  ;;  %v1238_v36 = vpop.f32.mrf.mxu1  ;;  %v1215_v45 = vadd.f32 %v6956_v28, %v1214_v3  ;;  %v7020_v3 = vor.u32 %v5702_v53, %v5177_v55 }
 0x227   :  { %v1239_v50 = vadd.f32 %v1238_v36, %v1210_v63  ;;  %1866 = vmatpush.bf16.msrb.mxu2 %v6996_v24  ;;  %1879 = vmatpush.bf16.msrb.mxu3 %v6998_v34  ;;  %v5175_v36 = vld [vmem:[#allocation6 + $0x88] sm:$0xf] }
 0x228   :  { %v7018_v63 = vor.u32 %v5704_v52, %v5175_v36  ;;  %8650 = vst [vmem:[#allocation18_spill] sm:$0xff] %v7020_v3 }
 0x229   :  { %v1255_v16 = vmax.f32 %v1239_v50, 0.0 }
 0x22b   :  { %1867 = vmatpush.bf16.msrb.mxu2 %v7004_v40  ;;  %1880 = vmatpush.bf16.msrb.mxu3 %v7006_v41 }
 0x22e   :  { %v1240_v0 = vpop.f32.mrf.mxu1 }
 0x22f   :  { %v1241_v12 = vadd.f32 %v1240_v0, %v1212_v46  ;;  %1868 = vmatpush.bf16.msrb.mxu2 %v7011_v29  ;;  %1881 = vmatpush.bf16.msrb.mxu3 %v7013_v32 }
 0x231   :  { %v1256_v60 = vmax.f32 %v1241_v12, 0.0  ;;  %v5159_v12 = vld [vmem:[#allocation6 + $0x68] sm:$0xf] }
 0x232   :  { %v7024_v57 = vor.u32 %v5700_v20, %v5159_v12  ;;  %v5343_v20 = vld [vmem:[#allocation9 + $0xe0] sm:$0xf] }
 0x233   :  { %v1262_v6 = vpack.c.bf16 %v1256_v60, %v1255_v16  ;;  %1869 = vmatpush.bf16.msrb.mxu2 %v7018_v63  ;;  %1882 = vmatpush.bf16.msrb.mxu3 %v7020_v3  ;;  %v5143_v16 = vld [vmem:[#allocation6 + $0x48] sm:$0xf]  ;;  %v5696_v60 = vld [vmem:[#allocation6 + $0x54] sm:$0xf0] }
 0x234   :  { %v7030_v14 = vor.u32 %v5696_v60, %v5143_v16  ;;  %v7066_v16 = vor.u32 %v5779_v21, %v5343_v20  ;;  %v5345_v60 = vld [vmem:[#allocation9 + $0xf0] sm:$0xf0]  ;;  %v5335_v21 = vld [vmem:[#allocation9 + $0xc8] sm:$0xf] }
 0x235   :  { %1480 = vmatmul.bf16.gmra.mxu2 %v1262_v6  ;;  %1509 = vmatmul.bf16.gmra.mxu3 %v1262_v6  ;;  %v5329_v20 = vld [vmem:[#allocation9 + $0xd0] sm:$0xf0] }
 0x236   :  { %1538 = vmatmul.bf16.gmra.mxu0 %v1262_v6  ;;  %1567 = vmatmul.bf16.gmra.mxu1 %v1262_v6  ;;  %v1243_v33 = vpop.f32.mrf.mxu1 }
 0x237   :  { %v1244_v49 = vadd.f32 %v1243_v33, %v1215_v45  ;;  %1870 = vmatpush.bf16.msrb.mxu2 %v7024_v57  ;;  %1883 = vmatpush.bf16.msrb.mxu3 %v7026_v7  ;;  %v1221_v33 = vpop.f32.mrf.mxu0  ;;  %v5113_v45 = vld [vmem:[#allocation6 + $0x18] sm:$0xf0] }
 0x238   :  { %v1222_v42 = vadd.f32 %v6956_v28, %v1221_v33  ;;  %v7046_v52 = vor.u32 %v5686_v44, %v5113_v45  ;;  %v8499_v28 = vmov 0   ;;  %2056 = vmatpush.bf16.msrb.mxu0 %v7066_v16  ;;  %v7079_v33 = vor.u32 %v5780_v26, %v5351_v25  ;;  %v5774_v26 = vld [vmem:[#allocation9 + $0xcc] sm:$0xf] }
 0x239   :  { %v1257_v46 = vmax.f32 %v1244_v49, 0.0  ;;  %v7044_v49 = vor.u32 %v5688_v61, %v5111_v39  ;;  %v7081_v39 = vperm.slane %v1297_v9, 2 }
 0x23b   :  { %1871 = vmatpush.bf16.msrb.mxu2 %v7030_v14  ;;  %1884 = vmatpush.bf16.msrb.mxu3 %v7032_v18  ;;  %8655 = vst [vmem:[#allocation23_spill] sm:$0xff] %v7081_v39 }
 0x23e   :  { %v1245_v56 = vpop.f32.mrf.mxu1 }
 0x23f   :  { %v1246_v59 = vadd.f32 %v1245_v56, %v1217_v27  ;;  %1872 = vmatpush.bf16.msrb.mxu2 %v7037_v48  ;;  %1885 = vmatpush.bf16.msrb.mxu3 %v7039_v38 }
 0x241   :  { %v1258_v50 = vmax.f32 %v1246_v59, 0.0 }
 0x243   :  { %v1263_v0 = vpack.c.bf16 %v1258_v50, %v1257_v46  ;;  %1873 = vmatpush.bf16.msrb.mxu2 %v7044_v49  ;;  %1886 = vmatpush.bf16.msrb.mxu3 %v7046_v52 }
 0x245   :  { %1485 = vmatmul.bf16.gmra.mxu2 %v1263_v0  ;;  %1514 = vmatmul.bf16.gmra.mxu3 %v1263_v0 }
 0x246   :  { %1543 = vmatmul.bf16.gmra.mxu0 %v1263_v0  ;;  %1572 = vmatmul.bf16.gmra.mxu1 %v1263_v0  ;;  %v1248_v6 = vpop.f32.mrf.mxu1 }
 0x247   :  { %v1249_v43 = vadd.f32 %v1248_v6, %v1220_v37  ;;  %v7068_v6 = vor.u32 %v5777_v15, %v5345_v60  ;;  %v5353_v37 = vld [vmem:[#allocation9 + $0xf8] sm:$0xf0]  ;;  %v5776_v15 = vld [vmem:[#allocation9 + $0xd4] sm:$0xf0] }
 0x248   :  { %v7099_v25 = vor.u32 %v5776_v15, %v5335_v21 }
 0x249   :  { %v1259_v53 = vmax.f32 %v1249_v43, 0.0  ;;  %2069 = vmatpush.bf16.msra.mxu1 %v7068_v6  ;;  %v7085_v43 = vor.u32 %v5778_v31, %v5353_v37  ;;  %v5337_v31 = vld [vmem:[#allocation9 + $0xd8] sm:$0xf0]  ;;  %v7101_v37 = vperm.slane %v1297_v9, 0 }
 0x24a   :  { %8662 = vst [vmem:[#allocation30_spill] sm:$0xff] %v7099_v25 }
 0x24b   :  { %8657 = vst [vmem:[#allocation25_spill] sm:$0xff] %v7085_v43 }
 0x24c   :  { %8663 = vst [vmem:[#allocation31_spill] sm:$0xff] %v7101_v37 }
 0x24e   :  { %v1250_v36 = vpop.f32.mrf.mxu1 }
 0x24f   :  { %v1251_v27 = vadd.f32 %v1250_v36, %v1222_v42  ;;  %v7083_v42 = vperm.slane %v1297_v9, 3 }
 0x251   :  { %v1260_v55 = vmax.f32 %v1251_v27, 0.0  ;;  %8656 = vst [vmem:[#allocation24_spill] sm:$0xff] %v7083_v42  ;;  %v5327_v27 = vld [vmem:[#allocation9 + $0xc0] sm:$0xf] }
 0x253   :  { %v1264_v56 = vpack.c.bf16 %v1260_v55, %v1259_v53  ;;  %v5775_v53 = vld [vmem:[#allocation9 + $0xcc] sm:$0xf0]  ;;  %v5773_v55 = vld [vmem:[#allocation9 + $0xc4] sm:$0xf] }
 0x254   :  { %v7097_v60 = vor.u32 %v5773_v55, %v5329_v20  ;;  %v5771_v55 = vld [vmem:[#allocation9 + $0xac] sm:$0xf0]  ;;  %v5769_v20 = vld [vmem:[#allocation9 + $0xa4] sm:$0xf] }
 0x255   :  { %1490 = vmatmul.bf16.gmra.mxu2 %v1264_v56  ;;  %1519 = vmatmul.bf16.gmra.mxu3 %v1264_v56 }
 0x256   :  { %1548 = vmatmul.bf16.gmra.mxu0 %v1264_v56  ;;  %1577 = vmatmul.bf16.gmra.mxu1 %v1264_v56  ;;  %v7095_v56 = vor.u32 %v5775_v53, %v5327_v27  ;;  %8661 = vst [vmem:[#allocation29_spill] sm:$0xff] %v7097_v60  ;;  %v5311_v53 = vld [vmem:[#allocation9 + $0xa0] sm:$0xf] }
 0x257   :  { %2070 = vmatpush.bf16.msra.mxu1 %v7097_v60  ;;  %v8710_v60 = vmov 0  }
 0x258   :  { %8660 = vst [vmem:[#allocation28_spill] sm:$0xff] %v7095_v56  ;;  %2057 = vmatpush.bf16.msrb.mxu0 %v7095_v56 }
 0x265   :  { %1848 = vmatmul.bf16.vlgmr.msra.gmra.mxu2 %v8499_v28  ;;  %1861 = vmatmul.bf16.vlgmr.msra.gmra.mxu3 %v8499_v28 }
 0x266   :  { %2082 = vmatpush.bf16.msra.mxu2 %v7079_v33  ;;  %2095 = vmatpush.bf16.msra.mxu3 %v7085_v43 }
 0x26a   :  { %2083 = vmatpush.bf16.msra.mxu2 %v7099_v25  ;;  %v5468_v25 = vld [vmem:[#allocation7 + $0xd8] sm:$0xf0] }
 0x275   :  { %1874 = vmatmul.bf16.vlgmr.msrb.gmra.mxu2 %v8499_v28  ;;  %1887 = vmatmul.bf16.vlgmr.msrb.gmra.mxu3 %v8499_v28 }
 0x2a3   :  { %v7054_v59 = vpop.f32.mrf.mxu0  ;;  %v7056_v62 = vpop.f32.mrf.mxu1 }
 0x2a8   :  { %v7058_v46 = vpop.f32.mrf.mxu2  ;;  %v7060_v50 = vpop.f32.mrf.mxu3 }
 0x2ab   :  { %v7062_v0 = vpop.f32.mrf.mxu0  ;;  %v7064_v12 = vpop.f32.mrf.mxu1 }
 0x2ac   :  { %8651 = vst [vmem:[#allocation19_spill] sm:$0xff] %v7062_v0 }
 0x2ad   :  { %8652 = vst [vmem:[#allocation20_spill] sm:$0xff] %v7064_v12  ;;  %v5770_v12 = vld [vmem:[#allocation9 + $0xac] sm:$0xf] }
 0x2b0   :  { %v7074_v10 = vpop.f32.mrf.mxu2  ;;  %v7076_v19 = vpop.f32.mrf.mxu3 }
 0x2b1   :  { %8653 = vst [vmem:[#allocation21_spill] sm:$0xff] %v7074_v10 }
 0x2b2   :  { %8654 = vst [vmem:[#allocation22_spill] sm:$0xff] %v7076_v19  ;;  %v5321_v19 = vld [vmem:[#allocation9 + $0xb8] sm:$0xf0] }
 0x2b3   :  { %v1539_v61 = vpop.f32.mrf.mxu0  ;;  %v1568_v44 = vpop.f32.mrf.mxu1 }
 0x2b4   :  { %v7089_v45 = vadd.f32 %v1539_v61, %v7081_v39  ;;  %v7092_v36 = vadd.f32 %v1568_v44, %v7083_v42  ;;  %v7103_v61 = vperm.slane %v1297_v9, 1  ;;  %v7106_v44 = vor.u32 %v5774_v26, %v5337_v31  ;;  %v5313_v26 = vld [vmem:[#allocation9 + $0xb0] sm:$0xf0]  ;;  %v5319_v31 = vld [vmem:[#allocation9 + $0xa8] sm:$0xf] }
 0x2b5   :  { %v7117_v9 = vor.u32 %v5771_v55, %v5311_v53  ;;  %v5295_v53 = vld [vmem:[#allocation9 + $0x80] sm:$0xf]  ;;  %v5767_v55 = vld [vmem:[#allocation9 + $0x8c] sm:$0xf0] }
 0x2b6   :  { %8658 = vst [vmem:[#allocation26_spill] sm:$0xff] %v7089_v45  ;;  %2096 = vmatpush.bf16.msra.mxu3 %v7106_v44  ;;  %v5772_v45 = vld [vmem:[#allocation9 + $0xb4] sm:$0xf0] }
 0x2b7   :  { %8659 = vst [vmem:[#allocation27_spill] sm:$0xff] %v7092_v36  ;;  %v7119_v36 = vor.u32 %v5769_v20, %v5313_v26  ;;  %v7121_v0 = vor.u32 %v5772_v45, %v5319_v31  ;;  %2058 = vmatpush.bf16.msrb.mxu0 %v7117_v9  ;;  %v5765_v20 = vld [vmem:[#allocation9 + $0x84] sm:$0xf]  ;;  %v7133_v45 = vor.u32 %v5767_v55, %v5295_v53  ;;  %v5297_v26 = vld [vmem:[#allocation9 + $0x90] sm:$0xf0] }
 0x2b8   :  { %8664 = vst [vmem:[#allocation32_spill] sm:$0xff] %v7103_v61  ;;  %v1481_v28 = vpop.f32.mrf.mxu2  ;;  %v1510_v27 = vpop.f32.mrf.mxu3  ;;  %v5303_v31 = vld [vmem:[#allocation9 + $0x88] sm:$0xf]  ;;  %v5279_v53 = vld [vmem:[#allocation9 + $0x60] sm:$0xf] }
 0x2b9   :  { %8665 = vst [vmem:[#allocation33_spill] sm:$0xff] %v7106_v44  ;;  %v7111_v21 = vadd.f32 %v1481_v28, %v7101_v37  ;;  %v7114_v15 = vadd.f32 %v1510_v27, %v7103_v61  ;;  %v7128_v27 = vor.u32 %v5770_v12, %v5321_v19  ;;  %2071 = vmatpush.bf16.msra.mxu1 %v7119_v36  ;;  %v5766_v12 = vld [vmem:[#allocation9 + $0x8c] sm:$0xf]  ;;  %v5305_v19 = vld [vmem:[#allocation9 + $0x98] sm:$0xf0] }
 0x2ba   :  { %8668 = vst [vmem:[#allocation36_spill] sm:$0xff] %v7117_v9  ;;  %2084 = vmatpush.bf16.msra.mxu2 %v7121_v0  ;;  %v5763_v55 = vld [vmem:[#allocation9 + $0x6c] sm:$0xf0] }
 0x2bb   :  { %8666 = vst [vmem:[#allocation34_spill] sm:$0xff] %v7111_v21  ;;  %v7123_v10 = vpop.f32.mrf.mxu0  ;;  %v7125_v28 = vpop.f32.mrf.mxu1  ;;  %2097 = vmatpush.bf16.msra.mxu3 %v7128_v27  ;;  %2059 = vmatpush.bf16.msrb.mxu0 %v7133_v45  ;;  %v7140_v21 = vor.u32 %v5766_v12, %v5305_v19  ;;  %v5759_v44 = vld [vmem:[#allocation9 + $0x4c] sm:$0xf0] }
 0x2bc   :  { %8667 = vst [vmem:[#allocation35_spill] sm:$0xff] %v7114_v15  ;;  %v7135_v15 = vor.u32 %v5765_v20, %v5297_v26  ;;  %v5761_v20 = vld [vmem:[#allocation9 + $0x64] sm:$0xf]  ;;  %v5281_v26 = vld [vmem:[#allocation9 + $0x70] sm:$0xf0] }
 0x2bd   :  { %8669 = vst [vmem:[#allocation37_spill] sm:$0xff] %v7119_v36  ;;  %v7151_v12 = vor.u32 %v5761_v20, %v5281_v26  ;;  %v5271_v26 = vld [vmem:[#allocation9 + $0x48] sm:$0xf] }
 0x2be   :  { %8670 = vst [vmem:[#allocation38_spill] sm:$0xff] %v7121_v0  ;;  %2072 = vmatpush.bf16.msra.mxu1 %v7135_v15 }
 0x2bf   :  { %8671 = vst [vmem:[#allocation39_spill] sm:$0xff] %v7123_v10  ;;  %v5768_v10 = vld [vmem:[#allocation9 + $0x94] sm:$0xf0]  ;;  %2098 = vmatpush.bf16.msra.mxu3 %v7140_v21 }
 0x2c0   :  { %8672 = vst [vmem:[#allocation40_spill] sm:$0xff] %v7125_v28  ;;  %v7137_v28 = vor.u32 %v5768_v10, %v5303_v31  ;;  %v7142_v0 = vpop.f32.mrf.mxu2  ;;  %v7144_v36 = vpop.f32.mrf.mxu3  ;;  %v7149_v10 = vor.u32 %v5763_v55, %v5279_v53  ;;  %v5287_v31 = vld [vmem:[#allocation9 + $0x68] sm:$0xf]  ;;  %v5265_v53 = vld [vmem:[#allocation9 + $0x50] sm:$0xf0] }
 0x2c1   :  { %8673 = vst [vmem:[#allocation41_spill] sm:$0xff] %v7128_v27  ;;  %v5263_v27 = vld [vmem:[#allocation9 + $0x40] sm:$0xf] }
 0x2c2   :  { %8674 = vst [vmem:[#allocation42_spill] sm:$0xff] %v7133_v45  ;;  %2085 = vmatpush.bf16.msra.mxu2 %v7137_v28  ;;  %v5764_v45 = vld [vmem:[#allocation9 + $0x74] sm:$0xf0]  ;;  %2060 = vmatpush.bf16.msrb.mxu0 %v7149_v10 }
 0x2c3   :  { %8675 = vst [vmem:[#allocation43_spill] sm:$0xff] %v7135_v15  ;;  %v7153_v19 = vor.u32 %v5764_v45, %v5287_v31  ;;  %v1544_v15 = vpop.f32.mrf.mxu0  ;;  %v1573_v9 = vpop.f32.mrf.mxu1  ;;  %2073 = vmatpush.bf16.msra.mxu1 %v7151_v12  ;;  %v7166_v45 = vor.u32 %v5759_v44, %v5263_v27  ;;  %v5760_v31 = vld [vmem:[#allocation9 + $0x54] sm:$0xf0]  ;;  %v5247_v44 = vld [vmem:[#allocation9 + $0x20] sm:$0xf] }
 0x2c4   :  { %8676 = vst [vmem:[#allocation44_spill] sm:$0xff] %v7137_v28  ;;  %v7159_v55 = vadd.f32 %v1544_v15, %v7081_v39  ;;  %v7162_v20 = vadd.f32 %v1573_v9, %v7083_v42  ;;  %v5273_v15 = vld [vmem:[#allocation9 + $0x58] sm:$0xf0]  ;;  %v5755_v27 = vld [vmem:[#allocation9 + $0x2c] sm:$0xf0] }
 0x2c5   :  { %8677 = vst [vmem:[#allocation45_spill] sm:$0xff] %v7140_v21  ;;  %v5757_v21 = vld [vmem:[#allocation9 + $0x44] sm:$0xf] }
 0x2c6   :  { %8678 = vst [vmem:[#allocation46_spill] sm:$0xff] %v7142_v0  ;;  %v5762_v0 = vld [vmem:[#allocation9 + $0x6c] sm:$0xf]  ;;  %2086 = vmatpush.bf16.msra.mxu2 %v7153_v19  ;;  %2061 = vmatpush.bf16.msrb.mxu0 %v7166_v45 }
 0x2c7   :  { %8679 = vst [vmem:[#allocation47_spill] sm:$0xff] %v7144_v36  ;;  %v5289_v36 = vld [vmem:[#allocation9 + $0x78] sm:$0xf0] }
 0x2c8   :  { %8680 = vst [vmem:[#allocation48_spill] sm:$0xff] %v7149_v10  ;;  %v7156_v28 = vor.u32 %v5762_v0, %v5289_v36  ;;  %v5758_v10 = vld [vmem:[#allocation9 + $0x4c] sm:$0xf]  ;;  %v7169_v0 = vor.u32 %v5757_v21, %v5265_v53  ;;  %v7171_v36 = vor.u32 %v5760_v31, %v5271_v26  ;;  %v1486_v9 = vpop.f32.mrf.mxu2  ;;  %v5249_v53 = vld [vmem:[#allocation9 + $0x30] sm:$0xf0] }
 0x2c9   :  { %8681 = vst [vmem:[#allocation49_spill] sm:$0xff] %v7151_v12  ;;  %v5255_v26 = vld [vmem:[#allocation9 + $0x28] sm:$0xf]  ;;  %v5756_v31 = vld [vmem:[#allocation9 + $0x34] sm:$0xf0] }
 0x2ca   :  { %8682 = vst [vmem:[#allocation50_spill] sm:$0xff] %v7153_v19  ;;  %2099 = vmatpush.bf16.msra.mxu3 %v7156_v28  ;;  %2074 = vmatpush.bf16.msra.mxu1 %v7169_v0  ;;  %v5753_v19 = vld [vmem:[#allocation9 + $0x24] sm:$0xf] }
 0x2cb   :  { %8683 = vst [vmem:[#allocation51_spill] sm:$0xff] %v7156_v28  ;;  %2087 = vmatpush.bf16.msra.mxu2 %v7171_v36  ;;  %v7179_v28 = vadd.f32 %v1486_v9, %v7101_v37  ;;  %v7191_v12 = vpop.f32.mrf.mxu0  ;;  %v7193_v9 = vpop.f32.mrf.mxu1 }
 0x2cc   :  { %8684 = vst [vmem:[#allocation52_spill] sm:$0xff] %v7159_v55  ;;  %v7173_v55 = vor.u32 %v5758_v10, %v5273_v15  ;;  %v7185_v10 = vor.u32 %v5755_v27, %v5247_v44  ;;  %v7187_v15 = vor.u32 %v5753_v19, %v5249_v53  ;;  %v5231_v44 = vld [vmem:[#allocation9] sm:$0xf]  ;;  %v5751_v27 = vld [vmem:[#allocation9 + $0xc] sm:$0xf0] }
 0x2cd   :  { %8685 = vst [vmem:[#allocation53_spill] sm:$0xff] %v7162_v20  ;;  %v1515_v20 = vpop.f32.mrf.mxu3  ;;  %v5749_v19 = vld [vmem:[#allocation9 + $0x4] sm:$0xf]  ;;  %v7201_v53 = vor.u32 %v5751_v27, %v5231_v44 }
 0x2ce   :  { %8686 = vst [vmem:[#allocation54_spill] sm:$0xff] %v7166_v45  ;;  %v7182_v21 = vadd.f32 %v1515_v20, %v7103_v61  ;;  %2100 = vmatpush.bf16.msra.mxu3 %v7173_v55  ;;  %v5257_v45 = vld [vmem:[#allocation9 + $0x38] sm:$0xf0]  ;;  %2062 = vmatpush.bf16.msrb.mxu0 %v7185_v10 }
 0x2cf   :  { %8687 = vst [vmem:[#allocation55_spill] sm:$0xff] %v7169_v0  ;;  %v7189_v0 = vor.u32 %v5756_v31, %v5255_v26  ;;  %2075 = vmatpush.bf16.msra.mxu1 %v7187_v15  ;;  %v5233_v26 = vld [vmem:[#allocation9 + $0x10] sm:$0xf0]  ;;  %v5239_v31 = vld [vmem:[#allocation9 + $0x8] sm:$0xf] }
 0x2d0   :  { %8688 = vst [vmem:[#allocation56_spill] sm:$0xff] %v7171_v36  ;;  %v5754_v36 = vld [vmem:[#allocation9 + $0x2c] sm:$0xf] }
 0x2d1   :  { %8689 = vst [vmem:[#allocation57_spill] sm:$0xff] %v7173_v55  ;;  %v7196_v20 = vor.u32 %v5754_v36, %v5257_v45  ;;  %2088 = vmatpush.bf16.msra.mxu2 %v7189_v0  ;;  %v5750_v45 = vld [vmem:[#allocation9 + $0xc] sm:$0xf]  ;;  %v5241_v36 = vld [vmem:[#allocation9 + $0x18] sm:$0xf0] }
 0x2d2   :  { %8690 = vst [vmem:[#allocation58_spill] sm:$0xff] %v7179_v28  ;;  %v5474_v28 = vld [vmem:[#allocation7 + $0xe0] sm:$0xf]  ;;  %2063 = vmatpush.bf16.msrb.mxu0 %v7201_v53  ;;  %v5476_v55 = vld [vmem:[#allocation7 + $0xf0] sm:$0xf0] }
 0x2d3   :  { %8691 = vst [vmem:[#allocation59_spill] sm:$0xff] %v7182_v21  ;;  %2101 = vmatpush.bf16.msra.mxu3 %v7196_v20  ;;  %v7203_v21 = vor.u32 %v5749_v19, %v5233_v26  ;;  %v5482_v19 = vld [vmem:[#allocation7 + $0xe8] sm:$0xf]  ;;  %v5748_v26 = vld [vmem:[#allocation7 + $0xf4] sm:$0xf0] }
 0x2d4   :  { %8692 = vst [vmem:[#allocation60_spill] sm:$0xff] %v7185_v10  ;;  %v5745_v10 = vld [vmem:[#allocation7 + $0xe4] sm:$0xf] }
 0x2d5   :  { %8693 = vst [vmem:[#allocation61_spill] sm:$0xff] %v7187_v15  ;;  %v5747_v15 = vld [vmem:[#allocation7 + $0xec] sm:$0xf0]  ;;  %v7212_v44 = vpop.f32.mrf.mxu3  ;;  %2076 = vmatpush.bf16.msra.mxu1 %v7203_v21  ;;  %v7218_v27 = vor.u32 %v5745_v10, %v5476_v55  ;;  %v5741_v55 = vld [vmem:[#allocation7 + $0xc4] sm:$0xf]  ;;  %2064 = vmatmul.bf16.vlgmr.msrb.gmra.mxu0 %v8710_v60 }
 0x2d6   :  { %8694 = vst [vmem:[#allocation62_spill] sm:$0xff] %v7189_v0  ;;  %v7208_v0 = vor.u32 %v5750_v45, %v5241_v36  ;;  %v7221_v45 = vor.u32 %v5748_v26, %v5482_v19  ;;  %v5484_v36 = vld [vmem:[#allocation7 + $0xf8] sm:$0xf0]  ;;  %v5460_v10 = vld [vmem:[#allocation7 + $0xd0] sm:$0xf0] }
 0x2d7   :  { %8695 = vst [vmem:[#allocation63_spill] sm:$0xff] %v7191_v12  ;;  %v5752_v12 = vld [vmem:[#allocation9 + $0x14] sm:$0xf0]  ;;  %v7230_v19 = vor.u32 %v5741_v55, %v5460_v10  ;;  %v5739_v55 = vld [vmem:[#allocation7 + $0xac] sm:$0xf0] }
 0x2d8   :  { %8696 = vst [vmem:[#allocation64_spill] sm:$0xff] %v7193_v9  ;;  %v7205_v9 = vor.u32 %v5752_v12, %v5239_v31  ;;  %v7216_v12 = vor.u32 %v5747_v15, %v5474_v28  ;;  %v5746_v31 = vld [vmem:[#allocation7 + $0xec] sm:$0xf]  ;;  %2102 = vmatpush.bf16.msra.mxu3 %v7208_v0  ;;  %v5466_v15 = vld [vmem:[#allocation7 + $0xc8] sm:$0xf]  ;;  %2077 = vmatmul.bf16.vlgmr.msra.gmra.mxu1 %v8710_v60 }
 0x2d9   :  { %8697 = vst [vmem:[#allocation65_spill] sm:$0xff] %v7196_v20  ;;  %v7210_v20 = vpop.f32.mrf.mxu2  ;;  %2345 = vmatpush.bf16.msrb.mxu1 %v7218_v27  ;;  %v5744_v26 = vld [vmem:[#allocation7 + $0xd4] sm:$0xf0]  ;;  %v5737_v10 = vld [vmem:[#allocation7 + $0xa4] sm:$0xf] }
 0x2da   :  { %8698 = vst [vmem:[#allocation66_spill] sm:$0xff] %v7201_v53  ;;  %2089 = vmatpush.bf16.msra.mxu2 %v7205_v9  ;;  %v5458_v53 = vld [vmem:[#allocation7 + $0xc0] sm:$0xf]  ;;  %2332 = vmatpush.bf16.msra.mxu0 %v7216_v12 }
 0x2db   :  { %8699 = vst [vmem:[#allocation67_spill] sm:$0xff] %v7203_v21  ;;  %v1578_v21 = vpop.f32.mrf.mxu1  ;;  %2103 = vmatmul.bf16.vlgmr.msra.gmra.mxu3 %v8710_v60 }
 0x2dc   :  { %8700 = vst [vmem:[#allocation68_spill] sm:$0xff] %v7205_v9  ;;  %v1549_v9 = vpop.f32.mrf.mxu0 }
 0x2dd   :  { %8701 = vst [vmem:[#allocation69_spill] sm:$0xff] %v7208_v0  ;;  %v5742_v0 = vld [vmem:[#allocation7 + $0xcc] sm:$0xf]  ;;  %2346 = vmatpush.bf16.msrb.mxu1 %v7230_v19  ;;  %2090 = vmatmul.bf16.vlgmr.msra.gmra.mxu2 %v8710_v60 }
 0x2de   :  { %8702 = vst [vmem:[#allocation70_spill] sm:$0xff] %v7210_v20  ;;  %v5743_v20 = vld [vmem:[#allocation7 + $0xcc] sm:$0xf0]  ;;  %2358 = vmatpush.bf16.msrb.mxu2 %v7221_v45 }
 0x2df   :  { %8703 = vst [vmem:[#allocation71_spill] sm:$0xff] %v7212_v44  ;;  %v7225_v44 = vor.u32 %v5746_v31, %v5484_v36  ;;  %v7227_v28 = vor.u32 %v5743_v20, %v5458_v53  ;;  %v7237_v20 = vadd.f32 %v1578_v21, %v7083_v42  ;;  %v7240_v53 = vor.u32 %v5744_v26, %v5466_v15  ;;  %v5442_v36 = vld [vmem:[#allocation7 + $0xa0] sm:$0xf]  ;;  %v5444_v21 = vld [vmem:[#allocation7 + $0xb0] sm:$0xf0] }
 0x2e0   :  { %8704 = vst [vmem:[#allocation72_spill] sm:$0xff] %v7216_v12  ;;  %v7242_v31 = vor.u32 %v5742_v0, %v5468_v25  ;;  %v7251_v25 = vor.u32 %v5737_v10, %v5444_v21  ;;  %v5738_v15 = vld [vmem:[#allocation7 + $0xac] sm:$0xf]  ;;  %v5452_v26 = vld [vmem:[#allocation7 + $0xb8] sm:$0xf0] }
 0x2e1   :  { %8705 = vst [vmem:[#allocation73_spill] sm:$0xff] %v7218_v27  ;;  %v7234_v27 = vadd.f32 %v1549_v9, %v7081_v39  ;;  %2371 = vmatpush.bf16.msrb.mxu3 %v7225_v44  ;;  %2333 = vmatpush.bf16.msra.mxu0 %v7227_v28  ;;  %v7248_v9 = vor.u32 %v5739_v55, %v5442_v36  ;;  %v5426_v10 = vld [vmem:[#allocation7 + $0x80] sm:$0xf]  ;;  %v5735_v21 = vld [vmem:[#allocation7 + $0x8c] sm:$0xf0] }
 0x2e2   :  { %8706 = vst [vmem:[#allocation74_spill] sm:$0xff] %v7221_v45  ;;  %2359 = vmatpush.bf16.msrb.mxu2 %v7240_v53  ;;  %v1520_v45 = vpop.f32.mrf.mxu3  ;;  %2347 = vmatpush.bf16.msrb.mxu1 %v7251_v25  ;;  %v5717_v12 = vld [vmem:[#allocation7 + $0x4] sm:$0xf] }
 0x2e3   :  { %8707 = vst [vmem:[#allocation75_spill] sm:$0xff] %v7225_v44  ;;  %v1491_v44 = vpop.f32.mrf.mxu2  ;;  %v7263_v55 = vadd.f32 %v1520_v45, %v7103_v61  ;;  %v5734_v45 = vld [vmem:[#allocation7 + $0x8c] sm:$0xf] }
 0x2e4   :  { %8708 = vst [vmem:[#allocation76_spill] sm:$0xff] %v7227_v28  ;;  %v7256_v28 = vor.u32 %v5738_v15, %v5452_v26  ;;  %v7260_v36 = vadd.f32 %v1491_v44, %v7101_v37  ;;  %v5434_v15 = vld [vmem:[#allocation7 + $0x88] sm:$0xf]  ;;  %v5736_v26 = vld [vmem:[#allocation7 + $0x94] sm:$0xf0] }
 0x2e5   :  { %8709 = vst [vmem:[#allocation77_spill] sm:$0xff] %v7230_v19  ;;  %2372 = vmatpush.bf16.msrb.mxu3 %v7242_v31  ;;  %2334 = vmatpush.bf16.msra.mxu0 %v7248_v9  ;;  %v7272_v44 = vor.u32 %v5736_v26, %v5434_v15 }
 0x2e6   :  { %8711 = vst [vmem:[#allocation78_spill] sm:$0xff] %v7234_v27  ;;  %v5450_v27 = vld [vmem:[#allocation7 + $0xa8] sm:$0xf] }
 0x2e7   :  { %8712 = vst [vmem:[#allocation79_spill] sm:$0xff] %v7237_v20  ;;  %v5740_v20 = vld [vmem:[#allocation7 + $0xb4] sm:$0xf0] }
 0x2e8   :  { %8713 = vst [vmem:[#allocation80_spill] sm:$0xff] %v7240_v53  ;;  %v7253_v0 = vor.u32 %v5740_v20, %v5450_v27  ;;  %v5733_v27 = vld [vmem:[#allocation7 + $0x84] sm:$0xf]  ;;  %v7267_v20 = vor.u32 %v5735_v21, %v5426_v10  ;;  %v5731_v53 = vld [vmem:[#allocation7 + $0x6c] sm:$0xf0] }
 0x2e9   :  { %8714 = vst [vmem:[#allocation81_spill] sm:$0xff] %v7242_v31  ;;  %v5428_v31 = vld [vmem:[#allocation7 + $0x90] sm:$0xf0]  ;;  %2373 = vmatpush.bf16.msrb.mxu3 %v7256_v28 }
 0x2ea   :  { %8715 = vst [vmem:[#allocation82_spill] sm:$0xff] %v7248_v9  ;;  %2360 = vmatpush.bf16.msrb.mxu2 %v7253_v0  ;;  %v7270_v60 = vor.u32 %v5733_v27, %v5428_v31  ;;  %v5410_v9 = vld [vmem:[#allocation7 + $0x60] sm:$0xf]  ;;  %2335 = vmatpush.bf16.msra.mxu0 %v7267_v20  ;;  %v5412_v21 = vld [vmem:[#allocation7 + $0x70] sm:$0xf0] }
 0x2eb   :  { %8716 = vst [vmem:[#allocation83_spill] sm:$0xff] %v7251_v25  ;;  %v5729_v25 = vld [vmem:[#allocation7 + $0x64] sm:$0xf]  ;;  %v7279_v10 = vor.u32 %v5731_v53, %v5410_v9  ;;  %v5418_v31 = vld [vmem:[#allocation7 + $0x68] sm:$0xf] }
 0x2ec   :  { %8717 = vst [vmem:[#allocation84_spill] sm:$0xff] %v7253_v0  ;;  %2348 = vmatpush.bf16.msrb.mxu1 %v7270_v60  ;;  %v5732_v27 = vld [vmem:[#allocation7 + $0x74] sm:$0xf0]  ;;  %v7282_v15 = vor.u32 %v5729_v25, %v5412_v21  ;;  %v7288_v0 = vpop.f32.mrf.mxu3  ;;  %v5394_v53 = vld [vmem:[#allocation7 + $0x40] sm:$0xf] }
 0x2ed   :  { %8718 = vst [vmem:[#allocation85_spill] sm:$0xff] %v7256_v28  ;;  %v7284_v26 = vor.u32 %v5732_v27, %v5418_v31  ;;  %v7286_v28 = vpop.f32.mrf.mxu2  ;;  %v5727_v9 = vld [vmem:[#allocation7 + $0x4c] sm:$0xf0]  ;;  %v5396_v21 = vld [vmem:[#allocation7 + $0x50] sm:$0xf0] }
 0x2ee   :  { %8719 = vst [vmem:[#allocation86_spill] sm:$0xff] %v7260_v36  ;;  %2361 = vmatpush.bf16.msrb.mxu2 %v7272_v44  ;;  %2336 = vmatpush.bf16.msra.mxu0 %v7279_v10  ;;  %v7295_v25 = vor.u32 %v5727_v9, %v5394_v53  ;;  %v5402_v31 = vld [vmem:[#allocation7 + $0x48] sm:$0xf]  ;;  %v5728_v27 = vld [vmem:[#allocation7 + $0x54] sm:$0xf0] }
 0x2ef   :  { %8720 = vst [vmem:[#allocation87_spill] sm:$0xff] %v7263_v55  ;;  %v5436_v55 = vld [vmem:[#allocation7 + $0x98] sm:$0xf0]  ;;  %v5380_v9 = vld [vmem:[#allocation7 + $0x30] sm:$0xf0] }
 0x2f0   :  { %8721 = vst [vmem:[#allocation88_spill] sm:$0xff] %v7267_v20  ;;  %v7275_v36 = vor.u32 %v5734_v45, %v5436_v55  ;;  %v5730_v55 = vld [vmem:[#allocation7 + $0x6c] sm:$0xf]  ;;  %v5420_v45 = vld [vmem:[#allocation7 + $0x78] sm:$0xf0]  ;;  %2349 = vmatpush.bf16.msrb.mxu1 %v7282_v15 }
 0x2f1   :  { %8722 = vst [vmem:[#allocation89_spill] sm:$0xff] %v7270_v60  ;;  %v7291_v60 = vor.u32 %v5730_v55, %v5420_v45  ;;  %v5725_v20 = vld [vmem:[#allocation7 + $0x44] sm:$0xf]  ;;  %v5726_v55 = vld [vmem:[#allocation7 + $0x4c] sm:$0xf] }
 0x2f2   :  { %8723 = vst [vmem:[#allocation90_spill] sm:$0xff] %v7272_v44  ;;  %2374 = vmatpush.bf16.msrb.mxu3 %v7275_v36  ;;  %2362 = vmatpush.bf16.msrb.mxu2 %v7284_v26  ;;  %v5404_v45 = vld [vmem:[#allocation7 + $0x58] sm:$0xf0]  ;;  %v5723_v44 = vld [vmem:[#allocation7 + $0x2c] sm:$0xf0] }
 0x2f3   :  { %8724 = vst [vmem:[#allocation91_spill] sm:$0xff] %v7275_v36  ;;  %v7303_v36 = vor.u32 %v5726_v55, %v5404_v45  ;;  %2337 = vmatpush.bf16.msra.mxu0 %v7295_v25 }
 0x2f4   :  { %8725 = vst [vmem:[#allocation92_spill] sm:$0xff] %v7279_v10  ;;  %v5378_v10 = vld [vmem:[#allocation7 + $0x20] sm:$0xf] }
 0x2f5   :  { %8726 = vst [vmem:[#allocation93_spill] sm:$0xff] %v7282_v15  ;;  %v5721_v15 = vld [vmem:[#allocation7 + $0x24] sm:$0xf]  ;;  %v7307_v53 = vor.u32 %v5723_v44, %v5378_v10  ;;  %v1862_v44 = vpop.f32.mrf.mxu3 }
 0x2f6   :  { %8727 = vst [vmem:[#allocation94_spill] sm:$0xff] %v7284_v26  ;;  %2375 = vmatpush.bf16.msrb.mxu3 %v7291_v60  ;;  %v7314_v55 = vor.u32 %v5721_v15, %v5380_v9  ;;  %v5364_v15 = vld [vmem:[#allocation7 + $0x10] sm:$0xf0]  ;;  %v5370_v9 = vld [vmem:[#allocation7 + $0x8] sm:$0xf] }
 0x2f7   :  { %8728 = vst [vmem:[#allocation95_spill] sm:$0xff] %v7286_v28  ;;  %v7298_v28 = vor.u32 %v5725_v20, %v5396_v21  ;;  %v5386_v20 = vld [vmem:[#allocation7 + $0x28] sm:$0xf]  ;;  %v5724_v21 = vld [vmem:[#allocation7 + $0x34] sm:$0xf0]  ;;  %2338 = vmatpush.bf16.msra.mxu0 %v7307_v53 }
 0x2f8   :  { %8729 = vst [vmem:[#allocation96_spill] sm:$0xff] %v7288_v0  ;;  %v7300_v0 = vor.u32 %v5728_v27, %v5402_v31  ;;  %v1477_v31 = vadd.f32 %v7058_v46, %v7101_v37  ;;  %v1506_v27 = vadd.f32 %v7060_v50, %v7103_v61  ;;  %v7316_v45 = vor.u32 %v5724_v21, %v5386_v20  ;;  %v5362_v46 = vld [vmem:[#allocation7] sm:$0xf]  ;;  %v5719_v37 = vld [vmem:[#allocation7 + $0xc] sm:$0xf0] }
 0x2f9   :  { %8730 = vst [vmem:[#allocation97_spill] sm:$0xff] %v7291_v60  ;;  %2350 = vmatpush.bf16.msrb.mxu1 %v7298_v28  ;;  %v5388_v60 = vld [vmem:[#allocation7 + $0x38] sm:$0xf0]  ;;  %v7323_v50 = vor.u32 %v5719_v37, %v5362_v46  ;;  %v5720_v20 = vld [vmem:[#allocation7 + $0x14] sm:$0xf0]  ;;  %v1564_v46 = vadd.f32 %v7056_v62, %v7083_v42 }
 0x2fa   :  { %8731 = vst [vmem:[#allocation98_spill] sm:$0xff] %v7295_v25  ;;  %2363 = vmatpush.bf16.msrb.mxu2 %v7300_v0  ;;  %v5722_v25 = vld [vmem:[#allocation7 + $0x2c] sm:$0xf]  ;;  %2376 = vmatpush.bf16.msrb.mxu3 %v7303_v36  ;;  %v1893_v19 = vadd.f32 %v1862_v44, %v1506_v27 }
 0x2fb   :  { %8732 = vst [vmem:[#allocation99_spill] sm:$0xff] %v7298_v28  ;;  %v1849_v28 = vpop.f32.mrf.mxu2  ;;  %v7319_v10 = vor.u32 %v5722_v25, %v5388_v60  ;;  %v7326_v60 = vor.u32 %v5717_v12, %v5364_v15  ;;  %v5718_v25 = vld [vmem:[#allocation7 + $0xc] sm:$0xf]  ;;  %2339 = vmatpush.bf16.msra.mxu0 %v7323_v50 }
 0x2fc   :  { %8733 = vst [vmem:[#allocation100_spill] sm:$0xff] %v7300_v0  ;;  %v1892_v26 = vadd.f32 %v1849_v28, %v1477_v31  ;;  %v5358_v61 = vmul.f32 -1.442695, %v1893_v19  ;;  %v7328_v28 = vor.u32 %v5720_v20, %v5370_v9  ;;  %v5372_v31 = vld [vmem:[#allocation7 + $0x18] sm:$0xf0] }
 0x2fd   :  { %8734 = vst [vmem:[#allocation101_spill] sm:$0xff] %v7303_v36  ;;  %2351 = vmatpush.bf16.msrb.mxu1 %v7314_v55  ;;  %v7331_v27 = vor.u32 %v5718_v25, %v5372_v31  ;;  %v1864_v12 = vpop.f32.mrf.mxu3 }
 0x2fe   :  { %8735 = vst [vmem:[#allocation102_spill] sm:$0xff] %v7307_v53  ;;  %v5357_v21 = vmul.f32 -1.442695, %v1892_v26  ;;  %2364 = vmatpush.bf16.msrb.mxu2 %v7316_v45  ;;  %2377 = vmatpush.bf16.msrb.mxu3 %v7319_v10 }
 0x2ff   :  { %8736 = vst [vmem:[#allocation103_spill] sm:$0xff] %v7314_v55  ;;  %2460 = vmatpush.bf16.msrb.mxu0 %v6944_v13 }
 0x300   :  { %8737 = vst [vmem:[#allocation104_spill] sm:$0xff] %v7316_v45  ;;  %5805 = vpow2.f32 %v5357_v21  ;;  %v1535_v21 = vadd.f32 %v7054_v59, %v7081_v39 }
 0x301   :  { %8738 = vst [vmem:[#allocation105_spill] sm:$0xff] %v7319_v10  ;;  %5807 = vpow2.f32 %v5358_v61  ;;  %2352 = vmatpush.bf16.msrb.mxu1 %v7326_v60 }
 0x302   :  { %8739 = vst [vmem:[#allocation106_spill] sm:$0xff] %v7323_v50  ;;  %2365 = vmatpush.bf16.msrb.mxu2 %v7328_v28  ;;  %2378 = vmatpush.bf16.msrb.mxu3 %v7331_v27 }
 0x303   :  { %8740 = vst [vmem:[#allocation107_spill] sm:$0xff] %v7326_v60  ;;  %v1851_v37 = vpop.f32.mrf.mxu2  ;;  %2461 = vmatpush.bf16.msrb.mxu0 %v6950_v23 }
 0x304   :  { %8741 = vst [vmem:[#allocation108_spill] sm:$0xff] %v7328_v28 }
 0x305   :  { %8742 = vst [vmem:[#allocation109_spill] sm:$0xff] %v7331_v27  ;;  %2473 = vmatpush.bf16.msra.mxu1 %v6941_v8  ;;  %v1888_v9 = vpop.f32.mrf.mxu3 }
 0x306   :  { %2486 = vmatpush.bf16.msra.mxu2 %v6996_v24  ;;  %2499 = vmatpush.bf16.msra.mxu3 %v6998_v34  ;;  %v5806_v19 = vpop.eup %5805  ;;  %v1895_v20 = vadd.f32 %v1888_v9, %v1564_v46 }
 0x307   :  { %v5808_v61 = vpop.eup %5807  ;;  %v2111_v26 = vadd.f32 1.0, %v5806_v19  ;;  %2462 = vmatpush.bf16.msrb.mxu0 %v6961_v35 }
 0x308   :  { %v2130_v44 = vadd.f32 1.0, %v5808_v61  ;;  %v5359_v25 = vmul.f32 -1.442695, %v1895_v20 }
 0x309   :  { %2474 = vmatpush.bf16.msra.mxu1 %v6946_v17  ;;  %5809 = vrcp.f32 %v2111_v26  ;;  %v2123_v59 = vand.u32 2147483648, %v2111_v26  ;;  %vm2117_vm4 = vweird.f32 %v2111_v26 }
 0x30a   :  { %2487 = vmatpush.bf16.msra.mxu2 %v7004_v40  ;;  %2500 = vmatpush.bf16.msra.mxu3 %v7006_v41  ;;  %5811 = vrcp.f32 %v2130_v44  ;;  %vm2136_vm5 = vweird.f32 %v2130_v44 }
 0x30b   :  { %v1875_v15 = vpop.f32.mrf.mxu2  ;;  %2463 = vmatpush.bf16.msrb.mxu0 %v6969_v47  ;;  %5813 = vpow2.f32 %v5359_v25 }
 0x30c   :  { %v1894_v62 = vadd.f32 %v1875_v15, %v1535_v21  ;;  %v2142_v15 = vand.u32 2147483648, %v2130_v44 }
 0x30d   :  { %2475 = vmatpush.bf16.msra.mxu1 %v6958_v30  ;;  %v1890_v9 = vpop.f32.mrf.mxu3 }
 0x30e   :  { %2488 = vmatpush.bf16.msra.mxu2 %v7011_v29  ;;  %2501 = vmatpush.bf16.msra.mxu3 %v7013_v32  ;;  %5815 = vtanh.f32 %v1894_v62  ;;  %v2124_v62 = vor.u32 1.1754944e-38, %v2123_v59 }
 0x30f   :  { %v5810_v31 = vpop.eup %5809  ;;  %2464 = vmatpush.bf16.msrb.mxu0 %v6974_v54 }
 0x310   :  { %v5812_v37 = vpop.eup %5811  ;;  %v2113_v12 = vmul.f32 %v5810_v31, %v2111_v26  ;;  %vm2118_vm2 = vweird.f32 %v5810_v31 }
 0x311   :  { %2476 = vmatpush.bf16.msra.mxu1 %v6964_v4  ;;  %v2132_v19 = vmul.f32 %v5812_v37, %v2130_v44  ;;  %v2121_v4 = vand.u32 2147483647, %v2111_v26  ;;  %vm2137_vm3 = vweird.f32 %v5812_v37  ;;  %vm2119_vm6 = vmor %vm2117_vm4, %vm2118_vm2 }
 0x312   :  { %2489 = vmatpush.bf16.msra.mxu2 %v7018_v63  ;;  %2502 = vmatpush.bf16.msra.mxu3 %v7020_v3  ;;  %v2114_v61 = vsub.f32 1.0, %v2113_v12  ;;  %v2140_v12 = vand.u32 2147483647, %v2130_v44  ;;  %v5814_v3 = vpop.eup %5813  ;;  %vm2138_vm8 = vmor %vm2136_vm5, %vm2137_vm3 }
 0x313   :  { %v2133_v46 = vsub.f32 1.0, %v2132_v19  ;;  %v1877_v20 = vpop.f32.mrf.mxu2  ;;  %2465 = vmatpush.bf16.msrb.mxu0 %v6979_v1  ;;  %v2150_v9 = vadd.f32 1.0, %v5814_v3  ;;  %vm2122_vm7 = vcmp.eq.f32.partialorder %v2121_v4, 8.507059e+37 }
 0x314   :  { %v2115_v21 = vmul.f32 %v5810_v31, %v2114_v61  ;;  %v2143_v61 = vor.u32 1.1754944e-38, %v2142_v15  ;;  %vm2141_vm9 = vcmp.eq.f32.partialorder %v2140_v12, 8.507059e+37 }
 0x315   :  { %2477 = vmatpush.bf16.msra.mxu1 %v6972_v51  ;;  %v2134_v25 = vmul.f32 %v5812_v37, %v2133_v46  ;;  %v5816_v46 = vpop.eup %5815  ;;  %5817 = vrcp.f32 %v2150_v9  ;;  %v2162_v15 = vand.u32 2147483648, %v2150_v9  ;;  %v2160_v12 = vand.u32 2147483647, %v2150_v9 }
 0x316   :  { %2490 = vmatpush.bf16.msra.mxu2 %v7024_v57  ;;  %2503 = vmatpush.bf16.msra.mxu3 %v7026_v7  ;;  %v2116_v54 = vadd.f32 %v5810_v31, %v2115_v21  ;;  %vm2156_vm11 = vweird.f32 %v2150_v9 }
 0x317   :  { %v2135_v19 = vadd.f32 %v5812_v37, %v2134_v25  ;;  %2466 = vmatpush.bf16.msrb.mxu0 %v6986_v58  ;;  %vm2161_vm13 = vcmp.eq.f32.partialorder %v2160_v12, 8.507059e+37  ;;  %v8752_v12 = vld [vmem:[#allocation44_spill] sm:$0xff] }
 0x318   :  { %v2120_v20 = vsel %vm2119_vm6, %v5810_v31, %v2116_v54 }
 0x319   :  { %2478 = vmatpush.bf16.msra.mxu1 %v6981_v2  ;;  %v2125_v26 = vsel %vm2122_vm7, %v2124_v62, %v2120_v20  ;;  %v2139_v21 = vsel %vm2138_vm8, %v5812_v37, %v2135_v19  ;;  %v2163_v19 = vor.u32 1.1754944e-38, %v2162_v15  ;;  %v8750_v15 = vld [vmem:[#allocation42_spill] sm:$0xff] }
 0x31a   :  { %2491 = vmatpush.bf16.msra.mxu2 %v7030_v14  ;;  %2504 = vmatpush.bf16.msra.mxu3 %v7032_v18  ;;  %v2144_v44 = vsel %vm2141_vm9, %v2143_v61, %v2139_v21  ;;  %v2167_v59 = vmul.f32 %v5816_v46, %v2125_v26 }
 0x31b   :  { %v2166_v3 = vmul.f32 0.0, %v2144_v44  ;;  %2467 = vmatpush.bf16.msrb.mxu0 %v6992_v11  ;;  %v5818_v54 = vpop.eup %5817  ;;  %v8744_v44 = vld [vmem:[#allocation30_spill] sm:$0xff] }
 0x31c   :  { %v2152_v31 = vmul.f32 %v5818_v54, %v2150_v9  ;;  %vm2157_vm10 = vweird.f32 %v5818_v54  ;;  %v8743_v9 = vld [vmem:[#allocation29_spill] sm:$0xff] }
 0x31d   :  { %2479 = vmatpush.bf16.msra.mxu1 %v6988_v5  ;;  %v7370_v4 = vadd.f32 %v2167_v59, %v2166_v3  ;;  %vm2158_vm12 = vmor %vm2156_vm11, %vm2157_vm10  ;;  %v8745_v59 = vld [vmem:[#allocation33_spill] sm:$0xff]  ;;  %v8746_v3 = vld [vmem:[#allocation36_spill] sm:$0xff] }
 0x31e   :  { %2492 = vmatpush.bf16.msra.mxu2 %v7037_v48  ;;  %2505 = vmatpush.bf16.msra.mxu3 %v7039_v38  ;;  %v2153_v37 = vsub.f32 1.0, %v2152_v31  ;;  %v8748_v31 = vld [vmem:[#allocation38_spill] sm:$0xff] }
 0x31f   :  { %5819 = vtanh.f32 %v7370_v4 }
 0x320   :  { %v2154_v25 = vmul.f32 %v5818_v54, %v2153_v37  ;;  %v8749_v37 = vld [vmem:[#allocation41_spill] sm:$0xff] }
 0x321   :  { %2480 = vmatpush.bf16.msra.mxu1 %v6994_v22 }
 0x322   :  { %2493 = vmatpush.bf16.msra.mxu2 %v7044_v49  ;;  %2506 = vmatpush.bf16.msra.mxu3 %v7046_v52  ;;  %v2155_v62 = vadd.f32 %v5818_v54, %v2154_v25  ;;  %v8751_v25 = vld [vmem:[#allocation43_spill] sm:$0xff] }
 0x324   :  { %v2159_v61 = vsel %vm2158_vm12, %v5818_v54, %v2155_v62  ;;  %v8747_v54 = vld [vmem:[#allocation37_spill] sm:$0xff] }
 0x325   :  { %v5820_v20 = vpop.eup %5819  ;;  %v2164_v46 = vsel %vm2161_vm13, %v2163_v19, %v2159_v61  ;;  %v8753_v62 = vld [vmem:[#allocation45_spill] sm:$0xff]  ;;  %v8754_v19 = vld [vmem:[#allocation48_spill] sm:$0xff] }
 0x326   :  { %v2170_v26 = vmul.f32 %v5820_v20, %v2164_v46  ;;  %v8755_v61 = vld [vmem:[#allocation49_spill] sm:$0xff]  ;;  %v8756_v20 = vld [vmem:[#allocation50_spill] sm:$0xff]  ;;  %v8757_v46 = vld [vmem:[#allocation51_spill] sm:$0xff] }
 0x328   :  { %v2171_v21 = vpack.c.bf16 %v2170_v26, %v2170_v26  ;;  %v8758_v26 = vld [vmem:[#allocation54_spill] sm:$0xff] }
 0x32a   :  { %2340 = vmatmul.bf16.vlgmr.msra.gmra.mxu0 %v2171_v21  ;;  %2353 = vmatmul.bf16.vlgmr.msrb.gmra.mxu1 %v2171_v21 }
 0x32b   :  { %2366 = vmatmul.bf16.vlgmr.msrb.gmra.mxu2 %v2171_v21  ;;  %2379 = vmatmul.bf16.vlgmr.msrb.gmra.mxu3 %v2171_v21 }
 0x32c   :  { %2517 = vmatpush.bf16.msra.mxu0 %v7066_v16  ;;  %2530 = vmatpush.bf16.msrb.mxu1 %v7068_v6 }
 0x32d   :  { %2543 = vmatpush.bf16.msrb.mxu2 %v7079_v33  ;;  %2556 = vmatpush.bf16.msrb.mxu3 %v7085_v43 }
 0x330   :  { %2518 = vmatpush.bf16.msra.mxu0 %v7095_v56  ;;  %2531 = vmatpush.bf16.msrb.mxu1 %v8743_v9 }
 0x331   :  { %2544 = vmatpush.bf16.msrb.mxu2 %v8744_v44  ;;  %2557 = vmatpush.bf16.msrb.mxu3 %v8745_v59 }
 0x334   :  { %2519 = vmatpush.bf16.msra.mxu0 %v8746_v3  ;;  %2532 = vmatpush.bf16.msrb.mxu1 %v8747_v54 }
 0x335   :  { %2545 = vmatpush.bf16.msrb.mxu2 %v8748_v31  ;;  %2558 = vmatpush.bf16.msrb.mxu3 %v8749_v37  ;;  %v8763_v37 = vld [vmem:[#allocation61_spill] sm:$0xff] }
 0x338   :  { %2520 = vmatpush.bf16.msra.mxu0 %v8750_v15  ;;  %2533 = vmatpush.bf16.msrb.mxu1 %v8751_v25  ;;  %v8759_v15 = vld [vmem:[#allocation55_spill] sm:$0xff]  ;;  %v8760_v25 = vld [vmem:[#allocation56_spill] sm:$0xff] }
 0x339   :  { %2546 = vmatpush.bf16.msrb.mxu2 %v8752_v12  ;;  %2559 = vmatpush.bf16.msrb.mxu3 %v8753_v62  ;;  %v8761_v12 = vld [vmem:[#allocation57_spill] sm:$0xff]  ;;  %v8762_v62 = vld [vmem:[#allocation60_spill] sm:$0xff] }
 0x33a   :  { %2468 = vmatmul.bf16.vlgmr.msrb.gmra.mxu0 %v2171_v21  ;;  %2481 = vmatmul.bf16.vlgmr.msra.gmra.mxu1 %v2171_v21 }
 0x33b   :  { %2494 = vmatmul.bf16.vlgmr.msra.gmra.mxu2 %v2171_v21  ;;  %2507 = vmatmul.bf16.vlgmr.msra.gmra.mxu3 %v2171_v21  ;;  %v8764_v21 = vld [vmem:[#allocation62_spill] sm:$0xff] }
 0x33c   :  { %2521 = vmatpush.bf16.msra.mxu0 %v8754_v19  ;;  %2534 = vmatpush.bf16.msrb.mxu1 %v8755_v61  ;;  %v8765_v19 = vld [vmem:[#allocation65_spill] sm:$0xff]  ;;  %v8766_v61 = vld [vmem:[#allocation66_spill] sm:$0xff] }
 0x33d   :  { %2547 = vmatpush.bf16.msrb.mxu2 %v8756_v20  ;;  %2560 = vmatpush.bf16.msrb.mxu3 %v8757_v46  ;;  %v8767_v20 = vld [vmem:[#allocation67_spill] sm:$0xff]  ;;  %v8768_v46 = vld [vmem:[#allocation68_spill] sm:$0xff] }
 0x340   :  { %2522 = vmatpush.bf16.msra.mxu0 %v8758_v26  ;;  %2535 = vmatpush.bf16.msrb.mxu1 %v8759_v15  ;;  %v8769_v26 = vld [vmem:[#allocation69_spill] sm:$0xff]  ;;  %v8770_v15 = vld [vmem:[#allocation72_spill] sm:$0xff] }
 0x341   :  { %2548 = vmatpush.bf16.msrb.mxu2 %v8760_v25  ;;  %2561 = vmatpush.bf16.msrb.mxu3 %v8761_v12  ;;  %v8771_v25 = vld [vmem:[#allocation73_spill] sm:$0xff]  ;;  %v8772_v12 = vld [vmem:[#allocation74_spill] sm:$0xff] }
 0x344   :  { %2523 = vmatpush.bf16.msra.mxu0 %v8762_v62  ;;  %2536 = vmatpush.bf16.msrb.mxu1 %v8763_v37  ;;  %v8773_v62 = vld [vmem:[#allocation75_spill] sm:$0xff]  ;;  %v8774_v37 = vld [vmem:[#allocation76_spill] sm:$0xff] }
 0x345   :  { %2549 = vmatpush.bf16.msrb.mxu2 %v8764_v21  ;;  %2562 = vmatpush.bf16.msrb.mxu3 %v8765_v19  ;;  %v8775_v21 = vld [vmem:[#allocation77_spill] sm:$0xff]  ;;  %v8776_v19 = vld [vmem:[#allocation80_spill] sm:$0xff] }
 0x348   :  { %2524 = vmatpush.bf16.msra.mxu0 %v8766_v61  ;;  %2537 = vmatpush.bf16.msrb.mxu1 %v8767_v20  ;;  %v8777_v61 = vld [vmem:[#allocation81_spill] sm:$0xff]  ;;  %v8778_v20 = vld [vmem:[#allocation82_spill] sm:$0xff] }
 0x349   :  { %2550 = vmatpush.bf16.msrb.mxu2 %v8768_v46  ;;  %2563 = vmatpush.bf16.msrb.mxu3 %v8769_v26  ;;  %v8779_v46 = vld [vmem:[#allocation83_spill] sm:$0xff]  ;;  %v8780_v26 = vld [vmem:[#allocation84_spill] sm:$0xff] }
 0x34c   :  { %2633 = vmatpush.bf16.msrb.mxu0 %v8770_v15  ;;  %2646 = vmatpush.bf16.msra.mxu1 %v8771_v25  ;;  %v8781_v15 = vld [vmem:[#allocation85_spill] sm:$0xff]  ;;  %v8782_v25 = vld [vmem:[#allocation88_spill] sm:$0xff] }
 0x34d   :  { %2659 = vmatpush.bf16.msra.mxu2 %v8772_v12  ;;  %2672 = vmatpush.bf16.msra.mxu3 %v8773_v62  ;;  %v8783_v12 = vld [vmem:[#allocation89_spill] sm:$0xff]  ;;  %v7423_v62 = vpop.f32.mrf.mxu0 }
 0x34e   :  { %8784 = vst [vmem:[#allocation110_spill] sm:$0xff] %v7423_v62 }
 0x350   :  { %2634 = vmatpush.bf16.msrb.mxu0 %v8774_v37  ;;  %2647 = vmatpush.bf16.msra.mxu1 %v8775_v21  ;;  %v8785_v37 = vld [vmem:[#allocation90_spill] sm:$0xff]  ;;  %v8786_v21 = vld [vmem:[#allocation91_spill] sm:$0xff] }
 0x351   :  { %2660 = vmatpush.bf16.msra.mxu2 %v8776_v19  ;;  %2673 = vmatpush.bf16.msra.mxu3 %v8777_v61  ;;  %v7427_v19 = vpop.f32.mrf.mxu1  ;;  %v8788_v61 = vld [vmem:[#allocation92_spill] sm:$0xff] }
 0x352   :  { %8787 = vst [vmem:[#allocation111_spill] sm:$0xff] %v7427_v19 }
 0x354   :  { %2635 = vmatpush.bf16.msrb.mxu0 %v8778_v20  ;;  %2648 = vmatpush.bf16.msra.mxu1 %v8779_v46  ;;  %v8789_v20 = vld [vmem:[#allocation93_spill] sm:$0xff]  ;;  %v8790_v46 = vld [vmem:[#allocation94_spill] sm:$0xff] }
 0x355   :  { %2661 = vmatpush.bf16.msra.mxu2 %v8780_v26  ;;  %2674 = vmatpush.bf16.msra.mxu3 %v8781_v15  ;;  %v8791_v26 = vld [vmem:[#allocation97_spill] sm:$0xff]  ;;  %v8792_v15 = vld [vmem:[#allocation98_spill] sm:$0xff] }
 0x358   :  { %2636 = vmatpush.bf16.msrb.mxu0 %v8782_v25  ;;  %2649 = vmatpush.bf16.msra.mxu1 %v8783_v12  ;;  %v8793_v25 = vld [vmem:[#allocation99_spill] sm:$0xff]  ;;  %v2065_v12 = vpop.f32.mrf.mxu0 }
 0x359   :  { %2662 = vmatpush.bf16.msra.mxu2 %v8785_v37  ;;  %2675 = vmatpush.bf16.msra.mxu3 %v8786_v21  ;;  %v2078_v62 = vpop.f32.mrf.mxu1 }
 0x35c   :  { %2637 = vmatpush.bf16.msrb.mxu0 %v8788_v61  ;;  %2650 = vmatpush.bf16.msra.mxu1 %v8789_v20 }
 0x35d   :  { %2663 = vmatpush.bf16.msra.mxu2 %v8790_v46  ;;  %2676 = vmatpush.bf16.msra.mxu3 %v8791_v26 }
 0x360   :  { %2638 = vmatpush.bf16.msrb.mxu0 %v8792_v15  ;;  %2651 = vmatpush.bf16.msra.mxu1 %v8793_v25  ;;  %v2067_v19 = vpop.f32.mrf.mxu0  ;;  %v2104_v25 = vpop.f32.mrf.mxu3 }
 0x361   :  { %2664 = vmatpush.bf16.msra.mxu2 %v7300_v0  ;;  %2677 = vmatpush.bf16.msra.mxu3 %v7303_v36  ;;  %v2080_v36 = vpop.f32.mrf.mxu1  ;;  %v2091_v0 = vpop.f32.mrf.mxu2 }
 0x364   :  { %2639 = vmatpush.bf16.msrb.mxu0 %v7307_v53  ;;  %2652 = vmatpush.bf16.msra.mxu1 %v7314_v55 }
 0x365   :  { %2665 = vmatpush.bf16.msra.mxu2 %v7316_v45  ;;  %2678 = vmatpush.bf16.msra.mxu3 %v7319_v10  ;;  %v1679_v45 = vld [vmem:[%s8495_s12] sm:$0xf] }
 0x366   :  { %v7448_v55 = vperm.slane %v1679_v45, 0  ;;  %v7450_v10 = vperm.slane %v1679_v45, 1 }
 0x368   :  { %2640 = vmatpush.bf16.msrb.mxu0 %v7323_v50  ;;  %2653 = vmatpush.bf16.msra.mxu1 %v7326_v60  ;;  %v2106_v15 = vpop.f32.mrf.mxu3  ;;  %8794 = vst [vmem:[#allocation112_spill] sm:$0xff] %v7448_v55 }
 0x369   :  { %2666 = vmatpush.bf16.msra.mxu2 %v7328_v28  ;;  %2679 = vmatpush.bf16.msra.mxu3 %v7331_v27  ;;  %v2093_v53 = vpop.f32.mrf.mxu2  ;;  %8795 = vst [vmem:[#allocation113_spill] sm:$0xff] %v7450_v10  ;;  %v7454_v15 = vperm.slane %v1679_v45, 3 }
 0x36b   :  { %8796 = vst [vmem:[#allocation114_spill] sm:$0xff] %v7454_v15 }
 0x3a7   :  { %v2341_v50 = vpop.f32.mrf.mxu0  ;;  %v2354_v60 = vpop.f32.mrf.mxu1 }
 0x3a8   :  { %v2342_v19 = vadd.f32 %v2341_v50, %v2065_v12  ;;  %v2355_v26 = vadd.f32 %v2354_v60, %v2078_v62 }
 0x3aa   :  { %v2393_v28 = vadd.f32 %v7448_v55, %v2342_v19  ;;  %v2394_v27 = vadd.f32 %v7450_v10, %v2355_v26  ;;  %v8797_v26 = vld [vmem:[#allocation31_spill] sm:$0xff]  ;;  %v8798_v19 = vld [vmem:[#allocation21_spill] sm:$0xff]  ;;  %v8799_v10 = vld [vmem:[#allocation32_spill] sm:$0xff] }
 0x3ab   :  { %v8800_v55 = vld [vmem:[#allocation22_spill] sm:$0xff] }
 0x3ac   :  { %v5488_v36 = vmul.f32 -1.442695, %v2393_v28  ;;  %v5489_v46 = vmul.f32 -1.442695, %v2394_v27 }
 0x3ae   :  { %5821 = vpow2.f32 %v5488_v36  ;;  %v2367_v53 = vpop.f32.mrf.mxu2  ;;  %v2380_v20 = vpop.f32.mrf.mxu3  ;;  %v1479_v36 = vadd.f32 %v8798_v19, %v8797_v26 }
 0x3af   :  { %5823 = vpow2.f32 %v5489_v46  ;;  %v2381_v61 = vadd.f32 %v2380_v20, %v2104_v25  ;;  %v2343_v21 = vpop.f32.mrf.mxu0  ;;  %v2356_v37 = vpop.f32.mrf.mxu1  ;;  %v1508_v46 = vadd.f32 %v8800_v55, %v8799_v10  ;;  %v8802_v10 = vld [vmem:[#allocation20_spill] sm:$0xff] }
 0x3b0   :  { %v1566_v26 = vadd.f32 %v8802_v10, %v7083_v42 }
 0x3b1   :  { %v2396_v31 = vadd.f32 %v7454_v15, %v2381_v61  ;;  %v7464_v61 = vperm.slane %v1679_v45, 2 }
 0x3b3   :  { %v5490_v54 = vmul.f32 -1.442695, %v2396_v31  ;;  %v2368_v31 = vadd.f32 %v2367_v53, %v2091_v0  ;;  %8801 = vst [vmem:[#allocation21_spill] sm:$0xff] %v7464_v61 }
 0x3b4   :  { %v5822_v50 = vpop.eup %5821 }
 0x3b5   :  { %v5824_v60 = vpop.eup %5823  ;;  %v2400_v12 = vadd.f32 1.0, %v5822_v50  ;;  %5825 = vpow2.f32 %v5490_v54  ;;  %v2395_v19 = vadd.f32 %v7464_v61, %v2368_v31 }
 0x3b6   :  { %v7457_v62 = vadd.f32 1.0, %v5824_v60  ;;  %v2369_v28 = vpop.f32.mrf.mxu2  ;;  %v2382_v27 = vpop.f32.mrf.mxu3 }
 0x3b7   :  { %5827 = vrcp.f32 %v2400_v12  ;;  %v2469_v25 = vpop.f32.mrf.mxu0  ;;  %v2482_v37 = vpop.f32.mrf.mxu1  ;;  %v2412_v31 = vand.u32 2147483648, %v2400_v12  ;;  %vm2406_vm15 = vweird.f32 %v2400_v12 }
 0x3b8   :  { %5829 = vrcp.f32 %v7457_v62  ;;  %v2512_v20 = vadd.f32 %v2469_v25, %v1479_v36  ;;  %v2513_v54 = vadd.f32 %v2482_v37, %v1508_v46  ;;  %v2429_v3 = vand.u32 2147483647, %v7457_v62 }
 0x3b9   :  { %vm2425_vm1 = vweird.f32 %v7457_v62 }
 0x3ba   :  { %v5491_v50 = vmul.f32 -1.442695, %v2512_v20  ;;  %v5492_v60 = vmul.f32 -1.442695, %v2513_v54  ;;  %v2410_v54 = vand.u32 2147483647, %v2400_v12 }
 0x3bb   :  { %v5826_v21 = vpop.eup %5825  ;;  %vm2430_vm5 = vcmp.eq.f32.partialorder %v2429_v3, 8.507059e+37 }
 0x3bc   :  { %v7466_v28 = vadd.f32 1.0, %v5826_v21  ;;  %5831 = vpow2.f32 %v5491_v50  ;;  %v2431_v21 = vand.u32 2147483648, %v7457_v62  ;;  %vm2411_vm3 = vcmp.eq.f32.partialorder %v2410_v54, 8.507059e+37 }
 0x3bd   :  { %v5828_v27 = vpop.eup %5827 }
 0x3be   :  { %v5830_v55 = vpop.eup %5829  ;;  %v2402_v15 = vmul.f32 %v5828_v27, %v2400_v12  ;;  %5833 = vrcp.f32 %v7466_v28  ;;  %v2495_v0 = vpop.f32.mrf.mxu2  ;;  %vm2407_vm14 = vweird.f32 %v5828_v27  ;;  %v2432_v12 = vor.u32 1.1754944e-38, %v2431_v21 }
 0x3bf   :  { %v2508_v45 = vpop.f32.mrf.mxu3  ;;  %v2421_v53 = vmul.f32 %v5830_v55, %v7457_v62  ;;  %5835 = vpow2.f32 %v5492_v60  ;;  %v2471_v36 = vpop.f32.mrf.mxu0  ;;  %vm2426_vm0 = vweird.f32 %v5830_v55  ;;  %vm2408_vm2 = vmor %vm2406_vm15, %vm2407_vm14  ;;  %vm2445_vm7 = vweird.f32 %v7466_v28 }
 0x3c0   :  { %v2484_v46 = vpop.f32.mrf.mxu1  ;;  %v2403_v25 = vsub.f32 1.0, %v2402_v15  ;;  %v2515_v37 = vadd.f32 %v2508_v45, %v1566_v26  ;;  %5837 = vtanh.f32 %v2395_v19  ;;  %v2413_v45 = vor.u32 1.1754944e-38, %v2412_v31  ;;  %vm2427_vm4 = vmor %vm2425_vm1, %vm2426_vm0 }
 0x3c1   :  { %v2422_v20 = vsub.f32 1.0, %v2421_v53 }
 0x3c2   :  { %v2404_v50 = vmul.f32 %v5828_v27, %v2403_v25  ;;  %v5493_v10 = vmul.f32 -1.442695, %v2515_v37  ;;  %v5832_v42 = vpop.eup %5831 }
 0x3c3   :  { %v2423_v61 = vmul.f32 %v5830_v55, %v2422_v20  ;;  %v7478_v26 = vadd.f32 1.0, %v5832_v42 }
 0x3c4   :  { %v7475_v60 = vpop.eup %5833  ;;  %v2405_v15 = vadd.f32 %v5828_v27, %v2404_v50  ;;  %5839 = vpow2.f32 %v5493_v10 }
 0x3c5   :  { %v5836_v19 = vpop.eup %5835  ;;  %v2424_v53 = vadd.f32 %v5830_v55, %v2423_v61  ;;  %v2441_v36 = vmul.f32 %v7475_v60, %v7466_v28  ;;  %5841 = vrcp.f32 %v7478_v26  ;;  %vm2446_vm6 = vweird.f32 %v7475_v60 }
 0x3c6   :  { %v2409_v46 = vsel %vm2408_vm2, %v5828_v27, %v2405_v15  ;;  %v7484_v25 = vadd.f32 1.0, %v5836_v19  ;;  %v2497_v62 = vpop.f32.mrf.mxu2  ;;  %v5838_v37 = vpop.eup %5837  ;;  %v8803_v15 = vld [vmem:[#allocation19_spill] sm:$0xff]  ;;  %vm7503_vm8 = vmor %vm2445_vm7, %vm2446_vm6  ;;  %vm2578_vm10 = vweird.f32 %v7478_v26 }
 0x3c7   :  { %v2510_v42 = vpop.f32.mrf.mxu3  ;;  %v2414_v20 = vsel %vm2411_vm3, %v2413_v45, %v2409_v46  ;;  %v2428_v50 = vsel %vm2427_vm4, %v5830_v55, %v2424_v53  ;;  %v2442_v54 = vsub.f32 1.0, %v2441_v36  ;;  %v1537_v59 = vadd.f32 %v8803_v15, %v7081_v39 }
 0x3c8   :  { %v2433_v31 = vsel %vm2430_vm5, %v2432_v12, %v2428_v50  ;;  %v2456_v61 = vmul.f32 %v5838_v37, %v2414_v20  ;;  %5843 = vrcp.f32 %v7484_v25  ;;  %v2451_v55 = vand.u32 2147483648, %v7466_v28 }
 0x3c9   :  { %v2455_v10 = vmul.f32 0.0, %v2433_v31  ;;  %v2443_v27 = vmul.f32 %v7475_v60, %v2442_v54  ;;  %v2514_v3 = vadd.f32 %v2495_v0, %v1537_v59  ;;  %v2449_v12 = vand.u32 2147483647, %v7466_v28 }
 0x3ca   :  { %v5840_v21 = vpop.eup %5839  ;;  %v2584_v0 = vand.u32 2147483648, %v7478_v26  ;;  %v2452_v50 = vor.u32 1.1754944e-38, %v2451_v55  ;;  %v2582_v28 = vand.u32 2147483647, %v7478_v26  ;;  %vm2597_vm13 = vweird.f32 %v7484_v25 }
 0x3cb   :  { %v7490_v19 = vadd.f32 %v2456_v61, %v2455_v10  ;;  %v7492_v62 = vadd.f32 1.0, %v5840_v21  ;;  %v5842_v42 = vpop.eup %5841  ;;  %v2444_v45 = vadd.f32 %v7475_v60, %v2443_v27  ;;  %v2603_v61 = vand.u32 2147483648, %v7484_v25 }
 0x3cc   :  { %v2574_v53 = vmul.f32 %v5842_v42, %v7478_v26  ;;  %vm2579_vm9 = vweird.f32 %v5842_v42  ;;  %v2601_v10 = vand.u32 2147483647, %v7484_v25  ;;  %vm2450_vm11 = vcmp.eq.f32.partialorder %v2449_v12, 8.507059e+37 }
 0x3cd   :  { %5845 = vtanh.f32 %v7490_v19  ;;  %v2448_v20 = vsel %vm7503_vm8, %v7475_v60, %v2444_v45  ;;  %vm2580_vm14 = vmor %vm2578_vm10, %vm2579_vm9  ;;  %v2585_v60 = vor.u32 1.1754944e-38, %v2584_v0  ;;  %vm2583_vm15 = vcmp.eq.f32.partialorder %v2582_v28, 8.507059e+37 }
 0x3ce   :  { %v5844_v36 = vpop.eup %5843  ;;  %5847 = vrcp.f32 %v7492_v62  ;;  %v2575_v46 = vsub.f32 1.0, %v2574_v53  ;;  %v2604_v59 = vor.u32 1.1754944e-38, %v2603_v61  ;;  %vm2602_vm1 = vcmp.eq.f32.partialorder %v2601_v10, 8.507059e+37 }
 0x3cf   :  { %v2593_v37 = vmul.f32 %v5844_v36, %v7484_v25  ;;  %5849 = vtanh.f32 %v2514_v3  ;;  %vm2598_vm12 = vweird.f32 %v5844_v36  ;;  %v2453_v3 = vsel %vm2450_vm11, %v2452_v50, %v2448_v20 }
 0x3d0   :  { %v2576_v31 = vmul.f32 %v5842_v42, %v2575_v46  ;;  %vm2599_vm0 = vmor %vm2597_vm13, %vm2598_vm12  ;;  %v2623_v28 = vand.u32 2147483648, %v7492_v62  ;;  %vm2617_vm3 = vweird.f32 %v7492_v62 }
 0x3d1   :  { %v2594_v54 = vsub.f32 1.0, %v2593_v37 }
 0x3d2   :  { %v2577_v15 = vadd.f32 %v5842_v42, %v2576_v31  ;;  %v2624_v61 = vor.u32 1.1754944e-38, %v2623_v28  ;;  %v8824_v28 = vld [vmem:[#allocation56_spill] sm:$0xff] }
 0x3d3   :  { %v5846_v27 = vpop.eup %5845  ;;  %v2595_v21 = vmul.f32 %v5844_v36, %v2594_v54 }
 0x3d4   :  { %v5848_v53 = vpop.eup %5847  ;;  %v2459_v55 = vmul.f32 %v5846_v27, %v2453_v3  ;;  %v2581_v45 = vsel %vm2580_vm14, %v5842_v42, %v2577_v15  ;;  %v8806_v15 = vld [vmem:[#allocation16_spill] sm:$0xff]  ;;  %v8807_v3 = vld [vmem:[#allocation18_spill] sm:$0xff] }
 0x3d5   :  { %v2596_v46 = vadd.f32 %v5844_v36, %v2595_v21  ;;  %v2613_v37 = vmul.f32 %v5848_v53, %v7492_v62  ;;  %v5850_v26 = vpop.eup %5849  ;;  %v2586_v12 = vsel %vm2583_vm15, %v2585_v60, %v2581_v45  ;;  %vm2618_vm2 = vweird.f32 %v5848_v53  ;;  %v8809_v60 = vld [vmem:[#allocation33_spill] sm:$0xff] }
 0x3d6   :  { %v2516_v39 = vpack.c.bf16 %v2459_v55, %v2459_v55  ;;  %v2628_v31 = vmul.f32 %v5850_v26, %v2586_v12  ;;  %vm2619_vm4 = vmor %vm2617_vm3, %vm2618_vm2  ;;  %v8810_v55 = vld [vmem:[#allocation36_spill] sm:$0xff]  ;;  %v8811_v45 = vld [vmem:[#allocation37_spill] sm:$0xff] }
 0x3d7   :  { %v2600_v54 = vsel %vm2599_vm0, %v5844_v36, %v2596_v46  ;;  %v2614_v20 = vsub.f32 1.0, %v2613_v37  ;;  %v8812_v46 = vld [vmem:[#allocation38_spill] sm:$0xff]  ;;  %v8813_v37 = vld [vmem:[#allocation41_spill] sm:$0xff]  ;;  %v8816_v12 = vld [vmem:[#allocation44_spill] sm:$0xff] }
 0x3d8   :  { %v2605_v50 = vsel %vm2602_vm1, %v2604_v59, %v2600_v54  ;;  %2525 = vmatmul.bf16.vlgmr.msra.gmra.mxu0 %v2516_v39  ;;  %2538 = vmatmul.bf16.vlgmr.msrb.gmra.mxu1 %v2516_v39  ;;  %v8814_v26 = vld [vmem:[#allocation42_spill] sm:$0xff]  ;;  %v8815_v59 = vld [vmem:[#allocation43_spill] sm:$0xff]  ;;  %v8817_v54 = vld [vmem:[#allocation45_spill] sm:$0xff] }
 0x3d9   :  { %v2627_v25 = vmul.f32 %v2605_v50, %v7370_v4  ;;  %v2615_v0 = vmul.f32 %v5848_v53, %v2614_v20  ;;  %2551 = vmatmul.bf16.vlgmr.msrb.gmra.mxu2 %v2516_v39  ;;  %2564 = vmatmul.bf16.vlgmr.msrb.gmra.mxu3 %v2516_v39  ;;  %v2621_v39 = vand.u32 2147483647, %v7492_v62  ;;  %v8819_v20 = vld [vmem:[#allocation49_spill] sm:$0xff]  ;;  %v8820_v50 = vld [vmem:[#allocation50_spill] sm:$0xff] }
 0x3da   :  { %2752 = vmatpush.bf16.msra.mxu0 %v6944_v13  ;;  %2765 = vmatpush.bf16.msrb.mxu1 %v6941_v8 }
 0x3db   :  { %v7520_v42 = vadd.f32 %v2628_v31, %v2627_v25  ;;  %2778 = vmatpush.bf16.msrb.mxu2 %v6996_v24  ;;  %2791 = vmatpush.bf16.msrb.mxu3 %v6998_v34  ;;  %v2616_v36 = vadd.f32 %v5848_v53, %v2615_v0  ;;  %vm2622_vm5 = vcmp.eq.f32.partialorder %v2621_v39, 8.507059e+37  ;;  %v8818_v31 = vld [vmem:[#allocation48_spill] sm:$0xff]  ;;  %v8821_v25 = vld [vmem:[#allocation51_spill] sm:$0xff]  ;;  %v8822_v0 = vld [vmem:[#allocation54_spill] sm:$0xff] }
 0x3dc   :  { %v8825_v39 = vld [vmem:[#allocation57_spill] sm:$0xff] }
 0x3dd   :  { %5851 = vtanh.f32 %v7520_v42  ;;  %v2620_v4 = vsel %vm2619_vm4, %v5848_v53, %v2616_v36  ;;  %v8808_v53 = vld [vmem:[#allocation17_spill] sm:$0xff]  ;;  %v8823_v36 = vld [vmem:[#allocation55_spill] sm:$0xff] }
 0x3de   :  { %2753 = vmatpush.bf16.msra.mxu0 %v6950_v23  ;;  %2766 = vmatpush.bf16.msrb.mxu1 %v6946_v17  ;;  %v2625_v27 = vsel %vm2622_vm5, %v2624_v61, %v2620_v4  ;;  %v8826_v4 = vld [vmem:[#allocation60_spill] sm:$0xff]  ;;  %v8827_v61 = vld [vmem:[#allocation61_spill] sm:$0xff] }
 0x3df   :  { %2779 = vmatpush.bf16.msrb.mxu2 %v7004_v40  ;;  %2792 = vmatpush.bf16.msrb.mxu3 %v7006_v41 }
 0x3e2   :  { %2754 = vmatpush.bf16.msra.mxu0 %v6961_v35  ;;  %2767 = vmatpush.bf16.msrb.mxu1 %v6958_v30 }
 0x3e3   :  { %v5852_v10 = vpop.eup %5851  ;;  %2780 = vmatpush.bf16.msrb.mxu2 %v7011_v29  ;;  %2793 = vmatpush.bf16.msrb.mxu3 %v7013_v32 }
 0x3e4   :  { %v2631_v62 = vmul.f32 %v5852_v10, %v2625_v27  ;;  %v8828_v10 = vld [vmem:[#allocation62_spill] sm:$0xff]  ;;  %v8829_v27 = vld [vmem:[#allocation65_spill] sm:$0xff] }
 0x3e6   :  { %v2632_v21 = vpack.c.bf16 %v2631_v62, %v2631_v62  ;;  %2755 = vmatpush.bf16.msra.mxu0 %v6969_v47  ;;  %2768 = vmatpush.bf16.msrb.mxu1 %v8806_v15  ;;  %v8830_v62 = vld [vmem:[#allocation66_spill] sm:$0xff] }
 0x3e7   :  { %2781 = vmatpush.bf16.msrb.mxu2 %v7018_v63  ;;  %2794 = vmatpush.bf16.msrb.mxu3 %v8807_v3 }
 0x3e8   :  { %2641 = vmatmul.bf16.vlgmr.msrb.gmra.mxu0 %v2632_v21  ;;  %2654 = vmatmul.bf16.vlgmr.msra.gmra.mxu1 %v2632_v21 }
 0x3e9   :  { %2667 = vmatmul.bf16.vlgmr.msra.gmra.mxu2 %v2632_v21  ;;  %2680 = vmatmul.bf16.vlgmr.msra.gmra.mxu3 %v2632_v21 }
 0x3ea   :  { %2756 = vmatpush.bf16.msra.mxu0 %v8808_v53  ;;  %2769 = vmatpush.bf16.msrb.mxu1 %v6972_v51 }
 0x3eb   :  { %2782 = vmatpush.bf16.msrb.mxu2 %v7024_v57  ;;  %2795 = vmatpush.bf16.msrb.mxu3 %v7026_v7 }
 0x3ee   :  { %2757 = vmatpush.bf16.msra.mxu0 %v6979_v1  ;;  %2770 = vmatpush.bf16.msrb.mxu1 %v6981_v2 }
 0x3ef   :  { %2783 = vmatpush.bf16.msrb.mxu2 %v7030_v14  ;;  %2796 = vmatpush.bf16.msrb.mxu3 %v7032_v18 }
 0x3f2   :  { %2758 = vmatpush.bf16.msra.mxu0 %v6986_v58  ;;  %2771 = vmatpush.bf16.msrb.mxu1 %v6988_v5 }
 0x3f3   :  { %2784 = vmatpush.bf16.msrb.mxu2 %v7037_v48  ;;  %2797 = vmatpush.bf16.msrb.mxu3 %v7039_v38 }
 0x3f6   :  { %2759 = vmatpush.bf16.msra.mxu0 %v6992_v11  ;;  %2772 = vmatpush.bf16.msrb.mxu1 %v6994_v22 }
 0x3f7   :  { %2785 = vmatpush.bf16.msrb.mxu2 %v7044_v49  ;;  %2798 = vmatpush.bf16.msrb.mxu3 %v7046_v52 }
 0x3f9   :  { %2760 = vmatmul.bf16.vlgmr.msra.gmra.mxu0 %v2632_v21  ;;  %2773 = vmatmul.bf16.vlgmr.msrb.gmra.mxu1 %v2632_v21 }
 0x3fa   :  { %2809 = vmatpush.bf16.msrb.mxu0 %v7066_v16  ;;  %2822 = vmatpush.bf16.msra.mxu1 %v7068_v6 }
 0x3fb   :  { %2786 = vmatmul.bf16.vlgmr.msrb.gmra.mxu2 %v2632_v21  ;;  %2799 = vmatmul.bf16.vlgmr.msrb.gmra.mxu3 %v2632_v21  ;;  %v8831_v21 = vld [vmem:[#allocation67_spill] sm:$0xff] }
 0x3fc   :  { %2835 = vmatpush.bf16.msra.mxu2 %v7079_v33  ;;  %2848 = vmatpush.bf16.msra.mxu3 %v7085_v43 }
 0x3fe   :  { %2810 = vmatpush.bf16.msrb.mxu0 %v7095_v56  ;;  %2823 = vmatpush.bf16.msra.mxu1 %v8743_v9 }
 0x400   :  { %2836 = vmatpush.bf16.msra.mxu2 %v8744_v44  ;;  %2849 = vmatpush.bf16.msra.mxu3 %v8809_v60 }
 0x402   :  { %2811 = vmatpush.bf16.msrb.mxu0 %v8810_v55  ;;  %2824 = vmatpush.bf16.msra.mxu1 %v8811_v45 }
 0x404   :  { %2837 = vmatpush.bf16.msra.mxu2 %v8812_v46  ;;  %2850 = vmatpush.bf16.msra.mxu3 %v8813_v37 }
 0x406   :  { %2812 = vmatpush.bf16.msrb.mxu0 %v8814_v26  ;;  %2825 = vmatpush.bf16.msra.mxu1 %v8815_v59  ;;  %v8866_v59 = vld [vmem:[#allocation112_spill] sm:$0xff]  ;;  %v8867_v26 = vld [vmem:[#allocation113_spill] sm:$0xff] }
 0x408   :  { %2838 = vmatpush.bf16.msra.mxu2 %v8816_v12  ;;  %2851 = vmatpush.bf16.msra.mxu3 %v8817_v54 }
 0x40a   :  { %2813 = vmatpush.bf16.msrb.mxu0 %v8818_v31  ;;  %2826 = vmatpush.bf16.msra.mxu1 %v8819_v20 }
 0x40c   :  { %2839 = vmatpush.bf16.msra.mxu2 %v8820_v50  ;;  %2852 = vmatpush.bf16.msra.mxu3 %v8821_v25  ;;  %v8832_v25 = vld [vmem:[#allocation72_spill] sm:$0xff] }
 0x40e   :  { %2814 = vmatpush.bf16.msrb.mxu0 %v8822_v0  ;;  %2827 = vmatpush.bf16.msra.mxu1 %v8823_v36  ;;  %v8833_v0 = vld [vmem:[#allocation73_spill] sm:$0xff]  ;;  %v8834_v36 = vld [vmem:[#allocation68_spill] sm:$0xff] }
 0x410   :  { %2840 = vmatpush.bf16.msra.mxu2 %v8824_v28  ;;  %2853 = vmatpush.bf16.msra.mxu3 %v8825_v39  ;;  %v8835_v28 = vld [vmem:[#allocation69_spill] sm:$0xff]  ;;  %v8836_v39 = vld [vmem:[#allocation74_spill] sm:$0xff] }
 0x412   :  { %2815 = vmatpush.bf16.msrb.mxu0 %v8826_v4  ;;  %2828 = vmatpush.bf16.msra.mxu1 %v8827_v61  ;;  %v8837_v4 = vld [vmem:[#allocation75_spill] sm:$0xff]  ;;  %v8838_v61 = vld [vmem:[#allocation76_spill] sm:$0xff] }
 0x414   :  { %2841 = vmatpush.bf16.msra.mxu2 %v8828_v10  ;;  %2854 = vmatpush.bf16.msra.mxu3 %v8829_v27  ;;  %v8839_v10 = vld [vmem:[#allocation77_spill] sm:$0xff]  ;;  %v8840_v27 = vld [vmem:[#allocation80_spill] sm:$0xff] }
 0x416   :  { %2816 = vmatpush.bf16.msrb.mxu0 %v8830_v62  ;;  %2829 = vmatpush.bf16.msra.mxu1 %v8831_v21  ;;  %v8841_v62 = vld [vmem:[#allocation81_spill] sm:$0xff]  ;;  %v8842_v21 = vld [vmem:[#allocation82_spill] sm:$0xff] }
 0x418   :  { %2842 = vmatpush.bf16.msra.mxu2 %v8834_v36  ;;  %2855 = vmatpush.bf16.msra.mxu3 %v8835_v28  ;;  %v8845_v36 = vld [vmem:[#allocation85_spill] sm:$0xff]  ;;  %v8846_v28 = vld [vmem:[#allocation88_spill] sm:$0xff] }
 0x41a   :  { %2925 = vmatpush.bf16.msra.mxu0 %v8832_v25  ;;  %2938 = vmatpush.bf16.msrb.mxu1 %v8833_v0  ;;  %v8843_v25 = vld [vmem:[#allocation83_spill] sm:$0xff]  ;;  %v8844_v0 = vld [vmem:[#allocation84_spill] sm:$0xff] }
 0x41c   :  { %2951 = vmatpush.bf16.msrb.mxu2 %v8836_v39  ;;  %2964 = vmatpush.bf16.msrb.mxu3 %v8837_v4  ;;  %v8847_v39 = vld [vmem:[#allocation89_spill] sm:$0xff]  ;;  %v8848_v4 = vld [vmem:[#allocation90_spill] sm:$0xff] }
 0x41e   :  { %2926 = vmatpush.bf16.msra.mxu0 %v8838_v61  ;;  %2939 = vmatpush.bf16.msrb.mxu1 %v8839_v10  ;;  %v8849_v61 = vld [vmem:[#allocation91_spill] sm:$0xff]  ;;  %v8850_v10 = vld [vmem:[#allocation92_spill] sm:$0xff] }
 0x420   :  { %2952 = vmatpush.bf16.msrb.mxu2 %v8840_v27  ;;  %2965 = vmatpush.bf16.msrb.mxu3 %v8841_v62  ;;  %v8851_v27 = vld [vmem:[#allocation93_spill] sm:$0xff]  ;;  %v8852_v62 = vld [vmem:[#allocation94_spill] sm:$0xff] }
 0x422   :  { %2927 = vmatpush.bf16.msra.mxu0 %v8842_v21  ;;  %2940 = vmatpush.bf16.msrb.mxu1 %v8843_v25  ;;  %v8853_v21 = vld [vmem:[#allocation97_spill] sm:$0xff]  ;;  %v8854_v25 = vld [vmem:[#allocation98_spill] sm:$0xff] }
 0x424   :  { %2953 = vmatpush.bf16.msrb.mxu2 %v8844_v0  ;;  %2966 = vmatpush.bf16.msrb.mxu3 %v8845_v36  ;;  %v8855_v0 = vld [vmem:[#allocation99_spill] sm:$0xff]  ;;  %v8856_v36 = vld [vmem:[#allocation100_spill] sm:$0xff] }
 0x426   :  { %2928 = vmatpush.bf16.msra.mxu0 %v8846_v28  ;;  %2941 = vmatpush.bf16.msrb.mxu1 %v8847_v39  ;;  %v8857_v28 = vld [vmem:[#allocation101_spill] sm:$0xff]  ;;  %v8858_v39 = vld [vmem:[#allocation102_spill] sm:$0xff] }
 0x428   :  { %2954 = vmatpush.bf16.msrb.mxu2 %v8848_v4  ;;  %2967 = vmatpush.bf16.msrb.mxu3 %v8849_v61  ;;  %v8859_v4 = vld [vmem:[#allocation103_spill] sm:$0xff]  ;;  %v8860_v61 = vld [vmem:[#allocation104_spill] sm:$0xff] }
 0x42a   :  { %2929 = vmatpush.bf16.msra.mxu0 %v8850_v10  ;;  %2942 = vmatpush.bf16.msrb.mxu1 %v8851_v27  ;;  %v8861_v10 = vld [vmem:[#allocation105_spill] sm:$0xff]  ;;  %v8862_v27 = vld [vmem:[#allocation106_spill] sm:$0xff] }
 0x42c   :  { %2955 = vmatpush.bf16.msrb.mxu2 %v8852_v62  ;;  %2968 = vmatpush.bf16.msrb.mxu3 %v8853_v21  ;;  %v8863_v62 = vld [vmem:[#allocation107_spill] sm:$0xff]  ;;  %v8864_v21 = vld [vmem:[#allocation108_spill] sm:$0xff] }
 0x42e   :  { %2930 = vmatpush.bf16.msra.mxu0 %v8854_v25  ;;  %2943 = vmatpush.bf16.msrb.mxu1 %v8855_v0  ;;  %v8865_v25 = vld [vmem:[#allocation109_spill] sm:$0xff] }
 0x430   :  { %2956 = vmatpush.bf16.msrb.mxu2 %v8856_v36  ;;  %2969 = vmatpush.bf16.msrb.mxu3 %v8857_v28 }
 0x432   :  { %2931 = vmatpush.bf16.msra.mxu0 %v8858_v39  ;;  %2944 = vmatpush.bf16.msrb.mxu1 %v8859_v4 }
 0x434   :  { %2957 = vmatpush.bf16.msrb.mxu2 %v8860_v61  ;;  %2970 = vmatpush.bf16.msrb.mxu3 %v8861_v10 }
 0x436   :  { %2932 = vmatpush.bf16.msra.mxu0 %v8862_v27  ;;  %2945 = vmatpush.bf16.msrb.mxu1 %v8863_v62 }
 0x438   :  { %2958 = vmatpush.bf16.msrb.mxu2 %v8864_v21  ;;  %2971 = vmatpush.bf16.msrb.mxu3 %v8865_v25 }
 0x455   :  { %v2526_v0 = vpop.f32.mrf.mxu0  ;;  %v2539_v36 = vpop.f32.mrf.mxu1 }
 0x45c   :  { %v2552_v50 = vpop.f32.mrf.mxu2  ;;  %v2565_v28 = vpop.f32.mrf.mxu3 }
 0x45d   :  { %v2528_v20 = vpop.f32.mrf.mxu0  ;;  %v2541_v39 = vpop.f32.mrf.mxu1 }
 0x45e   :  { %v8868_v39 = vld [vmem:[#allocation114_spill] sm:$0xff] }
 0x464   :  { %v2554_v31 = vpop.f32.mrf.mxu2  ;;  %v2567_v4 = vpop.f32.mrf.mxu3 }
 0x465   :  { %v2642_v54 = vpop.f32.mrf.mxu0  ;;  %v2655_v61 = vpop.f32.mrf.mxu1 }
 0x466   :  { %v2643_v12 = vadd.f32 %v2642_v54, %v2526_v0  ;;  %v2656_v10 = vadd.f32 %v2655_v61, %v2539_v36 }
 0x468   :  { %v2685_v27 = vadd.f32 %v2643_v12, %v8866_v59  ;;  %v2686_v62 = vadd.f32 %v2656_v10, %v8867_v26 }
 0x46a   :  { %v5494_v37 = vmul.f32 -1.442695, %v2685_v27  ;;  %v5495_v21 = vmul.f32 -1.442695, %v2686_v62  ;;  %v8869_v27 = vld [vmem:[#allocation34_spill] sm:$0xff] }
 0x46c   :  { %5853 = vpow2.f32 %v5494_v37  ;;  %v2668_v25 = vpop.f32.mrf.mxu2  ;;  %v2681_v46 = vpop.f32.mrf.mxu3 }
 0x46d   :  { %5855 = vpow2.f32 %v5495_v21  ;;  %v2682_v45 = vadd.f32 %v2681_v46, %v2565_v28  ;;  %v2644_v55 = vpop.f32.mrf.mxu0  ;;  %v2657_v20 = vpop.f32.mrf.mxu1  ;;  %v2669_v10 = vadd.f32 %v2668_v25, %v2552_v50  ;;  %v8870_v46 = vld [vmem:[#allocation35_spill] sm:$0xff] }
 0x46f   :  { %v2688_v31 = vadd.f32 %v2682_v45, %v8868_v39 }
 0x471   :  { %v5496_v4 = vmul.f32 -1.442695, %v2688_v31 }
 0x472   :  { %v5854_v60 = vpop.eup %5853 }
 0x473   :  { %v5856_v44 = vpop.eup %5855  ;;  %v2692_v54 = vadd.f32 1.0, %v5854_v60  ;;  %5857 = vpow2.f32 %v5496_v4  ;;  %v8871_v60 = vld [vmem:[#allocation21_spill] sm:$0xff] }
 0x474   :  { %v2711_v0 = vadd.f32 1.0, %v5856_v44  ;;  %v2670_v12 = vpop.f32.mrf.mxu2  ;;  %v2683_v36 = vpop.f32.mrf.mxu3  ;;  %v2687_v4 = vadd.f32 %v2669_v10, %v8871_v60 }
 0x475   :  { %5859 = vrcp.f32 %v2692_v54  ;;  %v2704_v39 = vand.u32 2147483648, %v2692_v54  ;;  %vm2698_vm8 = vweird.f32 %v2692_v54 }
 0x476   :  { %5861 = vrcp.f32 %v2711_v0  ;;  %v2761_v61 = vpop.f32.mrf.mxu0  ;;  %v2774_v37 = vpop.f32.mrf.mxu1  ;;  %v2723_v26 = vand.u32 2147483648, %v2711_v0  ;;  %vm2717_vm9 = vweird.f32 %v2711_v0 }
 0x477   :  { %v2804_v62 = vadd.f32 %v2761_v61, %v8869_v27  ;;  %v2805_v55 = vadd.f32 %v2774_v37, %v8870_v46  ;;  %v8872_v27 = vld [vmem:[#allocation27_spill] sm:$0xff] }
 0x479   :  { %v5858_v28 = vpop.eup %5857  ;;  %v5497_v21 = vmul.f32 -1.442695, %v2804_v62  ;;  %v5498_v45 = vmul.f32 -1.442695, %v2805_v55 }
 0x47a   :  { %v7625_v20 = vadd.f32 1.0, %v5858_v28  ;;  %v2702_v28 = vand.u32 2147483647, %v2692_v54 }
 0x47b   :  { %v5860_v31 = vpop.eup %5859  ;;  %5863 = vpow2.f32 %v5497_v21 }
 0x47c   :  { %v5862_v44 = vpop.eup %5861  ;;  %v2694_v12 = vmul.f32 %v5860_v31, %v2692_v54  ;;  %5865 = vrcp.f32 %v7625_v20  ;;  %vm2699_vm6 = vweird.f32 %v5860_v31  ;;  %vm2703_vm11 = vcmp.eq.f32.partialorder %v2702_v28, 8.507059e+37 }
 0x47d   :  { %v2713_v36 = vmul.f32 %v5862_v44, %v2711_v0  ;;  %5867 = vpow2.f32 %v5498_v45  ;;  %vm2718_vm7 = vweird.f32 %v5862_v44  ;;  %v2721_v45 = vand.u32 2147483647, %v2711_v0  ;;  %vm2700_vm10 = vmor %vm2698_vm8, %vm2699_vm6 }
 0x47e   :  { %v2787_v50 = vpop.f32.mrf.mxu2  ;;  %v2800_v25 = vpop.f32.mrf.mxu3  ;;  %v2695_v61 = vsub.f32 1.0, %v2694_v12  ;;  %5869 = vtanh.f32 %v2687_v4  ;;  %v2705_v4 = vor.u32 1.1754944e-38, %v2704_v39  ;;  %vm2719_vm12 = vmor %vm2717_vm9, %vm2718_vm7  ;;  %vm2737_vm15 = vweird.f32 %v7625_v20 }
 0x47f   :  { %v2807_v37 = vadd.f32 %v2800_v25, %v8872_v27  ;;  %v2763_v46 = vpop.f32.mrf.mxu0  ;;  %v2776_v62 = vpop.f32.mrf.mxu1  ;;  %v2714_v55 = vsub.f32 1.0, %v2713_v36  ;;  %vm2722_vm13 = vcmp.eq.f32.partialorder %v2721_v45, 8.507059e+37  ;;  %v8873_v45 = vld [vmem:[#allocation26_spill] sm:$0xff] }
 0x480   :  { %v2696_v10 = vmul.f32 %v5860_v31, %v2695_v61 }
 0x481   :  { %v5499_v21 = vmul.f32 -1.442695, %v2807_v37  ;;  %v5864_v60 = vpop.eup %5863  ;;  %v2715_v59 = vmul.f32 %v5862_v44, %v2714_v55  ;;  %v2724_v37 = vor.u32 1.1754944e-38, %v2723_v26 }
 0x482   :  { %v7630_v9 = vpop.eup %5865  ;;  %v2697_v12 = vadd.f32 %v5860_v31, %v2696_v10  ;;  %v7632_v25 = vadd.f32 1.0, %v5864_v60 }
 0x483   :  { %5871 = vpow2.f32 %v5499_v21  ;;  %v5868_v36 = vpop.eup %5867  ;;  %v2716_v27 = vadd.f32 %v5862_v44, %v2715_v59  ;;  %v2733_v61 = vmul.f32 %v7630_v9, %v7625_v20  ;;  %vm2738_vm14 = vweird.f32 %v7630_v9 }
 0x484   :  { %v2701_v46 = vsel %vm2700_vm10, %v5860_v31, %v2697_v12  ;;  %5873 = vrcp.f32 %v7632_v25  ;;  %v7637_v54 = vadd.f32 1.0, %v5868_v36  ;;  %v5870_v0 = vpop.eup %5869  ;;  %vm7656_vm0 = vmor %vm2737_vm15, %vm2738_vm14  ;;  %vm2870_vm2 = vweird.f32 %v7632_v25 }
 0x485   :  { %v2706_v62 = vsel %vm2703_vm11, %v2705_v4, %v2701_v46  ;;  %v2720_v60 = vsel %vm2719_vm12, %v5862_v44, %v2716_v27  ;;  %v2734_v55 = vsub.f32 1.0, %v2733_v61  ;;  %v2743_v44 = vand.u32 2147483648, %v7625_v20 }
 0x486   :  { %v2789_v10 = vpop.f32.mrf.mxu2  ;;  %v2802_v21 = vpop.f32.mrf.mxu3  ;;  %v2725_v28 = vsel %vm2722_vm13, %v2724_v37, %v2720_v60  ;;  %v2748_v39 = vmul.f32 %v5870_v0, %v2706_v62  ;;  %5875 = vrcp.f32 %v7637_v54  ;;  %v2806_v4 = vadd.f32 %v2787_v50, %v8873_v45 }
 0x487   :  { %v2747_v59 = vmul.f32 %v2725_v28, %v7490_v19  ;;  %v2735_v26 = vmul.f32 %v7630_v9, %v2734_v55  ;;  %v2741_v37 = vand.u32 2147483647, %v7625_v20  ;;  %v2876_v62 = vand.u32 2147483648, %v7632_v25 }
 0x488   :  { %v2744_v55 = vor.u32 1.1754944e-38, %v2743_v44  ;;  %v2874_v20 = vand.u32 2147483647, %v7632_v25  ;;  %v2895_v28 = vand.u32 2147483648, %v7637_v54  ;;  %vm2889_vm5 = vweird.f32 %v7637_v54 }
 0x489   :  { %v5872_v31 = vpop.eup %5871  ;;  %v7642_v12 = vadd.f32 %v2748_v39, %v2747_v59  ;;  %v2736_v27 = vadd.f32 %v7630_v9, %v2735_v26  ;;  %v2893_v39 = vand.u32 2147483647, %v7637_v54  ;;  %vm2742_vm3 = vcmp.eq.f32.partialorder %v2741_v37, 8.507059e+37 }
 0x48a   :  { %v7644_v36 = vadd.f32 1.0, %v5872_v31  ;;  %v5874_v56 = vpop.eup %5873  ;;  %vm2875_vm7 = vcmp.eq.f32.partialorder %v2874_v20, 8.507059e+37 }
 0x48b   :  { %5877 = vtanh.f32 %v7642_v12  ;;  %v2866_v19 = vmul.f32 %v5874_v56, %v7632_v25  ;;  %v2740_v60 = vsel %vm7656_vm0, %v7630_v9, %v2736_v27  ;;  %vm2871_vm1 = vweird.f32 %v5874_v56 }
 0x48c   :  { %v5876_v61 = vpop.eup %5875  ;;  %5879 = vrcp.f32 %v7644_v36  ;;  %v2745_v45 = vsel %vm2742_vm3, %v2744_v55, %v2740_v60  ;;  %vm2872_vm6 = vmor %vm2870_vm2, %vm2871_vm1  ;;  %v2877_v9 = vor.u32 1.1754944e-38, %v2876_v62  ;;  %vm2894_vm9 = vcmp.eq.f32.partialorder %v2893_v39, 8.507059e+37 }
 0x48d   :  { %v2867_v46 = vsub.f32 1.0, %v2866_v19  ;;  %v2885_v0 = vmul.f32 %v5876_v61, %v7637_v54  ;;  %5881 = vtanh.f32 %v2806_v4  ;;  %vm2890_vm4 = vweird.f32 %v5876_v61 }
 0x48e   :  { %vm2891_vm8 = vmor %vm2889_vm5, %vm2890_vm4  ;;  %v2915_v20 = vand.u32 2147483648, %v7644_v36  ;;  %vm2909_vm11 = vweird.f32 %v7644_v36 }
 0x48f   :  { %v2886_v10 = vsub.f32 1.0, %v2885_v0  ;;  %v2868_v21 = vmul.f32 %v5874_v56, %v2867_v46  ;;  %v2896_v0 = vor.u32 1.1754944e-38, %v2895_v28 }
 0x490   :  { %v2916_v39 = vor.u32 1.1754944e-38, %v2915_v20  ;;  %v8894_v20 = vld [vmem:[#allocation56_spill] sm:$0xff] }
 0x491   :  { %v5878_v59 = vpop.eup %5877  ;;  %v2887_v26 = vmul.f32 %v5876_v61, %v2886_v10  ;;  %v2869_v31 = vadd.f32 %v5874_v56, %v2868_v21 }
 0x492   :  { %v5880_v4 = vpop.eup %5879  ;;  %v2751_v44 = vmul.f32 %v5878_v59, %v2745_v45  ;;  %v8876_v45 = vld [vmem:[#allocation28_spill] sm:$0xff] }
 0x493   :  { %v2873_v27 = vsel %vm2872_vm6, %v5874_v56, %v2869_v31  ;;  %v2888_v19 = vadd.f32 %v5876_v61, %v2887_v26  ;;  %v2905_v46 = vmul.f32 %v5880_v4, %v7644_v36  ;;  %v5882_v25 = vpop.eup %5881  ;;  %vm2910_vm10 = vweird.f32 %v5880_v4 }
 0x494   :  { %v2878_v37 = vsel %vm2875_vm7, %v2877_v9, %v2873_v27  ;;  %v2808_v50 = vpack.c.bf16 %v2751_v44, %v2751_v44  ;;  %vm2911_vm12 = vmor %vm2909_vm11, %vm2910_vm10  ;;  %v8878_v9 = vld [vmem:[#allocation30_spill] sm:$0xff]  ;;  %v8879_v44 = vld [vmem:[#allocation33_spill] sm:$0xff] }
 0x495   :  { %v2892_v10 = vsel %vm2891_vm8, %v5876_v61, %v2888_v19  ;;  %v2920_v21 = vmul.f32 %v5882_v25, %v2878_v37  ;;  %v2906_v60 = vsub.f32 1.0, %v2905_v46  ;;  %v8880_v27 = vld [vmem:[#allocation36_spill] sm:$0xff]  ;;  %v8881_v19 = vld [vmem:[#allocation37_spill] sm:$0xff]  ;;  %v8882_v46 = vld [vmem:[#allocation38_spill] sm:$0xff] }
 0x496   :  { %v2897_v55 = vsel %vm2894_vm9, %v2896_v0, %v2892_v10  ;;  %2817 = vmatmul.bf16.vlgmr.msrb.gmra.mxu0 %v2808_v50  ;;  %2830 = vmatmul.bf16.vlgmr.msra.gmra.mxu1 %v2808_v50  ;;  %v8883_v25 = vld [vmem:[#allocation41_spill] sm:$0xff]  ;;  %v8884_v0 = vld [vmem:[#allocation42_spill] sm:$0xff]  ;;  %v8885_v37 = vld [vmem:[#allocation43_spill] sm:$0xff] }
 0x497   :  { %v2919_v54 = vmul.f32 %v2897_v55, %v7520_v42  ;;  %v2907_v62 = vmul.f32 %v5880_v4, %v2906_v60  ;;  %2843 = vmatmul.bf16.vlgmr.msra.gmra.mxu2 %v2808_v50  ;;  %2856 = vmatmul.bf16.vlgmr.msra.gmra.mxu3 %v2808_v50  ;;  %v2913_v42 = vand.u32 2147483647, %v7644_v36  ;;  %v8886_v50 = vld [vmem:[#allocation44_spill] sm:$0xff]  ;;  %v8887_v10 = vld [vmem:[#allocation45_spill] sm:$0xff]  ;;  %v8890_v55 = vld [vmem:[#allocation50_spill] sm:$0xff] }
 0x498   :  { %3044 = vmatpush.bf16.msrb.mxu0 %v6944_v13  ;;  %3057 = vmatpush.bf16.msra.mxu1 %v6941_v8  ;;  %v8889_v60 = vld [vmem:[#allocation49_spill] sm:$0xff] }
 0x499   :  { %v7673_v56 = vadd.f32 %v2920_v21, %v2919_v54  ;;  %3070 = vmatpush.bf16.msra.mxu2 %v6996_v24  ;;  %3083 = vmatpush.bf16.msra.mxu3 %v6998_v34  ;;  %v2908_v61 = vadd.f32 %v5880_v4, %v2907_v62  ;;  %vm2914_vm13 = vcmp.eq.f32.partialorder %v2913_v42, 8.507059e+37  ;;  %v8888_v21 = vld [vmem:[#allocation48_spill] sm:$0xff]  ;;  %v8891_v54 = vld [vmem:[#allocation51_spill] sm:$0xff]  ;;  %v8892_v62 = vld [vmem:[#allocation54_spill] sm:$0xff] }
 0x49a   :  { %v8895_v42 = vld [vmem:[#allocation57_spill] sm:$0xff] }
 0x49b   :  { %5883 = vtanh.f32 %v7673_v56  ;;  %v2912_v28 = vsel %vm2911_vm12, %v5880_v4, %v2908_v61  ;;  %v8877_v4 = vld [vmem:[#allocation29_spill] sm:$0xff]  ;;  %v8893_v61 = vld [vmem:[#allocation55_spill] sm:$0xff] }
 0x49c   :  { %3045 = vmatpush.bf16.msrb.mxu0 %v6950_v23  ;;  %3058 = vmatpush.bf16.msra.mxu1 %v6946_v17  ;;  %v2917_v26 = vsel %vm2914_vm13, %v2916_v39, %v2912_v28  ;;  %v8896_v28 = vld [vmem:[#allocation60_spill] sm:$0xff]  ;;  %v8897_v39 = vld [vmem:[#allocation61_spill] sm:$0xff] }
 0x49d   :  { %3071 = vmatpush.bf16.msra.mxu2 %v7004_v40  ;;  %3084 = vmatpush.bf16.msra.mxu3 %v7006_v41 }
 0x4a0   :  { %3046 = vmatpush.bf16.msrb.mxu0 %v6961_v35  ;;  %3059 = vmatpush.bf16.msra.mxu1 %v6958_v30 }
 0x4a1   :  { %v5884_v59 = vpop.eup %5883  ;;  %3072 = vmatpush.bf16.msra.mxu2 %v7011_v29  ;;  %3085 = vmatpush.bf16.msra.mxu3 %v7013_v32 }
 0x4a2   :  { %v2923_v36 = vmul.f32 %v5884_v59, %v2917_v26  ;;  %v8898_v59 = vld [vmem:[#allocation62_spill] sm:$0xff]  ;;  %v8899_v26 = vld [vmem:[#allocation65_spill] sm:$0xff] }
 0x4a4   :  { %v2924_v31 = vpack.c.bf16 %v2923_v36, %v2923_v36  ;;  %3047 = vmatpush.bf16.msrb.mxu0 %v6969_v47  ;;  %3060 = vmatpush.bf16.msra.mxu1 %v8806_v15  ;;  %v8900_v36 = vld [vmem:[#allocation66_spill] sm:$0xff] }
 0x4a5   :  { %3073 = vmatpush.bf16.msra.mxu2 %v7018_v63  ;;  %3086 = vmatpush.bf16.msra.mxu3 %v8807_v3 }
 0x4a6   :  { %2933 = vmatmul.bf16.vlgmr.msra.gmra.mxu0 %v2924_v31  ;;  %2946 = vmatmul.bf16.vlgmr.msrb.gmra.mxu1 %v2924_v31 }
 0x4a7   :  { %2959 = vmatmul.bf16.vlgmr.msrb.gmra.mxu2 %v2924_v31  ;;  %2972 = vmatmul.bf16.vlgmr.msrb.gmra.mxu3 %v2924_v31 }
 0x4a8   :  { %3048 = vmatpush.bf16.msrb.mxu0 %v8808_v53  ;;  %3061 = vmatpush.bf16.msra.mxu1 %v6972_v51 }
 0x4a9   :  { %3074 = vmatpush.bf16.msra.mxu2 %v7024_v57  ;;  %3087 = vmatpush.bf16.msra.mxu3 %v7026_v7 }
 0x4ac   :  { %3049 = vmatpush.bf16.msrb.mxu0 %v6979_v1  ;;  %3062 = vmatpush.bf16.msra.mxu1 %v6981_v2 }
 0x4ad   :  { %3075 = vmatpush.bf16.msra.mxu2 %v7030_v14  ;;  %3088 = vmatpush.bf16.msra.mxu3 %v7032_v18 }
 0x4b0   :  { %3050 = vmatpush.bf16.msrb.mxu0 %v6986_v58  ;;  %3063 = vmatpush.bf16.msra.mxu1 %v6988_v5 }
 0x4b1   :  { %3076 = vmatpush.bf16.msra.mxu2 %v7037_v48  ;;  %3089 = vmatpush.bf16.msra.mxu3 %v7039_v38 }
 0x4b4   :  { %3051 = vmatpush.bf16.msrb.mxu0 %v6992_v11  ;;  %3064 = vmatpush.bf16.msra.mxu1 %v6994_v22 }
 0x4b5   :  { %3077 = vmatpush.bf16.msra.mxu2 %v7044_v49  ;;  %3090 = vmatpush.bf16.msra.mxu3 %v7046_v52 }
 0x4b7   :  { %3052 = vmatmul.bf16.vlgmr.msrb.gmra.mxu0 %v2924_v31  ;;  %3065 = vmatmul.bf16.vlgmr.msra.gmra.mxu1 %v2924_v31 }
 0x4b8   :  { %3101 = vmatpush.bf16.msra.mxu0 %v7066_v16  ;;  %3114 = vmatpush.bf16.msrb.mxu1 %v7068_v6 }
 0x4b9   :  { %3078 = vmatmul.bf16.vlgmr.msra.gmra.mxu2 %v2924_v31  ;;  %3091 = vmatmul.bf16.vlgmr.msra.gmra.mxu3 %v2924_v31  ;;  %v8901_v31 = vld [vmem:[#allocation67_spill] sm:$0xff] }
 0x4ba   :  { %3127 = vmatpush.bf16.msrb.mxu2 %v7079_v33  ;;  %3140 = vmatpush.bf16.msrb.mxu3 %v7085_v43 }
 0x4bc   :  { %3102 = vmatpush.bf16.msra.mxu0 %v8876_v45  ;;  %3115 = vmatpush.bf16.msrb.mxu1 %v8877_v4  ;;  %v8947_v45 = vld [vmem:[#allocation39_spill] sm:$0xff] }
 0x4be   :  { %3128 = vmatpush.bf16.msrb.mxu2 %v8878_v9  ;;  %3141 = vmatpush.bf16.msrb.mxu3 %v8879_v44 }
 0x4c0   :  { %3103 = vmatpush.bf16.msra.mxu0 %v8880_v27  ;;  %3116 = vmatpush.bf16.msrb.mxu1 %v8881_v19 }
 0x4c2   :  { %3129 = vmatpush.bf16.msrb.mxu2 %v8882_v46  ;;  %3142 = vmatpush.bf16.msrb.mxu3 %v8883_v25 }
 0x4c4   :  { %3104 = vmatpush.bf16.msra.mxu0 %v8884_v0  ;;  %3117 = vmatpush.bf16.msrb.mxu1 %v8885_v37  ;;  %v8936_v37 = vld [vmem:[#allocation112_spill] sm:$0xff]  ;;  %v8937_v0 = vld [vmem:[#allocation113_spill] sm:$0xff] }
 0x4c6   :  { %3130 = vmatpush.bf16.msrb.mxu2 %v8886_v50  ;;  %3143 = vmatpush.bf16.msrb.mxu3 %v8887_v10 }
 0x4c8   :  { %3105 = vmatpush.bf16.msra.mxu0 %v8888_v21  ;;  %3118 = vmatpush.bf16.msrb.mxu1 %v8889_v60 }
 0x4ca   :  { %3131 = vmatpush.bf16.msrb.mxu2 %v8890_v55  ;;  %3144 = vmatpush.bf16.msrb.mxu3 %v8891_v54  ;;  %v8902_v54 = vld [vmem:[#allocation72_spill] sm:$0xff] }
 0x4cc   :  { %3106 = vmatpush.bf16.msra.mxu0 %v8892_v62  ;;  %3119 = vmatpush.bf16.msrb.mxu1 %v8893_v61  ;;  %v8903_v62 = vld [vmem:[#allocation73_spill] sm:$0xff]  ;;  %v8904_v61 = vld [vmem:[#allocation68_spill] sm:$0xff] }
 0x4ce   :  { %3132 = vmatpush.bf16.msrb.mxu2 %v8894_v20  ;;  %3145 = vmatpush.bf16.msrb.mxu3 %v8895_v42  ;;  %v8905_v20 = vld [vmem:[#allocation69_spill] sm:$0xff]  ;;  %v8906_v42 = vld [vmem:[#allocation74_spill] sm:$0xff] }
 0x4d0   :  { %3107 = vmatpush.bf16.msra.mxu0 %v8896_v28  ;;  %3120 = vmatpush.bf16.msrb.mxu1 %v8897_v39  ;;  %v8907_v28 = vld [vmem:[#allocation75_spill] sm:$0xff]  ;;  %v8908_v39 = vld [vmem:[#allocation76_spill] sm:$0xff] }
 0x4d2   :  { %3133 = vmatpush.bf16.msrb.mxu2 %v8898_v59  ;;  %3146 = vmatpush.bf16.msrb.mxu3 %v8899_v26  ;;  %v8909_v59 = vld [vmem:[#allocation77_spill] sm:$0xff]  ;;  %v8910_v26 = vld [vmem:[#allocation80_spill] sm:$0xff] }
 0x4d4   :  { %3108 = vmatpush.bf16.msra.mxu0 %v8900_v36  ;;  %3121 = vmatpush.bf16.msrb.mxu1 %v8901_v31  ;;  %v8911_v36 = vld [vmem:[#allocation81_spill] sm:$0xff]  ;;  %v8912_v31 = vld [vmem:[#allocation82_spill] sm:$0xff] }
 0x4d6   :  { %3134 = vmatpush.bf16.msrb.mxu2 %v8904_v61  ;;  %3147 = vmatpush.bf16.msrb.mxu3 %v8905_v20  ;;  %v8915_v61 = vld [vmem:[#allocation85_spill] sm:$0xff]  ;;  %v8916_v20 = vld [vmem:[#allocation88_spill] sm:$0xff] }
 0x4d8   :  { %3217 = vmatpush.bf16.msrb.mxu0 %v8902_v54  ;;  %3230 = vmatpush.bf16.msra.mxu1 %v8903_v62  ;;  %v8913_v54 = vld [vmem:[#allocation83_spill] sm:$0xff]  ;;  %v8914_v62 = vld [vmem:[#allocation84_spill] sm:$0xff] }
 0x4da   :  { %3243 = vmatpush.bf16.msra.mxu2 %v8906_v42  ;;  %3256 = vmatpush.bf16.msra.mxu3 %v8907_v28  ;;  %v8917_v42 = vld [vmem:[#allocation89_spill] sm:$0xff]  ;;  %v8918_v28 = vld [vmem:[#allocation90_spill] sm:$0xff] }
 0x4dc   :  { %3218 = vmatpush.bf16.msrb.mxu0 %v8908_v39  ;;  %3231 = vmatpush.bf16.msra.mxu1 %v8909_v59  ;;  %v8919_v39 = vld [vmem:[#allocation91_spill] sm:$0xff]  ;;  %v8920_v59 = vld [vmem:[#allocation92_spill] sm:$0xff] }
 0x4de   :  { %3244 = vmatpush.bf16.msra.mxu2 %v8910_v26  ;;  %3257 = vmatpush.bf16.msra.mxu3 %v8911_v36  ;;  %v8921_v26 = vld [vmem:[#allocation93_spill] sm:$0xff]  ;;  %v8922_v36 = vld [vmem:[#allocation94_spill] sm:$0xff] }
 0x4e0   :  { %3219 = vmatpush.bf16.msrb.mxu0 %v8912_v31  ;;  %3232 = vmatpush.bf16.msra.mxu1 %v8913_v54  ;;  %v8923_v31 = vld [vmem:[#allocation97_spill] sm:$0xff]  ;;  %v8924_v54 = vld [vmem:[#allocation98_spill] sm:$0xff] }
 0x4e2   :  { %3245 = vmatpush.bf16.msra.mxu2 %v8914_v62  ;;  %3258 = vmatpush.bf16.msra.mxu3 %v8915_v61  ;;  %v8925_v62 = vld [vmem:[#allocation99_spill] sm:$0xff]  ;;  %v8926_v61 = vld [vmem:[#allocation100_spill] sm:$0xff] }
 0x4e4   :  { %3220 = vmatpush.bf16.msrb.mxu0 %v8916_v20  ;;  %3233 = vmatpush.bf16.msra.mxu1 %v8917_v42  ;;  %v8927_v20 = vld [vmem:[#allocation101_spill] sm:$0xff]  ;;  %v8928_v42 = vld [vmem:[#allocation102_spill] sm:$0xff] }
 0x4e6   :  { %3246 = vmatpush.bf16.msra.mxu2 %v8918_v28  ;;  %3259 = vmatpush.bf16.msra.mxu3 %v8919_v39  ;;  %v8929_v28 = vld [vmem:[#allocation103_spill] sm:$0xff]  ;;  %v8930_v39 = vld [vmem:[#allocation104_spill] sm:$0xff] }
 0x4e8   :  { %3221 = vmatpush.bf16.msrb.mxu0 %v8920_v59  ;;  %3234 = vmatpush.bf16.msra.mxu1 %v8921_v26  ;;  %v8931_v59 = vld [vmem:[#allocation105_spill] sm:$0xff]  ;;  %v8932_v26 = vld [vmem:[#allocation106_spill] sm:$0xff] }
 0x4ea   :  { %3247 = vmatpush.bf16.msra.mxu2 %v8922_v36  ;;  %3260 = vmatpush.bf16.msra.mxu3 %v8923_v31  ;;  %v8933_v36 = vld [vmem:[#allocation107_spill] sm:$0xff]  ;;  %v8934_v31 = vld [vmem:[#allocation108_spill] sm:$0xff] }
 0x4ec   :  { %3222 = vmatpush.bf16.msrb.mxu0 %v8924_v54  ;;  %3235 = vmatpush.bf16.msra.mxu1 %v8925_v62  ;;  %v8935_v54 = vld [vmem:[#allocation109_spill] sm:$0xff] }
 0x4ee   :  { %3248 = vmatpush.bf16.msra.mxu2 %v8926_v61  ;;  %3261 = vmatpush.bf16.msra.mxu3 %v8927_v20 }
 0x4f0   :  { %3223 = vmatpush.bf16.msrb.mxu0 %v8928_v42  ;;  %3236 = vmatpush.bf16.msra.mxu1 %v8929_v28 }
 0x4f2   :  { %3249 = vmatpush.bf16.msra.mxu2 %v8930_v39  ;;  %3262 = vmatpush.bf16.msra.mxu3 %v8931_v59 }
 0x4f4   :  { %3224 = vmatpush.bf16.msrb.mxu0 %v8932_v26  ;;  %3237 = vmatpush.bf16.msra.mxu1 %v8933_v36 }
 0x4f6   :  { %3250 = vmatpush.bf16.msra.mxu2 %v8934_v31  ;;  %3263 = vmatpush.bf16.msra.mxu3 %v8935_v54 }
 0x513   :  { %v2818_v62 = vpop.f32.mrf.mxu0  ;;  %v2831_v61 = vpop.f32.mrf.mxu1 }
 0x51a   :  { %v2844_v55 = vpop.f32.mrf.mxu2  ;;  %v2857_v20 = vpop.f32.mrf.mxu3 }
 0x51b   :  { %v2820_v60 = vpop.f32.mrf.mxu0  ;;  %v2833_v42 = vpop.f32.mrf.mxu1 }
 0x51c   :  { %v8938_v42 = vld [vmem:[#allocation114_spill] sm:$0xff] }
 0x522   :  { %v2846_v21 = vpop.f32.mrf.mxu2  ;;  %v2859_v28 = vpop.f32.mrf.mxu3 }
 0x523   :  { %v2934_v10 = vpop.f32.mrf.mxu0  ;;  %v2947_v39 = vpop.f32.mrf.mxu1 }
 0x524   :  { %v2935_v50 = vadd.f32 %v2934_v10, %v2818_v62  ;;  %v2948_v59 = vadd.f32 %v2947_v39, %v2831_v61  ;;  %v8939_v39 = vld [vmem:[#allocation31_spill] sm:$0xff] }
 0x526   :  { %v2977_v26 = vadd.f32 %v2935_v50, %v8936_v37  ;;  %v2978_v36 = vadd.f32 %v2948_v59, %v8937_v0  ;;  %v8940_v59 = vld [vmem:[#allocation46_spill] sm:$0xff] }
 0x528   :  { %v5500_v25 = vmul.f32 -1.442695, %v2977_v26  ;;  %v5501_v31 = vmul.f32 -1.442695, %v2978_v36  ;;  %v8941_v26 = vld [vmem:[#allocation32_spill] sm:$0xff]  ;;  %v8942_v36 = vld [vmem:[#allocation47_spill] sm:$0xff] }
 0x52a   :  { %5885 = vpow2.f32 %v5500_v25  ;;  %v2960_v54 = vpop.f32.mrf.mxu2  ;;  %v2973_v46 = vpop.f32.mrf.mxu3  ;;  %v1484_v25 = vadd.f32 %v8940_v59, %v8939_v39  ;;  %v8944_v39 = vld [vmem:[#allocation24_spill] sm:$0xff] }
 0x52b   :  { %5887 = vpow2.f32 %v5501_v31  ;;  %v2974_v19 = vadd.f32 %v2973_v46, %v2857_v20  ;;  %v2936_v27 = vpop.f32.mrf.mxu0  ;;  %v2949_v60 = vpop.f32.mrf.mxu1  ;;  %v1513_v31 = vadd.f32 %v8942_v36, %v8941_v26  ;;  %v2961_v46 = vadd.f32 %v2960_v54, %v2844_v55  ;;  %v8945_v36 = vld [vmem:[#allocation40_spill] sm:$0xff] }
 0x52c   :  { %v1571_v26 = vadd.f32 %v8945_v36, %v8944_v39 }
 0x52d   :  { %v2980_v21 = vadd.f32 %v2974_v19, %v8938_v42 }
 0x52f   :  { %v5502_v28 = vmul.f32 -1.442695, %v2980_v21 }
 0x530   :  { %v5886_v44 = vpop.eup %5885 }
 0x531   :  { %v5888_v9 = vpop.eup %5887  ;;  %v2984_v10 = vadd.f32 1.0, %v5886_v44  ;;  %5889 = vpow2.f32 %v5502_v28 }
 0x532   :  { %v7776_v62 = vadd.f32 1.0, %v5888_v9  ;;  %v2962_v50 = vpop.f32.mrf.mxu2  ;;  %v2975_v61 = vpop.f32.mrf.mxu3 }
 0x533   :  { %5891 = vrcp.f32 %v2984_v10  ;;  %v8943_v61 = vld [vmem:[#allocation21_spill] sm:$0xff]  ;;  %vm2990_vm0 = vweird.f32 %v2984_v10 }
 0x534   :  { %5893 = vrcp.f32 %v7776_v62  ;;  %v3053_v27 = vpop.f32.mrf.mxu0  ;;  %v3066_v19 = vpop.f32.mrf.mxu1  ;;  %v2979_v42 = vadd.f32 %v2961_v46, %v8943_v61  ;;  %v2996_v46 = vand.u32 2147483648, %v2984_v10  ;;  %vm3009_vm1 = vweird.f32 %v7776_v62 }
 0x535   :  { %v3096_v20 = vadd.f32 %v3053_v27, %v1484_v25  ;;  %v3097_v60 = vadd.f32 %v3066_v19, %v1513_v31 }
 0x537   :  { %v5890_v44 = vpop.eup %5889  ;;  %v5503_v21 = vmul.f32 -1.442695, %v3096_v20  ;;  %v5504_v9 = vmul.f32 -1.442695, %v3097_v60 }
 0x538   :  { %v7783_v28 = vadd.f32 1.0, %v5890_v44  ;;  %v2994_v44 = vand.u32 2147483647, %v2984_v10 }
 0x539   :  { %v5892_v50 = vpop.eup %5891  ;;  %5895 = vpow2.f32 %v5503_v21  ;;  %v3015_v21 = vand.u32 2147483648, %v7776_v62 }
 0x53a   :  { %v5894_v59 = vpop.eup %5893  ;;  %v2986_v0 = vmul.f32 %v5892_v50, %v2984_v10  ;;  %5897 = vrcp.f32 %v7783_v28  ;;  %vm2991_vm14 = vweird.f32 %v5892_v50  ;;  %vm2995_vm3 = vcmp.eq.f32.partialorder %v2994_v44, 8.507059e+37 }
 0x53b   :  { %v3005_v55 = vmul.f32 %v5894_v59, %v7776_v62  ;;  %5899 = vpow2.f32 %v5504_v9  ;;  %vm3010_vm15 = vweird.f32 %v5894_v59  ;;  %v3013_v9 = vand.u32 2147483647, %v7776_v62  ;;  %vm2992_vm2 = vmor %vm2990_vm0, %vm2991_vm14 }
 0x53c   :  { %v3079_v54 = vpop.f32.mrf.mxu2  ;;  %v3092_v25 = vpop.f32.mrf.mxu3  ;;  %v2987_v31 = vsub.f32 1.0, %v2986_v0  ;;  %5901 = vtanh.f32 %v2979_v42  ;;  %vm3011_vm4 = vmor %vm3009_vm1, %vm3010_vm15  ;;  %v3016_v10 = vor.u32 1.1754944e-38, %v3015_v21  ;;  %vm3029_vm7 = vweird.f32 %v7783_v28 }
 0x53d   :  { %v3099_v27 = vadd.f32 %v3092_v25, %v1571_v26  ;;  %v3055_v19 = vpop.f32.mrf.mxu0  ;;  %v3068_v20 = vpop.f32.mrf.mxu1  ;;  %v3006_v60 = vsub.f32 1.0, %v3005_v55  ;;  %v2997_v55 = vor.u32 1.1754944e-38, %v2996_v46  ;;  %vm3014_vm5 = vcmp.eq.f32.partialorder %v3013_v9, 8.507059e+37 }
 0x53e   :  { %v2988_v61 = vmul.f32 %v5892_v50, %v2987_v31  ;;  %v3035_v9 = vand.u32 2147483648, %v7783_v28 }
 0x53f   :  { %v5505_v36 = vmul.f32 -1.442695, %v3099_v27  ;;  %v5896_v39 = vpop.eup %5895  ;;  %v3007_v37 = vmul.f32 %v5894_v59, %v3006_v60 }
 0x540   :  { %v7792_v4 = vpop.eup %5897  ;;  %v2989_v0 = vadd.f32 %v5892_v50, %v2988_v61  ;;  %v7795_v26 = vadd.f32 1.0, %v5896_v39 }
 0x541   :  { %5903 = vpow2.f32 %v5505_v36  ;;  %v5900_v42 = vpop.eup %5899  ;;  %v3008_v25 = vadd.f32 %v5894_v59, %v3007_v37  ;;  %v3025_v31 = vmul.f32 %v7792_v4, %v7783_v28  ;;  %vm3030_vm6 = vweird.f32 %v7792_v4 }
 0x542   :  { %v2993_v27 = vsel %vm2992_vm2, %v5892_v50, %v2989_v0  ;;  %5905 = vrcp.f32 %v7795_v26  ;;  %v7800_v19 = vadd.f32 1.0, %v5900_v42  ;;  %v5902_v62 = vpop.eup %5901  ;;  %v8946_v0 = vld [vmem:[#allocation23_spill] sm:$0xff]  ;;  %vm7820_vm8 = vmor %vm3029_vm7, %vm3030_vm6  ;;  %vm3162_vm10 = vweird.f32 %v7795_v26 }
 0x543   :  { %v2998_v61 = vsel %vm2995_vm3, %v2997_v55, %v2993_v27  ;;  %v3012_v39 = vsel %vm3011_vm4, %v5894_v59, %v3008_v25  ;;  %v3026_v20 = vsub.f32 1.0, %v3025_v31  ;;  %v1542_v42 = vadd.f32 %v8947_v45, %v8946_v0  ;;  %v8976_v0 = vld [vmem:[#allocation67_spill] sm:$0xff] }
 0x544   :  { %v3081_v60 = vpop.f32.mrf.mxu2  ;;  %v3094_v36 = vpop.f32.mrf.mxu3  ;;  %v3017_v44 = vsel %vm3014_vm5, %v3016_v10, %v3012_v39  ;;  %v3040_v46 = vmul.f32 %v5902_v62, %v2998_v61  ;;  %5907 = vrcp.f32 %v7800_v19  ;;  %v3033_v45 = vand.u32 2147483647, %v7783_v28 }
 0x545   :  { %v3039_v37 = vmul.f32 %v3017_v44, %v7642_v12  ;;  %v3027_v21 = vmul.f32 %v7792_v4, %v3026_v20  ;;  %v3098_v25 = vadd.f32 %v3079_v54, %v1542_v42  ;;  %v3168_v61 = vand.u32 2147483648, %v7795_v26 }
 0x546   :  { %v3036_v20 = vor.u32 1.1754944e-38, %v3035_v9  ;;  %v3166_v28 = vand.u32 2147483647, %v7795_v26  ;;  %v3187_v44 = vand.u32 2147483648, %v7800_v19  ;;  %vm3034_vm11 = vcmp.eq.f32.partialorder %v3033_v45, 8.507059e+37 }
 0x547   :  { %v5904_v50 = vpop.eup %5903  ;;  %v7807_v43 = vadd.f32 %v3040_v46, %v3039_v37  ;;  %v3028_v31 = vadd.f32 %v7792_v4, %v3027_v21  ;;  %v3185_v46 = vand.u32 2147483647, %v7800_v19  ;;  %vm3181_vm13 = vweird.f32 %v7800_v19 }
 0x548   :  { %v7809_v55 = vadd.f32 1.0, %v5904_v50  ;;  %v5906_v59 = vpop.eup %5905  ;;  %vm3167_vm15 = vcmp.eq.f32.partialorder %v3166_v28, 8.507059e+37 }
 0x549   :  { %5909 = vtanh.f32 %v7807_v43  ;;  %v3158_v12 = vmul.f32 %v5906_v59, %v7795_v26  ;;  %v3032_v39 = vsel %vm7820_vm8, %v7792_v4, %v3028_v31  ;;  %vm3163_vm9 = vweird.f32 %v5906_v59 }
 0x54a   :  { %v5908_v10 = vpop.eup %5907  ;;  %5911 = vrcp.f32 %v7809_v55  ;;  %v3037_v42 = vsel %vm3034_vm11, %v3036_v20, %v3032_v39  ;;  %vm3164_vm14 = vmor %vm3162_vm10, %vm3163_vm9  ;;  %v3169_v4 = vor.u32 1.1754944e-38, %v3168_v61  ;;  %vm3186_vm1 = vcmp.eq.f32.partialorder %v3185_v46, 8.507059e+37 }
 0x54b   :  { %v3159_v27 = vsub.f32 1.0, %v3158_v12  ;;  %v3177_v62 = vmul.f32 %v5908_v10, %v7800_v19  ;;  %5913 = vtanh.f32 %v3098_v25  ;;  %vm3182_vm12 = vweird.f32 %v5908_v10 }
 0x54c   :  { %vm3183_vm0 = vmor %vm3181_vm13, %vm3182_vm12  ;;  %v3207_v28 = vand.u32 2147483648, %v7809_v55  ;;  %vm3201_vm3 = vweird.f32 %v7809_v55 }
 0x54d   :  { %v3178_v60 = vsub.f32 1.0, %v3177_v62  ;;  %v3160_v36 = vmul.f32 %v5906_v59, %v3159_v27  ;;  %v3188_v62 = vor.u32 1.1754944e-38, %v3187_v44 }
 0x54e   :  { %v3208_v46 = vor.u32 1.1754944e-38, %v3207_v28  ;;  %v8968_v28 = vld [vmem:[#allocation55_spill] sm:$0xff] }
 0x54f   :  { %v5910_v37 = vpop.eup %5909  ;;  %v3179_v21 = vmul.f32 %v5908_v10, %v3178_v60  ;;  %v3161_v50 = vadd.f32 %v5906_v59, %v3160_v36 }
 0x550   :  { %v5912_v25 = vpop.eup %5911  ;;  %v3043_v9 = vmul.f32 %v5910_v37, %v3037_v42  ;;  %v8950_v42 = vld [vmem:[#allocation25_spill] sm:$0xff] }
 0x551   :  { %v3165_v31 = vsel %vm3164_vm14, %v5906_v59, %v3161_v50  ;;  %v3180_v12 = vadd.f32 %v5908_v10, %v3179_v21  ;;  %v3197_v27 = vmul.f32 %v5912_v25, %v7809_v55  ;;  %v5914_v26 = vpop.eup %5913  ;;  %vm3202_vm2 = vweird.f32 %v5912_v25 }
 0x552   :  { %v3170_v45 = vsel %vm3167_vm15, %v3169_v4, %v3165_v31  ;;  %v3100_v54 = vpack.c.bf16 %v3043_v9, %v3043_v9  ;;  %vm3203_vm4 = vmor %vm3201_vm3, %vm3202_vm2  ;;  %v8952_v4 = vld [vmem:[#allocation29_spill] sm:$0xff]  ;;  %v8953_v9 = vld [vmem:[#allocation30_spill] sm:$0xff] }
 0x553   :  { %v3184_v60 = vsel %vm3183_vm0, %v5908_v10, %v3180_v12  ;;  %v3212_v36 = vmul.f32 %v5914_v26, %v3170_v45  ;;  %v3198_v39 = vsub.f32 1.0, %v3197_v27  ;;  %v8954_v31 = vld [vmem:[#allocation33_spill] sm:$0xff]  ;;  %v8955_v12 = vld [vmem:[#allocation36_spill] sm:$0xff]  ;;  %v8957_v26 = vld [vmem:[#allocation38_spill] sm:$0xff] }
 0x554   :  { %v3189_v20 = vsel %vm3186_vm1, %v3188_v62, %v3184_v60  ;;  %3109 = vmatmul.bf16.vlgmr.msra.gmra.mxu0 %v3100_v54  ;;  %3122 = vmatmul.bf16.vlgmr.msrb.gmra.mxu1 %v3100_v54  ;;  %v8956_v27 = vld [vmem:[#allocation37_spill] sm:$0xff]  ;;  %v8959_v45 = vld [vmem:[#allocation42_spill] sm:$0xff]  ;;  %v8961_v60 = vld [vmem:[#allocation44_spill] sm:$0xff] }
 0x555   :  { %v3211_v19 = vmul.f32 %v3189_v20, %v7673_v56  ;;  %v3199_v61 = vmul.f32 %v5912_v25, %v3198_v39  ;;  %3135 = vmatmul.bf16.vlgmr.msrb.gmra.mxu2 %v3100_v54  ;;  %3148 = vmatmul.bf16.vlgmr.msrb.gmra.mxu3 %v3100_v54  ;;  %v3205_v56 = vand.u32 2147483647, %v7809_v55  ;;  %v8958_v62 = vld [vmem:[#allocation41_spill] sm:$0xff]  ;;  %v8960_v54 = vld [vmem:[#allocation43_spill] sm:$0xff]  ;;  %v8963_v39 = vld [vmem:[#allocation48_spill] sm:$0xff] }
 0x556   :  { %3336 = vmatpush.bf16.msra.mxu0 %v6944_v13  ;;  %3349 = vmatpush.bf16.msrb.mxu1 %v6941_v8  ;;  %v8964_v20 = vld [vmem:[#allocation49_spill] sm:$0xff] }
 0x557   :  { %v7837_v59 = vadd.f32 %v3212_v36, %v3211_v19  ;;  %3362 = vmatpush.bf16.msrb.mxu2 %v6996_v24  ;;  %3375 = vmatpush.bf16.msrb.mxu3 %v6998_v34  ;;  %v3200_v10 = vadd.f32 %v5912_v25, %v3199_v61  ;;  %vm3206_vm5 = vcmp.eq.f32.partialorder %v3205_v56, 8.507059e+37  ;;  %v8962_v36 = vld [vmem:[#allocation45_spill] sm:$0xff]  ;;  %v8965_v19 = vld [vmem:[#allocation50_spill] sm:$0xff]  ;;  %v8966_v61 = vld [vmem:[#allocation51_spill] sm:$0xff] }
 0x558   :  { %v8969_v56 = vld [vmem:[#allocation56_spill] sm:$0xff] }
 0x559   :  { %5915 = vtanh.f32 %v7837_v59  ;;  %v3204_v44 = vsel %vm3203_vm4, %v5912_v25, %v3200_v10  ;;  %v8951_v25 = vld [vmem:[#allocation28_spill] sm:$0xff]  ;;  %v8967_v10 = vld [vmem:[#allocation54_spill] sm:$0xff] }
 0x55a   :  { %3337 = vmatpush.bf16.msra.mxu0 %v6950_v23  ;;  %3350 = vmatpush.bf16.msrb.mxu1 %v6946_v17  ;;  %v3209_v21 = vsel %vm3206_vm5, %v3208_v46, %v3204_v44  ;;  %v8970_v44 = vld [vmem:[#allocation57_spill] sm:$0xff]  ;;  %v8971_v46 = vld [vmem:[#allocation60_spill] sm:$0xff] }
 0x55b   :  { %3363 = vmatpush.bf16.msrb.mxu2 %v7004_v40  ;;  %3376 = vmatpush.bf16.msrb.mxu3 %v7006_v41 }
 0x55e   :  { %3338 = vmatpush.bf16.msra.mxu0 %v6961_v35  ;;  %3351 = vmatpush.bf16.msrb.mxu1 %v6958_v30 }
 0x55f   :  { %v5916_v37 = vpop.eup %5915  ;;  %3364 = vmatpush.bf16.msrb.mxu2 %v7011_v29  ;;  %3377 = vmatpush.bf16.msrb.mxu3 %v7013_v32 }
 0x560   :  { %v3215_v55 = vmul.f32 %v5916_v37, %v3209_v21  ;;  %v8972_v37 = vld [vmem:[#allocation61_spill] sm:$0xff]  ;;  %v8973_v21 = vld [vmem:[#allocation62_spill] sm:$0xff] }
 0x562   :  { %v3216_v50 = vpack.c.bf16 %v3215_v55, %v3215_v55  ;;  %3339 = vmatpush.bf16.msra.mxu0 %v6969_v47  ;;  %3352 = vmatpush.bf16.msrb.mxu1 %v8806_v15  ;;  %v8974_v55 = vld [vmem:[#allocation65_spill] sm:$0xff] }
 0x563   :  { %3365 = vmatpush.bf16.msrb.mxu2 %v7018_v63  ;;  %3378 = vmatpush.bf16.msrb.mxu3 %v8807_v3 }
 0x564   :  { %3225 = vmatmul.bf16.vlgmr.msrb.gmra.mxu0 %v3216_v50  ;;  %3238 = vmatmul.bf16.vlgmr.msra.gmra.mxu1 %v3216_v50 }
 0x565   :  { %3251 = vmatmul.bf16.vlgmr.msra.gmra.mxu2 %v3216_v50  ;;  %3264 = vmatmul.bf16.vlgmr.msra.gmra.mxu3 %v3216_v50 }
 0x566   :  { %3340 = vmatpush.bf16.msra.mxu0 %v8808_v53  ;;  %3353 = vmatpush.bf16.msrb.mxu1 %v6972_v51 }
 0x567   :  { %3366 = vmatpush.bf16.msrb.mxu2 %v7024_v57  ;;  %3379 = vmatpush.bf16.msrb.mxu3 %v7026_v7 }
 0x56a   :  { %3341 = vmatpush.bf16.msra.mxu0 %v6979_v1  ;;  %3354 = vmatpush.bf16.msrb.mxu1 %v6981_v2 }
 0x56b   :  { %3367 = vmatpush.bf16.msrb.mxu2 %v7030_v14  ;;  %3380 = vmatpush.bf16.msrb.mxu3 %v7032_v18 }
 0x56e   :  { %3342 = vmatpush.bf16.msra.mxu0 %v6986_v58  ;;  %3355 = vmatpush.bf16.msrb.mxu1 %v6988_v5 }
 0x56f   :  { %3368 = vmatpush.bf16.msrb.mxu2 %v7037_v48  ;;  %3381 = vmatpush.bf16.msrb.mxu3 %v7039_v38 }
 0x572   :  { %3343 = vmatpush.bf16.msra.mxu0 %v6992_v11  ;;  %3356 = vmatpush.bf16.msrb.mxu1 %v6994_v22 }
 0x573   :  { %3369 = vmatpush.bf16.msrb.mxu2 %v7044_v49  ;;  %3382 = vmatpush.bf16.msrb.mxu3 %v7046_v52 }
 0x575   :  { %3344 = vmatmul.bf16.vlgmr.msra.gmra.mxu0 %v3216_v50  ;;  %3357 = vmatmul.bf16.vlgmr.msrb.gmra.mxu1 %v3216_v50 }
 0x576   :  { %3393 = vmatpush.bf16.msrb.mxu0 %v7066_v16  ;;  %3406 = vmatpush.bf16.msra.mxu1 %v7068_v6 }
 0x577   :  { %3370 = vmatmul.bf16.vlgmr.msrb.gmra.mxu2 %v3216_v50  ;;  %3383 = vmatmul.bf16.vlgmr.msrb.gmra.mxu3 %v3216_v50  ;;  %v8975_v50 = vld [vmem:[#allocation66_spill] sm:$0xff] }
 0x578   :  { %3419 = vmatpush.bf16.msra.mxu2 %v7079_v33  ;;  %3432 = vmatpush.bf16.msra.mxu3 %v8950_v42 }
 0x57a   :  { %3394 = vmatpush.bf16.msrb.mxu0 %v8951_v25  ;;  %3407 = vmatpush.bf16.msra.mxu1 %v8952_v4 }
 0x57c   :  { %3420 = vmatpush.bf16.msra.mxu2 %v8953_v9  ;;  %3433 = vmatpush.bf16.msra.mxu3 %v8954_v31 }
 0x57e   :  { %3395 = vmatpush.bf16.msrb.mxu0 %v8955_v12  ;;  %3408 = vmatpush.bf16.msra.mxu1 %v8956_v27 }
 0x580   :  { %3421 = vmatpush.bf16.msra.mxu2 %v8957_v26  ;;  %3434 = vmatpush.bf16.msra.mxu3 %v8958_v62 }
 0x582   :  { %3396 = vmatpush.bf16.msrb.mxu0 %v8959_v45  ;;  %3409 = vmatpush.bf16.msra.mxu1 %v8960_v54  ;;  %v9011_v54 = vld [vmem:[#allocation112_spill] sm:$0xff]  ;;  %v9012_v45 = vld [vmem:[#allocation113_spill] sm:$0xff] }
 0x584   :  { %3422 = vmatpush.bf16.msra.mxu2 %v8961_v60  ;;  %3435 = vmatpush.bf16.msra.mxu3 %v8962_v36 }
 0x586   :  { %3397 = vmatpush.bf16.msrb.mxu0 %v8963_v39  ;;  %3410 = vmatpush.bf16.msra.mxu1 %v8964_v20 }
 0x588   :  { %3423 = vmatpush.bf16.msra.mxu2 %v8965_v19  ;;  %3436 = vmatpush.bf16.msra.mxu3 %v8966_v61  ;;  %v8977_v61 = vld [vmem:[#allocation72_spill] sm:$0xff] }
 0x58a   :  { %3398 = vmatpush.bf16.msrb.mxu0 %v8967_v10  ;;  %3411 = vmatpush.bf16.msra.mxu1 %v8968_v28  ;;  %v8978_v10 = vld [vmem:[#allocation73_spill] sm:$0xff]  ;;  %v8979_v28 = vld [vmem:[#allocation68_spill] sm:$0xff] }
 0x58c   :  { %3424 = vmatpush.bf16.msra.mxu2 %v8969_v56  ;;  %3437 = vmatpush.bf16.msra.mxu3 %v8970_v44  ;;  %v8980_v56 = vld [vmem:[#allocation69_spill] sm:$0xff]  ;;  %v8981_v44 = vld [vmem:[#allocation74_spill] sm:$0xff] }
 0x58e   :  { %3399 = vmatpush.bf16.msrb.mxu0 %v8971_v46  ;;  %3412 = vmatpush.bf16.msra.mxu1 %v8972_v37  ;;  %v8982_v46 = vld [vmem:[#allocation75_spill] sm:$0xff]  ;;  %v8983_v37 = vld [vmem:[#allocation76_spill] sm:$0xff] }
 0x590   :  { %3425 = vmatpush.bf16.msra.mxu2 %v8973_v21  ;;  %3438 = vmatpush.bf16.msra.mxu3 %v8974_v55  ;;  %v8984_v21 = vld [vmem:[#allocation77_spill] sm:$0xff]  ;;  %v8985_v55 = vld [vmem:[#allocation80_spill] sm:$0xff] }
 0x592   :  { %3400 = vmatpush.bf16.msrb.mxu0 %v8975_v50  ;;  %3413 = vmatpush.bf16.msra.mxu1 %v8976_v0  ;;  %v8986_v50 = vld [vmem:[#allocation81_spill] sm:$0xff]  ;;  %v8987_v0 = vld [vmem:[#allocation82_spill] sm:$0xff] }
 0x594   :  { %3426 = vmatpush.bf16.msra.mxu2 %v8979_v28  ;;  %3439 = vmatpush.bf16.msra.mxu3 %v8980_v56  ;;  %v8990_v28 = vld [vmem:[#allocation85_spill] sm:$0xff]  ;;  %v8991_v56 = vld [vmem:[#allocation88_spill] sm:$0xff] }
 0x596   :  { %3509 = vmatpush.bf16.msra.mxu0 %v8977_v61  ;;  %3522 = vmatpush.bf16.msrb.mxu1 %v8978_v10  ;;  %v8988_v61 = vld [vmem:[#allocation83_spill] sm:$0xff]  ;;  %v8989_v10 = vld [vmem:[#allocation84_spill] sm:$0xff] }
 0x598   :  { %3535 = vmatpush.bf16.msrb.mxu2 %v8981_v44  ;;  %3548 = vmatpush.bf16.msrb.mxu3 %v8982_v46  ;;  %v8992_v44 = vld [vmem:[#allocation89_spill] sm:$0xff]  ;;  %v8993_v46 = vld [vmem:[#allocation90_spill] sm:$0xff] }
 0x59a   :  { %3510 = vmatpush.bf16.msra.mxu0 %v8983_v37  ;;  %3523 = vmatpush.bf16.msrb.mxu1 %v8984_v21  ;;  %v8994_v37 = vld [vmem:[#allocation91_spill] sm:$0xff]  ;;  %v8995_v21 = vld [vmem:[#allocation92_spill] sm:$0xff] }
 0x59c   :  { %3536 = vmatpush.bf16.msrb.mxu2 %v8985_v55  ;;  %3549 = vmatpush.bf16.msrb.mxu3 %v8986_v50  ;;  %v8996_v55 = vld [vmem:[#allocation93_spill] sm:$0xff]  ;;  %v8997_v50 = vld [vmem:[#allocation94_spill] sm:$0xff] }
 0x59e   :  { %3511 = vmatpush.bf16.msra.mxu0 %v8987_v0  ;;  %3524 = vmatpush.bf16.msrb.mxu1 %v8988_v61  ;;  %v8998_v0 = vld [vmem:[#allocation97_spill] sm:$0xff]  ;;  %v8999_v61 = vld [vmem:[#allocation98_spill] sm:$0xff] }
 0x5a0   :  { %3537 = vmatpush.bf16.msrb.mxu2 %v8989_v10  ;;  %3550 = vmatpush.bf16.msrb.mxu3 %v8990_v28  ;;  %v9000_v10 = vld [vmem:[#allocation99_spill] sm:$0xff]  ;;  %v9001_v28 = vld [vmem:[#allocation100_spill] sm:$0xff] }
 0x5a2   :  { %3512 = vmatpush.bf16.msra.mxu0 %v8991_v56  ;;  %3525 = vmatpush.bf16.msrb.mxu1 %v8992_v44  ;;  %v9002_v56 = vld [vmem:[#allocation101_spill] sm:$0xff]  ;;  %v9003_v44 = vld [vmem:[#allocation102_spill] sm:$0xff] }
 0x5a4   :  { %3538 = vmatpush.bf16.msrb.mxu2 %v8993_v46  ;;  %3551 = vmatpush.bf16.msrb.mxu3 %v8994_v37  ;;  %v9004_v46 = vld [vmem:[#allocation103_spill] sm:$0xff]  ;;  %v9005_v37 = vld [vmem:[#allocation104_spill] sm:$0xff] }
 0x5a6   :  { %3513 = vmatpush.bf16.msra.mxu0 %v8995_v21  ;;  %3526 = vmatpush.bf16.msrb.mxu1 %v8996_v55  ;;  %v9006_v21 = vld [vmem:[#allocation105_spill] sm:$0xff]  ;;  %v9007_v55 = vld [vmem:[#allocation106_spill] sm:$0xff] }
 0x5a8   :  { %3539 = vmatpush.bf16.msrb.mxu2 %v8997_v50  ;;  %3552 = vmatpush.bf16.msrb.mxu3 %v8998_v0  ;;  %v9008_v50 = vld [vmem:[#allocation107_spill] sm:$0xff]  ;;  %v9009_v0 = vld [vmem:[#allocation108_spill] sm:$0xff] }
 0x5aa   :  { %3514 = vmatpush.bf16.msra.mxu0 %v8999_v61  ;;  %3527 = vmatpush.bf16.msrb.mxu1 %v9000_v10  ;;  %v9010_v61 = vld [vmem:[#allocation109_spill] sm:$0xff] }
 0x5ac   :  { %3540 = vmatpush.bf16.msrb.mxu2 %v9001_v28  ;;  %3553 = vmatpush.bf16.msrb.mxu3 %v9002_v56 }
 0x5ae   :  { %3515 = vmatpush.bf16.msra.mxu0 %v9003_v44  ;;  %3528 = vmatpush.bf16.msrb.mxu1 %v9004_v46 }
 0x5b0   :  { %3541 = vmatpush.bf16.msrb.mxu2 %v9005_v37  ;;  %3554 = vmatpush.bf16.msrb.mxu3 %v9006_v21 }
 0x5b2   :  { %3516 = vmatpush.bf16.msra.mxu0 %v9007_v55  ;;  %3529 = vmatpush.bf16.msrb.mxu1 %v9008_v50 }
 0x5b4   :  { %3542 = vmatpush.bf16.msrb.mxu2 %v9009_v0  ;;  %3555 = vmatpush.bf16.msrb.mxu3 %v9010_v61 }
 0x5d1   :  { %v3110_v10 = vpop.f32.mrf.mxu0  ;;  %v3123_v28 = vpop.f32.mrf.mxu1 }
 0x5d8   :  { %v3136_v19 = vpop.f32.mrf.mxu2  ;;  %v3149_v56 = vpop.f32.mrf.mxu3 }
 0x5d9   :  { %v3112_v20 = vpop.f32.mrf.mxu0  ;;  %v3125_v44 = vpop.f32.mrf.mxu1 }
 0x5da   :  { %v9013_v44 = vld [vmem:[#allocation114_spill] sm:$0xff] }
 0x5e0   :  { %v3138_v39 = vpop.f32.mrf.mxu2  ;;  %v3151_v46 = vpop.f32.mrf.mxu3 }
 0x5e1   :  { %v3226_v36 = vpop.f32.mrf.mxu0  ;;  %v3239_v37 = vpop.f32.mrf.mxu1 }
 0x5e2   :  { %v3227_v60 = vadd.f32 %v3226_v36, %v3110_v10  ;;  %v3240_v21 = vadd.f32 %v3239_v37, %v3123_v28 }
 0x5e4   :  { %v3269_v55 = vadd.f32 %v3227_v60, %v9011_v54  ;;  %v3270_v50 = vadd.f32 %v3240_v21, %v9012_v45 }
 0x5e6   :  { %v5506_v62 = vmul.f32 -1.442695, %v3269_v55  ;;  %v5507_v0 = vmul.f32 -1.442695, %v3270_v50  ;;  %v9014_v55 = vld [vmem:[#allocation58_spill] sm:$0xff] }
 0x5e8   :  { %5917 = vpow2.f32 %v5506_v62  ;;  %v3252_v61 = vpop.f32.mrf.mxu2  ;;  %v3265_v26 = vpop.f32.mrf.mxu3 }
 0x5e9   :  { %5919 = vpow2.f32 %v5507_v0  ;;  %v3266_v27 = vadd.f32 %v3265_v26, %v3149_v56  ;;  %v3228_v12 = vpop.f32.mrf.mxu0  ;;  %v3241_v20 = vpop.f32.mrf.mxu1  ;;  %v3253_v21 = vadd.f32 %v3252_v61, %v3136_v19  ;;  %v9015_v26 = vld [vmem:[#allocation59_spill] sm:$0xff] }
 0x5eb   :  { %v3272_v39 = vadd.f32 %v3266_v27, %v9013_v44 }
 0x5ed   :  { %v5508_v46 = vmul.f32 -1.442695, %v3272_v39 }
 0x5ee   :  { %v5918_v31 = vpop.eup %5917 }
 0x5ef   :  { %v5920_v9 = vpop.eup %5919  ;;  %v3276_v36 = vadd.f32 1.0, %v5918_v31  ;;  %5921 = vpow2.f32 %v5508_v46  ;;  %v9016_v31 = vld [vmem:[#allocation21_spill] sm:$0xff] }
 0x5f0   :  { %v3295_v10 = vadd.f32 1.0, %v5920_v9  ;;  %v3254_v60 = vpop.f32.mrf.mxu2  ;;  %v3267_v28 = vpop.f32.mrf.mxu3  ;;  %v3271_v46 = vadd.f32 %v3253_v21, %v9016_v31 }
 0x5f1   :  { %5923 = vrcp.f32 %v3276_v36  ;;  %v3288_v44 = vand.u32 2147483648, %v3276_v36  ;;  %vm3282_vm8 = vweird.f32 %v3276_v36 }
 0x5f2   :  { %5925 = vrcp.f32 %v3295_v10  ;;  %v3345_v37 = vpop.f32.mrf.mxu0  ;;  %v3358_v62 = vpop.f32.mrf.mxu1  ;;  %v3307_v45 = vand.u32 2147483648, %v3295_v10  ;;  %vm3301_vm9 = vweird.f32 %v3295_v10 }
 0x5f3   :  { %v3388_v0 = vadd.f32 %v3345_v37, %v9014_v55  ;;  %v3389_v12 = vadd.f32 %v3358_v62, %v9015_v26  ;;  %v9017_v55 = vld [vmem:[#allocation53_spill] sm:$0xff] }
 0x5f5   :  { %v5922_v56 = vpop.eup %5921  ;;  %v5509_v50 = vmul.f32 -1.442695, %v3388_v0  ;;  %v5510_v27 = vmul.f32 -1.442695, %v3389_v12 }
 0x5f6   :  { %v7942_v20 = vadd.f32 1.0, %v5922_v56  ;;  %v3286_v56 = vand.u32 2147483647, %v3276_v36 }
 0x5f7   :  { %v5924_v39 = vpop.eup %5923  ;;  %5927 = vpow2.f32 %v5509_v50 }
 0x5f8   :  { %v5926_v9 = vpop.eup %5925  ;;  %v3278_v60 = vmul.f32 %v5924_v39, %v3276_v36  ;;  %5929 = vrcp.f32 %v7942_v20  ;;  %vm3283_vm6 = vweird.f32 %v5924_v39  ;;  %vm3287_vm11 = vcmp.eq.f32.partialorder %v3286_v56, 8.507059e+37 }
 0x5f9   :  { %v3297_v28 = vmul.f32 %v5926_v9, %v3295_v10  ;;  %5931 = vpow2.f32 %v5510_v27  ;;  %vm3302_vm7 = vweird.f32 %v5926_v9  ;;  %v3305_v27 = vand.u32 2147483647, %v3295_v10  ;;  %vm3284_vm10 = vmor %vm3282_vm8, %vm3283_vm6 }
 0x5fa   :  { %v3371_v19 = vpop.f32.mrf.mxu2  ;;  %v3384_v61 = vpop.f32.mrf.mxu3  ;;  %v3279_v37 = vsub.f32 1.0, %v3278_v60  ;;  %5933 = vtanh.f32 %v3271_v46  ;;  %v3289_v46 = vor.u32 1.1754944e-38, %v3288_v44  ;;  %vm3303_vm12 = vmor %vm3301_vm9, %vm3302_vm7  ;;  %vm3321_vm15 = vweird.f32 %v7942_v20 }
 0x5fb   :  { %v3391_v62 = vadd.f32 %v3384_v61, %v9017_v55  ;;  %v3347_v26 = vpop.f32.mrf.mxu0  ;;  %v3360_v0 = vpop.f32.mrf.mxu1  ;;  %v3298_v12 = vsub.f32 1.0, %v3297_v28  ;;  %vm3306_vm13 = vcmp.eq.f32.partialorder %v3305_v27, 8.507059e+37  ;;  %v9018_v27 = vld [vmem:[#allocation52_spill] sm:$0xff] }
 0x5fc   :  { %v3280_v21 = vmul.f32 %v5924_v39, %v3279_v37 }
 0x5fd   :  { %v5511_v50 = vmul.f32 -1.442695, %v3391_v62  ;;  %v5928_v31 = vpop.eup %5927  ;;  %v3299_v54 = vmul.f32 %v5926_v9, %v3298_v12  ;;  %v3308_v62 = vor.u32 1.1754944e-38, %v3307_v45 }
 0x5fe   :  { %v7947_v4 = vpop.eup %5929  ;;  %v3281_v60 = vadd.f32 %v5924_v39, %v3280_v21  ;;  %v7949_v61 = vadd.f32 1.0, %v5928_v31 }
 0x5ff   :  { %5935 = vpow2.f32 %v5511_v50  ;;  %v5932_v28 = vpop.eup %5931  ;;  %v3300_v55 = vadd.f32 %v5926_v9, %v3299_v54  ;;  %v3317_v37 = vmul.f32 %v7947_v4, %v7942_v20  ;;  %vm3322_vm14 = vweird.f32 %v7947_v4 }
 0x600   :  { %v3285_v26 = vsel %vm3284_vm10, %v5924_v39, %v3281_v60  ;;  %5937 = vrcp.f32 %v7949_v61  ;;  %v7954_v36 = vadd.f32 1.0, %v5932_v28  ;;  %v5934_v10 = vpop.eup %5933  ;;  %vm7973_vm0 = vmor %vm3321_vm15, %vm3322_vm14  ;;  %vm3454_vm2 = vweird.f32 %v7949_v61 }
 0x601   :  { %v3290_v0 = vsel %vm3287_vm11, %v3289_v46, %v3285_v26  ;;  %v3304_v31 = vsel %vm3303_vm12, %v5926_v9, %v3300_v55  ;;  %v3318_v12 = vsub.f32 1.0, %v3317_v37  ;;  %v3327_v9 = vand.u32 2147483648, %v7942_v20 }
 0x602   :  { %v3373_v21 = vpop.f32.mrf.mxu2  ;;  %v3386_v50 = vpop.f32.mrf.mxu3  ;;  %v3309_v56 = vsel %vm3306_vm13, %v3308_v62, %v3304_v31  ;;  %v3332_v44 = vmul.f32 %v5934_v10, %v3290_v0  ;;  %5939 = vrcp.f32 %v7954_v36  ;;  %v3390_v46 = vadd.f32 %v3371_v19, %v9018_v27 }
 0x603   :  { %v3331_v54 = vmul.f32 %v3309_v56, %v7807_v43  ;;  %v3319_v45 = vmul.f32 %v7947_v4, %v3318_v12  ;;  %v3325_v62 = vand.u32 2147483647, %v7942_v20  ;;  %v3460_v0 = vand.u32 2147483648, %v7949_v61 }
 0x604   :  { %v3328_v12 = vor.u32 1.1754944e-38, %v3327_v9  ;;  %v3458_v20 = vand.u32 2147483647, %v7949_v61  ;;  %v3479_v56 = vand.u32 2147483648, %v7954_v36  ;;  %vm3473_vm5 = vweird.f32 %v7954_v36 }
 0x605   :  { %v5936_v39 = vpop.eup %5935  ;;  %v7959_v60 = vadd.f32 %v3332_v44, %v3331_v54  ;;  %v3320_v55 = vadd.f32 %v7947_v4, %v3319_v45  ;;  %v3477_v44 = vand.u32 2147483647, %v7954_v36  ;;  %vm3326_vm3 = vcmp.eq.f32.partialorder %v3325_v62, 8.507059e+37 }
 0x606   :  { %v7961_v28 = vadd.f32 1.0, %v5936_v39  ;;  %v5938_v25 = vpop.eup %5937  ;;  %vm3459_vm7 = vcmp.eq.f32.partialorder %v3458_v20, 8.507059e+37 }
 0x607   :  { %5941 = vtanh.f32 %v7959_v60  ;;  %v3450_v43 = vmul.f32 %v5938_v25, %v7949_v61  ;;  %v3324_v31 = vsel %vm7973_vm0, %v7947_v4, %v3320_v55  ;;  %vm3455_vm1 = vweird.f32 %v5938_v25 }
 0x608   :  { %v5940_v37 = vpop.eup %5939  ;;  %5943 = vrcp.f32 %v7961_v28  ;;  %v3329_v27 = vsel %vm3326_vm3, %v3328_v12, %v3324_v31  ;;  %vm3456_vm6 = vmor %vm3454_vm2, %vm3455_vm1  ;;  %v3461_v4 = vor.u32 1.1754944e-38, %v3460_v0  ;;  %vm3478_vm9 = vcmp.eq.f32.partialorder %v3477_v44, 8.507059e+37 }
 0x609   :  { %v3451_v26 = vsub.f32 1.0, %v3450_v43  ;;  %v3469_v10 = vmul.f32 %v5940_v37, %v7954_v36  ;;  %5945 = vtanh.f32 %v3390_v46  ;;  %vm3474_vm4 = vweird.f32 %v5940_v37 }
 0x60a   :  { %vm3475_vm8 = vmor %vm3473_vm5, %vm3474_vm4  ;;  %v3499_v20 = vand.u32 2147483648, %v7961_v28  ;;  %vm3493_vm11 = vweird.f32 %v7961_v28 }
 0x60b   :  { %v3470_v21 = vsub.f32 1.0, %v3469_v10  ;;  %v3452_v50 = vmul.f32 %v5938_v25, %v3451_v26  ;;  %v3480_v10 = vor.u32 1.1754944e-38, %v3479_v56 }
 0x60c   :  { %v3500_v44 = vor.u32 1.1754944e-38, %v3499_v20  ;;  %v9039_v20 = vld [vmem:[#allocation56_spill] sm:$0xff] }
 0x60d   :  { %v5942_v54 = vpop.eup %5941  ;;  %v3471_v45 = vmul.f32 %v5940_v37, %v3470_v21  ;;  %v3453_v39 = vadd.f32 %v5938_v25, %v3452_v50 }
 0x60e   :  { %v5944_v46 = vpop.eup %5943  ;;  %v3335_v9 = vmul.f32 %v5942_v54, %v3329_v27  ;;  %v9021_v27 = vld [vmem:[#allocation28_spill] sm:$0xff] }
 0x60f   :  { %v3457_v55 = vsel %vm3456_vm6, %v5938_v25, %v3453_v39  ;;  %v3472_v43 = vadd.f32 %v5940_v37, %v3471_v45  ;;  %v3489_v26 = vmul.f32 %v5944_v46, %v7961_v28  ;;  %v5946_v61 = vpop.eup %5945  ;;  %vm3494_vm10 = vweird.f32 %v5944_v46 }
 0x610   :  { %v3462_v62 = vsel %vm3459_vm7, %v3461_v4, %v3457_v55  ;;  %v3392_v19 = vpack.c.bf16 %v3335_v9, %v3335_v9  ;;  %vm3495_vm12 = vmor %vm3493_vm11, %vm3494_vm10  ;;  %v9023_v4 = vld [vmem:[#allocation30_spill] sm:$0xff]  ;;  %v9024_v9 = vld [vmem:[#allocation33_spill] sm:$0xff] }
 0x611   :  { %v3476_v21 = vsel %vm3475_vm8, %v5940_v37, %v3472_v43  ;;  %v3504_v50 = vmul.f32 %v5946_v61, %v3462_v62  ;;  %v3490_v31 = vsub.f32 1.0, %v3489_v26  ;;  %v9025_v55 = vld [vmem:[#allocation36_spill] sm:$0xff]  ;;  %v9026_v43 = vld [vmem:[#allocation37_spill] sm:$0xff]  ;;  %v9027_v26 = vld [vmem:[#allocation38_spill] sm:$0xff] }
 0x612   :  { %v3481_v12 = vsel %vm3478_vm9, %v3480_v10, %v3476_v21  ;;  %3401 = vmatmul.bf16.vlgmr.msrb.gmra.mxu0 %v3392_v19  ;;  %3414 = vmatmul.bf16.vlgmr.msra.gmra.mxu1 %v3392_v19  ;;  %v9028_v61 = vld [vmem:[#allocation41_spill] sm:$0xff]  ;;  %v9029_v10 = vld [vmem:[#allocation42_spill] sm:$0xff]  ;;  %v9030_v62 = vld [vmem:[#allocation43_spill] sm:$0xff] }
 0x613   :  { %v3503_v36 = vmul.f32 %v3481_v12, %v7837_v59  ;;  %v3491_v0 = vmul.f32 %v5944_v46, %v3490_v31  ;;  %3427 = vmatmul.bf16.vlgmr.msra.gmra.mxu2 %v3392_v19  ;;  %3440 = vmatmul.bf16.vlgmr.msra.gmra.mxu3 %v3392_v19  ;;  %v3497_v59 = vand.u32 2147483647, %v7961_v28  ;;  %v9031_v19 = vld [vmem:[#allocation44_spill] sm:$0xff]  ;;  %v9032_v21 = vld [vmem:[#allocation45_spill] sm:$0xff]  ;;  %v9035_v12 = vld [vmem:[#allocation50_spill] sm:$0xff] }
 0x614   :  { %3628 = vmatpush.bf16.msrb.mxu0 %v6944_v13  ;;  %3641 = vmatpush.bf16.msra.mxu1 %v6941_v8  ;;  %v9034_v31 = vld [vmem:[#allocation49_spill] sm:$0xff] }
 0x615   :  { %v7990_v25 = vadd.f32 %v3504_v50, %v3503_v36  ;;  %3654 = vmatpush.bf16.msra.mxu2 %v6996_v24  ;;  %3667 = vmatpush.bf16.msra.mxu3 %v6998_v34  ;;  %v3492_v37 = vadd.f32 %v5944_v46, %v3491_v0  ;;  %vm3498_vm13 = vcmp.eq.f32.partialorder %v3497_v59, 8.507059e+37  ;;  %v9033_v50 = vld [vmem:[#allocation48_spill] sm:$0xff]  ;;  %v9036_v36 = vld [vmem:[#allocation51_spill] sm:$0xff]  ;;  %v9037_v0 = vld [vmem:[#allocation54_spill] sm:$0xff] }
 0x616   :  { %v9040_v59 = vld [vmem:[#allocation57_spill] sm:$0xff] }
 0x617   :  { %5947 = vtanh.f32 %v7990_v25  ;;  %v3496_v56 = vsel %vm3495_vm12, %v5944_v46, %v3492_v37  ;;  %v9022_v46 = vld [vmem:[#allocation29_spill] sm:$0xff]  ;;  %v9038_v37 = vld [vmem:[#allocation55_spill] sm:$0xff] }
 0x618   :  { %3629 = vmatpush.bf16.msrb.mxu0 %v6950_v23  ;;  %3642 = vmatpush.bf16.msra.mxu1 %v6946_v17  ;;  %v3501_v45 = vsel %vm3498_vm13, %v3500_v44, %v3496_v56  ;;  %v9041_v56 = vld [vmem:[#allocation60_spill] sm:$0xff]  ;;  %v9042_v44 = vld [vmem:[#allocation61_spill] sm:$0xff] }
 0x619   :  { %3655 = vmatpush.bf16.msra.mxu2 %v7004_v40  ;;  %3668 = vmatpush.bf16.msra.mxu3 %v7006_v41 }
 0x61c   :  { %3630 = vmatpush.bf16.msrb.mxu0 %v6961_v35  ;;  %3643 = vmatpush.bf16.msra.mxu1 %v6958_v30 }
 0x61d   :  { %v5948_v54 = vpop.eup %5947  ;;  %3656 = vmatpush.bf16.msra.mxu2 %v7011_v29  ;;  %3669 = vmatpush.bf16.msra.mxu3 %v7013_v32 }
 0x61e   :  { %v3507_v28 = vmul.f32 %v5948_v54, %v3501_v45  ;;  %v9043_v54 = vld [vmem:[#allocation62_spill] sm:$0xff]  ;;  %v9044_v45 = vld [vmem:[#allocation65_spill] sm:$0xff] }
 0x620   :  { %v3508_v39 = vpack.c.bf16 %v3507_v28, %v3507_v28  ;;  %3631 = vmatpush.bf16.msrb.mxu0 %v6969_v47  ;;  %3644 = vmatpush.bf16.msra.mxu1 %v8806_v15  ;;  %v9045_v28 = vld [vmem:[#allocation66_spill] sm:$0xff] }
 0x621   :  { %3657 = vmatpush.bf16.msra.mxu2 %v7018_v63  ;;  %3670 = vmatpush.bf16.msra.mxu3 %v8807_v3 }
 0x622   :  { %3517 = vmatmul.bf16.vlgmr.msra.gmra.mxu0 %v3508_v39  ;;  %3530 = vmatmul.bf16.vlgmr.msrb.gmra.mxu1 %v3508_v39 }
 0x623   :  { %3543 = vmatmul.bf16.vlgmr.msrb.gmra.mxu2 %v3508_v39  ;;  %3556 = vmatmul.bf16.vlgmr.msrb.gmra.mxu3 %v3508_v39 }
 0x624   :  { %3632 = vmatpush.bf16.msrb.mxu0 %v8808_v53  ;;  %3645 = vmatpush.bf16.msra.mxu1 %v6972_v51 }
 0x625   :  { %3658 = vmatpush.bf16.msra.mxu2 %v7024_v57  ;;  %3671 = vmatpush.bf16.msra.mxu3 %v7026_v7 }
 0x628   :  { %3633 = vmatpush.bf16.msrb.mxu0 %v6979_v1  ;;  %3646 = vmatpush.bf16.msra.mxu1 %v6981_v2 }
 0x629   :  { %3659 = vmatpush.bf16.msra.mxu2 %v7030_v14  ;;  %3672 = vmatpush.bf16.msra.mxu3 %v7032_v18 }
 0x62c   :  { %3634 = vmatpush.bf16.msrb.mxu0 %v6986_v58  ;;  %3647 = vmatpush.bf16.msra.mxu1 %v6988_v5 }
 0x62d   :  { %3660 = vmatpush.bf16.msra.mxu2 %v7037_v48  ;;  %3673 = vmatpush.bf16.msra.mxu3 %v7039_v38 }
 0x630   :  { %3635 = vmatpush.bf16.msrb.mxu0 %v6992_v11  ;;  %3648 = vmatpush.bf16.msra.mxu1 %v6994_v22 }
 0x631   :  { %3661 = vmatpush.bf16.msra.mxu2 %v7044_v49  ;;  %3674 = vmatpush.bf16.msra.mxu3 %v7046_v52 }
 0x633   :  { %3636 = vmatmul.bf16.vlgmr.msrb.gmra.mxu0 %v3508_v39  ;;  %3649 = vmatmul.bf16.vlgmr.msra.gmra.mxu1 %v3508_v39 }
 0x634   :  { %3685 = vmatpush.bf16.msra.mxu0 %v7066_v16  ;;  %3698 = vmatpush.bf16.msrb.mxu1 %v7068_v6 }
 0x635   :  { %3662 = vmatmul.bf16.vlgmr.msra.gmra.mxu2 %v3508_v39  ;;  %3675 = vmatmul.bf16.vlgmr.msra.gmra.mxu3 %v3508_v39  ;;  %v9046_v39 = vld [vmem:[#allocation67_spill] sm:$0xff] }
 0x636   :  { %3711 = vmatpush.bf16.msrb.mxu2 %v7079_v33  ;;  %3724 = vmatpush.bf16.msrb.mxu3 %v8950_v42 }
 0x638   :  { %3686 = vmatpush.bf16.msra.mxu0 %v9021_v27  ;;  %3699 = vmatpush.bf16.msrb.mxu1 %v9022_v46  ;;  %v9092_v27 = vld [vmem:[#allocation63_spill] sm:$0xff] }
 0x63a   :  { %3712 = vmatpush.bf16.msrb.mxu2 %v9023_v4  ;;  %3725 = vmatpush.bf16.msrb.mxu3 %v9024_v9 }
 0x63c   :  { %3687 = vmatpush.bf16.msra.mxu0 %v9025_v55  ;;  %3700 = vmatpush.bf16.msrb.mxu1 %v9026_v43 }
 0x63e   :  { %3713 = vmatpush.bf16.msrb.mxu2 %v9027_v26  ;;  %3726 = vmatpush.bf16.msrb.mxu3 %v9028_v61 }
 0x640   :  { %3688 = vmatpush.bf16.msra.mxu0 %v9029_v10  ;;  %3701 = vmatpush.bf16.msrb.mxu1 %v9030_v62  ;;  %v9081_v62 = vld [vmem:[#allocation112_spill] sm:$0xff]  ;;  %v9082_v10 = vld [vmem:[#allocation113_spill] sm:$0xff] }
 0x642   :  { %3714 = vmatpush.bf16.msrb.mxu2 %v9031_v19  ;;  %3727 = vmatpush.bf16.msrb.mxu3 %v9032_v21 }
 0x644   :  { %3689 = vmatpush.bf16.msra.mxu0 %v9033_v50  ;;  %3702 = vmatpush.bf16.msrb.mxu1 %v9034_v31 }
 0x646   :  { %3715 = vmatpush.bf16.msrb.mxu2 %v9035_v12  ;;  %3728 = vmatpush.bf16.msrb.mxu3 %v9036_v36  ;;  %v9047_v36 = vld [vmem:[#allocation72_spill] sm:$0xff] }
 0x648   :  { %3690 = vmatpush.bf16.msra.mxu0 %v9037_v0  ;;  %3703 = vmatpush.bf16.msrb.mxu1 %v9038_v37  ;;  %v9048_v0 = vld [vmem:[#allocation73_spill] sm:$0xff]  ;;  %v9049_v37 = vld [vmem:[#allocation68_spill] sm:$0xff] }
 0x64a   :  { %3716 = vmatpush.bf16.msrb.mxu2 %v9039_v20  ;;  %3729 = vmatpush.bf16.msrb.mxu3 %v9040_v59  ;;  %v9050_v20 = vld [vmem:[#allocation69_spill] sm:$0xff]  ;;  %v9051_v59 = vld [vmem:[#allocation74_spill] sm:$0xff] }
 0x64c   :  { %3691 = vmatpush.bf16.msra.mxu0 %v9041_v56  ;;  %3704 = vmatpush.bf16.msrb.mxu1 %v9042_v44  ;;  %v9052_v56 = vld [vmem:[#allocation75_spill] sm:$0xff]  ;;  %v9053_v44 = vld [vmem:[#allocation76_spill] sm:$0xff] }
 0x64e   :  { %3717 = vmatpush.bf16.msrb.mxu2 %v9043_v54  ;;  %3730 = vmatpush.bf16.msrb.mxu3 %v9044_v45  ;;  %v9054_v54 = vld [vmem:[#allocation77_spill] sm:$0xff]  ;;  %v9055_v45 = vld [vmem:[#allocation80_spill] sm:$0xff] }
 0x650   :  { %3692 = vmatpush.bf16.msra.mxu0 %v9045_v28  ;;  %3705 = vmatpush.bf16.msrb.mxu1 %v9046_v39  ;;  %v9056_v28 = vld [vmem:[#allocation81_spill] sm:$0xff]  ;;  %v9057_v39 = vld [vmem:[#allocation82_spill] sm:$0xff] }
 0x652   :  { %3718 = vmatpush.bf16.msrb.mxu2 %v9049_v37  ;;  %3731 = vmatpush.bf16.msrb.mxu3 %v9050_v20  ;;  %v9060_v37 = vld [vmem:[#allocation85_spill] sm:$0xff]  ;;  %v9061_v20 = vld [vmem:[#allocation88_spill] sm:$0xff] }
 0x654   :  { %3801 = vmatpush.bf16.msrb.mxu0 %v9047_v36  ;;  %3814 = vmatpush.bf16.msra.mxu1 %v9048_v0  ;;  %v9058_v36 = vld [vmem:[#allocation83_spill] sm:$0xff]  ;;  %v9059_v0 = vld [vmem:[#allocation84_spill] sm:$0xff] }
 0x656   :  { %3827 = vmatpush.bf16.msra.mxu2 %v9051_v59  ;;  %3840 = vmatpush.bf16.msra.mxu3 %v9052_v56  ;;  %v9062_v59 = vld [vmem:[#allocation89_spill] sm:$0xff]  ;;  %v9063_v56 = vld [vmem:[#allocation90_spill] sm:$0xff] }
 0x658   :  { %3802 = vmatpush.bf16.msrb.mxu0 %v9053_v44  ;;  %3815 = vmatpush.bf16.msra.mxu1 %v9054_v54  ;;  %v9064_v44 = vld [vmem:[#allocation91_spill] sm:$0xff]  ;;  %v9065_v54 = vld [vmem:[#allocation92_spill] sm:$0xff] }
 0x65a   :  { %3828 = vmatpush.bf16.msra.mxu2 %v9055_v45  ;;  %3841 = vmatpush.bf16.msra.mxu3 %v9056_v28  ;;  %v9066_v45 = vld [vmem:[#allocation93_spill] sm:$0xff]  ;;  %v9067_v28 = vld [vmem:[#allocation94_spill] sm:$0xff] }
 0x65c   :  { %3803 = vmatpush.bf16.msrb.mxu0 %v9057_v39  ;;  %3816 = vmatpush.bf16.msra.mxu1 %v9058_v36  ;;  %v9068_v39 = vld [vmem:[#allocation97_spill] sm:$0xff]  ;;  %v9069_v36 = vld [vmem:[#allocation98_spill] sm:$0xff] }
 0x65e   :  { %3829 = vmatpush.bf16.msra.mxu2 %v9059_v0  ;;  %3842 = vmatpush.bf16.msra.mxu3 %v9060_v37  ;;  %v9070_v0 = vld [vmem:[#allocation99_spill] sm:$0xff]  ;;  %v9071_v37 = vld [vmem:[#allocation100_spill] sm:$0xff] }
 0x660   :  { %3804 = vmatpush.bf16.msrb.mxu0 %v9061_v20  ;;  %3817 = vmatpush.bf16.msra.mxu1 %v9062_v59  ;;  %v9072_v20 = vld [vmem:[#allocation101_spill] sm:$0xff]  ;;  %v9073_v59 = vld [vmem:[#allocation102_spill] sm:$0xff] }
 0x662   :  { %3830 = vmatpush.bf16.msra.mxu2 %v9063_v56  ;;  %3843 = vmatpush.bf16.msra.mxu3 %v9064_v44  ;;  %v9074_v56 = vld [vmem:[#allocation103_spill] sm:$0xff]  ;;  %v9075_v44 = vld [vmem:[#allocation104_spill] sm:$0xff] }
 0x664   :  { %3805 = vmatpush.bf16.msrb.mxu0 %v9065_v54  ;;  %3818 = vmatpush.bf16.msra.mxu1 %v9066_v45  ;;  %v9076_v54 = vld [vmem:[#allocation105_spill] sm:$0xff]  ;;  %v9077_v45 = vld [vmem:[#allocation106_spill] sm:$0xff] }
 0x666   :  { %3831 = vmatpush.bf16.msra.mxu2 %v9067_v28  ;;  %3844 = vmatpush.bf16.msra.mxu3 %v9068_v39  ;;  %v9078_v28 = vld [vmem:[#allocation107_spill] sm:$0xff]  ;;  %v9079_v39 = vld [vmem:[#allocation108_spill] sm:$0xff] }
 0x668   :  { %3806 = vmatpush.bf16.msrb.mxu0 %v9069_v36  ;;  %3819 = vmatpush.bf16.msra.mxu1 %v9070_v0  ;;  %v9080_v36 = vld [vmem:[#allocation109_spill] sm:$0xff] }
 0x66a   :  { %3832 = vmatpush.bf16.msra.mxu2 %v9071_v37  ;;  %3845 = vmatpush.bf16.msra.mxu3 %v9072_v20 }
 0x66c   :  { %3807 = vmatpush.bf16.msrb.mxu0 %v9073_v59  ;;  %3820 = vmatpush.bf16.msra.mxu1 %v9074_v56 }
 0x66e   :  { %3833 = vmatpush.bf16.msra.mxu2 %v9075_v44  ;;  %3846 = vmatpush.bf16.msra.mxu3 %v9076_v54 }
 0x670   :  { %3808 = vmatpush.bf16.msrb.mxu0 %v9077_v45  ;;  %3821 = vmatpush.bf16.msra.mxu1 %v9078_v28 }
 0x672   :  { %3834 = vmatpush.bf16.msra.mxu2 %v9079_v39  ;;  %3847 = vmatpush.bf16.msra.mxu3 %v9080_v36 }
 0x68f   :  { %v3402_v0 = vpop.f32.mrf.mxu0  ;;  %v3415_v37 = vpop.f32.mrf.mxu1 }
 0x696   :  { %v3428_v12 = vpop.f32.mrf.mxu2  ;;  %v3441_v20 = vpop.f32.mrf.mxu3 }
 0x697   :  { %v3404_v31 = vpop.f32.mrf.mxu0  ;;  %v3417_v59 = vpop.f32.mrf.mxu1 }
 0x698   :  { %v9083_v59 = vld [vmem:[#allocation114_spill] sm:$0xff] }
 0x69e   :  { %v3430_v50 = vpop.f32.mrf.mxu2  ;;  %v3443_v56 = vpop.f32.mrf.mxu3 }
 0x69f   :  { %v3518_v21 = vpop.f32.mrf.mxu0  ;;  %v3531_v44 = vpop.f32.mrf.mxu1 }
 0x6a0   :  { %v3519_v19 = vadd.f32 %v3518_v21, %v3402_v0  ;;  %v3532_v54 = vadd.f32 %v3531_v44, %v3415_v37  ;;  %v9084_v44 = vld [vmem:[#allocation31_spill] sm:$0xff] }
 0x6a2   :  { %v3561_v45 = vadd.f32 %v3519_v19, %v9081_v62  ;;  %v3562_v28 = vadd.f32 %v3532_v54, %v9082_v10  ;;  %v9085_v54 = vld [vmem:[#allocation70_spill] sm:$0xff] }
 0x6a4   :  { %v5512_v61 = vmul.f32 -1.442695, %v3561_v45  ;;  %v5513_v39 = vmul.f32 -1.442695, %v3562_v28  ;;  %v9086_v45 = vld [vmem:[#allocation32_spill] sm:$0xff]  ;;  %v9087_v28 = vld [vmem:[#allocation71_spill] sm:$0xff] }
 0x6a6   :  { %5949 = vpow2.f32 %v5512_v61  ;;  %v3544_v36 = vpop.f32.mrf.mxu2  ;;  %v3557_v26 = vpop.f32.mrf.mxu3  ;;  %v1489_v61 = vadd.f32 %v9085_v54, %v9084_v44  ;;  %v9089_v44 = vld [vmem:[#allocation24_spill] sm:$0xff] }
 0x6a7   :  { %5951 = vpow2.f32 %v5513_v39  ;;  %v3558_v43 = vadd.f32 %v3557_v26, %v3441_v20  ;;  %v3520_v55 = vpop.f32.mrf.mxu0  ;;  %v3533_v31 = vpop.f32.mrf.mxu1  ;;  %v1518_v39 = vadd.f32 %v9087_v28, %v9086_v45  ;;  %v3545_v26 = vadd.f32 %v3544_v36, %v3428_v12  ;;  %v9090_v28 = vld [vmem:[#allocation64_spill] sm:$0xff] }
 0x6a8   :  { %v1576_v45 = vadd.f32 %v9090_v28, %v9089_v44 }
 0x6a9   :  { %v3564_v50 = vadd.f32 %v3558_v43, %v9083_v59 }
 0x6ab   :  { %v5514_v56 = vmul.f32 -1.442695, %v3564_v50 }
 0x6ac   :  { %v5950_v9 = vpop.eup %5949 }
 0x6ad   :  { %v5952_v4 = vpop.eup %5951  ;;  %v3568_v21 = vadd.f32 1.0, %v5950_v9  ;;  %5953 = vpow2.f32 %v5514_v56 }
 0x6ae   :  { %v8093_v0 = vadd.f32 1.0, %v5952_v4  ;;  %v3546_v19 = vpop.f32.mrf.mxu2  ;;  %v3559_v37 = vpop.f32.mrf.mxu3 }
 0x6af   :  { %5955 = vrcp.f32 %v3568_v21  ;;  %v9088_v37 = vld [vmem:[#allocation21_spill] sm:$0xff]  ;;  %vm3574_vm0 = vweird.f32 %v3568_v21 }
 0x6b0   :  { %5957 = vrcp.f32 %v8093_v0  ;;  %v3637_v55 = vpop.f32.mrf.mxu0  ;;  %v3650_v43 = vpop.f32.mrf.mxu1  ;;  %v3563_v59 = vadd.f32 %v3545_v26, %v9088_v37  ;;  %v3580_v26 = vand.u32 2147483648, %v3568_v21  ;;  %vm3593_vm1 = vweird.f32 %v8093_v0 }
 0x6b1   :  { %v3680_v20 = vadd.f32 %v3637_v55, %v1489_v61  ;;  %v3681_v31 = vadd.f32 %v3650_v43, %v1518_v39 }
 0x6b3   :  { %v5954_v9 = vpop.eup %5953  ;;  %v5515_v50 = vmul.f32 -1.442695, %v3680_v20  ;;  %v5516_v4 = vmul.f32 -1.442695, %v3681_v31 }
 0x6b4   :  { %v8100_v56 = vadd.f32 1.0, %v5954_v9  ;;  %v3578_v9 = vand.u32 2147483647, %v3568_v21 }
 0x6b5   :  { %v5956_v19 = vpop.eup %5955  ;;  %5959 = vpow2.f32 %v5515_v50  ;;  %v3599_v50 = vand.u32 2147483648, %v8093_v0 }
 0x6b6   :  { %v5958_v54 = vpop.eup %5957  ;;  %v3570_v10 = vmul.f32 %v5956_v19, %v3568_v21  ;;  %5961 = vrcp.f32 %v8100_v56  ;;  %vm3575_vm14 = vweird.f32 %v5956_v19  ;;  %vm3579_vm3 = vcmp.eq.f32.partialorder %v3578_v9, 8.507059e+37 }
 0x6b7   :  { %v3589_v12 = vmul.f32 %v5958_v54, %v8093_v0  ;;  %5963 = vpow2.f32 %v5516_v4  ;;  %vm3594_vm15 = vweird.f32 %v5958_v54  ;;  %v3597_v4 = vand.u32 2147483647, %v8093_v0  ;;  %vm3576_vm2 = vmor %vm3574_vm0, %vm3575_vm14 }
 0x6b8   :  { %v3663_v36 = vpop.f32.mrf.mxu2  ;;  %v3676_v61 = vpop.f32.mrf.mxu3  ;;  %v3571_v39 = vsub.f32 1.0, %v3570_v10  ;;  %5965 = vtanh.f32 %v3563_v59  ;;  %vm3595_vm4 = vmor %vm3593_vm1, %vm3594_vm15  ;;  %v3600_v21 = vor.u32 1.1754944e-38, %v3599_v50  ;;  %vm3613_vm7 = vweird.f32 %v8100_v56 }
 0x6b9   :  { %v3683_v55 = vadd.f32 %v3676_v61, %v1576_v45  ;;  %v3639_v43 = vpop.f32.mrf.mxu0  ;;  %v3652_v20 = vpop.f32.mrf.mxu1  ;;  %v3590_v31 = vsub.f32 1.0, %v3589_v12  ;;  %v3581_v12 = vor.u32 1.1754944e-38, %v3580_v26  ;;  %vm3598_vm5 = vcmp.eq.f32.partialorder %v3597_v4, 8.507059e+37 }
 0x6ba   :  { %v3572_v37 = vmul.f32 %v5956_v19, %v3571_v39  ;;  %v3619_v4 = vand.u32 2147483648, %v8100_v56 }
 0x6bb   :  { %v5517_v28 = vmul.f32 -1.442695, %v3683_v55  ;;  %v5960_v44 = vpop.eup %5959  ;;  %v3591_v62 = vmul.f32 %v5958_v54, %v3590_v31 }
 0x6bc   :  { %v8109_v46 = vpop.eup %5961  ;;  %v3573_v10 = vadd.f32 %v5956_v19, %v3572_v37  ;;  %v8112_v45 = vadd.f32 1.0, %v5960_v44 }
 0x6bd   :  { %5967 = vpow2.f32 %v5517_v28  ;;  %v5964_v59 = vpop.eup %5963  ;;  %v3592_v61 = vadd.f32 %v5958_v54, %v3591_v62  ;;  %v3609_v39 = vmul.f32 %v8109_v46, %v8100_v56  ;;  %vm3614_vm6 = vweird.f32 %v8109_v46 }
 0x6be   :  { %v3577_v55 = vsel %vm3576_vm2, %v5956_v19, %v3573_v10  ;;  %5969 = vrcp.f32 %v8112_v45  ;;  %v8117_v43 = vadd.f32 1.0, %v5964_v59  ;;  %v5966_v0 = vpop.eup %5965  ;;  %v9091_v10 = vld [vmem:[#allocation23_spill] sm:$0xff]  ;;  %vm8137_vm8 = vmor %vm3613_vm7, %vm3614_vm6  ;;  %vm3746_vm10 = vweird.f32 %v8112_v45 }
 0x6bf   :  { %v3582_v37 = vsel %vm3579_vm3, %v3581_v12, %v3577_v55  ;;  %v3596_v44 = vsel %vm3595_vm4, %v5958_v54, %v3592_v61  ;;  %v3610_v20 = vsub.f32 1.0, %v3609_v39  ;;  %v1547_v59 = vadd.f32 %v9092_v27, %v9091_v10  ;;  %v9121_v10 = vld [vmem:[#allocation67_spill] sm:$0xff] }
 0x6c0   :  { %v3665_v31 = vpop.f32.mrf.mxu2  ;;  %v3678_v28 = vpop.f32.mrf.mxu3  ;;  %v3601_v9 = vsel %vm3598_vm5, %v3600_v21, %v3596_v44  ;;  %v3624_v26 = vmul.f32 %v5966_v0, %v3582_v37  ;;  %5971 = vrcp.f32 %v8117_v43  ;;  %v3617_v27 = vand.u32 2147483647, %v8100_v56 }
 0x6c1   :  { %v3623_v62 = vmul.f32 %v3601_v9, %v7959_v60  ;;  %v3611_v50 = vmul.f32 %v8109_v46, %v3610_v20  ;;  %v3682_v61 = vadd.f32 %v3663_v36, %v1547_v59  ;;  %v3752_v37 = vand.u32 2147483648, %v8112_v45 }
 0x6c2   :  { %v3620_v20 = vor.u32 1.1754944e-38, %v3619_v4  ;;  %v3750_v56 = vand.u32 2147483647, %v8112_v45  ;;  %v3771_v9 = vand.u32 2147483648, %v8117_v43  ;;  %vm3618_vm11 = vcmp.eq.f32.partialorder %v3617_v27, 8.507059e+37 }
 0x6c3   :  { %v5968_v19 = vpop.eup %5967  ;;  %v8124_v42 = vadd.f32 %v3624_v26, %v3623_v62  ;;  %v3612_v39 = vadd.f32 %v8109_v46, %v3611_v50  ;;  %v3769_v26 = vand.u32 2147483647, %v8117_v43  ;;  %vm3765_vm13 = vweird.f32 %v8117_v43 }
 0x6c4   :  { %v8126_v12 = vadd.f32 1.0, %v5968_v19  ;;  %v5970_v54 = vpop.eup %5969  ;;  %vm3751_vm15 = vcmp.eq.f32.partialorder %v3750_v56, 8.507059e+37 }
 0x6c5   :  { %5973 = vtanh.f32 %v8124_v42  ;;  %v3742_v60 = vmul.f32 %v5970_v54, %v8112_v45  ;;  %v3616_v44 = vsel %vm8137_vm8, %v8109_v46, %v3612_v39  ;;  %vm3747_vm9 = vweird.f32 %v5970_v54 }
 0x6c6   :  { %v5972_v21 = vpop.eup %5971  ;;  %5975 = vrcp.f32 %v8126_v12  ;;  %v3621_v59 = vsel %vm3618_vm11, %v3620_v20, %v3616_v44  ;;  %vm3748_vm14 = vmor %vm3746_vm10, %vm3747_vm9  ;;  %v3753_v46 = vor.u32 1.1754944e-38, %v3752_v37  ;;  %vm3770_vm1 = vcmp.eq.f32.partialorder %v3769_v26, 8.507059e+37 }
 0x6c7   :  { %v3743_v55 = vsub.f32 1.0, %v3742_v60  ;;  %v3761_v0 = vmul.f32 %v5972_v21, %v8117_v43  ;;  %5977 = vtanh.f32 %v3682_v61  ;;  %vm3766_vm12 = vweird.f32 %v5972_v21 }
 0x6c8   :  { %vm3767_vm0 = vmor %vm3765_vm13, %vm3766_vm12  ;;  %v3791_v56 = vand.u32 2147483648, %v8126_v12  ;;  %vm3785_vm3 = vweird.f32 %v8126_v12 }
 0x6c9   :  { %v3762_v31 = vsub.f32 1.0, %v3761_v0  ;;  %v3744_v28 = vmul.f32 %v5970_v54, %v3743_v55  ;;  %v3772_v0 = vor.u32 1.1754944e-38, %v3771_v9 }
 0x6ca   :  { %v3792_v26 = vor.u32 1.1754944e-38, %v3791_v56  ;;  %v9113_v56 = vld [vmem:[#allocation55_spill] sm:$0xff] }
 0x6cb   :  { %v5974_v62 = vpop.eup %5973  ;;  %v3763_v50 = vmul.f32 %v5972_v21, %v3762_v31  ;;  %v3745_v19 = vadd.f32 %v5970_v54, %v3744_v28 }
 0x6cc   :  { %v5976_v61 = vpop.eup %5975  ;;  %v3627_v4 = vmul.f32 %v5974_v62, %v3621_v59  ;;  %v9095_v59 = vld [vmem:[#allocation25_spill] sm:$0xff] }
 0x6cd   :  { %v3749_v39 = vsel %vm3748_vm14, %v5970_v54, %v3745_v19  ;;  %v3764_v60 = vadd.f32 %v5972_v21, %v3763_v50  ;;  %v3781_v55 = vmul.f32 %v5976_v61, %v8126_v12  ;;  %v5978_v45 = vpop.eup %5977  ;;  %vm3786_vm2 = vweird.f32 %v5976_v61 }
 0x6ce   :  { %v3754_v27 = vsel %vm3751_vm15, %v3753_v46, %v3749_v39  ;;  %v3684_v36 = vpack.c.bf16 %v3627_v4, %v3627_v4  ;;  %vm3787_vm4 = vmor %vm3785_vm3, %vm3786_vm2  ;;  %v9097_v46 = vld [vmem:[#allocation29_spill] sm:$0xff]  ;;  %v9098_v4 = vld [vmem:[#allocation30_spill] sm:$0xff] }
 0x6cf   :  { %v3768_v31 = vsel %vm3767_vm0, %v5972_v21, %v3764_v60  ;;  %v3796_v28 = vmul.f32 %v5978_v45, %v3754_v27  ;;  %v3782_v44 = vsub.f32 1.0, %v3781_v55  ;;  %v9099_v39 = vld [vmem:[#allocation33_spill] sm:$0xff]  ;;  %v9100_v60 = vld [vmem:[#allocation36_spill] sm:$0xff]  ;;  %v9102_v45 = vld [vmem:[#allocation38_spill] sm:$0xff] }
 0x6d0   :  { %v3773_v20 = vsel %vm3770_vm1, %v3772_v0, %v3768_v31  ;;  %3693 = vmatmul.bf16.vlgmr.msra.gmra.mxu0 %v3684_v36  ;;  %3706 = vmatmul.bf16.vlgmr.msrb.gmra.mxu1 %v3684_v36  ;;  %v9101_v55 = vld [vmem:[#allocation37_spill] sm:$0xff]  ;;  %v9104_v27 = vld [vmem:[#allocation42_spill] sm:$0xff]  ;;  %v9106_v31 = vld [vmem:[#allocation44_spill] sm:$0xff] }
 0x6d1   :  { %v3795_v43 = vmul.f32 %v3773_v20, %v7990_v25  ;;  %v3783_v37 = vmul.f32 %v5976_v61, %v3782_v44  ;;  %3719 = vmatmul.bf16.vlgmr.msrb.gmra.mxu2 %v3684_v36  ;;  %3732 = vmatmul.bf16.vlgmr.msrb.gmra.mxu3 %v3684_v36  ;;  %v3789_v25 = vand.u32 2147483647, %v8126_v12  ;;  %v9103_v0 = vld [vmem:[#allocation41_spill] sm:$0xff]  ;;  %v9105_v36 = vld [vmem:[#allocation43_spill] sm:$0xff]  ;;  %v9108_v44 = vld [vmem:[#allocation48_spill] sm:$0xff] }
 0x6d2   :  { %3920 = vmatpush.bf16.msra.mxu0 %v6944_v13  ;;  %3933 = vmatpush.bf16.msrb.mxu1 %v6941_v8  ;;  %v9109_v20 = vld [vmem:[#allocation49_spill] sm:$0xff] }
 0x6d3   :  { %v8154_v54 = vadd.f32 %v3796_v28, %v3795_v43  ;;  %3946 = vmatpush.bf16.msrb.mxu2 %v6996_v24  ;;  %3959 = vmatpush.bf16.msrb.mxu3 %v6998_v34  ;;  %v3784_v21 = vadd.f32 %v5976_v61, %v3783_v37  ;;  %vm3790_vm5 = vcmp.eq.f32.partialorder %v3789_v25, 8.507059e+37  ;;  %v9107_v28 = vld [vmem:[#allocation45_spill] sm:$0xff]  ;;  %v9110_v43 = vld [vmem:[#allocation50_spill] sm:$0xff]  ;;  %v9111_v37 = vld [vmem:[#allocation51_spill] sm:$0xff] }
 0x6d4   :  { %v9114_v25 = vld [vmem:[#allocation56_spill] sm:$0xff] }
 0x6d5   :  { %5979 = vtanh.f32 %v8154_v54  ;;  %v3788_v9 = vsel %vm3787_vm4, %v5976_v61, %v3784_v21  ;;  %v9096_v61 = vld [vmem:[#allocation28_spill] sm:$0xff]  ;;  %v9112_v21 = vld [vmem:[#allocation54_spill] sm:$0xff] }
 0x6d6   :  { %3921 = vmatpush.bf16.msra.mxu0 %v6950_v23  ;;  %3934 = vmatpush.bf16.msrb.mxu1 %v6946_v17  ;;  %v3793_v50 = vsel %vm3790_vm5, %v3792_v26, %v3788_v9  ;;  %v9115_v9 = vld [vmem:[#allocation57_spill] sm:$0xff]  ;;  %v9116_v26 = vld [vmem:[#allocation60_spill] sm:$0xff] }
 0x6d7   :  { %3947 = vmatpush.bf16.msrb.mxu2 %v7004_v40  ;;  %3960 = vmatpush.bf16.msrb.mxu3 %v7006_v41 }
 0x6da   :  { %3922 = vmatpush.bf16.msra.mxu0 %v6961_v35  ;;  %3935 = vmatpush.bf16.msrb.mxu1 %v6958_v30 }
 0x6db   :  { %v5980_v62 = vpop.eup %5979  ;;  %3948 = vmatpush.bf16.msrb.mxu2 %v7011_v29  ;;  %3961 = vmatpush.bf16.msrb.mxu3 %v7013_v32 }
 0x6dc   :  { %v3799_v12 = vmul.f32 %v5980_v62, %v3793_v50  ;;  %v9117_v62 = vld [vmem:[#allocation61_spill] sm:$0xff]  ;;  %v9118_v50 = vld [vmem:[#allocation62_spill] sm:$0xff] }
 0x6de   :  { %v3800_v19 = vpack.c.bf16 %v3799_v12, %v3799_v12  ;;  %3923 = vmatpush.bf16.msra.mxu0 %v6969_v47  ;;  %3936 = vmatpush.bf16.msrb.mxu1 %v8806_v15  ;;  %v9119_v12 = vld [vmem:[#allocation65_spill] sm:$0xff] }
 0x6df   :  { %3949 = vmatpush.bf16.msrb.mxu2 %v7018_v63  ;;  %3962 = vmatpush.bf16.msrb.mxu3 %v8807_v3 }
 0x6e0   :  { %3809 = vmatmul.bf16.vlgmr.msrb.gmra.mxu0 %v3800_v19  ;;  %3822 = vmatmul.bf16.vlgmr.msra.gmra.mxu1 %v3800_v19 }
 0x6e1   :  { %3835 = vmatmul.bf16.vlgmr.msra.gmra.mxu2 %v3800_v19  ;;  %3848 = vmatmul.bf16.vlgmr.msra.gmra.mxu3 %v3800_v19 }
 0x6e2   :  { %3924 = vmatpush.bf16.msra.mxu0 %v8808_v53  ;;  %3937 = vmatpush.bf16.msrb.mxu1 %v6972_v51 }
 0x6e3   :  { %3950 = vmatpush.bf16.msrb.mxu2 %v7024_v57  ;;  %3963 = vmatpush.bf16.msrb.mxu3 %v7026_v7 }
 0x6e6   :  { %3925 = vmatpush.bf16.msra.mxu0 %v6979_v1  ;;  %3938 = vmatpush.bf16.msrb.mxu1 %v6981_v2 }
 0x6e7   :  { %3951 = vmatpush.bf16.msrb.mxu2 %v7030_v14  ;;  %3964 = vmatpush.bf16.msrb.mxu3 %v7032_v18 }
 0x6ea   :  { %3926 = vmatpush.bf16.msra.mxu0 %v6986_v58  ;;  %3939 = vmatpush.bf16.msrb.mxu1 %v6988_v5 }
 0x6eb   :  { %3952 = vmatpush.bf16.msrb.mxu2 %v7037_v48  ;;  %3965 = vmatpush.bf16.msrb.mxu3 %v7039_v38 }
 0x6ee   :  { %3927 = vmatpush.bf16.msra.mxu0 %v6992_v11  ;;  %3940 = vmatpush.bf16.msrb.mxu1 %v6994_v22 }
 0x6ef   :  { %3953 = vmatpush.bf16.msrb.mxu2 %v7044_v49  ;;  %3966 = vmatpush.bf16.msrb.mxu3 %v7046_v52 }
 0x6f1   :  { %3928 = vmatmul.bf16.vlgmr.msra.gmra.mxu0 %v3800_v19  ;;  %3941 = vmatmul.bf16.vlgmr.msrb.gmra.mxu1 %v3800_v19 }
 0x6f2   :  { %3977 = vmatpush.bf16.msrb.mxu0 %v7066_v16  ;;  %3990 = vmatpush.bf16.msra.mxu1 %v7068_v6 }
 0x6f3   :  { %3954 = vmatmul.bf16.vlgmr.msrb.gmra.mxu2 %v3800_v19  ;;  %3967 = vmatmul.bf16.vlgmr.msrb.gmra.mxu3 %v3800_v19  ;;  %v9120_v19 = vld [vmem:[#allocation66_spill] sm:$0xff] }
 0x6f4   :  { %4003 = vmatpush.bf16.msra.mxu2 %v7079_v33  ;;  %4016 = vmatpush.bf16.msra.mxu3 %v9095_v59 }
 0x6f6   :  { %3978 = vmatpush.bf16.msrb.mxu0 %v9096_v61  ;;  %3991 = vmatpush.bf16.msra.mxu1 %v9097_v46 }
 0x6f8   :  { %4004 = vmatpush.bf16.msra.mxu2 %v9098_v4  ;;  %4017 = vmatpush.bf16.msra.mxu3 %v9099_v39 }
 0x6fa   :  { %3979 = vmatpush.bf16.msrb.mxu0 %v9100_v60  ;;  %3992 = vmatpush.bf16.msra.mxu1 %v9101_v55 }
 0x6fc   :  { %4005 = vmatpush.bf16.msra.mxu2 %v9102_v45  ;;  %4018 = vmatpush.bf16.msra.mxu3 %v9103_v0 }
 0x6fe   :  { %3980 = vmatpush.bf16.msrb.mxu0 %v9104_v27  ;;  %3993 = vmatpush.bf16.msra.mxu1 %v9105_v36  ;;  %v9156_v36 = vld [vmem:[#allocation112_spill] sm:$0xff]  ;;  %v9157_v27 = vld [vmem:[#allocation113_spill] sm:$0xff] }
 0x700   :  { %4006 = vmatpush.bf16.msra.mxu2 %v9106_v31  ;;  %4019 = vmatpush.bf16.msra.mxu3 %v9107_v28 }
 0x702   :  { %3981 = vmatpush.bf16.msrb.mxu0 %v9108_v44  ;;  %3994 = vmatpush.bf16.msra.mxu1 %v9109_v20 }
 0x704   :  { %4007 = vmatpush.bf16.msra.mxu2 %v9110_v43  ;;  %4020 = vmatpush.bf16.msra.mxu3 %v9111_v37  ;;  %v9122_v37 = vld [vmem:[#allocation72_spill] sm:$0xff] }
 0x706   :  { %3982 = vmatpush.bf16.msrb.mxu0 %v9112_v21  ;;  %3995 = vmatpush.bf16.msra.mxu1 %v9113_v56  ;;  %v9123_v21 = vld [vmem:[#allocation73_spill] sm:$0xff]  ;;  %v9124_v56 = vld [vmem:[#allocation68_spill] sm:$0xff] }
 0x708   :  { %4008 = vmatpush.bf16.msra.mxu2 %v9114_v25  ;;  %4021 = vmatpush.bf16.msra.mxu3 %v9115_v9  ;;  %v9125_v25 = vld [vmem:[#allocation69_spill] sm:$0xff]  ;;  %v9126_v9 = vld [vmem:[#allocation74_spill] sm:$0xff] }
 0x70a   :  { %3983 = vmatpush.bf16.msrb.mxu0 %v9116_v26  ;;  %3996 = vmatpush.bf16.msra.mxu1 %v9117_v62  ;;  %v9127_v26 = vld [vmem:[#allocation75_spill] sm:$0xff]  ;;  %v9128_v62 = vld [vmem:[#allocation76_spill] sm:$0xff] }
 0x70c   :  { %4009 = vmatpush.bf16.msra.mxu2 %v9118_v50  ;;  %4022 = vmatpush.bf16.msra.mxu3 %v9119_v12  ;;  %v9129_v50 = vld [vmem:[#allocation77_spill] sm:$0xff]  ;;  %v9130_v12 = vld [vmem:[#allocation80_spill] sm:$0xff] }
 0x70e   :  { %3984 = vmatpush.bf16.msrb.mxu0 %v9120_v19  ;;  %3997 = vmatpush.bf16.msra.mxu1 %v9121_v10  ;;  %v9131_v19 = vld [vmem:[#allocation81_spill] sm:$0xff]  ;;  %v9132_v10 = vld [vmem:[#allocation82_spill] sm:$0xff] }
 0x710   :  { %4010 = vmatpush.bf16.msra.mxu2 %v9124_v56  ;;  %4023 = vmatpush.bf16.msra.mxu3 %v9125_v25  ;;  %v9135_v56 = vld [vmem:[#allocation85_spill] sm:$0xff]  ;;  %v9136_v25 = vld [vmem:[#allocation88_spill] sm:$0xff] }
 0x712   :  { %4093 = vmatpush.bf16.msra.mxu0 %v9122_v37  ;;  %4106 = vmatpush.bf16.msrb.mxu1 %v9123_v21  ;;  %v9133_v37 = vld [vmem:[#allocation83_spill] sm:$0xff]  ;;  %v9134_v21 = vld [vmem:[#allocation84_spill] sm:$0xff] }
 0x714   :  { %4119 = vmatpush.bf16.msrb.mxu2 %v9126_v9  ;;  %4132 = vmatpush.bf16.msrb.mxu3 %v9127_v26  ;;  %v9137_v9 = vld [vmem:[#allocation89_spill] sm:$0xff]  ;;  %v9138_v26 = vld [vmem:[#allocation90_spill] sm:$0xff] }
 0x716   :  { %4094 = vmatpush.bf16.msra.mxu0 %v9128_v62  ;;  %4107 = vmatpush.bf16.msrb.mxu1 %v9129_v50  ;;  %v9139_v62 = vld [vmem:[#allocation91_spill] sm:$0xff]  ;;  %v9140_v50 = vld [vmem:[#allocation92_spill] sm:$0xff] }
 0x718   :  { %4120 = vmatpush.bf16.msrb.mxu2 %v9130_v12  ;;  %4133 = vmatpush.bf16.msrb.mxu3 %v9131_v19  ;;  %v9141_v12 = vld [vmem:[#allocation93_spill] sm:$0xff]  ;;  %v9142_v19 = vld [vmem:[#allocation94_spill] sm:$0xff] }
 0x71a   :  { %4095 = vmatpush.bf16.msra.mxu0 %v9132_v10  ;;  %4108 = vmatpush.bf16.msrb.mxu1 %v9133_v37  ;;  %v9143_v10 = vld [vmem:[#allocation97_spill] sm:$0xff]  ;;  %v9144_v37 = vld [vmem:[#allocation98_spill] sm:$0xff] }
 0x71c   :  { %4121 = vmatpush.bf16.msrb.mxu2 %v9134_v21  ;;  %4134 = vmatpush.bf16.msrb.mxu3 %v9135_v56  ;;  %v9145_v21 = vld [vmem:[#allocation99_spill] sm:$0xff]  ;;  %v9146_v56 = vld [vmem:[#allocation100_spill] sm:$0xff] }
 0x71e   :  { %4096 = vmatpush.bf16.msra.mxu0 %v9136_v25  ;;  %4109 = vmatpush.bf16.msrb.mxu1 %v9137_v9  ;;  %v9147_v25 = vld [vmem:[#allocation101_spill] sm:$0xff]  ;;  %v9148_v9 = vld [vmem:[#allocation102_spill] sm:$0xff] }
 0x720   :  { %4122 = vmatpush.bf16.msrb.mxu2 %v9138_v26  ;;  %4135 = vmatpush.bf16.msrb.mxu3 %v9139_v62  ;;  %v9149_v26 = vld [vmem:[#allocation103_spill] sm:$0xff]  ;;  %v9150_v62 = vld [vmem:[#allocation104_spill] sm:$0xff] }
 0x722   :  { %4097 = vmatpush.bf16.msra.mxu0 %v9140_v50  ;;  %4110 = vmatpush.bf16.msrb.mxu1 %v9141_v12  ;;  %v9151_v50 = vld [vmem:[#allocation105_spill] sm:$0xff]  ;;  %v9152_v12 = vld [vmem:[#allocation106_spill] sm:$0xff] }
 0x724   :  { %4123 = vmatpush.bf16.msrb.mxu2 %v9142_v19  ;;  %4136 = vmatpush.bf16.msrb.mxu3 %v9143_v10  ;;  %v9153_v19 = vld [vmem:[#allocation107_spill] sm:$0xff]  ;;  %v9154_v10 = vld [vmem:[#allocation108_spill] sm:$0xff] }
 0x726   :  { %4098 = vmatpush.bf16.msra.mxu0 %v9144_v37  ;;  %4111 = vmatpush.bf16.msrb.mxu1 %v9145_v21  ;;  %v9155_v37 = vld [vmem:[#allocation109_spill] sm:$0xff] }
 0x728   :  { %4124 = vmatpush.bf16.msrb.mxu2 %v9146_v56  ;;  %4137 = vmatpush.bf16.msrb.mxu3 %v9147_v25 }
 0x72a   :  { %4099 = vmatpush.bf16.msra.mxu0 %v9148_v9  ;;  %4112 = vmatpush.bf16.msrb.mxu1 %v9149_v26 }
 0x72c   :  { %4125 = vmatpush.bf16.msrb.mxu2 %v9150_v62  ;;  %4138 = vmatpush.bf16.msrb.mxu3 %v9151_v50 }
 0x72e   :  { %4100 = vmatpush.bf16.msra.mxu0 %v9152_v12  ;;  %4113 = vmatpush.bf16.msrb.mxu1 %v9153_v19 }
 0x730   :  { %4126 = vmatpush.bf16.msrb.mxu2 %v9154_v10  ;;  %4139 = vmatpush.bf16.msrb.mxu3 %v9155_v37 }
 0x74d   :  { %v3694_v21 = vpop.f32.mrf.mxu0  ;;  %v3707_v56 = vpop.f32.mrf.mxu1 }
 0x754   :  { %v3720_v43 = vpop.f32.mrf.mxu2  ;;  %v3733_v25 = vpop.f32.mrf.mxu3 }
 0x755   :  { %v3696_v20 = vpop.f32.mrf.mxu0  ;;  %v3709_v9 = vpop.f32.mrf.mxu1 }
 0x756   :  { %v9158_v9 = vld [vmem:[#allocation114_spill] sm:$0xff] }
 0x75c   :  { %v3722_v44 = vpop.f32.mrf.mxu2  ;;  %v3735_v26 = vpop.f32.mrf.mxu3 }
 0x75d   :  { %v3810_v28 = vpop.f32.mrf.mxu0  ;;  %v3823_v62 = vpop.f32.mrf.mxu1 }
 0x75e   :  { %v3811_v31 = vadd.f32 %v3810_v28, %v3694_v21  ;;  %v3824_v50 = vadd.f32 %v3823_v62, %v3707_v56 }
 0x760   :  { %v3853_v12 = vadd.f32 %v3811_v31, %v9156_v36  ;;  %v3854_v19 = vadd.f32 %v3824_v50, %v9157_v27 }
 0x762   :  { %v5518_v0 = vmul.f32 -1.442695, %v3853_v12  ;;  %v5519_v10 = vmul.f32 -1.442695, %v3854_v19  ;;  %v9159_v12 = vld [vmem:[#allocation86_spill] sm:$0xff] }
 0x764   :  { %5981 = vpow2.f32 %v5518_v0  ;;  %v3836_v37 = vpop.f32.mrf.mxu2  ;;  %v3849_v45 = vpop.f32.mrf.mxu3 }
 0x765   :  { %5983 = vpow2.f32 %v5519_v10  ;;  %v3850_v55 = vadd.f32 %v3849_v45, %v3733_v25  ;;  %v3812_v60 = vpop.f32.mrf.mxu0  ;;  %v3825_v20 = vpop.f32.mrf.mxu1  ;;  %v3837_v50 = vadd.f32 %v3836_v37, %v3720_v43  ;;  %v9160_v45 = vld [vmem:[#allocation87_spill] sm:$0xff] }
 0x767   :  { %v3856_v44 = vadd.f32 %v3850_v55, %v9158_v9 }
 0x769   :  { %v5520_v26 = vmul.f32 -1.442695, %v3856_v44 }
 0x76a   :  { %v5982_v39 = vpop.eup %5981 }
 0x76b   :  { %v5984_v4 = vpop.eup %5983  ;;  %v3860_v28 = vadd.f32 1.0, %v5982_v39  ;;  %5985 = vpow2.f32 %v5520_v26  ;;  %v9161_v39 = vld [vmem:[#allocation21_spill] sm:$0xff] }
 0x76c   :  { %v3879_v21 = vadd.f32 1.0, %v5984_v4  ;;  %v3838_v31 = vpop.f32.mrf.mxu2  ;;  %v3851_v56 = vpop.f32.mrf.mxu3  ;;  %v3855_v26 = vadd.f32 %v3837_v50, %v9161_v39 }
 0x76d   :  { %5987 = vrcp.f32 %v3860_v28  ;;  %v3872_v9 = vand.u32 2147483648, %v3860_v28  ;;  %vm3866_vm8 = vweird.f32 %v3860_v28 }
 0x76e   :  { %5989 = vrcp.f32 %v3879_v21  ;;  %v3929_v62 = vpop.f32.mrf.mxu0  ;;  %v3942_v0 = vpop.f32.mrf.mxu1  ;;  %v3891_v27 = vand.u32 2147483648, %v3879_v21  ;;  %vm3885_vm9 = vweird.f32 %v3879_v21 }
 0x76f   :  { %v3972_v10 = vadd.f32 %v3929_v62, %v9159_v12  ;;  %v3973_v60 = vadd.f32 %v3942_v0, %v9160_v45  ;;  %v9162_v12 = vld [vmem:[#allocation79_spill] sm:$0xff] }
 0x771   :  { %v5986_v25 = vpop.eup %5985  ;;  %v5521_v19 = vmul.f32 -1.442695, %v3972_v10  ;;  %v5522_v55 = vmul.f32 -1.442695, %v3973_v60 }
 0x772   :  { %v8259_v20 = vadd.f32 1.0, %v5986_v25  ;;  %v3870_v25 = vand.u32 2147483647, %v3860_v28 }
 0x773   :  { %v5988_v44 = vpop.eup %5987  ;;  %5991 = vpow2.f32 %v5521_v19 }
 0x774   :  { %v5990_v4 = vpop.eup %5989  ;;  %v3862_v31 = vmul.f32 %v5988_v44, %v3860_v28  ;;  %5993 = vrcp.f32 %v8259_v20  ;;  %vm3867_vm6 = vweird.f32 %v5988_v44  ;;  %vm3871_vm11 = vcmp.eq.f32.partialorder %v3870_v25, 8.507059e+37 }
 0x775   :  { %v3881_v56 = vmul.f32 %v5990_v4, %v3879_v21  ;;  %5995 = vpow2.f32 %v5522_v55  ;;  %vm3886_vm7 = vweird.f32 %v5990_v4  ;;  %v3889_v55 = vand.u32 2147483647, %v3879_v21  ;;  %vm3868_vm10 = vmor %vm3866_vm8, %vm3867_vm6 }
 0x776   :  { %v3955_v43 = vpop.f32.mrf.mxu2  ;;  %v3968_v37 = vpop.f32.mrf.mxu3  ;;  %v3863_v62 = vsub.f32 1.0, %v3862_v31  ;;  %5997 = vtanh.f32 %v3855_v26  ;;  %v3873_v26 = vor.u32 1.1754944e-38, %v3872_v9  ;;  %vm3887_vm12 = vmor %vm3885_vm9, %vm3886_vm7  ;;  %vm3905_vm15 = vweird.f32 %v8259_v20 }
 0x777   :  { %v3975_v0 = vadd.f32 %v3968_v37, %v9162_v12  ;;  %v3931_v45 = vpop.f32.mrf.mxu0  ;;  %v3944_v10 = vpop.f32.mrf.mxu1  ;;  %v3882_v60 = vsub.f32 1.0, %v3881_v56  ;;  %vm3890_vm13 = vcmp.eq.f32.partialorder %v3889_v55, 8.507059e+37  ;;  %v9163_v55 = vld [vmem:[#allocation78_spill] sm:$0xff] }
 0x778   :  { %v3864_v50 = vmul.f32 %v5988_v44, %v3863_v62 }
 0x779   :  { %v5523_v19 = vmul.f32 -1.442695, %v3975_v0  ;;  %v5992_v39 = vpop.eup %5991  ;;  %v3883_v36 = vmul.f32 %v5990_v4, %v3882_v60  ;;  %v3892_v0 = vor.u32 1.1754944e-38, %v3891_v27 }
 0x77a   :  { %v8264_v46 = vpop.eup %5993  ;;  %v3865_v31 = vadd.f32 %v5988_v44, %v3864_v50  ;;  %v8266_v37 = vadd.f32 1.0, %v5992_v39 }
 0x77b   :  { %5999 = vpow2.f32 %v5523_v19  ;;  %v5996_v56 = vpop.eup %5995  ;;  %v3884_v12 = vadd.f32 %v5990_v4, %v3883_v36  ;;  %v3901_v62 = vmul.f32 %v8264_v46, %v8259_v20  ;;  %vm3906_vm14 = vweird.f32 %v8264_v46 }
 0x77c   :  { %v3869_v45 = vsel %vm3868_vm10, %v5988_v44, %v3865_v31  ;;  %6001 = vrcp.f32 %v8266_v37  ;;  %v8271_v28 = vadd.f32 1.0, %v5996_v56  ;;  %v5998_v21 = vpop.eup %5997  ;;  %vm8290_vm0 = vmor %vm3905_vm15, %vm3906_vm14  ;;  %vm4038_vm2 = vweird.f32 %v8266_v37 }
 0x77d   :  { %v3874_v10 = vsel %vm3871_vm11, %v3873_v26, %v3869_v45  ;;  %v3888_v39 = vsel %vm3887_vm12, %v5990_v4, %v3884_v12  ;;  %v3902_v60 = vsub.f32 1.0, %v3901_v62  ;;  %v3911_v4 = vand.u32 2147483648, %v8259_v20 }
 0x77e   :  { %v3957_v50 = vpop.f32.mrf.mxu2  ;;  %v3970_v19 = vpop.f32.mrf.mxu3  ;;  %v3893_v25 = vsel %vm3890_vm13, %v3892_v0, %v3888_v39  ;;  %v3916_v9 = vmul.f32 %v5998_v21, %v3874_v10  ;;  %6003 = vrcp.f32 %v8271_v28  ;;  %v3974_v26 = vadd.f32 %v3955_v43, %v9163_v55 }
 0x77f   :  { %v3915_v36 = vmul.f32 %v3893_v25, %v8124_v42  ;;  %v3903_v27 = vmul.f32 %v8264_v46, %v3902_v60  ;;  %v3909_v0 = vand.u32 2147483647, %v8259_v20  ;;  %v4044_v10 = vand.u32 2147483648, %v8266_v37 }
 0x780   :  { %v3912_v60 = vor.u32 1.1754944e-38, %v3911_v4  ;;  %v4042_v20 = vand.u32 2147483647, %v8266_v37  ;;  %v4063_v25 = vand.u32 2147483648, %v8271_v28  ;;  %vm4057_vm5 = vweird.f32 %v8271_v28 }
 0x781   :  { %v6000_v44 = vpop.eup %5999  ;;  %v8276_v31 = vadd.f32 %v3916_v9, %v3915_v36  ;;  %v3904_v12 = vadd.f32 %v8264_v46, %v3903_v27  ;;  %v4061_v9 = vand.u32 2147483647, %v8271_v28  ;;  %vm3910_vm3 = vcmp.eq.f32.partialorder %v3909_v0, 8.507059e+37 }
 0x782   :  { %v8278_v56 = vadd.f32 1.0, %v6000_v44  ;;  %v6002_v61 = vpop.eup %6001  ;;  %vm4043_vm7 = vcmp.eq.f32.partialorder %v4042_v20, 8.507059e+37 }
 0x783   :  { %6005 = vtanh.f32 %v8276_v31  ;;  %v4034_v42 = vmul.f32 %v6002_v61, %v8266_v37  ;;  %v3908_v39 = vsel %vm8290_vm0, %v8264_v46, %v3904_v12  ;;  %vm4039_vm1 = vweird.f32 %v6002_v61 }
 0x784   :  { %v6004_v62 = vpop.eup %6003  ;;  %6007 = vrcp.f32 %v8278_v56  ;;  %v3913_v55 = vsel %vm3910_vm3, %v3912_v60, %v3908_v39  ;;  %vm4040_vm6 = vmor %vm4038_vm2, %vm4039_vm1  ;;  %v4045_v46 = vor.u32 1.1754944e-38, %v4044_v10  ;;  %vm4062_vm9 = vcmp.eq.f32.partialorder %v4061_v9, 8.507059e+37  ;;  %v9198_v9 = vld [vmem:[#allocation76_spill] sm:$0xff] }
 0x785   :  { %v4035_v45 = vsub.f32 1.0, %v4034_v42  ;;  %v4053_v21 = vmul.f32 %v6004_v62, %v8271_v28  ;;  %6009 = vtanh.f32 %v3974_v26  ;;  %vm4058_vm4 = vweird.f32 %v6004_v62 }
 0x786   :  { %vm4059_vm8 = vmor %vm4057_vm5, %vm4058_vm4  ;;  %v4083_v20 = vand.u32 2147483648, %v8278_v56  ;;  %vm4077_vm11 = vweird.f32 %v8278_v56 }
 0x787   :  { %v4054_v50 = vsub.f32 1.0, %v4053_v21  ;;  %v4036_v19 = vmul.f32 %v6002_v61, %v4035_v45  ;;  %v4064_v21 = vor.u32 1.1754944e-38, %v4063_v25  ;;  %v9197_v25 = vld [vmem:[#allocation75_spill] sm:$0xff] }
 0x789   :  { %v6006_v36 = vpop.eup %6005  ;;  %v4055_v27 = vmul.f32 %v6004_v62, %v4054_v50  ;;  %v4037_v44 = vadd.f32 %v6002_v61, %v4036_v19 }
 0x78a   :  { %v6008_v26 = vpop.eup %6007  ;;  %v3919_v4 = vmul.f32 %v6006_v36, %v3913_v55  ;;  %v9199_v36 = vld [vmem:[#allocation77_spill] sm:$0xff]  ;;  %v9202_v55 = vld [vmem:[#allocation82_spill] sm:$0xff] }
 0x78b   :  { %v4041_v12 = vsel %vm4040_vm6, %v6002_v61, %v4037_v44  ;;  %v4056_v42 = vadd.f32 %v6004_v62, %v4055_v27  ;;  %v4073_v45 = vmul.f32 %v6008_v26, %v8278_v56  ;;  %v6010_v37 = vpop.eup %6009  ;;  %vm4078_vm10 = vweird.f32 %v6008_v26  ;;  %v9200_v27 = vld [vmem:[#allocation80_spill] sm:$0xff]  ;;  %v9201_v44 = vld [vmem:[#allocation81_spill] sm:$0xff] }
 0x78c   :  { %v4046_v0 = vsel %vm4043_vm7, %v4045_v46, %v4041_v12  ;;  %v3976_v43 = vpack.c.bf16 %v3919_v4, %v3919_v4  ;;  %vm4079_vm12 = vmor %vm4077_vm11, %vm4078_vm10  ;;  %v9204_v46 = vld [vmem:[#allocation84_spill] sm:$0xff]  ;;  %v9205_v4 = vld [vmem:[#allocation85_spill] sm:$0xff] }
 0x78d   :  { %v4060_v50 = vsel %vm4059_vm8, %v6004_v62, %v4056_v42  ;;  %v4088_v19 = vmul.f32 %v6010_v37, %v4046_v0  ;;  %v4074_v39 = vsub.f32 1.0, %v4073_v45  ;;  %v9206_v12 = vld [vmem:[#allocation88_spill] sm:$0xff]  ;;  %v9207_v42 = vld [vmem:[#allocation89_spill] sm:$0xff]  ;;  %v9208_v45 = vld [vmem:[#allocation90_spill] sm:$0xff] }
 0x78e   :  { %v4065_v60 = vsel %vm4062_vm9, %v4064_v21, %v4060_v50  ;;  %3985 = vmatmul.bf16.vlgmr.msrb.gmra.mxu0 %v3976_v43  ;;  %3998 = vmatmul.bf16.vlgmr.msra.gmra.mxu1 %v3976_v43  ;;  %v9209_v37 = vld [vmem:[#allocation91_spill] sm:$0xff]  ;;  %v9210_v21 = vld [vmem:[#allocation92_spill] sm:$0xff]  ;;  %v9211_v0 = vld [vmem:[#allocation93_spill] sm:$0xff] }
 0x78f   :  { %v4087_v28 = vmul.f32 %v4065_v60, %v8154_v54  ;;  %v4075_v10 = vmul.f32 %v6008_v26, %v4074_v39  ;;  %4011 = vmatmul.bf16.vlgmr.msra.gmra.mxu2 %v3976_v43  ;;  %4024 = vmatmul.bf16.vlgmr.msra.gmra.mxu3 %v3976_v43  ;;  %v4081_v54 = vand.u32 2147483647, %v8278_v56  ;;  %v9196_v56 = vld [vmem:[#allocation74_spill] sm:$0xff]  ;;  %v9213_v50 = vld [vmem:[#allocation97_spill] sm:$0xff]  ;;  %v9215_v39 = vld [vmem:[#allocation99_spill] sm:$0xff] }
 0x790   :  { %4212 = vmatpush.bf16.msrb.mxu0 %v6944_v13  ;;  %4225 = vmatpush.bf16.msra.mxu1 %v6941_v8  ;;  %v4084_v13 = vor.u32 1.1754944e-38, %v4083_v20  ;;  %v9212_v43 = vld [vmem:[#allocation94_spill] sm:$0xff]  ;;  %v9216_v60 = vld [vmem:[#allocation100_spill] sm:$0xff] }
 0x791   :  { %v8307_v61 = vadd.f32 %v4088_v19, %v4087_v28  ;;  %4238 = vmatpush.bf16.msra.mxu2 %v6996_v24  ;;  %4251 = vmatpush.bf16.msra.mxu3 %v6998_v34  ;;  %v4076_v62 = vadd.f32 %v6008_v26, %v4075_v10  ;;  %vm4082_vm13 = vcmp.eq.f32.partialorder %v4081_v54, 8.507059e+37  ;;  %v9214_v19 = vld [vmem:[#allocation98_spill] sm:$0xff]  ;;  %v9217_v28 = vld [vmem:[#allocation101_spill] sm:$0xff]  ;;  %v9220_v20 = vld [vmem:[#allocation104_spill] sm:$0xff] }
 0x792   :  { %v9218_v10 = vld [vmem:[#allocation102_spill] sm:$0xff]  ;;  %v9221_v54 = vld [vmem:[#allocation105_spill] sm:$0xff] }
 0x793   :  { %6011 = vtanh.f32 %v8307_v61  ;;  %v4080_v8 = vsel %vm4079_vm12, %v6008_v26, %v4076_v62  ;;  %v9203_v26 = vld [vmem:[#allocation83_spill] sm:$0xff] }
 0x794   :  { %4213 = vmatpush.bf16.msrb.mxu0 %v6950_v23  ;;  %4226 = vmatpush.bf16.msra.mxu1 %v6946_v17  ;;  %v4085_v34 = vsel %vm4082_vm13, %v4084_v13, %v4080_v8  ;;  %v9219_v62 = vld [vmem:[#allocation103_spill] sm:$0xff]  ;;  %v9222_v8 = vld [vmem:[#allocation106_spill] sm:$0xff] }
 0x795   :  { %4239 = vmatpush.bf16.msra.mxu2 %v7004_v40  ;;  %4252 = vmatpush.bf16.msra.mxu3 %v7006_v41  ;;  %v9176_v40 = vld [vmem:[#allocation44_spill] sm:$0xff]  ;;  %v9177_v41 = vld [vmem:[#allocation45_spill] sm:$0xff]  ;;  %v9223_v13 = vld [vmem:[#allocation107_spill] sm:$0xff] }
 0x798   :  { %4214 = vmatpush.bf16.msrb.mxu0 %v6961_v35  ;;  %4227 = vmatpush.bf16.msra.mxu1 %v6958_v30  ;;  %v9166_v30 = vld [vmem:[#allocation28_spill] sm:$0xff]  ;;  %v9167_v35 = vld [vmem:[#allocation29_spill] sm:$0xff] }
 0x799   :  { %v6012_v24 = vpop.eup %6011  ;;  %4240 = vmatpush.bf16.msra.mxu2 %v7011_v29  ;;  %4253 = vmatpush.bf16.msra.mxu3 %v7013_v32  ;;  %v9178_v29 = vld [vmem:[#allocation48_spill] sm:$0xff]  ;;  %v9179_v32 = vld [vmem:[#allocation49_spill] sm:$0xff] }
 0x79a   :  { %v4091_v23 = vmul.f32 %v6012_v24, %v4085_v34  ;;  %v9224_v24 = vld [vmem:[#allocation108_spill] sm:$0xff]  ;;  %v9225_v34 = vld [vmem:[#allocation109_spill] sm:$0xff] }
 0x79c   :  { %v4092_v17 = vpack.c.bf16 %v4091_v23, %v4091_v23  ;;  %4215 = vmatpush.bf16.msrb.mxu0 %v6969_v47  ;;  %4228 = vmatpush.bf16.msra.mxu1 %v8806_v15  ;;  %v9168_v47 = vld [vmem:[#allocation30_spill] sm:$0xff]  ;;  %v9192_v15 = vld [vmem:[#allocation72_spill] sm:$0xff] }
 0x79d   :  { %4241 = vmatpush.bf16.msra.mxu2 %v7018_v63  ;;  %4254 = vmatpush.bf16.msra.mxu3 %v8807_v3  ;;  %v9180_v63 = vld [vmem:[#allocation50_spill] sm:$0xff]  ;;  %v9193_v3 = vld [vmem:[#allocation73_spill] sm:$0xff] }
 0x79e   :  { %4101 = vmatmul.bf16.vlgmr.msra.gmra.mxu0 %v4092_v17  ;;  %4114 = vmatmul.bf16.vlgmr.msrb.gmra.mxu1 %v4092_v17 }
 0x79f   :  { %4127 = vmatmul.bf16.vlgmr.msrb.gmra.mxu2 %v4092_v17  ;;  %4140 = vmatmul.bf16.vlgmr.msrb.gmra.mxu3 %v4092_v17 }
 0x7a0   :  { %4216 = vmatpush.bf16.msrb.mxu0 %v8808_v53  ;;  %4229 = vmatpush.bf16.msra.mxu1 %v6972_v51  ;;  %v9169_v51 = vld [vmem:[#allocation33_spill] sm:$0xff]  ;;  %v9194_v53 = vld [vmem:[#allocation68_spill] sm:$0xff] }
 0x7a1   :  { %4242 = vmatpush.bf16.msra.mxu2 %v7024_v57  ;;  %4255 = vmatpush.bf16.msra.mxu3 %v7026_v7  ;;  %v9181_v57 = vld [vmem:[#allocation51_spill] sm:$0xff]  ;;  %v9182_v7 = vld [vmem:[#allocation54_spill] sm:$0xff] }
 0x7a4   :  { %4217 = vmatpush.bf16.msrb.mxu0 %v6979_v1  ;;  %4230 = vmatpush.bf16.msra.mxu1 %v6981_v2  ;;  %v9170_v1 = vld [vmem:[#allocation36_spill] sm:$0xff]  ;;  %v9171_v2 = vld [vmem:[#allocation37_spill] sm:$0xff] }
 0x7a5   :  { %4243 = vmatpush.bf16.msra.mxu2 %v7030_v14  ;;  %4256 = vmatpush.bf16.msra.mxu3 %v7032_v18  ;;  %v9183_v14 = vld [vmem:[#allocation55_spill] sm:$0xff]  ;;  %v9184_v18 = vld [vmem:[#allocation56_spill] sm:$0xff] }
 0x7a8   :  { %4218 = vmatpush.bf16.msrb.mxu0 %v6986_v58  ;;  %4231 = vmatpush.bf16.msra.mxu1 %v6988_v5  ;;  %v9172_v58 = vld [vmem:[#allocation38_spill] sm:$0xff]  ;;  %v9173_v5 = vld [vmem:[#allocation41_spill] sm:$0xff] }
 0x7a9   :  { %4244 = vmatpush.bf16.msra.mxu2 %v7037_v48  ;;  %4257 = vmatpush.bf16.msra.mxu3 %v7039_v38  ;;  %v9185_v48 = vld [vmem:[#allocation57_spill] sm:$0xff]  ;;  %v9186_v38 = vld [vmem:[#allocation60_spill] sm:$0xff] }
 0x7ac   :  { %4219 = vmatpush.bf16.msrb.mxu0 %v6992_v11  ;;  %4232 = vmatpush.bf16.msra.mxu1 %v6994_v22  ;;  %v9174_v11 = vld [vmem:[#allocation42_spill] sm:$0xff]  ;;  %v9175_v22 = vld [vmem:[#allocation43_spill] sm:$0xff] }
 0x7ad   :  { %4245 = vmatpush.bf16.msra.mxu2 %v7044_v49  ;;  %4258 = vmatpush.bf16.msra.mxu3 %v7046_v52  ;;  %v9187_v49 = vld [vmem:[#allocation61_spill] sm:$0xff]  ;;  %v9188_v52 = vld [vmem:[#allocation62_spill] sm:$0xff] }
 0x7af   :  { %4220 = vmatmul.bf16.vlgmr.msrb.gmra.mxu0 %v4092_v17  ;;  %4233 = vmatmul.bf16.vlgmr.msra.gmra.mxu1 %v4092_v17 }
 0x7b0   :  { %4269 = vmatpush.bf16.msra.mxu0 %v7066_v16  ;;  %4282 = vmatpush.bf16.msrb.mxu1 %v7068_v6  ;;  %v9189_v16 = vld [vmem:[#allocation65_spill] sm:$0xff]  ;;  %v9190_v6 = vld [vmem:[#allocation66_spill] sm:$0xff] }
 0x7b1   :  { %4246 = vmatmul.bf16.vlgmr.msra.gmra.mxu2 %v4092_v17  ;;  %4259 = vmatmul.bf16.vlgmr.msra.gmra.mxu3 %v4092_v17 }
 0x7b2   :  { %4295 = vmatpush.bf16.msrb.mxu2 %v7079_v33  ;;  %4308 = vmatpush.bf16.msrb.mxu3 %v9095_v59  ;;  %v9191_v33 = vld [vmem:[#allocation67_spill] sm:$0xff]  ;;  %v9195_v59 = vld [vmem:[#allocation69_spill] sm:$0xff] }
 0x7b4   :  { %4270 = vmatpush.bf16.msra.mxu0 %v9166_v30  ;;  %4283 = vmatpush.bf16.msrb.mxu1 %v9167_v35 }
 0x7b6   :  { %4296 = vmatpush.bf16.msrb.mxu2 %v9168_v47  ;;  %4309 = vmatpush.bf16.msrb.mxu3 %v9169_v51 }
 0x7b8   :  { %4271 = vmatpush.bf16.msra.mxu0 %v9170_v1  ;;  %4284 = vmatpush.bf16.msrb.mxu1 %v9171_v2 }
 0x7ba   :  { %4297 = vmatpush.bf16.msrb.mxu2 %v9172_v58  ;;  %4310 = vmatpush.bf16.msrb.mxu3 %v9173_v5 }
 0x7bc   :  { %4272 = vmatpush.bf16.msra.mxu0 %v9174_v11  ;;  %4285 = vmatpush.bf16.msrb.mxu1 %v9175_v22 }
 0x7be   :  { %4298 = vmatpush.bf16.msrb.mxu2 %v9176_v40  ;;  %4311 = vmatpush.bf16.msrb.mxu3 %v9177_v41  ;;  %v9226_v40 = vld [vmem:[#allocation112_spill] sm:$0xff] }
 0x7c0   :  { %4273 = vmatpush.bf16.msra.mxu0 %v9178_v29  ;;  %4286 = vmatpush.bf16.msrb.mxu1 %v9179_v32  ;;  %v9227_v29 = vld [vmem:[#allocation113_spill] sm:$0xff] }
 0x7c2   :  { %4299 = vmatpush.bf16.msrb.mxu2 %v9180_v63  ;;  %4312 = vmatpush.bf16.msrb.mxu3 %v9181_v57 }
 0x7c4   :  { %4274 = vmatpush.bf16.msra.mxu0 %v9182_v7  ;;  %4287 = vmatpush.bf16.msrb.mxu1 %v9183_v14 }
 0x7c6   :  { %4300 = vmatpush.bf16.msrb.mxu2 %v9184_v18  ;;  %4313 = vmatpush.bf16.msrb.mxu3 %v9185_v48 }
 0x7c8   :  { %4275 = vmatpush.bf16.msra.mxu0 %v9186_v38  ;;  %4288 = vmatpush.bf16.msrb.mxu1 %v9187_v49  ;;  %v9228_v49 = vld [vmem:[#allocation114_spill] sm:$0xff] }
 0x7ca   :  { %4301 = vmatpush.bf16.msrb.mxu2 %v9188_v52  ;;  %4314 = vmatpush.bf16.msrb.mxu3 %v9189_v16 }
 0x7cc   :  { %4276 = vmatpush.bf16.msra.mxu0 %v9190_v6  ;;  %4289 = vmatpush.bf16.msrb.mxu1 %v9191_v33 }
 0x7ce   :  { %4302 = vmatpush.bf16.msrb.mxu2 %v9194_v53  ;;  %4315 = vmatpush.bf16.msrb.mxu3 %v9195_v59 }
 0x7d0   :  { %4385 = vmatpush.bf16.msrb.mxu0 %v9192_v15  ;;  %4398 = vmatpush.bf16.msra.mxu1 %v9193_v3 }
 0x7d2   :  { %4411 = vmatpush.bf16.msra.mxu2 %v9196_v56  ;;  %4424 = vmatpush.bf16.msra.mxu3 %v9197_v25  ;;  %v9229_v56 = vld [vmem:[#allocation31_spill] sm:$0xff] }
 0x7d3   :  { %v9230_v25 = vld [vmem:[#allocation95_spill] sm:$0xff] }
 0x7d4   :  { %4386 = vmatpush.bf16.msrb.mxu0 %v9198_v9  ;;  %4399 = vmatpush.bf16.msra.mxu1 %v9199_v36  ;;  %v1494_v9 = vadd.f32 %v9230_v25, %v9229_v56  ;;  %v9231_v36 = vld [vmem:[#allocation32_spill] sm:$0xff]  ;;  %v9236_v25 = vld [vmem:[#allocation23_spill] sm:$0xff] }
 0x7d6   :  { %4412 = vmatpush.bf16.msra.mxu2 %v9200_v27  ;;  %4425 = vmatpush.bf16.msra.mxu3 %v9201_v44  ;;  %v9232_v27 = vld [vmem:[#allocation96_spill] sm:$0xff] }
 0x7d7   :  { %v1523_v44 = vadd.f32 %v9232_v27, %v9231_v36 }
 0x7d8   :  { %4387 = vmatpush.bf16.msrb.mxu0 %v9202_v55  ;;  %4400 = vmatpush.bf16.msra.mxu1 %v9203_v26 }
 0x7da   :  { %4413 = vmatpush.bf16.msra.mxu2 %v9204_v46  ;;  %4426 = vmatpush.bf16.msra.mxu3 %v9205_v4 }
 0x7dc   :  { %4388 = vmatpush.bf16.msrb.mxu0 %v9206_v12  ;;  %4401 = vmatpush.bf16.msra.mxu1 %v9207_v42 }
 0x7de   :  { %4414 = vmatpush.bf16.msra.mxu2 %v9208_v45  ;;  %4427 = vmatpush.bf16.msra.mxu3 %v9209_v37 }
 0x7e0   :  { %4389 = vmatpush.bf16.msrb.mxu0 %v9210_v21  ;;  %4402 = vmatpush.bf16.msra.mxu1 %v9211_v0 }
 0x7e2   :  { %4415 = vmatpush.bf16.msra.mxu2 %v9212_v43  ;;  %4428 = vmatpush.bf16.msra.mxu3 %v9213_v50  ;;  %v9233_v43 = vld [vmem:[#allocation21_spill] sm:$0xff] }
 0x7e4   :  { %4390 = vmatpush.bf16.msrb.mxu0 %v9214_v19  ;;  %4403 = vmatpush.bf16.msra.mxu1 %v9215_v39  ;;  %v9234_v39 = vld [vmem:[#allocation24_spill] sm:$0xff] }
 0x7e6   :  { %4416 = vmatpush.bf16.msra.mxu2 %v9216_v60  ;;  %4429 = vmatpush.bf16.msra.mxu3 %v9217_v28  ;;  %v9235_v60 = vld [vmem:[#allocation111_spill] sm:$0xff] }
 0x7e7   :  { %v1581_v28 = vadd.f32 %v9235_v60, %v9234_v39 }
 0x7e8   :  { %4391 = vmatpush.bf16.msrb.mxu0 %v9218_v10  ;;  %4404 = vmatpush.bf16.msra.mxu1 %v9219_v62 }
 0x7ea   :  { %4417 = vmatpush.bf16.msra.mxu2 %v9220_v20  ;;  %4430 = vmatpush.bf16.msra.mxu3 %v9221_v54 }
 0x7ec   :  { %4392 = vmatpush.bf16.msrb.mxu0 %v9222_v8  ;;  %4405 = vmatpush.bf16.msra.mxu1 %v9223_v13 }
 0x7ee   :  { %4418 = vmatpush.bf16.msra.mxu2 %v9224_v24  ;;  %4431 = vmatpush.bf16.msra.mxu3 %v9225_v34 }
 0x80b   :  { %v3986_v23 = vpop.f32.mrf.mxu0  ;;  %v3999_v17 = vpop.f32.mrf.mxu1 }
 0x812   :  { %v4012_v30 = vpop.f32.mrf.mxu2  ;;  %v4025_v35 = vpop.f32.mrf.mxu3 }
 0x813   :  { %v3988_v47 = vpop.f32.mrf.mxu0  ;;  %v4001_v51 = vpop.f32.mrf.mxu1 }
 0x81a   :  { %v4014_v1 = vpop.f32.mrf.mxu2  ;;  %v4027_v2 = vpop.f32.mrf.mxu3 }
 0x81b   :  { %v4102_v58 = vpop.f32.mrf.mxu0  ;;  %v4115_v5 = vpop.f32.mrf.mxu1 }
 0x81c   :  { %v4103_v11 = vadd.f32 %v4102_v58, %v3986_v23  ;;  %v4116_v22 = vadd.f32 %v4115_v5, %v3999_v17 }
 0x81e   :  { %v4145_v41 = vadd.f32 %v4103_v11, %v9226_v40  ;;  %v4146_v32 = vadd.f32 %v4116_v22, %v9227_v29 }
 0x820   :  { %v5524_v63 = vmul.f32 -1.442695, %v4145_v41  ;;  %v5525_v57 = vmul.f32 -1.442695, %v4146_v32 }
 0x822   :  { %6013 = vpow2.f32 %v5524_v63  ;;  %v4128_v7 = vpop.f32.mrf.mxu2  ;;  %v4141_v14 = vpop.f32.mrf.mxu3 }
 0x823   :  { %6015 = vpow2.f32 %v5525_v57  ;;  %v4142_v18 = vadd.f32 %v4141_v14, %v4025_v35  ;;  %v4104_v48 = vpop.f32.mrf.mxu0  ;;  %v4117_v38 = vpop.f32.mrf.mxu1  ;;  %v4129_v46 = vadd.f32 %v4128_v7, %v4012_v30 }
 0x825   :  { %v4148_v52 = vadd.f32 %v4142_v18, %v9228_v49  ;;  %v4147_v50 = vadd.f32 %v4129_v46, %v9233_v43 }
 0x827   :  { %v5526_v16 = vmul.f32 -1.442695, %v4148_v52 }
 0x828   :  { %v6014_v6 = vpop.eup %6013 }
 0x829   :  { %v6016_v33 = vpop.eup %6015  ;;  %v4152_v15 = vadd.f32 1.0, %v6014_v6  ;;  %6017 = vpow2.f32 %v5526_v16 }
 0x82a   :  { %v8410_v3 = vadd.f32 1.0, %v6016_v33  ;;  %v4130_v53 = vpop.f32.mrf.mxu2  ;;  %v4143_v59 = vpop.f32.mrf.mxu3 }
 0x82b   :  { %6019 = vrcp.f32 %v4152_v15  ;;  %v4162_v17 = vand.u32 2147483647, %v4152_v15  ;;  %v4164_v30 = vand.u32 2147483648, %v4152_v15  ;;  %vm4158_vm0 = vweird.f32 %v4152_v15 }
 0x82c   :  { %6021 = vrcp.f32 %v8410_v3  ;;  %v4221_v55 = vpop.f32.mrf.mxu0  ;;  %v4234_v26 = vpop.f32.mrf.mxu1  ;;  %v4183_v35 = vand.u32 2147483648, %v8410_v3  ;;  %v4181_v58 = vand.u32 2147483647, %v8410_v3  ;;  %vm4177_vm1 = vweird.f32 %v8410_v3 }
 0x82d   :  { %v4264_v4 = vadd.f32 %v4221_v55, %v1494_v9  ;;  %v4265_v12 = vadd.f32 %v4234_v26, %v1523_v44  ;;  %vm4163_vm3 = vcmp.eq.f32.partialorder %v4162_v17, 8.507059e+37  ;;  %v4165_v32 = vor.u32 1.1754944e-38, %v4164_v30  ;;  %v9237_v9 = vld [vmem:[#allocation110_spill] sm:$0xff] }
 0x82e   :  { %v4184_v7 = vor.u32 1.1754944e-38, %v4183_v35  ;;  %vm4182_vm5 = vcmp.eq.f32.partialorder %v4181_v58, 8.507059e+37  ;;  %v1552_v36 = vadd.f32 %v9237_v9, %v9236_v25  ;;  %v5786_v9 = vld [vmem:[#allocation10 + $0x28] sm:$0xff] }
 0x82f   :  { %v6018_v42 = vpop.eup %6017  ;;  %v5527_v45 = vmul.f32 -1.442695, %v4264_v4  ;;  %v5528_v37 = vmul.f32 -1.442695, %v4265_v12 }
 0x830   :  { %v8417_v21 = vadd.f32 1.0, %v6018_v42 }
 0x831   :  { %v6020_v0 = vpop.eup %6019  ;;  %6023 = vpow2.f32 %v5527_v45 }
 0x832   :  { %v6022_v19 = vpop.eup %6021  ;;  %v4154_v10 = vmul.f32 %v6020_v0, %v4152_v15  ;;  %6025 = vrcp.f32 %v8417_v21  ;;  %vm4159_vm14 = vweird.f32 %v6020_v0  ;;  %v4203_v26 = vand.u32 2147483648, %v8417_v21 }
 0x833   :  { %v4173_v62 = vmul.f32 %v6022_v19, %v8410_v3  ;;  %6027 = vpow2.f32 %v5528_v37  ;;  %vm4178_vm15 = vweird.f32 %v6022_v19  ;;  %vm4160_vm2 = vmor %vm4158_vm0, %vm4159_vm14  ;;  %vm4197_vm7 = vweird.f32 %v8417_v21 }
 0x834   :  { %v4247_v20 = vpop.f32.mrf.mxu2  ;;  %v4260_v54 = vpop.f32.mrf.mxu3  ;;  %v4155_v8 = vsub.f32 1.0, %v4154_v10  ;;  %6029 = vtanh.f32 %v4147_v50  ;;  %vm4179_vm4 = vmor %vm4177_vm1, %vm4178_vm15  ;;  %v4201_v42 = vand.u32 2147483647, %v8417_v21  ;;  %v4204_v39 = vor.u32 1.1754944e-38, %v4203_v26 }
 0x835   :  { %v4267_v13 = vadd.f32 %v4260_v54, %v1581_v28  ;;  %v4223_v24 = vpop.f32.mrf.mxu0  ;;  %v4236_v34 = vpop.f32.mrf.mxu1  ;;  %v4174_v23 = vsub.f32 1.0, %v4173_v62  ;;  %v4266_v46 = vadd.f32 %v4247_v20, %v1552_v36 }
 0x836   :  { %v4156_v47 = vmul.f32 %v6020_v0, %v4155_v8  ;;  %vm4202_vm11 = vcmp.eq.f32.partialorder %v4201_v42, 8.507059e+37 }
 0x837   :  { %v5529_v51 = vmul.f32 -1.442695, %v4267_v13  ;;  %v6024_v1 = vpop.eup %6023  ;;  %v4175_v2 = vmul.f32 %v6022_v19, %v4174_v23 }
 0x838   :  { %v8426_v5 = vpop.eup %6025  ;;  %v4157_v11 = vadd.f32 %v6020_v0, %v4156_v47  ;;  %v8429_v22 = vadd.f32 1.0, %v6024_v1 }
 0x839   :  { %6031 = vpow2.f32 %v5529_v51  ;;  %v6028_v41 = vpop.eup %6027  ;;  %v4176_v63 = vadd.f32 %v6022_v19, %v4175_v2  ;;  %v4193_v57 = vmul.f32 %v8426_v5, %v8417_v21  ;;  %vm4198_vm6 = vweird.f32 %v8426_v5 }
 0x83a   :  { %v4161_v14 = vsel %vm4160_vm2, %v6020_v0, %v4157_v11  ;;  %6033 = vrcp.f32 %v8429_v22  ;;  %v8434_v18 = vadd.f32 1.0, %v6028_v41  ;;  %v6030_v48 = vpop.eup %6029  ;;  %vm8454_vm8 = vmor %vm4197_vm7, %vm4198_vm6  ;;  %v4336_v50 = vand.u32 2147483648, %v8429_v22 }
 0x83b   :  { %v4166_v38 = vsel %vm4163_vm3, %v4165_v32, %v4161_v14  ;;  %v4180_v52 = vsel %vm4179_vm4, %v6022_v19, %v4176_v63  ;;  %v4194_v16 = vsub.f32 1.0, %v4193_v57  ;;  %v4334_v21 = vand.u32 2147483647, %v8429_v22 }
 0x83c   :  { %v4249_v6 = vpop.f32.mrf.mxu2  ;;  %v4262_v33 = vpop.f32.mrf.mxu3  ;;  %v4185_v15 = vsel %vm4182_vm5, %v4184_v7, %v4180_v52  ;;  %v4208_v3 = vmul.f32 %v6030_v48, %v4166_v38  ;;  %6035 = vrcp.f32 %v8434_v18  ;;  %v4355_v10 = vand.u32 2147483648, %v8434_v18 }
 0x83d   :  { %v4207_v53 = vmul.f32 %v4185_v15, %v8276_v31  ;;  %v4195_v59 = vmul.f32 %v8426_v5, %v4194_v16  ;;  %vm4330_vm10 = vweird.f32 %v8429_v22  ;;  %v4353_v62 = vand.u32 2147483647, %v8434_v18  ;;  %v5788_v15 = vld [vmem:[#allocation10 + $0x38] sm:$0xff] }
 0x83e   :  { %vm4349_vm13 = vweird.f32 %v8434_v18  ;;  %v4337_v34 = vor.u32 1.1754944e-38, %v4336_v50  ;;  %vm4335_vm15 = vcmp.eq.f32.partialorder %v4334_v21, 8.507059e+37  ;;  %v4356_v51 = vor.u32 1.1754944e-38, %v4355_v10  ;;  %v5783_v50 = vld [vmem:[#allocation10 + $0x10] sm:$0xff]  ;;  %v5782_v10 = vld [vmem:[#allocation10 + $0x8] sm:$0xff] }
 0x83f   :  { %v6032_v56 = vpop.eup %6031  ;;  %v8441_v27 = vadd.f32 %v4208_v3, %v4207_v53  ;;  %v4196_v4 = vadd.f32 %v8426_v5, %v4195_v59  ;;  %vm4354_vm1 = vcmp.eq.f32.partialorder %v4353_v62, 8.507059e+37  ;;  %v5787_v59 = vld [vmem:[#allocation10 + $0x30] sm:$0xff] }
 0x840   :  { %v8443_v44 = vadd.f32 1.0, %v6032_v56  ;;  %v6034_v55 = vpop.eup %6033 }
 0x841   :  { %6037 = vtanh.f32 %v8441_v27  ;;  %v4326_v31 = vmul.f32 %v6034_v55, %v8429_v22  ;;  %v4200_v19 = vsel %vm8454_vm8, %v8426_v5, %v4196_v4  ;;  %vm4331_vm9 = vweird.f32 %v6034_v55 }
 0x842   :  { %v6036_v12 = vpop.eup %6035  ;;  %6039 = vrcp.f32 %v8443_v44  ;;  %v4205_v13 = vsel %vm4202_vm11, %v4204_v39, %v4200_v19  ;;  %vm4332_vm14 = vmor %vm4330_vm10, %vm4331_vm9  ;;  %v4375_v7 = vand.u32 2147483648, %v8443_v44  ;;  %vm4369_vm3 = vweird.f32 %v8443_v44 }
 0x843   :  { %v4327_v45 = vsub.f32 1.0, %v4326_v31  ;;  %v4345_v37 = vmul.f32 %v6036_v12, %v8434_v18  ;;  %6041 = vtanh.f32 %v4266_v46  ;;  %vm4350_vm12 = vweird.f32 %v6036_v12 }
 0x844   :  { %vm4351_vm0 = vmor %vm4349_vm13, %vm4350_vm12  ;;  %v4373_v14 = vand.u32 2147483647, %v8443_v44  ;;  %v4376_v48 = vor.u32 1.1754944e-38, %v4375_v7 }
 0x845   :  { %v4346_v60 = vsub.f32 1.0, %v4345_v37  ;;  %v4328_v28 = vmul.f32 %v6034_v55, %v4327_v45  ;;  %v5784_v45 = vld [vmem:[#allocation10 + $0x18] sm:$0xff] }
 0x846   :  { %vm4374_vm5 = vcmp.eq.f32.partialorder %v4373_v14, 8.507059e+37 }
 0x847   :  { %v6038_v20 = vpop.eup %6037  ;;  %v4347_v54 = vmul.f32 %v6036_v12, %v4346_v60  ;;  %v4329_v8 = vadd.f32 %v6034_v55, %v4328_v28 }
 0x848   :  { %v6040_v24 = vpop.eup %6039  ;;  %v4211_v23 = vmul.f32 %v6038_v20, %v4205_v13 }
 0x849   :  { %v4333_v17 = vsel %vm4332_vm14, %v6034_v55, %v4329_v8  ;;  %v4348_v30 = vadd.f32 %v6036_v12, %v4347_v54  ;;  %v4365_v35 = vmul.f32 %v6040_v24, %v8443_v44  ;;  %v6042_v47 = vpop.eup %6041  ;;  %vm4370_vm2 = vweird.f32 %v6040_v24  ;;  %v5785_v55 = vld [vmem:[#allocation10 + $0x20] sm:$0xff] }
 0x84a   :  { %v4338_v1 = vsel %vm4335_vm15, %v4337_v34, %v4333_v17  ;;  %v4268_v2 = vpack.c.bf16 %v4211_v23, %v4211_v23  ;;  %vm4371_vm4 = vmor %vm4369_vm3, %vm4370_vm2 }
 0x84b   :  { %v4352_v58 = vsel %vm4351_vm0, %v6036_v12, %v4348_v30  ;;  %v4380_v5 = vmul.f32 %v6042_v47, %v4338_v1  ;;  %v4366_v11 = vsub.f32 1.0, %v4365_v35 }
 0x84c   :  { %v4357_v22 = vsel %vm4354_vm1, %v4356_v51, %v4352_v58  ;;  %4277 = vmatmul.bf16.vlgmr.msra.gmra.mxu0 %v4268_v2  ;;  %4290 = vmatmul.bf16.vlgmr.msrb.gmra.mxu1 %v4268_v2 }
 0x84d   :  { %v4379_v41 = vmul.f32 %v4357_v22, %v8307_v61  ;;  %v4367_v32 = vmul.f32 %v6040_v24, %v4366_v11  ;;  %4303 = vmatmul.bf16.vlgmr.msrb.gmra.mxu2 %v4268_v2  ;;  %4316 = vmatmul.bf16.vlgmr.msrb.gmra.mxu3 %v4268_v2 }
 0x84e   :  { %4573 = vmatpush.bf16.msra.mxu0 %v5788_v15 }
 0x84f   :  { %v4381_v63 = vadd.f32 %v4380_v5, %v4379_v41  ;;  %v4368_v57 = vadd.f32 %v6040_v24, %v4367_v32 }
 0x851   :  { %6043 = vtanh.f32 %v4381_v63  ;;  %v4372_v18 = vsel %vm4371_vm4, %v6040_v24, %v4368_v57 }
 0x852   :  { %v4377_v52 = vsel %vm4374_vm5, %v4376_v48, %v4372_v18  ;;  %4574 = vmatpush.bf16.msra.mxu0 %v5787_v59 }
 0x856   :  { %4575 = vmatpush.bf16.msra.mxu0 %v5786_v9 }
 0x857   :  { %v6044_v38 = vpop.eup %6043 }
 0x858   :  { %v4383_v61 = vmul.f32 %v6044_v38, %v4377_v52 }
 0x85a   :  { %v4384_v16 = vpack.c.bf16 %v4383_v61, %v4383_v61  ;;  %4576 = vmatpush.bf16.msra.mxu0 %v5785_v55 }
 0x85c   :  { %4393 = vmatmul.bf16.vlgmr.msrb.gmra.mxu0 %v4384_v16  ;;  %4406 = vmatmul.bf16.vlgmr.msra.gmra.mxu1 %v4384_v16 }
 0x85d   :  { %4419 = vmatmul.bf16.vlgmr.msra.gmra.mxu2 %v4384_v16  ;;  %4432 = vmatmul.bf16.vlgmr.msra.gmra.mxu3 %v4384_v16 }
 0x85e   :  { %4577 = vmatpush.bf16.msra.mxu0 %v5784_v45 }
 0x862   :  { %4578 = vmatpush.bf16.msra.mxu0 %v5783_v50 }
 0x866   :  { %4579 = vmatpush.bf16.msra.mxu0 %v5782_v10 }
 0x8c9   :  { %v4278_v6 = vpop.f32.mrf.mxu0  ;;  %v4291_v33 = vpop.f32.mrf.mxu1 }
 0x8d0   :  { %v4304_v3 = vpop.f32.mrf.mxu2  ;;  %v4317_v53 = vpop.f32.mrf.mxu3 }
 0x8d1   :  { %v4280_v56 = vpop.f32.mrf.mxu0  ;;  %v4293_v25 = vpop.f32.mrf.mxu1 }
 0x8d8   :  { %v4306_v36 = vpop.f32.mrf.mxu2  ;;  %v4319_v44 = vpop.f32.mrf.mxu3 }
 0x8d9   :  { %v4394_v26 = vpop.f32.mrf.mxu0  ;;  %v4407_v46 = vpop.f32.mrf.mxu1 }
 0x8da   :  { %v4395_v4 = vadd.f32 %v4394_v26, %v4278_v6  ;;  %v4408_v31 = vadd.f32 %v4407_v46, %v4291_v33 }
 0x8dc   :  { %v4437_v12 = vadd.f32 %v4395_v4, %v9226_v40  ;;  %v4438_v42 = vadd.f32 %v4408_v31, %v9227_v29  ;;  %v5781_v29 = vld [vmem:[#allocation10] sm:$0xff] }
 0x8dd   :  { %4580 = vmatpush.bf16.msra.mxu0 %v5781_v29 }
 0x8de   :  { %v5530_v37 = vmul.f32 -1.442695, %v4437_v12  ;;  %v5531_v0 = vmul.f32 -1.442695, %v4438_v42 }
 0x8e0   :  { %6045 = vpow2.f32 %v5530_v37  ;;  %v4420_v19 = vpop.f32.mrf.mxu2  ;;  %v4433_v39 = vpop.f32.mrf.mxu3 }
 0x8e1   :  { %6047 = vpow2.f32 %v5531_v0  ;;  %v4434_v60 = vadd.f32 %v4433_v39, %v4317_v53  ;;  %v4396_v28 = vpop.f32.mrf.mxu0  ;;  %v4409_v21 = vpop.f32.mrf.mxu1  ;;  %v4421_v23 = vadd.f32 %v4420_v19, %v4304_v3 }
 0x8e3   :  { %v4440_v62 = vadd.f32 %v4434_v60, %v9228_v49  ;;  %v4439_v47 = vadd.f32 %v4421_v23, %v9233_v43 }
 0x8e5   :  { %v5532_v20 = vmul.f32 -1.442695, %v4440_v62 }
 0x8e6   :  { %v6046_v40 = vpop.eup %6045 }
 0x8e7   :  { %v6048_v54 = vpop.eup %6047  ;;  %v4444_v8 = vadd.f32 1.0, %v6046_v40  ;;  %6049 = vpow2.f32 %v5532_v20 }
 0x8e8   :  { %v4463_v13 = vadd.f32 1.0, %v6048_v54  ;;  %v4422_v24 = vpop.f32.mrf.mxu2  ;;  %v4435_v34 = vpop.f32.mrf.mxu3 }
 0x8e9   :  { %6051 = vrcp.f32 %v4444_v8  ;;  %v4456_v5 = vand.u32 2147483648, %v4444_v8  ;;  %v4454_v41 = vand.u32 2147483647, %v4444_v8  ;;  %vm4450_vm8 = vweird.f32 %v4444_v8 }
 0x8ea   :  { %6053 = vrcp.f32 %v4463_v13  ;;  %v4475_v11 = vand.u32 2147483648, %v4463_v13  ;;  %v4473_v63 = vand.u32 2147483647, %v4463_v13  ;;  %vm4469_vm9 = vweird.f32 %v4463_v13 }
 0x8eb   :  { %v4457_v43 = vor.u32 1.1754944e-38, %v4456_v5  ;;  %vm4455_vm12 = vcmp.eq.f32.partialorder %v4454_v41, 8.507059e+37 }
 0x8ec   :  { %v4476_v48 = vor.u32 1.1754944e-38, %v4475_v11  ;;  %vm4474_vm13 = vcmp.eq.f32.partialorder %v4473_v63, 8.507059e+37 }
 0x8ed   :  { %v6050_v17 = vpop.eup %6049 }
 0x8ee   :  { %v4483_v30 = vadd.f32 1.0, %v6050_v17 }
 0x8ef   :  { %v6052_v35 = vpop.eup %6051 }
 0x8f0   :  { %v6054_v49 = vpop.eup %6053  ;;  %v4446_v51 = vmul.f32 %v6052_v35, %v4444_v8  ;;  %6055 = vrcp.f32 %v4483_v30  ;;  %vm4451_vm6 = vweird.f32 %v6052_v35  ;;  %v4495_v25 = vand.u32 2147483648, %v4483_v30 }
 0x8f1   :  { %v4465_v1 = vmul.f32 %v6054_v49, %v4463_v13  ;;  %6057 = vtanh.f32 %v4439_v47  ;;  %vm4470_vm7 = vweird.f32 %v6054_v49  ;;  %vm4452_vm10 = vmor %vm4450_vm8, %vm4451_vm6  ;;  %vm4489_vm15 = vweird.f32 %v4483_v30 }
 0x8f2   :  { %v4447_v2 = vsub.f32 1.0, %v4446_v51  ;;  %vm4471_vm11 = vmor %vm4469_vm9, %vm4470_vm7  ;;  %v4493_v9 = vand.u32 2147483647, %v4483_v30  ;;  %v4496_v44 = vor.u32 1.1754944e-38, %v4495_v25 }
 0x8f3   :  { %v4466_v58 = vsub.f32 1.0, %v4465_v1 }
 0x8f4   :  { %v4448_v22 = vmul.f32 %v6052_v35, %v4447_v2  ;;  %vm4494_vm1 = vcmp.eq.f32.partialorder %v4493_v9, 8.507059e+37 }
 0x8f5   :  { %v4467_v32 = vmul.f32 %v6054_v49, %v4466_v58 }
 0x8f6   :  { %v6056_v57 = vpop.eup %6055  ;;  %v4449_v7 = vadd.f32 %v6052_v35, %v4448_v22 }
 0x8f7   :  { %v4468_v14 = vadd.f32 %v6054_v49, %v4467_v32  ;;  %v4485_v18 = vmul.f32 %v6056_v57, %v4483_v30  ;;  %v6058_v52 = vpop.eup %6057  ;;  %vm4490_vm14 = vweird.f32 %v6056_v57 }
 0x8f8   :  { %v4453_v38 = vsel %vm4452_vm10, %v6052_v35, %v4449_v7  ;;  %vm4491_vm0 = vmor %vm4489_vm15, %vm4490_vm14 }
 0x8f9   :  { %v4458_v61 = vsel %vm4455_vm12, %v4457_v43, %v4453_v38  ;;  %v4472_v16 = vsel %vm4471_vm11, %v6054_v49, %v4468_v14  ;;  %v4486_v6 = vsub.f32 1.0, %v4485_v18 }
 0x8fa   :  { %v4477_v33 = vsel %vm4474_vm13, %v4476_v48, %v4472_v16  ;;  %v4500_v15 = vmul.f32 %v6058_v52, %v4458_v61 }
 0x8fb   :  { %v4499_v3 = vmul.f32 %v4477_v33, %v8441_v27  ;;  %v4487_v53 = vmul.f32 %v6056_v57, %v4486_v6  ;;  %v5804_v27 = vld [vmem:[%s8497_s14] ss:$0 sm:$0xff] }
 0x8fd   :  { %v4501_v59 = vadd.f32 %v4500_v15, %v4499_v3  ;;  %v4488_v56 = vadd.f32 %v6056_v57, %v4487_v53 }
 0x8ff   :  { %6059 = vtanh.f32 %v4501_v59  ;;  %v4492_v36 = vsel %vm4491_vm0, %v6056_v57, %v4488_v56 }
 0x900   :  { %v4497_v26 = vsel %vm4494_vm1, %v4496_v44, %v4492_v36 }
 0x905   :  { %v6060_v55 = vpop.eup %6059 }
 0x906   :  { %v4503_v46 = vmul.f32 %v6060_v55, %v4497_v26 }
 0x908   :  { %v4504_v4 = vpack.c.bf16 %v4503_v46, %v4503_v46 }
 0x90a   :  { %4581 = vmatmul.bf16.vlgmr.msra.gmra.mxu0 %v4504_v4 }
 0x987   :  { %v4582_v31 = vpop.f32.mrf.mxu0 }
 0x988   :  { %v4583_v12 = vadd.f32 %v5804_v27, %v4582_v31 }
 0x98a   :  { %4586 = vmax.xlane.f32.xlu0 %v4583_v12 }
 0x98f   :  { %v4584_v42 = vpop.f32.mrf.mxu0 }
 0x9fd   :  { %v4587_v45 = vpop.xlane.xlu0 %4586 }
 0x9fe   :  { %v4588_v37 = vsub.f32 %v4583_v12, %v4587_v45 }
 0xa00   :  { %v4589_v0 = vmul.f32 1.442695, %v4588_v37 }
 0xa02   :  { %6061 = vpow2.f32 %v4589_v0 }
 0xa08   :  { %v6062_v50 = vpop.eup %6061 }
 0xa09   :  { %4591 = vadd.xlane.f32.xlu0 %v6062_v50 }
 0xa7c   :  { %v4592_v19 = vpop.xlane.xlu0 %4591 }
 0xa7d   :  { %6063 = vlog2.f32 %v4592_v19 }
 0xa83   :  { %v6064_v39 = vpop.eup %6063 }
 0xa84   :  { %v4594_v60 = vmul.f32 0.6931472, %v6064_v39 }
 0xa86   :  { %v4595_v28 = vsub.f32 %v4588_v37, %v4594_v60 }
 0xa88   :  { %4596 = vst [vmem:[%s8498_s15] sm:$0xff] %v4595_v28 }
 0xa89   :  { %4601 = vsyncpa [#allocation3], 1 }
 0xa8a   :  { %4602 = vsyncpa [#allocation5], 1 }
 0xa8b   :  { %4603 = vsyncpa [#allocation8], 1 }
 0xa8c   :  { %4604 = vsyncpa [#allocation11], 1 }

</bundles_post_ra>
